<compile_context>
chip_gen: v7x
topology: tpu7x:2x2x1
jax: 0.10.0
libtpu: 0.0.40
codegen_flags: <defaults>
</compile_context>

<pallas_src>
import functools

import jax
import jax.numpy as jnp
from jax.experimental import pallas as pl
from jax.experimental.pallas import tpu as pltpu

_MIB = 1 << 20


# ----------------------------------------------------------------------------
# Hardware / tiling helpers
# ----------------------------------------------------------------------------
def _vmem_capacity_bytes():
    """Physical per-core VMEM; conservative default if the query is unavailable."""
    try:
        return int(pltpu.get_tpu_info().vmem_capacity_bytes)
    except Exception:
        return 64 * _MIB  # v7x-sized (smallest of v5e/v6e/v7x)


def _pick_fold(rows, w, max_g=64):
    """Smallest divisor g of `rows` with g*w >= 128 (lane-dense tiles), capped.

    Falls back to the largest divisor <= min(128/w, max_g) if none exists.
    """
    if w >= 128:
        return 1
    want = -(-128 // w)
    limit = min(rows, max_g)
    for g in range(want, limit + 1):
        if rows % g == 0:
            return g
    for g in range(min(want, limit), 0, -1):
        if rows % g == 0:
            return g
    return 1


def _pick_row_block(rows, width, itemsize, *, target_step_bytes,
                    vmem_budget_bytes, want_min_steps):
    """Choose the per-step row block.

    Per grid step the kernel moves ~8*rblk*width*itemsize bytes of HBM traffic
    (4 input sub-band planes + one 4x-wide output slab), double-buffered by the
    Pallas pipeline.  Returns (rblk, padded_rows); padded_rows > rows only for
    awkward factorizations (the wrapper pads the input and slices the output).
    """
    per_row_bytes = 8 * width * itemsize
    cap = max(1, min(target_step_bytes, vmem_budget_bytes // 2) // per_row_bytes)
    align = 16 if itemsize == 2 else 8

    limit = cap
    if want_min_steps > 1 and rows >= want_min_steps * align:
        limit = min(limit, rows // want_min_steps)

    if rows <= limit:
        return rows, rows               # full dim is always a legal block shape

    limit = max(limit, align)
    best = 0
    d = align
    while d <= limit:                   # largest aligned divisor of rows <= limit
        if rows % d == 0:
            best = d
        d += align
    if best:
        return best, rows

    blk = max(align, (limit // align) * align)
    padded = -(-rows // blk) * blk
    return blk, padded


# ----------------------------------------------------------------------------
# Kernel
# ----------------------------------------------------------------------------
def _interleave_lanes(a, b):
    """(R, L), (R, L) -> (R, 2L) with out[:, 0::2] = a and out[:, 1::2] = b."""
    r, l = a.shape
    return jnp.stack([a, b], axis=-1).reshape(r, 2 * l)
    # NOTE: this stack+reshape lowers to XLU lane interleaves (verified on the
    # previous run); XLU rides its own VLIW slot so it is free while DMA-bound.


def _iwt_kernel(x_ref, o_ref, *, w, g):
    # x_ref: (1, 4, rblk, g*w) -- 4 Haar sub-bands, g folded (c, i) rows per lane row
    # o_ref: (1, rblk, g*4*w)  -- per folded row: g x [ h[2i, :] | h[2i+1, :] ]
    f32 = jnp.float32
    x1 = x_ref[0, 0].astype(f32)
    x2 = x_ref[0, 1].astype(f32)
    x3 = x_ref[0, 2].astype(f32)
    x4 = x_ref[0, 3].astype(f32)

    # Haar butterfly with the 1/2 folded in (12 VPU ops per 4 loaded values).
    d12 = (x1 - x2) * 0.5
    s12 = (x1 + x2) * 0.5
    d34 = (x3 - x4) * 0.5
    s34 = (x3 + x4) * 0.5
    o00 = d12 - d34      # h[0::2, 0::2]
    o01 = s12 - s34      # h[0::2, 1::2]
    o10 = d12 + d34      # h[1::2, 0::2]
    o11 = s12 + s34      # h[1::2, 1::2]

    dt = o_ref.dtype
    even = _interleave_lanes(o00, o01).astype(dt)   # (rblk, 2*g*w): g x h[2i,   :]
    odd = _interleave_lanes(o10, o11).astype(dt)    # (rblk, 2*g*w): g x h[2i+1, :]

    # Juxtapose the even/odd output rows per folded chunk with direct stores
    # (no concatenated temporary).  g is small and static -> unrolled at trace time.
    for k in range(g):
        o_ref[0, :, k * 4 * w: k * 4 * w + 2 * w] = even[:, k * 2 * w: (k + 1) * 2 * w]
        o_ref[0, :, k * 4 * w + 2 * w: (k + 1) * 4 * w] = odd[:, k * 2 * w: (k + 1) * 2 * w]


# ----------------------------------------------------------------------------
# Public entry points
# ----------------------------------------------------------------------------
def iwt(x):
    """Pallas IWT forward: (B, 4C, H, W) -> (B, C, 2H, 2W), dtype preserved."""
    if not jnp.issubdtype(x.dtype, jnp.floating) or x.dtype == jnp.float64:
        x = x.astype(jnp.float32)

    B, C4, H, W = x.shape
    assert C4 % 4 == 0, "input channels must be divisible by 4"
    C = C4 // 4
    rows = C * H
    itemsize = jnp.dtype(x.dtype).itemsize

    # Fold g consecutive flattened (c, i) rows into one lane row (lane density).
    g = _pick_fold(rows, W)
    rows_f = rows // g
    width = g * W

    # Free row-major re-view: (B, 4C, H, W) -> (B, 4, C*H/g, g*W).
    xr = x.reshape(B, 4, rows_f, width)

    vmem_cap = _vmem_capacity_bytes()
    vmem_budget = min((5 * vmem_cap) // 8, 80 * _MIB)
    rblk, rows_p = _pick_row_block(
        rows_f, width, itemsize,
        target_step_bytes=8 * _MIB,          # ~8 MiB of HBM traffic per grid step
        vmem_budget_bytes=vmem_budget,
        want_min_steps=1 if B >= 2 else 2,   # keep both v7x TensorCores busy
    )
    if rows_p != rows_f:
        xr = jnp.pad(xr, ((0, 0), (0, 0), (0, rows_p - rows_f), (0, 0)))

    grid = (B, rows_p // rblk)
    step_bytes = 8 * rblk * width * itemsize
    vmem_limit = int(min(max(32 * _MIB, 3 * step_bytes + 8 * _MIB),
                         (3 * vmem_cap) // 4))

    nelem = B * C4 * H * W
    out = pl.pallas_call(
        functools.partial(_iwt_kernel, w=W, g=g),
        out_shape=jax.ShapeDtypeStruct((B, rows_p, 4 * width), x.dtype),
        grid_spec=pltpu.PrefetchScalarGridSpec(
            num_scalar_prefetch=0,
            grid=grid,
            in_specs=[pl.BlockSpec((1, 4, rblk, width), lambda b, r: (b, 0, r, 0))],
            out_specs=pl.BlockSpec((1, rblk, 4 * width), lambda b, r: (b, r, 0)),
        ),
        compiler_params=pltpu.CompilerParams(
            dimension_semantics=("parallel", "parallel"),
            vmem_limit_bytes=vmem_limit,
        ),
        cost_estimate=pl.CostEstimate(
            flops=3 * nelem,                       # 12 VPU ops per 4 loaded values
            transcendentals=0,
            bytes_accessed=2 * nelem * itemsize,   # read once + write once
        ),
    )(xr)

    if rows_p != rows_f:
        out = out[:, :rows_f, :]

    # Free row-major re-view back to NCHW: (B, rows_f, 4*g*W) -> (B, C, 2H, 2W).
    return out.reshape(B, C, 2 * H, 2 * W)


class IWT:
    """Mirror of the torch nn.Module (no parameters)."""

    def __call__(self, x):
        return iwt(x)


def iwt_ref(x):
    """Pure-JAX reference replicating the PyTorch iwt_init semantics (f32)."""
    x = x.astype(jnp.float32)
    B, C4, H, W = x.shape
    C = C4 // 4
    x1 = x[:, 0 * C:1 * C] / 2
    x2 = x[:, 1 * C:2 * C] / 2
    x3 = x[:, 2 * C:3 * C] / 2
    x4 = x[:, 3 * C:4 * C] / 2
    h = jnp.zeros((B, C, 2 * H, 2 * W), jnp.float32)
    h = h.at[:, :, 0::2, 0::2].set(x1 - x2 - x3 + x4)
    h = h.at[:, :, 1::2, 0::2].set(x1 - x2 + x3 - x4)
    h = h.at[:, :, 0::2, 1::2].set(x1 + x2 - x3 - x4)
    h = h.at[:, :, 1::2, 1::2].set(x1 + x2 + x3 + x4)
    return h


if __name__ == "__main__":
    key = jax.random.PRNGKey(0)
    B, C_out, H, W = 2, 4, 16, 16            # input channels = 4 * C_out = 16
    x = jax.random.normal(key, (B, 4 * C_out, H, W), dtype=jnp.float32)

    model = IWT()

    # float32 path
    out = jax.block_until_ready(model(x))
    ref = iwt_ref(x)
    assert out.shape == (B, C_out, 2 * H, 2 * W), out.shape
    assert out.dtype == jnp.float32
    assert jnp.allclose(out, ref, atol=1e-5, rtol=1e-5), "f32 mismatch vs reference"

    # bfloat16 I/O path (bandwidth-bound op -> ~2x fewer HBM bytes)
    xb = x.astype(jnp.bfloat16)
    outb = jax.block_until_ready(model(xb))
    assert outb.dtype == jnp.bfloat16
    assert jnp.allclose(outb.astype(jnp.float32), ref, atol=6e-2, rtol=0.0), \
        "bf16 mismatch vs reference"

    print("KERNEL_OK")
</pallas_src>

<mosaic_0001>
module attributes {stable_mosaic.version = 11 : i64} {
  func.func @_iwt_kernel(%arg0: i32, %arg1: i32, %arg2: memref<1x4x8x128xf32, #tpu.memory_space<vmem>>, %arg3: memref<1x8x512xf32, #tpu.memory_space<vmem>>) attributes {dimension_semantics = [#tpu.dimension_semantics<parallel>, #tpu.dimension_semantics<parallel>], iteration_bounds = array<i64: 2, 1>, scalar_prefetch = 0 : i64, scratch_operands = 0 : i64, tpu.core_type = #tpu.core_type<tc>, window_params = [{transform_indices = @transform_0, window_bounds = array<i64: 1, 4, 8, 128>}, {transform_indices = @transform_1, window_bounds = array<i64: 1, 8, 512>}]} {
    %c0 = arith.constant 0 : index
    %c0_0 = arith.constant 0 : index
    %c0_1 = arith.constant 0 : index
    %c0_2 = arith.constant 0 : index
    %0 = vector.load %arg2[%c0, %c0_0, %c0_1, %c0_2] : memref<1x4x8x128xf32, #tpu.memory_space<vmem>>, vector<1x1x8x128xf32>
    %1 = vector.shape_cast %0 : vector<1x1x8x128xf32> to vector<8x128xf32>
    %c0_3 = arith.constant 0 : index
    %c1 = arith.constant 1 : index
    %c0_4 = arith.constant 0 : index
    %c0_5 = arith.constant 0 : index
    %2 = vector.load %arg2[%c0_3, %c1, %c0_4, %c0_5] : memref<1x4x8x128xf32, #tpu.memory_space<vmem>>, vector<1x1x8x128xf32>
    %3 = vector.shape_cast %2 : vector<1x1x8x128xf32> to vector<8x128xf32>
    %c0_6 = arith.constant 0 : index
    %c2 = arith.constant 2 : index
    %c0_7 = arith.constant 0 : index
    %c0_8 = arith.constant 0 : index
    %4 = vector.load %arg2[%c0_6, %c2, %c0_7, %c0_8] : memref<1x4x8x128xf32, #tpu.memory_space<vmem>>, vector<1x1x8x128xf32>
    %5 = vector.shape_cast %4 : vector<1x1x8x128xf32> to vector<8x128xf32>
    %c0_9 = arith.constant 0 : index
    %c3 = arith.constant 3 : index
    %c0_10 = arith.constant 0 : index
    %c0_11 = arith.constant 0 : index
    %6 = vector.load %arg2[%c0_9, %c3, %c0_10, %c0_11] : memref<1x4x8x128xf32, #tpu.memory_space<vmem>>, vector<1x1x8x128xf32>
    %7 = vector.shape_cast %6 : vector<1x1x8x128xf32> to vector<8x128xf32>
    %8 = arith.subf %1, %3 : vector<8x128xf32>
    %cst = arith.constant 5.000000e-01 : f32
    %9 = vector.broadcast %cst : f32 to vector<8x128xf32>
    %10 = arith.mulf %8, %9 : vector<8x128xf32>
    %11 = arith.addf %1, %3 : vector<8x128xf32>
    %cst_12 = arith.constant 5.000000e-01 : f32
    %12 = vector.broadcast %cst_12 : f32 to vector<8x128xf32>
    %13 = arith.mulf %11, %12 : vector<8x128xf32>
    %14 = arith.subf %5, %7 : vector<8x128xf32>
    %cst_13 = arith.constant 5.000000e-01 : f32
    %15 = vector.broadcast %cst_13 : f32 to vector<8x128xf32>
    %16 = arith.mulf %14, %15 : vector<8x128xf32>
    %17 = arith.addf %5, %7 : vector<8x128xf32>
    %cst_14 = arith.constant 5.000000e-01 : f32
    %18 = vector.broadcast %cst_14 : f32 to vector<8x128xf32>
    %19 = arith.mulf %17, %18 : vector<8x128xf32>
    %20 = arith.subf %10, %16 : vector<8x128xf32>
    %21 = arith.subf %13, %19 : vector<8x128xf32>
    %22 = arith.addf %10, %16 : vector<8x128xf32>
    %23 = arith.addf %13, %19 : vector<8x128xf32>
    %24 = vector.shape_cast %20 : vector<8x128xf32> to vector<8x128x1xf32>
    %25 = vector.shape_cast %21 : vector<8x128xf32> to vector<8x128x1xf32>
    %26 = tpu.concatenate %24, %25 in 2 : vector<8x128x1xf32>, vector<8x128x1xf32> -> vector<8x128x2xf32>
    %27 = vector.shape_cast %26 : vector<8x128x2xf32> to vector<8x256xf32>
    %28 = vector.shape_cast %22 : vector<8x128xf32> to vector<8x128x1xf32>
    %29 = vector.shape_cast %23 : vector<8x128xf32> to vector<8x128x1xf32>
    %30 = tpu.concatenate %28, %29 in 2 : vector<8x128x1xf32>, vector<8x128x1xf32> -> vector<8x128x2xf32>
    %31 = vector.shape_cast %30 : vector<8x128x2xf32> to vector<8x256xf32>
    %32 = vector.extract_strided_slice %27 {offsets = [0, 0], sizes = [8, 32], strides = [1, 1]} : vector<8x256xf32> to vector<8x32xf32>
    %c0_15 = arith.constant 0 : index
    %c0_16 = arith.constant 0 : index
    %c0_17 = arith.constant 0 : index
    %33 = vector.load %arg3[%c0_15, %c0_16, %c0_17] : memref<1x8x512xf32, #tpu.memory_space<vmem>>, vector<1x8x32xf32>
    %34 = vector.shape_cast %33 : vector<1x8x32xf32> to vector<8x32xf32>
    %35 = vector.shape_cast %32 : vector<8x32xf32> to vector<1x8x32xf32>
    tpu.vector_store %arg3[%c0_15, %c0_16, %c0_17], %35 {strides = array<i32>} : memref<1x8x512xf32, #tpu.memory_space<vmem>>, vector<1x8x32xf32>,
    %36 = vector.extract_strided_slice %31 {offsets = [0, 0], sizes = [8, 32], strides = [1, 1]} : vector<8x256xf32> to vector<8x32xf32>
    %c0_18 = arith.constant 0 : index
    %c0_19 = arith.constant 0 : index
    %c32 = arith.constant 32 : index
    %37 = vector.load %arg3[%c0_18, %c0_19, %c32] : memref<1x8x512xf32, #tpu.memory_space<vmem>>, vector<1x8x32xf32>
    %38 = vector.shape_cast %37 : vector<1x8x32xf32> to vector<8x32xf32>
    %39 = vector.shape_cast %36 : vector<8x32xf32> to vector<1x8x32xf32>
    tpu.vector_store %arg3[%c0_18, %c0_19, %c32], %39 {strides = array<i32>} : memref<1x8x512xf32, #tpu.memory_space<vmem>>, vector<1x8x32xf32>,
    %40 = vector.extract_strided_slice %27 {offsets = [0, 32], sizes = [8, 32], strides = [1, 1]} : vector<8x256xf32> to vector<8x32xf32>
    %c0_20 = arith.constant 0 : index
    %c0_21 = arith.constant 0 : index
    %c64 = arith.constant 64 : index
    %41 = vector.load %arg3[%c0_20, %c0_21, %c64] : memref<1x8x512xf32, #tpu.memory_space<vmem>>, vector<1x8x32xf32>
    %42 = vector.shape_cast %41 : vector<1x8x32xf32> to vector<8x32xf32>
    %43 = vector.shape_cast %40 : vector<8x32xf32> to vector<1x8x32xf32>
    tpu.vector_store %arg3[%c0_20, %c0_21, %c64], %43 {strides = array<i32>} : memref<1x8x512xf32, #tpu.memory_space<vmem>>, vector<1x8x32xf32>,
    %44 = vector.extract_strided_slice %31 {offsets = [0, 32], sizes = [8, 32], strides = [1, 1]} : vector<8x256xf32> to vector<8x32xf32>
    %c0_22 = arith.constant 0 : index
    %c0_23 = arith.constant 0 : index
    %c96 = arith.constant 96 : index
    %45 = vector.load %arg3[%c0_22, %c0_23, %c96] : memref<1x8x512xf32, #tpu.memory_space<vmem>>, vector<1x8x32xf32>
    %46 = vector.shape_cast %45 : vector<1x8x32xf32> to vector<8x32xf32>
    %47 = vector.shape_cast %44 : vector<8x32xf32> to vector<1x8x32xf32>
    tpu.vector_store %arg3[%c0_22, %c0_23, %c96], %47 {strides = array<i32>} : memref<1x8x512xf32, #tpu.memory_space<vmem>>, vector<1x8x32xf32>,
    %48 = vector.extract_strided_slice %27 {offsets = [0, 64], sizes = [8, 32], strides = [1, 1]} : vector<8x256xf32> to vector<8x32xf32>
    %c0_24 = arith.constant 0 : index
    %c0_25 = arith.constant 0 : index
    %c128 = arith.constant 128 : index
    %49 = vector.load %arg3[%c0_24, %c0_25, %c128] : memref<1x8x512xf32, #tpu.memory_space<vmem>>, vector<1x8x32xf32>
    %50 = vector.shape_cast %49 : vector<1x8x32xf32> to vector<8x32xf32>
    %51 = vector.shape_cast %48 : vector<8x32xf32> to vector<1x8x32xf32>
    tpu.vector_store %arg3[%c0_24, %c0_25, %c128], %51 {strides = array<i32>} : memref<1x8x512xf32, #tpu.memory_space<vmem>>, vector<1x8x32xf32>,
    %52 = vector.extract_strided_slice %31 {offsets = [0, 64], sizes = [8, 32], strides = [1, 1]} : vector<8x256xf32> to vector<8x32xf32>
    %c0_26 = arith.constant 0 : index
    %c0_27 = arith.constant 0 : index
    %c160 = arith.constant 160 : index
    %53 = vector.load %arg3[%c0_26, %c0_27, %c160] : memref<1x8x512xf32, #tpu.memory_space<vmem>>, vector<1x8x32xf32>
    %54 = vector.shape_cast %53 : vector<1x8x32xf32> to vector<8x32xf32>
    %55 = vector.shape_cast %52 : vector<8x32xf32> to vector<1x8x32xf32>
    tpu.vector_store %arg3[%c0_26, %c0_27, %c160], %55 {strides = array<i32>} : memref<1x8x512xf32, #tpu.memory_space<vmem>>, vector<1x8x32xf32>,
    %56 = vector.extract_strided_slice %27 {offsets = [0, 96], sizes = [8, 32], strides = [1, 1]} : vector<8x256xf32> to vector<8x32xf32>
    %c0_28 = arith.constant 0 : index
    %c0_29 = arith.constant 0 : index
    %c192 = arith.constant 192 : index
    %57 = vector.load %arg3[%c0_28, %c0_29, %c192] : memref<1x8x512xf32, #tpu.memory_space<vmem>>, vector<1x8x32xf32>
    %58 = vector.shape_cast %57 : vector<1x8x32xf32> to vector<8x32xf32>
    %59 = vector.shape_cast %56 : vector<8x32xf32> to vector<1x8x32xf32>
    tpu.vector_store %arg3[%c0_28, %c0_29, %c192], %59 {strides = array<i32>} : memref<1x8x512xf32, #tpu.memory_space<vmem>>, vector<1x8x32xf32>,
    %60 = vector.extract_strided_slice %31 {offsets = [0, 96], sizes = [8, 32], strides = [1, 1]} : vector<8x256xf32> to vector<8x32xf32>
    %c0_30 = arith.constant 0 : index
    %c0_31 = arith.constant 0 : index
    %c224 = arith.constant 224 : index
    %61 = vector.load %arg3[%c0_30, %c0_31, %c224] : memref<1x8x512xf32, #tpu.memory_space<vmem>>, vector<1x8x32xf32>
    %62 = vector.shape_cast %61 : vector<1x8x32xf32> to vector<8x32xf32>
    %63 = vector.shape_cast %60 : vector<8x32xf32> to vector<1x8x32xf32>
    tpu.vector_store %arg3[%c0_30, %c0_31, %c224], %63 {strides = array<i32>} : memref<1x8x512xf32, #tpu.memory_space<vmem>>, vector<1x8x32xf32>,
    %64 = vector.extract_strided_slice %27 {offsets = [0, 128], sizes = [8, 32], strides = [1, 1]} : vector<8x256xf32> to vector<8x32xf32>
    %c0_32 = arith.constant 0 : index
    %c0_33 = arith.constant 0 : index
    %c256 = arith.constant 256 : index
    %65 = vector.load %arg3[%c0_32, %c0_33, %c256] : memref<1x8x512xf32, #tpu.memory_space<vmem>>, vector<1x8x32xf32>
    %66 = vector.shape_cast %65 : vector<1x8x32xf32> to vector<8x32xf32>
    %67 = vector.shape_cast %64 : vector<8x32xf32> to vector<1x8x32xf32>
    tpu.vector_store %arg3[%c0_32, %c0_33, %c256], %67 {strides = array<i32>} : memref<1x8x512xf32, #tpu.memory_space<vmem>>, vector<1x8x32xf32>,
    %68 = vector.extract_strided_slice %31 {offsets = [0, 128], sizes = [8, 32], strides = [1, 1]} : vector<8x256xf32> to vector<8x32xf32>
    %c0_34 = arith.constant 0 : index
    %c0_35 = arith.constant 0 : index
    %c288 = arith.constant 288 : index
    %69 = vector.load %arg3[%c0_34, %c0_35, %c288] : memref<1x8x512xf32, #tpu.memory_space<vmem>>, vector<1x8x32xf32>
    %70 = vector.shape_cast %69 : vector<1x8x32xf32> to vector<8x32xf32>
    %71 = vector.shape_cast %68 : vector<8x32xf32> to vector<1x8x32xf32>
    tpu.vector_store %arg3[%c0_34, %c0_35, %c288], %71 {strides = array<i32>} : memref<1x8x512xf32, #tpu.memory_space<vmem>>, vector<1x8x32xf32>,
    %72 = vector.extract_strided_slice %27 {offsets = [0, 160], sizes = [8, 32], strides = [1, 1]} : vector<8x256xf32> to vector<8x32xf32>
    %c0_36 = arith.constant 0 : index
    %c0_37 = arith.constant 0 : index
    %c320 = arith.constant 320 : index
    %73 = vector.load %arg3[%c0_36, %c0_37, %c320] : memref<1x8x512xf32, #tpu.memory_space<vmem>>, vector<1x8x32xf32>
    %74 = vector.shape_cast %73 : vector<1x8x32xf32> to vector<8x32xf32>
    %75 = vector.shape_cast %72 : vector<8x32xf32> to vector<1x8x32xf32>
    tpu.vector_store %arg3[%c0_36, %c0_37, %c320], %75 {strides = array<i32>} : memref<1x8x512xf32, #tpu.memory_space<vmem>>, vector<1x8x32xf32>,
    %76 = vector.extract_strided_slice %31 {offsets = [0, 160], sizes = [8, 32], strides = [1, 1]} : vector<8x256xf32> to vector<8x32xf32>
    %c0_38 = arith.constant 0 : index
    %c0_39 = arith.constant 0 : index
    %c352 = arith.constant 352 : index
    %77 = vector.load %arg3[%c0_38, %c0_39, %c352] : memref<1x8x512xf32, #tpu.memory_space<vmem>>, vector<1x8x32xf32>
    %78 = vector.shape_cast %77 : vector<1x8x32xf32> to vector<8x32xf32>
    %79 = vector.shape_cast %76 : vector<8x32xf32> to vector<1x8x32xf32>
    tpu.vector_store %arg3[%c0_38, %c0_39, %c352], %79 {strides = array<i32>} : memref<1x8x512xf32, #tpu.memory_space<vmem>>, vector<1x8x32xf32>,
    %80 = vector.extract_strided_slice %27 {offsets = [0, 192], sizes = [8, 32], strides = [1, 1]} : vector<8x256xf32> to vector<8x32xf32>
    %c0_40 = arith.constant 0 : index
    %c0_41 = arith.constant 0 : index
    %c384 = arith.constant 384 : index
    %81 = vector.load %arg3[%c0_40, %c0_41, %c384] : memref<1x8x512xf32, #tpu.memory_space<vmem>>, vector<1x8x32xf32>
    %82 = vector.shape_cast %81 : vector<1x8x32xf32> to vector<8x32xf32>
    %83 = vector.shape_cast %80 : vector<8x32xf32> to vector<1x8x32xf32>
    tpu.vector_store %arg3[%c0_40, %c0_41, %c384], %83 {strides = array<i32>} : memref<1x8x512xf32, #tpu.memory_space<vmem>>, vector<1x8x32xf32>,
    %84 = vector.extract_strided_slice %31 {offsets = [0, 192], sizes = [8, 32], strides = [1, 1]} : vector<8x256xf32> to vector<8x32xf32>
    %c0_42 = arith.constant 0 : index
    %c0_43 = arith.constant 0 : index
    %c416 = arith.constant 416 : index
    %85 = vector.load %arg3[%c0_42, %c0_43, %c416] : memref<1x8x512xf32, #tpu.memory_space<vmem>>, vector<1x8x32xf32>
    %86 = vector.shape_cast %85 : vector<1x8x32xf32> to vector<8x32xf32>
    %87 = vector.shape_cast %84 : vector<8x32xf32> to vector<1x8x32xf32>
    tpu.vector_store %arg3[%c0_42, %c0_43, %c416], %87 {strides = array<i32>} : memref<1x8x512xf32, #tpu.memory_space<vmem>>, vector<1x8x32xf32>,
    %88 = vector.extract_strided_slice %27 {offsets = [0, 224], sizes = [8, 32], strides = [1, 1]} : vector<8x256xf32> to vector<8x32xf32>
    %c0_44 = arith.constant 0 : index
    %c0_45 = arith.constant 0 : index
    %c448 = arith.constant 448 : index
    %89 = vector.load %arg3[%c0_44, %c0_45, %c448] : memref<1x8x512xf32, #tpu.memory_space<vmem>>, vector<1x8x32xf32>
    %90 = vector.shape_cast %89 : vector<1x8x32xf32> to vector<8x32xf32>
    %91 = vector.shape_cast %88 : vector<8x32xf32> to vector<1x8x32xf32>
    tpu.vector_store %arg3[%c0_44, %c0_45, %c448], %91 {strides = array<i32>} : memref<1x8x512xf32, #tpu.memory_space<vmem>>, vector<1x8x32xf32>,
    %92 = vector.extract_strided_slice %31 {offsets = [0, 224], sizes = [8, 32], strides = [1, 1]} : vector<8x256xf32> to vector<8x32xf32>
    %c0_46 = arith.constant 0 : index
    %c0_47 = arith.constant 0 : index
    %c480 = arith.constant 480 : index
    %93 = vector.load %arg3[%c0_46, %c0_47, %c480] : memref<1x8x512xf32, #tpu.memory_space<vmem>>, vector<1x8x32xf32>
    %94 = vector.shape_cast %93 : vector<1x8x32xf32> to vector<8x32xf32>
    %95 = vector.shape_cast %92 : vector<8x32xf32> to vector<1x8x32xf32>
    tpu.vector_store %arg3[%c0_46, %c0_47, %c480], %95 {strides = array<i32>} : memref<1x8x512xf32, #tpu.memory_space<vmem>>, vector<1x8x32xf32>,
    return
  }
  func.func @transform_0(%arg0: i32, %arg1: i32) -> (i32, i32, i32, i32) {
    %c0_i32 = arith.constant 0 : i32
    %c0_i32_0 = arith.constant 0 : i32
    %c0_i32_1 = arith.constant 0 : i32
    return %arg0, %c0_i32, %arg1, %c0_i32_0 : i32, i32, i32, i32
  }
  func.func @transform_1(%arg0: i32, %arg1: i32) -> (i32, i32, i32) {
    %c0_i32 = arith.constant 0 : i32
    %c0_i32_0 = arith.constant 0 : i32
    return %arg0, %arg1, %c0_i32 : i32, i32, i32
  }
}

</mosaic_0001>

<bundles_post_ra>
// kernel: tpu_custom_call.1
= control target key start
LH: loop header
LB: loop body
LE: loop exit
PB: predicated region body
PF: predicated region fallthrough
CT: control target
= control target key end

     0   :  { %s12691_s0 = inlined_call_operand.hbm [shape: f32[2,4,8,128], index: 0, kind: input, shape index: {}]   ;;  %s12692_s1 = inlined_call_operand.hbm [shape: f32[2,8,512], index: 1, kind: output, shape index: {}]  }
   0x1   :  { %12916 = sst [smem:[#allocation221_spill]] %s12691_s0 }
   0x2   :  { %12917 = sst [smem:[#allocation222_spill]] %s12692_s1 }
   0x3   :  { %6 = vsyncpa [#allocation3], 0 }
   0x4   :  { %8 = vsyncpa [#allocation3 + $0x1], 0 }
   0x5   :  { %9 = vsyncpa [#allocation4], 0 }
   0x6   :  { %11 = vsyncpa [#allocation4 + $0x1], 0  ;;  %s8748_s6 = smov 0   ;;  %s8750_s7 = smov 0  }
   0x7   :  { %s8752_s8 = smov 0   ;;  %s8754_s9 = smov 0  }
   0x8   :  { %s8756_s10 = smov 0   ;;  %s8758_s11 = smov 0  }
   0x9 LB: > { %12918 = sst [smem:[#allocation8_spill]] %s8647_s6  ;;  %s8406_s12 = sadd.s32 4294967295, %s8667_s11   ;;  %s8667_s11 = sphi %s8758_s11, %s17_s11   ;;  %s8663_s10 = sphi %s8756_s10, %s14097_s10   ;;  %s8659_s9 = sphi %s8754_s9, %s14096_s9   ;;  %s8655_s8 = sphi %s8752_s8, %s14095_s8   ;;  %s8651_s7 = sphi %s8750_s7, %s14094_s7   ;;  %s8647_s6 = sphi %s8748_s6, %s14093_s6  }
   0xa   : > { %12919 = sst [smem:[#allocation9_spill]] %s8651_s7  ;;  %s8407_s13 = sadd.s32 4294967294, %s8667_s11  }
   0xb   : > { %12920 = sst [smem:[#allocation10_spill]] %s8655_s8  ;;  %s29_s14 = sadd.s32 1, %s8663_s10 }
   0xc   : > { %12921 = sst [smem:[#allocation11_spill]] %s8659_s9  ;;  %s38_s15 = sadd.s32 1, %s8655_s8 }
   0xd   : > { %12922 = sst [smem:[#allocation12_spill]] %s8663_s10  ;;  %p31_p0 = scmp.ge.s32.totalorder %s29_s14, 2 }
   0xe   : > { %12923 = sst [smem:[#allocation13_spill]] %s8667_s11  ;;  %p45_p1 = scmp.ne.s32.totalorder %s8655_s8, %s8651_s7 }
   0xf   : > { %p46_p2 = scmp.eq.s32.totalorder %s8667_s11, 0  ;;  %p51_p3 = scmp.ne.s32.totalorder %s8651_s7, %s8647_s6 }
  0x10   : > { %s14099_s14 = smov (%p31_p0, %s29_s14), 0  ;;  %p52_p5 = scmp.eq.s32.totalorder %s8406_s12, 0 }
  0x11   : > { %12924 = sst [smem:[#allocation14_spill]] %s14099_s14  ;;  %p8789_p4 = por %p46_p2, %p45_p1 }
  0x12   : > { %s33_s17 = ssub.s32 %s8663_s10, %s14099_s14  ;;  %p77_p6 = scmp.eq.s32.totalorder %s8406_s12, 1 }
  0x13   : > { %p36_p7 = scmp.eq.s32.totalorder %s33_s17, 0  ;;  %p8795_p8 = por %p52_p5, %p51_p3 }
  0x14   : > { %p8799_p9 = por %p77_p6, %p45_p1  ;;  %p83_p10 = scmp.eq.s32.totalorder %s8407_s13, 1 }
  0x15   : > { %s8804_s20 = scalar_select %p36_p7, %s8655_s8, %s38_s15  }
  0x16   : > { %s12927_s19 = scalar_select %p8799_p9, 1, 0 }
  0x17   : > { %12929 = sst [smem:[#allocation16_spill]] %s8804_s20  ;;  %p8806_p11 = por %p83_p10, %p51_p3 }
  0x18   : > { %12928 = sst [smem:[#allocation15_spill]] %s12927_s19  ;;  %p8438_p13 = scmp.lt.s32.totalorder %s8667_s11, 2 }
  0x19   : > { %s12930_s21 = scalar_select %p8806_p11, 1, 0 }
  0x1a   : > { %s103_s22 = sand.u32 1, %s8655_s8   ;;  %s8424_s24 = sshll.u32 %s8663_s10, 9 }
  0x1b   : > { %12931 = sst [smem:[#allocation17_spill]] %s12930_s21  ;;  %s8410_s23 = sshll.u32 %s103_s22, 5 }
  0x1c   : > { %s12932_s0 = sld [smem:[#allocation221_spill]]  ;;  %s107_s28 = scalar_lea.vmem [#allocation2], %s8410_s23 }
  0x1d   : > { %s115_s29 = sshll.u32 %s107_s28, 4  ;;  %p8823_p0 = pnand %p8438_p13, %p8789_p4  ;;  %s8819_s29 = int_to_ptr.vmem [resolvable:$true] %s115_s29 }
  0x1e   : > { %s8828_s2 = scalar_lea.sflag [#allocation3], %s103_s22 }
  0x1f   : > { %p8557_p3 = pneg %p8823_p0 }
  0x22   : > { %s8817_s27 = scalar_lea.hbm %s12932_s0, %s8424_s24  ;;  %s8560_s12 = scalar_lea.hbm %s12932_s0, 1024 }
  0x23   : > { %s8555_s3 = scalar_lea.hbm %s8817_s27, 512  ;;  %p8561_p4 = scmp.lt.u32.totalorder %s8817_s27, %s12932_s0 }
  0x24   : > { %p8556_p2 = scmp.ne.s32.totalorder %s8817_s27, %s8555_s3  ;;  %p8562_p7 = scmp.lt.u32.totalorder %s8560_s12, %s8555_s3 }
  0x25   : > { %p8564_p13 = scmp.lt.u32.totalorder %s8555_s3, %s8817_s27 }
  0x26   : > { %p8558_p5 = pnand %p8557_p3, %p8556_p2  ;;  %p8563_p10 = por %p8562_p7, %p8561_p4 }
  0x28   : > { %p8559_p6 = pneg %p8558_p5  ;;  %p8565_p12 = por %p8564_p13, %p8563_p10 }
  0x2a   : > { %p8566_p1 = pnand %p8565_p12, %p8559_p6 }
  0x2c   : > { %8569 = shalt.err (!%p8566_p1)
}
  0x2d   : > { %s8570_s16 = scalar_lea.vmem %s8819_s29, 512  ;;  %s8669_s17 = smov [#allocation2]  }
  0x2e   : > { %p8571_p2 = scmp.ne.s32.totalorder %s8819_s29, %s8570_s16  ;;  %s8575_s22 = sshll.u32 %s8669_s17, 4  ;;  %s8576_s22 = int_to_ptr.vmem [resolvable:$false] %s8575_s22 }
  0x2f   : > { %s8577_s23 = scalar_lea.vmem %s8576_s22, 1024  ;;  %p8578_p9 = scmp.lt.s32.totalorder %s8819_s29, %s8576_s22 }
  0x30   : > { %p8573_p5 = pnand %p8571_p2, %p8557_p3  ;;  %p8579_p4 = scmp.lt.s32.totalorder %s8577_s23, %s8570_s16 }
  0x32   : > { %p8574_p11 = pneg %p8573_p5  ;;  %p8580_p7 = por %p8579_p4, %p8578_p9 }
  0x34   : > { %p8581_p10 = pnand %p8580_p7, %p8574_p11 }
  0x36   : > { %8584 = shalt.err (!%p8581_p10)
}
  0x37   : > { %s8670_s24 = smov 128   ;;  %s8671_s25 = smov 8  }
  0x38   : > { %8433 = dma.hbm_to_vmem [thread:$0]  (!%p8823_p0), %s8817_s27, 512, %s8819_s29, %s8828_s2, %s8670_s24, %s8670_s24, %s8671_s25  }
  0x39   : > { %p123_p12 = scmp.lt.s32.totalorder %s8667_s11, 3  ;;  %p12934_p1 = scmp.ge.s32.totalorder %s8667_s11, 1 }
  0x3b   : > { %p124_p3 = pnand %p12934_p1, %p123_p12 }
  0x3d   : > { %127 = sbr.rel (%p124_p3) target bundleno = 2059 (0x80b), region = 24 }
  0x44   : > { %s8860_s26 = sand.u32 1, %s8651_s7  }
  0x45   : > { %12935 = sst [smem:[#allocation18_spill]] %s8860_s26  ;;  %s12714_s28 = sshll.u32 %s8860_s26, 5 }
  0x46   : > { %s130_s3 = scalar_lea.sflag [#allocation3], %s8860_s26  ;;  %s133_s4 = scalar_lea.vmem [#allocation2], %s12714_s28 }
  0x47   : > { %8638 = dma.done.wait (%p8795_p8), %s130_s3, 512  }
  0x48   : > { %8640 = vsyncadd (%p8795_p8), %s130_s3, 4294966784  ;;  %v171_v0 = vlaneseq  ;;  %v8870_v1 = vld [vmem:[%s133_s4] sm:$0xff]  ;;  %v8872_v2 = vld [vmem:[%s133_s4 + $0x8] sm:$0xff]  ;;  %vm12890_vm0 = vcmask 7168   ;;  %s12850_s18 = smov 4   ;;  %s12803_s27 = smov 2  }
  0x49   : > { %v8874_v3 = vld [vmem:[%s133_s4 + $0x10] sm:$0xff]  ;;  %v8878_v5 = vld [vmem:[%s133_s4 + $0x18] sm:$0xff]  ;;  %v159_v6 = vsub.f32 %v8870_v1, %v8872_v2  ;;  %s12847_s29 = smov 8   ;;  %s12844_s30 = smov 6   ;;  %vm4052_vm1 = vcmask 15360   ;;  %vm4054_vm2 = vcmask 31744  }
  0x4a   : > { %v8876_v4 = vshrl.u32 %v171_v0, 7  ;;  %v163_v7 = vsub.f32 %v8874_v3, %v8878_v5  ;;  %s12841_s2 = smov 12   ;;  %s12838_s5 = smov 10   ;;  %vm4056_vm3 = vcmask 48128   ;;  %vm4058_vm4 = vcmask 64512  }
  0x4b   : > { %v8884_v8 = vmul.f32 0.5, %v159_v6  ;;  %s12835_s12 = smov 16   ;;  %s12832_s13 = smov 14   ;;  %vm12902_vm5 = vcmask 80896   ;;  %vm12901_vm6 = vcmask 97280   ;;  %vm12904_vm7 = vcmask 113664  }
  0x4c   : > { %v8886_v9 = vmul.f32 0.5, %v163_v7  ;;  %v8889_v10 = vsub.s32 0, %v8876_v4  ;;  %v8898_v13 = vsub.s32 1, %v8876_v4  ;;  %v8903_v15 = vsub.s32 2, %v8876_v4  ;;  %s12829_s15 = smov 20   ;;  %s12826_s16 = smov 18  }
  0x4d   : > { %12936 = vst [vmem:[#allocation19_spill] sm:$0xff] %v8884_v8  ;;  %v8908_v17 = vsub.s32 3, %v8876_v4  ;;  %v8921_v23 = vsub.s32 4, %v8876_v4  ;;  %v8958_v41 = vsub.s32 5, %v8876_v4  ;;  %v8995_v59 = vsub.s32 6, %v8876_v4  ;;  %s12823_s17 = smov 24  }
  0x4e   : > { %12937 = vst [vmem:[#allocation20_spill] sm:$0xff] %v8886_v9  ;;  %12938 = vst [vmem:[#allocation21_spill] sm:$0xff] %v8889_v10  ;;  %v8893_v11 = vsub.f32 %v8884_v8, %v8886_v9  ;;  %s12820_s22 = smov 22   ;;  %s12817_s23 = smov 28   ;;  %vm12903_vm8 = vcmask 130048   ;;  %vm12906_vm9 = vcmask 146432  }
  0x4f   : > { %12939 = vst [vmem:[#allocation22_spill] sm:$0xff] %v8898_v13  ;;  %12940 = vst [vmem:[#allocation23_spill] sm:$0xff] %v8903_v15  ;;  %s12814_s24 = smov 26   ;;  %s12715_s25 = smov 32   ;;  %vm12905_vm10 = vcmask 162816   ;;  %vm12846_vm11 = vcmask 179200  }
  0x50   : > { %v174_v12 = vrot.slane %v8893_v11, %v8889_v10  ;;  %v241_v14 = vrot.slane %v8893_v11, %v8898_v13  ;;  %v308_v16 = vrot.slane %v8893_v11, %v8903_v15  ;;  %12941 = vst [vmem:[#allocation24_spill] sm:$0xff] %v8908_v17  ;;  %v375_v18 = vrot.slane %v8893_v11, %v8908_v17  ;;  %s12811_s3 = smov 30   ;;  %s12717_s4 = smov 36  }
  0x51   : > { %12944 = vst [vmem:[#allocation27_spill] sm:$0xff] %v8921_v23  ;;  %v442_v26 = vrot.slane %v8893_v11, %v8921_v23  ;;  %12958 = vst [vmem:[#allocation41_spill] sm:$0xff] %v8958_v41  ;;  %v509_v44 = vrot.slane %v8893_v11, %v8958_v41  ;;  %v576_v62 = vrot.slane %v8893_v11, %v8995_v59  ;;  %s12725_s28 = smov 34   ;;  %vm12806_vm12 = vcmask 195584   ;;  %s13314_s0 = smov 70  }
  0x52   : > { %184 = vbcast.lane.b32.xlu1 %v174_v12, 272  ;;  %176 = vbcast.lane.b32.xlu0 %v174_v12, 256  ;;  %12972 = vst [vmem:[#allocation55_spill] sm:$0xff] %v8995_v59  ;;  %vm12805_vm13 = vcmask 211968   ;;  %vm12808_vm14 = vcmask 228352   ;;  %vm12807_vm15 = vcmask 244736  }
  0x53   : > { %s13317_s14 = smov 68   ;;  %s13320_s10 = smov 74  }
  0x54   : > { %s13322_s20 = smov 72   ;;  %s13329_s8 = smov 78  }
  0x55   : > { %s13334_s7 = smov 76   ;;  %s13335_s11 = smov 82  }
  0x56   : > { %188 = vbcast.lane.b32.xlu1 %v174_v12, 280  ;;  %180 = vbcast.lane.b32.xlu0 %v174_v12, 264  ;;  %s13338_s21 = smov 80   ;;  %s13339_s6 = smov 86  }
  0x57   : > { %s13340_s1 = smov 84   ;;  %s13344_s19 = smov 90  }
  0x58   : > { %s13345_s9 = smov 88  }
  0x5a   : > { %196 = vbcast.lane.b32.xlu1 %v174_v12, 296  ;;  %192 = vbcast.lane.b32.xlu0 %v174_v12, 288 }
  0x5e   : > { %204 = vbcast.lane.b32.xlu1 %v174_v12, 312  ;;  %200 = vbcast.lane.b32.xlu0 %v174_v12, 304 }
  0x62   : > { %212 = vbcast.lane.b32.xlu1 %v174_v12, 328  ;;  %208 = vbcast.lane.b32.xlu0 %v174_v12, 320 }
  0x66   : > { %220 = vbcast.lane.b32.xlu1 %v174_v12, 344  ;;  %216 = vbcast.lane.b32.xlu0 %v174_v12, 336 }
  0x6a   : > { %228 = vbcast.lane.b32.xlu1 %v174_v12, 360  ;;  %224 = vbcast.lane.b32.xlu0 %v174_v12, 352 }
  0x6e   : > { %236 = vbcast.lane.b32.xlu1 %v174_v12, 376  ;;  %232 = vbcast.lane.b32.xlu0 %v174_v12, 368 }
  0x72   : > { %247 = vbcast.lane.b32.xlu1 %v241_v14, 264  ;;  %243 = vbcast.lane.b32.xlu0 %v241_v14, 256 }
  0x76   : > { %255 = vbcast.lane.b32.xlu1 %v241_v14, 280  ;;  %251 = vbcast.lane.b32.xlu0 %v241_v14, 272 }
  0x7a   : > { %263 = vbcast.lane.b32.xlu1 %v241_v14, 296  ;;  %259 = vbcast.lane.b32.xlu0 %v241_v14, 288 }
  0x7e   : > { %271 = vbcast.lane.b32.xlu1 %v241_v14, 312  ;;  %267 = vbcast.lane.b32.xlu0 %v241_v14, 304 }
  0x82   : > { %279 = vbcast.lane.b32.xlu1 %v241_v14, 328  ;;  %275 = vbcast.lane.b32.xlu0 %v241_v14, 320 }
  0x86   : > { %287 = vbcast.lane.b32.xlu1 %v241_v14, 344  ;;  %283 = vbcast.lane.b32.xlu0 %v241_v14, 336 }
  0x8a   : > { %295 = vbcast.lane.b32.xlu1 %v241_v14, 360  ;;  %291 = vbcast.lane.b32.xlu0 %v241_v14, 352 }
  0x8e   : > { %303 = vbcast.lane.b32.xlu1 %v241_v14, 376  ;;  %299 = vbcast.lane.b32.xlu0 %v241_v14, 368 }
  0x92   : > { %314 = vbcast.lane.b32.xlu1 %v308_v16, 264  ;;  %310 = vbcast.lane.b32.xlu0 %v308_v16, 256 }
  0x96   : > { %322 = vbcast.lane.b32.xlu1 %v308_v16, 280  ;;  %318 = vbcast.lane.b32.xlu0 %v308_v16, 272 }
  0x9a   : > { %330 = vbcast.lane.b32.xlu1 %v308_v16, 296  ;;  %326 = vbcast.lane.b32.xlu0 %v308_v16, 288 }
  0x9e   : > { %338 = vbcast.lane.b32.xlu1 %v308_v16, 312  ;;  %334 = vbcast.lane.b32.xlu0 %v308_v16, 304 }
  0xa2   : > { %346 = vbcast.lane.b32.xlu1 %v308_v16, 328  ;;  %342 = vbcast.lane.b32.xlu0 %v308_v16, 320 }
  0xa6   : > { %354 = vbcast.lane.b32.xlu1 %v308_v16, 344  ;;  %350 = vbcast.lane.b32.xlu0 %v308_v16, 336 }
  0xaa   : > { %362 = vbcast.lane.b32.xlu1 %v308_v16, 360  ;;  %358 = vbcast.lane.b32.xlu0 %v308_v16, 352 }
  0xae   : > { %370 = vbcast.lane.b32.xlu1 %v308_v16, 376  ;;  %366 = vbcast.lane.b32.xlu0 %v308_v16, 368 }
  0xb2   : > { %381 = vbcast.lane.b32.xlu1 %v375_v18, 264  ;;  %377 = vbcast.lane.b32.xlu0 %v375_v18, 256 }
  0xb6   : > { %389 = vbcast.lane.b32.xlu1 %v375_v18, 280  ;;  %385 = vbcast.lane.b32.xlu0 %v375_v18, 272 }
  0xba   : > { %397 = vbcast.lane.b32.xlu1 %v375_v18, 296  ;;  %393 = vbcast.lane.b32.xlu0 %v375_v18, 288 }
  0xbe   : > { %405 = vbcast.lane.b32.xlu1 %v375_v18, 312  ;;  %401 = vbcast.lane.b32.xlu0 %v375_v18, 304 }
  0xc2   : > { %413 = vbcast.lane.b32.xlu1 %v375_v18, 328  ;;  %409 = vbcast.lane.b32.xlu0 %v375_v18, 320 }
  0xc4   : > { %v8912_v19 = vpop.permute.xlu1 %184  ;;  %v8914_v20 = vpop.permute.xlu0 %176 }
  0xc5   : > { %12942 = vst [vmem:[#allocation25_spill] sm:$0xff] %v8912_v19 }
  0xc6   : > { %421 = vbcast.lane.b32.xlu1 %v375_v18, 344  ;;  %417 = vbcast.lane.b32.xlu0 %v375_v18, 336 }
  0xc8   : > { %v8916_v21 = vpop.permute.xlu1 %188  ;;  %v8918_v22 = vpop.permute.xlu0 %180 }
  0xc9   : > { %12943 = vst [vmem:[#allocation26_spill] sm:$0xff] %v8916_v21 }
  0xca   : > { %429 = vbcast.lane.b32.xlu1 %v375_v18, 360  ;;  %425 = vbcast.lane.b32.xlu0 %v375_v18, 352 }
  0xcc   : > { %v8923_v24 = vpop.permute.xlu1 %196  ;;  %v8925_v25 = vpop.permute.xlu0 %192 }
  0xcd   : > { %12945 = vst [vmem:[#allocation28_spill] sm:$0xff] %v8923_v24  ;;  %12946 = vst [vmem:[#allocation29_spill] sm:$0xff] %v8925_v25 }
  0xce   : > { %437 = vbcast.lane.b32.xlu1 %v375_v18, 376  ;;  %433 = vbcast.lane.b32.xlu0 %v375_v18, 368 }
  0xd0   : > { %v8929_v27 = vpop.permute.xlu1 %204  ;;  %v8931_v28 = vpop.permute.xlu0 %200 }
  0xd1   : > { %12947 = vst [vmem:[#allocation30_spill] sm:$0xff] %v8929_v27  ;;  %12948 = vst [vmem:[#allocation31_spill] sm:$0xff] %v8931_v28 }
  0xd2   : > { %448 = vbcast.lane.b32.xlu1 %v442_v26, 264  ;;  %444 = vbcast.lane.b32.xlu0 %v442_v26, 256 }
  0xd4   : > { %v8933_v29 = vpop.permute.xlu1 %212  ;;  %v8935_v30 = vpop.permute.xlu0 %208 }
  0xd5   : > { %12949 = vst [vmem:[#allocation32_spill] sm:$0xff] %v8933_v29 }
  0xd6   : > { %456 = vbcast.lane.b32.xlu1 %v442_v26, 280  ;;  %452 = vbcast.lane.b32.xlu0 %v442_v26, 272 }
  0xd8   : > { %v8937_v31 = vpop.permute.xlu1 %220  ;;  %v8939_v32 = vpop.permute.xlu0 %216 }
  0xd9   : > { %12950 = vst [vmem:[#allocation33_spill] sm:$0xff] %v8937_v31  ;;  %12951 = vst [vmem:[#allocation34_spill] sm:$0xff] %v8939_v32 }
  0xda   : > { %464 = vbcast.lane.b32.xlu1 %v442_v26, 296  ;;  %460 = vbcast.lane.b32.xlu0 %v442_v26, 288 }
  0xdc   : > { %v8941_v33 = vpop.permute.xlu1 %228  ;;  %v8943_v34 = vpop.permute.xlu0 %224 }
  0xdd   : > { %12952 = vst [vmem:[#allocation35_spill] sm:$0xff] %v8941_v33  ;;  %12953 = vst [vmem:[#allocation36_spill] sm:$0xff] %v8943_v34 }
  0xde   : > { %472 = vbcast.lane.b32.xlu1 %v442_v26, 312  ;;  %468 = vbcast.lane.b32.xlu0 %v442_v26, 304 }
  0xe0   : > { %v8945_v35 = vpop.permute.xlu1 %236  ;;  %v8947_v36 = vpop.permute.xlu0 %232 }
  0xe1   : > { %12954 = vst [vmem:[#allocation37_spill] sm:$0xff] %v8945_v35  ;;  %12955 = vst [vmem:[#allocation38_spill] sm:$0xff] %v8947_v36 }
  0xe2   : > { %480 = vbcast.lane.b32.xlu1 %v442_v26, 328  ;;  %476 = vbcast.lane.b32.xlu0 %v442_v26, 320 }
  0xe4   : > { %v8949_v37 = vpop.permute.xlu1 %247  ;;  %v8951_v38 = vpop.permute.xlu0 %243 }
  0xe6   : > { %488 = vbcast.lane.b32.xlu1 %v442_v26, 344  ;;  %484 = vbcast.lane.b32.xlu0 %v442_v26, 336 }
  0xe8   : > { %v8953_v39 = vpop.permute.xlu1 %255  ;;  %v8955_v40 = vpop.permute.xlu0 %251 }
  0xe9   : > { %12956 = vst [vmem:[#allocation39_spill] sm:$0xff] %v8953_v39  ;;  %12957 = vst [vmem:[#allocation40_spill] sm:$0xff] %v8955_v40 }
  0xea   : > { %496 = vbcast.lane.b32.xlu1 %v442_v26, 360  ;;  %492 = vbcast.lane.b32.xlu0 %v442_v26, 352 }
  0xec   : > { %v8960_v42 = vpop.permute.xlu1 %263  ;;  %v8962_v43 = vpop.permute.xlu0 %259 }
  0xed   : > { %12959 = vst [vmem:[#allocation42_spill] sm:$0xff] %v8960_v42  ;;  %12960 = vst [vmem:[#allocation43_spill] sm:$0xff] %v8962_v43 }
  0xee   : > { %504 = vbcast.lane.b32.xlu1 %v442_v26, 376  ;;  %500 = vbcast.lane.b32.xlu0 %v442_v26, 368 }
  0xf0   : > { %v8966_v45 = vpop.permute.xlu1 %271  ;;  %v8968_v46 = vpop.permute.xlu0 %267 }
  0xf1   : > { %12961 = vst [vmem:[#allocation44_spill] sm:$0xff] %v8966_v45  ;;  %12962 = vst [vmem:[#allocation45_spill] sm:$0xff] %v8968_v46 }
  0xf2   : > { %515 = vbcast.lane.b32.xlu1 %v509_v44, 264  ;;  %511 = vbcast.lane.b32.xlu0 %v509_v44, 256 }
  0xf4   : > { %v8970_v47 = vpop.permute.xlu1 %279  ;;  %v8972_v48 = vpop.permute.xlu0 %275 }
  0xf5   : > { %12963 = vst [vmem:[#allocation46_spill] sm:$0xff] %v8970_v47 }
  0xf6   : > { %523 = vbcast.lane.b32.xlu1 %v509_v44, 280  ;;  %519 = vbcast.lane.b32.xlu0 %v509_v44, 272 }
  0xf8   : > { %v8974_v49 = vpop.permute.xlu1 %287  ;;  %v8976_v50 = vpop.permute.xlu0 %283 }
  0xf9   : > { %12964 = vst [vmem:[#allocation47_spill] sm:$0xff] %v8974_v49  ;;  %12965 = vst [vmem:[#allocation48_spill] sm:$0xff] %v8976_v50  ;;  %v161_v50 = vadd.f32 %v8872_v2, %v8870_v1 }
  0xfa   : > { %531 = vbcast.lane.b32.xlu1 %v509_v44, 296  ;;  %527 = vbcast.lane.b32.xlu0 %v509_v44, 288 }
  0xfc   : > { %v8978_v51 = vpop.permute.xlu1 %295  ;;  %v8980_v52 = vpop.permute.xlu0 %291 }
  0xfd   : > { %12966 = vst [vmem:[#allocation49_spill] sm:$0xff] %v8978_v51  ;;  %12967 = vst [vmem:[#allocation50_spill] sm:$0xff] %v8980_v52 }
  0xfe   : > { %539 = vbcast.lane.b32.xlu1 %v509_v44, 312  ;;  %535 = vbcast.lane.b32.xlu0 %v509_v44, 304 }
 0x100   : > { %v8982_v53 = vpop.permute.xlu1 %303  ;;  %v8984_v54 = vpop.permute.xlu0 %299 }
 0x101   : > { %12968 = vst [vmem:[#allocation51_spill] sm:$0xff] %v8982_v53  ;;  %12969 = vst [vmem:[#allocation52_spill] sm:$0xff] %v8984_v54  ;;  %v9032_v54 = vsub.s32 7, %v8876_v4 }
 0x102   : > { %547 = vbcast.lane.b32.xlu1 %v509_v44, 328  ;;  %543 = vbcast.lane.b32.xlu0 %v509_v44, 320 }
 0x103   : > { %12985 = vst [vmem:[#allocation68_spill] sm:$0xff] %v9032_v54  ;;  %v643_v36 = vrot.slane %v8893_v11, %v9032_v54 }
 0x104   : > { %v8986_v55 = vpop.permute.xlu1 %314  ;;  %v8988_v56 = vpop.permute.xlu0 %310 }
 0x106   : > { %555 = vbcast.lane.b32.xlu1 %v509_v44, 344  ;;  %551 = vbcast.lane.b32.xlu0 %v509_v44, 336 }
 0x108   : > { %v8990_v57 = vpop.permute.xlu1 %322  ;;  %v8992_v58 = vpop.permute.xlu0 %318 }
 0x109   : > { %12970 = vst [vmem:[#allocation53_spill] sm:$0xff] %v8990_v57  ;;  %12971 = vst [vmem:[#allocation54_spill] sm:$0xff] %v8992_v58 }
 0x10a   : > { %563 = vbcast.lane.b32.xlu1 %v509_v44, 360  ;;  %559 = vbcast.lane.b32.xlu0 %v509_v44, 352 }
 0x10c   : > { %v8997_v60 = vpop.permute.xlu1 %330  ;;  %v8999_v61 = vpop.permute.xlu0 %326 }
 0x10d   : > { %12973 = vst [vmem:[#allocation56_spill] sm:$0xff] %v8997_v60  ;;  %12974 = vst [vmem:[#allocation57_spill] sm:$0xff] %v8999_v61 }
 0x10e   : > { %571 = vbcast.lane.b32.xlu1 %v509_v44, 376  ;;  %567 = vbcast.lane.b32.xlu0 %v509_v44, 368 }
 0x110   : > { %v9003_v63 = vpop.permute.xlu1 %338  ;;  %v9005_v0 = vpop.permute.xlu0 %334 }
 0x111   : > { %12975 = vst [vmem:[#allocation58_spill] sm:$0xff] %v9003_v63  ;;  %12976 = vst [vmem:[#allocation59_spill] sm:$0xff] %v9005_v0 }
 0x112   : > { %582 = vbcast.lane.b32.xlu1 %v576_v62, 264  ;;  %578 = vbcast.lane.b32.xlu0 %v576_v62, 256 }
 0x114   : > { %v9007_v6 = vpop.permute.xlu1 %346  ;;  %v9009_v7 = vpop.permute.xlu0 %342 }
 0x115   : > { %12977 = vst [vmem:[#allocation60_spill] sm:$0xff] %v9007_v6 }
 0x116   : > { %590 = vbcast.lane.b32.xlu1 %v576_v62, 280  ;;  %586 = vbcast.lane.b32.xlu0 %v576_v62, 272 }
 0x118   : > { %v9011_v12 = vpop.permute.xlu1 %354  ;;  %v9013_v14 = vpop.permute.xlu0 %350 }
 0x119   : > { %12978 = vst [vmem:[#allocation61_spill] sm:$0xff] %v9011_v12  ;;  %12979 = vst [vmem:[#allocation62_spill] sm:$0xff] %v9013_v14 }
 0x11a   : > { %598 = vbcast.lane.b32.xlu1 %v576_v62, 296  ;;  %594 = vbcast.lane.b32.xlu0 %v576_v62, 288 }
 0x11c   : > { %v9015_v16 = vpop.permute.xlu1 %362  ;;  %v9017_v18 = vpop.permute.xlu0 %358 }
 0x11d   : > { %12980 = vst [vmem:[#allocation63_spill] sm:$0xff] %v9015_v16  ;;  %12981 = vst [vmem:[#allocation64_spill] sm:$0xff] %v9017_v18 }
 0x11e   : > { %606 = vbcast.lane.b32.xlu1 %v576_v62, 312  ;;  %602 = vbcast.lane.b32.xlu0 %v576_v62, 304 }
 0x120   : > { %v9019_v26 = vpop.permute.xlu1 %370  ;;  %v9021_v44 = vpop.permute.xlu0 %366 }
 0x121   : > { %12982 = vst [vmem:[#allocation65_spill] sm:$0xff] %v9019_v26  ;;  %12983 = vst [vmem:[#allocation66_spill] sm:$0xff] %v9021_v44 }
 0x122   : > { %614 = vbcast.lane.b32.xlu1 %v576_v62, 328  ;;  %610 = vbcast.lane.b32.xlu0 %v576_v62, 320 }
 0x124   : > { %v9023_v9 = vpop.permute.xlu1 %381  ;;  %v9025_v8 = vpop.permute.xlu0 %377 }
 0x126   : > { %622 = vbcast.lane.b32.xlu1 %v576_v62, 344  ;;  %618 = vbcast.lane.b32.xlu0 %v576_v62, 336 }
 0x128   : > { %v9027_v53 = vpop.permute.xlu1 %389  ;;  %v9029_v35 = vpop.permute.xlu0 %385 }
 0x129   : > { %12984 = vst [vmem:[#allocation67_spill] sm:$0xff] %v9027_v53 }
 0x12a   : > { %630 = vbcast.lane.b32.xlu1 %v576_v62, 360  ;;  %626 = vbcast.lane.b32.xlu0 %v576_v62, 352 }
 0x12c   : > { %v9034_v26 = vpop.permute.xlu1 %397  ;;  %v9036_v44 = vpop.permute.xlu0 %393 }
 0x12d   : > { %12986 = vst [vmem:[#allocation69_spill] sm:$0xff] %v9034_v26  ;;  %12987 = vst [vmem:[#allocation70_spill] sm:$0xff] %v9036_v44 }
 0x12e   : > { %638 = vbcast.lane.b32.xlu1 %v576_v62, 376  ;;  %634 = vbcast.lane.b32.xlu0 %v576_v62, 368 }
 0x130   : > { %v9040_v51 = vpop.permute.xlu1 %405  ;;  %v9042_v16 = vpop.permute.xlu0 %401 }
 0x131   : > { %12988 = vst [vmem:[#allocation71_spill] sm:$0xff] %v9040_v51  ;;  %12989 = vst [vmem:[#allocation72_spill] sm:$0xff] %v9042_v16 }
 0x132   : > { %649 = vbcast.lane.b32.xlu1 %v643_v36, 264  ;;  %645 = vbcast.lane.b32.xlu0 %v643_v36, 256 }
 0x134   : > { %v9044_v52 = vpop.permute.xlu1 %413  ;;  %v9046_v18 = vpop.permute.xlu0 %409 }
 0x135   : > { %12990 = vst [vmem:[#allocation73_spill] sm:$0xff] %v9044_v52 }
 0x136   : > { %657 = vbcast.lane.b32.xlu1 %v643_v36, 280  ;;  %653 = vbcast.lane.b32.xlu0 %v643_v36, 272 }
 0x138   : > { %v9048_v34 = vpop.permute.xlu1 %421  ;;  %v9050_v49 = vpop.permute.xlu0 %417 }
 0x139   : > { %12991 = vst [vmem:[#allocation74_spill] sm:$0xff] %v9048_v34  ;;  %12992 = vst [vmem:[#allocation75_spill] sm:$0xff] %v9050_v49  ;;  %v165_v34 = vadd.f32 %v8878_v5, %v8874_v3 }
 0x13a   : > { %665 = vbcast.lane.b32.xlu1 %v643_v36, 296  ;;  %661 = vbcast.lane.b32.xlu0 %v643_v36, 288 }
 0x13c   : > { %v9052_v62 = vpop.permute.xlu1 %429  ;;  %v9054_v11 = vpop.permute.xlu0 %425 }
 0x13d   : > { %12993 = vst [vmem:[#allocation76_spill] sm:$0xff] %v9052_v62  ;;  %12994 = vst [vmem:[#allocation77_spill] sm:$0xff] %v9054_v11  ;;  %v9068_v62 = vmul.f32 0.5, %v161_v50  ;;  %v9070_v11 = vmul.f32 0.5, %v165_v34 }
 0x13e   : > { %673 = vbcast.lane.b32.xlu1 %v643_v36, 312  ;;  %669 = vbcast.lane.b32.xlu0 %v643_v36, 304 }
 0x13f   : > { %12997 = vst [vmem:[#allocation80_spill] sm:$0xff] %v9068_v62  ;;  %12998 = vst [vmem:[#allocation81_spill] sm:$0xff] %v9070_v11  ;;  %v9078_v1 = vsub.f32 %v9068_v62, %v9070_v11 }
 0x140   : > { %v9056_v33 = vpop.permute.xlu1 %437  ;;  %v9058_v12 = vpop.permute.xlu0 %433 }
 0x141   : > { %12995 = vst [vmem:[#allocation78_spill] sm:$0xff] %v9056_v33  ;;  %12996 = vst [vmem:[#allocation79_spill] sm:$0xff] %v9058_v12  ;;  %v710_v5 = vrot.slane %v9078_v1, %v8889_v10 }
 0x142   : > { %681 = vbcast.lane.b32.xlu1 %v643_v36, 328  ;;  %677 = vbcast.lane.b32.xlu0 %v643_v36, 320 }
 0x144   : > { %v9064_v49 = vpop.permute.xlu1 %448  ;;  %v9066_v14 = vpop.permute.xlu0 %444 }
 0x146   : > { %689 = vbcast.lane.b32.xlu1 %v643_v36, 344  ;;  %685 = vbcast.lane.b32.xlu0 %v643_v36, 336 }
 0x148   : > { %v9072_v33 = vpop.permute.xlu1 %456  ;;  %v9074_v12 = vpop.permute.xlu0 %452 }
 0x149   : > { %12999 = vst [vmem:[#allocation82_spill] sm:$0xff] %v9072_v33  ;;  %13000 = vst [vmem:[#allocation83_spill] sm:$0xff] %v9074_v12 }
 0x14a   : > { %697 = vbcast.lane.b32.xlu1 %v643_v36, 360  ;;  %693 = vbcast.lane.b32.xlu0 %v643_v36, 352 }
 0x14c   : > { %v9080_v2 = vpop.permute.xlu1 %464  ;;  %v9082_v3 = vpop.permute.xlu0 %460 }
 0x14d   : > { %13001 = vst [vmem:[#allocation84_spill] sm:$0xff] %v9080_v2  ;;  %13002 = vst [vmem:[#allocation85_spill] sm:$0xff] %v9082_v3 }
 0x14e   : > { %705 = vbcast.lane.b32.xlu1 %v643_v36, 376  ;;  %701 = vbcast.lane.b32.xlu0 %v643_v36, 368 }
 0x150   : > { %v9086_v34 = vpop.permute.xlu1 %472  ;;  %v9088_v50 = vpop.permute.xlu0 %468 }
 0x151   : > { %13003 = vst [vmem:[#allocation86_spill] sm:$0xff] %v9086_v34  ;;  %13004 = vst [vmem:[#allocation87_spill] sm:$0xff] %v9088_v50 }
 0x152   : > { %716 = vbcast.lane.b32.xlu1 %v710_v5, 264  ;;  %712 = vbcast.lane.b32.xlu0 %v710_v5, 256 }
 0x154   : > { %v9090_v32 = vpop.permute.xlu1 %480  ;;  %v9092_v31 = vpop.permute.xlu0 %476 }
 0x155   : > { %13005 = vst [vmem:[#allocation88_spill] sm:$0xff] %v9090_v32 }
 0x156   : > { %724 = vbcast.lane.b32.xlu1 %v710_v5, 280  ;;  %720 = vbcast.lane.b32.xlu0 %v710_v5, 272 }
 0x158   : > { %v9094_v11 = vpop.permute.xlu1 %488  ;;  %v9096_v62 = vpop.permute.xlu0 %484 }
 0x159   : > { %13006 = vst [vmem:[#allocation89_spill] sm:$0xff] %v9094_v11  ;;  %13007 = vst [vmem:[#allocation90_spill] sm:$0xff] %v9096_v62 }
 0x15a   : > { %732 = vbcast.lane.b32.xlu1 %v710_v5, 296  ;;  %728 = vbcast.lane.b32.xlu0 %v710_v5, 288 }
 0x15c   : > { %v9098_v36 = vpop.permute.xlu1 %496  ;;  %v9100_v10 = vpop.permute.xlu0 %492 }
 0x15d   : > { %13008 = vst [vmem:[#allocation91_spill] sm:$0xff] %v9098_v36  ;;  %13009 = vst [vmem:[#allocation92_spill] sm:$0xff] %v9100_v10 }
 0x15e   : > { %740 = vbcast.lane.b32.xlu1 %v710_v5, 312  ;;  %736 = vbcast.lane.b32.xlu0 %v710_v5, 304 }
 0x160   : > { %v9102_v47 = vpop.permute.xlu1 %504  ;;  %v9104_v52 = vpop.permute.xlu0 %500 }
 0x161   : > { %13010 = vst [vmem:[#allocation93_spill] sm:$0xff] %v9102_v47  ;;  %13011 = vst [vmem:[#allocation94_spill] sm:$0xff] %v9104_v52  ;;  %v777_v47 = vrot.slane %v9078_v1, %v8898_v13 }
 0x162   : > { %748 = vbcast.lane.b32.xlu1 %v710_v5, 328  ;;  %744 = vbcast.lane.b32.xlu0 %v710_v5, 320 }
 0x164   : > { %v9106_v32 = vpop.permute.xlu1 %515  ;;  %v9108_v6 = vpop.permute.xlu0 %511 }
 0x166   : > { %756 = vbcast.lane.b32.xlu1 %v710_v5, 344  ;;  %752 = vbcast.lane.b32.xlu0 %v710_v5, 336 }
 0x168   : > { %v9110_v11 = vpop.permute.xlu1 %523  ;;  %v9112_v62 = vpop.permute.xlu0 %519 }
 0x169   : > { %13012 = vst [vmem:[#allocation95_spill] sm:$0xff] %v9110_v11 }
 0x16a   : > { %764 = vbcast.lane.b32.xlu1 %v710_v5, 360  ;;  %760 = vbcast.lane.b32.xlu0 %v710_v5, 352 }
 0x16c   : > { %v9114_v36 = vpop.permute.xlu1 %531  ;;  %v9116_v10 = vpop.permute.xlu0 %527 }
 0x16d   : > { %13013 = vst [vmem:[#allocation96_spill] sm:$0xff] %v9114_v36  ;;  %13014 = vst [vmem:[#allocation97_spill] sm:$0xff] %v9116_v10 }
 0x16e   : > { %772 = vbcast.lane.b32.xlu1 %v710_v5, 376  ;;  %768 = vbcast.lane.b32.xlu0 %v710_v5, 368 }
 0x170   : > { %v9120_v52 = vpop.permute.xlu1 %539  ;;  %v9122_v29 = vpop.permute.xlu0 %535 }
 0x171   : > { %13015 = vst [vmem:[#allocation98_spill] sm:$0xff] %v9120_v52  ;;  %13016 = vst [vmem:[#allocation99_spill] sm:$0xff] %v9122_v29 }
 0x172   : > { %783 = vbcast.lane.b32.xlu1 %v777_v47, 264  ;;  %779 = vbcast.lane.b32.xlu0 %v777_v47, 256 }
 0x174   : > { %v9124_v34 = vpop.permute.xlu1 %547  ;;  %v9126_v45 = vpop.permute.xlu0 %543 }
 0x175   : > { %13017 = vst [vmem:[#allocation100_spill] sm:$0xff] %v9124_v34 }
 0x176   : > { %791 = vbcast.lane.b32.xlu1 %v777_v47, 280  ;;  %787 = vbcast.lane.b32.xlu0 %v777_v47, 272 }
 0x178   : > { %v9128_v27 = vpop.permute.xlu1 %555  ;;  %v9130_v51 = vpop.permute.xlu0 %551 }
 0x179   : > { %13018 = vst [vmem:[#allocation101_spill] sm:$0xff] %v9128_v27  ;;  %13019 = vst [vmem:[#allocation102_spill] sm:$0xff] %v9130_v51 }
 0x17a   : > { %799 = vbcast.lane.b32.xlu1 %v777_v47, 296  ;;  %795 = vbcast.lane.b32.xlu0 %v777_v47, 288 }
 0x17c   : > { %v9132_v5 = vpop.permute.xlu1 %563  ;;  %v9134_v13 = vpop.permute.xlu0 %559 }
 0x17d   : > { %13020 = vst [vmem:[#allocation103_spill] sm:$0xff] %v9132_v5  ;;  %13021 = vst [vmem:[#allocation104_spill] sm:$0xff] %v9134_v13 }
 0x17e   : > { %807 = vbcast.lane.b32.xlu1 %v777_v47, 312  ;;  %803 = vbcast.lane.b32.xlu0 %v777_v47, 304 }
 0x180   : > { %v9136_v52 = vpop.permute.xlu1 %571  ;;  %v9138_v63 = vpop.permute.xlu0 %567 }
 0x181   : > { %13022 = vst [vmem:[#allocation105_spill] sm:$0xff] %v9136_v52  ;;  %13023 = vst [vmem:[#allocation106_spill] sm:$0xff] %v9138_v63  ;;  %v844_v52 = vrot.slane %v9078_v1, %v8903_v15 }
 0x182   : > { %815 = vbcast.lane.b32.xlu1 %v777_v47, 328  ;;  %811 = vbcast.lane.b32.xlu0 %v777_v47, 320 }
 0x184   : > { %v9140_v34 = vpop.permute.xlu1 %582  ;;  %v9142_v50 = vpop.permute.xlu0 %578 }
 0x186   : > { %823 = vbcast.lane.b32.xlu1 %v777_v47, 344  ;;  %819 = vbcast.lane.b32.xlu0 %v777_v47, 336 }
 0x188   : > { %v9144_v27 = vpop.permute.xlu1 %590  ;;  %v9146_v51 = vpop.permute.xlu0 %586 }
 0x189   : > { %13024 = vst [vmem:[#allocation107_spill] sm:$0xff] %v9144_v27  ;;  %13025 = vst [vmem:[#allocation108_spill] sm:$0xff] %v9146_v51 }
 0x18a   : > { %831 = vbcast.lane.b32.xlu1 %v777_v47, 360  ;;  %827 = vbcast.lane.b32.xlu0 %v777_v47, 352 }
 0x18c   : > { %v9148_v5 = vpop.permute.xlu1 %598  ;;  %v9150_v13 = vpop.permute.xlu0 %594 }
 0x18d   : > { %13026 = vst [vmem:[#allocation109_spill] sm:$0xff] %v9148_v5  ;;  %13027 = vst [vmem:[#allocation110_spill] sm:$0xff] %v9150_v13 }
 0x18e   : > { %839 = vbcast.lane.b32.xlu1 %v777_v47, 376  ;;  %835 = vbcast.lane.b32.xlu0 %v777_v47, 368 }
 0x190   : > { %v9154_v63 = vpop.permute.xlu1 %606  ;;  %v9156_v46 = vpop.permute.xlu0 %602 }
 0x191   : > { %13028 = vst [vmem:[#allocation111_spill] sm:$0xff] %v9154_v63  ;;  %13029 = vst [vmem:[#allocation112_spill] sm:$0xff] %v9156_v46 }
 0x192   : > { %850 = vbcast.lane.b32.xlu1 %v844_v52, 264  ;;  %846 = vbcast.lane.b32.xlu0 %v844_v52, 256 }
 0x194   : > { %v9158_v28 = vpop.permute.xlu1 %614  ;;  %v9160_v29 = vpop.permute.xlu0 %610 }
 0x195   : > { %13030 = vst [vmem:[#allocation113_spill] sm:$0xff] %v9158_v28 }
 0x196   : > { %858 = vbcast.lane.b32.xlu1 %v844_v52, 280  ;;  %854 = vbcast.lane.b32.xlu0 %v844_v52, 272 }
 0x198   : > { %v9162_v16 = vpop.permute.xlu1 %622  ;;  %v9164_v0 = vpop.permute.xlu0 %618 }
 0x199   : > { %13031 = vst [vmem:[#allocation114_spill] sm:$0xff] %v9162_v16  ;;  %13032 = vst [vmem:[#allocation115_spill] sm:$0xff] %v9164_v0 }
 0x19a   : > { %866 = vbcast.lane.b32.xlu1 %v844_v52, 296  ;;  %862 = vbcast.lane.b32.xlu0 %v844_v52, 288 }
 0x19c   : > { %v9166_v47 = vpop.permute.xlu1 %630  ;;  %v9168_v15 = vpop.permute.xlu0 %626 }
 0x19d   : > { %13033 = vst [vmem:[#allocation116_spill] sm:$0xff] %v9166_v47  ;;  %13034 = vst [vmem:[#allocation117_spill] sm:$0xff] %v9168_v15 }
 0x19e   : > { %874 = vbcast.lane.b32.xlu1 %v844_v52, 312  ;;  %870 = vbcast.lane.b32.xlu0 %v844_v52, 304 }
 0x1a0   : > { %v9170_v63 = vpop.permute.xlu1 %638  ;;  %v9172_v46 = vpop.permute.xlu0 %634 }
 0x1a1   : > { %13035 = vst [vmem:[#allocation118_spill] sm:$0xff] %v9170_v63  ;;  %13036 = vst [vmem:[#allocation119_spill] sm:$0xff] %v9172_v46  ;;  %v911_v63 = vrot.slane %v9078_v1, %v8908_v17 }
 0x1a2   : > { %882 = vbcast.lane.b32.xlu1 %v844_v52, 328  ;;  %878 = vbcast.lane.b32.xlu0 %v844_v52, 320 }
 0x1a4   : > { %v9174_v28 = vpop.permute.xlu1 %649  ;;  %v9176_v2 = vpop.permute.xlu0 %645 }
 0x1a6   : > { %890 = vbcast.lane.b32.xlu1 %v844_v52, 344  ;;  %886 = vbcast.lane.b32.xlu0 %v844_v52, 336 }
 0x1a8   : > { %v9178_v16 = vpop.permute.xlu1 %657  ;;  %v9180_v0 = vpop.permute.xlu0 %653 }
 0x1a9   : > { %13037 = vst [vmem:[#allocation120_spill] sm:$0xff] %v9178_v16 }
 0x1aa   : > { %898 = vbcast.lane.b32.xlu1 %v844_v52, 360  ;;  %894 = vbcast.lane.b32.xlu0 %v844_v52, 352 }
 0x1ac   : > { %v9182_v47 = vpop.permute.xlu1 %665  ;;  %v9184_v15 = vpop.permute.xlu0 %661 }
 0x1ad   : > { %13038 = vst [vmem:[#allocation121_spill] sm:$0xff] %v9182_v47  ;;  %13039 = vst [vmem:[#allocation122_spill] sm:$0xff] %v9184_v15 }
 0x1ae   : > { %906 = vbcast.lane.b32.xlu1 %v844_v52, 376  ;;  %902 = vbcast.lane.b32.xlu0 %v844_v52, 368 }
 0x1b0   : > { %v9188_v46 = vpop.permute.xlu1 %673  ;;  %v9190_v42 = vpop.permute.xlu0 %669 }
 0x1b1   : > { %13040 = vst [vmem:[#allocation123_spill] sm:$0xff] %v9188_v46  ;;  %13041 = vst [vmem:[#allocation124_spill] sm:$0xff] %v9190_v42 }
 0x1b2   : > { %917 = vbcast.lane.b32.xlu1 %v911_v63, 264  ;;  %913 = vbcast.lane.b32.xlu0 %v911_v63, 256 }
 0x1b4   : > { %v9192_v24 = vpop.permute.xlu1 %681  ;;  %v9194_v5 = vpop.permute.xlu0 %677 }
 0x1b5   : > { %13042 = vst [vmem:[#allocation125_spill] sm:$0xff] %v9192_v24 }
 0x1b6   : > { %925 = vbcast.lane.b32.xlu1 %v911_v63, 280  ;;  %921 = vbcast.lane.b32.xlu0 %v911_v63, 272 }
 0x1b8   : > { %v9196_v36 = vpop.permute.xlu1 %689  ;;  %v9198_v26 = vpop.permute.xlu0 %685 }
 0x1b9   : > { %13043 = vst [vmem:[#allocation126_spill] sm:$0xff] %v9196_v36  ;;  %13044 = vst [vmem:[#allocation127_spill] sm:$0xff] %v9198_v26 }
 0x1ba   : > { %933 = vbcast.lane.b32.xlu1 %v911_v63, 296  ;;  %929 = vbcast.lane.b32.xlu0 %v911_v63, 288 }
 0x1bc   : > { %v9200_v52 = vpop.permute.xlu1 %697  ;;  %v9202_v17 = vpop.permute.xlu0 %693 }
 0x1bd   : > { %13045 = vst [vmem:[#allocation128_spill] sm:$0xff] %v9200_v52  ;;  %13046 = vst [vmem:[#allocation129_spill] sm:$0xff] %v9202_v17 }
 0x1be   : > { %941 = vbcast.lane.b32.xlu1 %v911_v63, 312  ;;  %937 = vbcast.lane.b32.xlu0 %v911_v63, 304 }
 0x1c0   : > { %v9204_v46 = vpop.permute.xlu1 %705  ;;  %v9206_v42 = vpop.permute.xlu0 %701 }
 0x1c1   : > { %13047 = vst [vmem:[#allocation130_spill] sm:$0xff] %v9204_v46  ;;  %13048 = vst [vmem:[#allocation131_spill] sm:$0xff] %v9206_v42  ;;  %v978_v46 = vrot.slane %v9078_v1, %v8921_v23 }
 0x1c2   : > { %949 = vbcast.lane.b32.xlu1 %v911_v63, 328  ;;  %945 = vbcast.lane.b32.xlu0 %v911_v63, 320 }
 0x1c4   : > { %v9208_v24 = vpop.permute.xlu1 %716  ;;  %v9210_v47 = vpop.permute.xlu0 %712 }
 0x1c6   : > { %957 = vbcast.lane.b32.xlu1 %v911_v63, 344  ;;  %953 = vbcast.lane.b32.xlu0 %v911_v63, 336 }
 0x1c8   : > { %v9212_v36 = vpop.permute.xlu1 %724  ;;  %v9214_v26 = vpop.permute.xlu0 %720 }
 0x1c9   : > { %13049 = vst [vmem:[#allocation132_spill] sm:$0xff] %v9212_v36  ;;  %13050 = vst [vmem:[#allocation133_spill] sm:$0xff] %v9214_v26 }
 0x1ca   : > { %965 = vbcast.lane.b32.xlu1 %v911_v63, 360  ;;  %961 = vbcast.lane.b32.xlu0 %v911_v63, 352 }
 0x1cc   : > { %v9216_v52 = vpop.permute.xlu1 %732  ;;  %v9218_v17 = vpop.permute.xlu0 %728 }
 0x1cd   : > { %13051 = vst [vmem:[#allocation134_spill] sm:$0xff] %v9216_v52  ;;  %13052 = vst [vmem:[#allocation135_spill] sm:$0xff] %v9218_v17 }
 0x1ce   : > { %973 = vbcast.lane.b32.xlu1 %v911_v63, 376  ;;  %969 = vbcast.lane.b32.xlu0 %v911_v63, 368 }
 0x1d0   : > { %v9222_v42 = vpop.permute.xlu1 %740  ;;  %v9224_v60 = vpop.permute.xlu0 %736 }
 0x1d1   : > { %13053 = vst [vmem:[#allocation136_spill] sm:$0xff] %v9222_v42  ;;  %13054 = vst [vmem:[#allocation137_spill] sm:$0xff] %v9224_v60 }
 0x1d2   : > { %984 = vbcast.lane.b32.xlu1 %v978_v46, 264  ;;  %980 = vbcast.lane.b32.xlu0 %v978_v46, 256 }
 0x1d4   : > { %v9226_v3 = vpop.permute.xlu1 %748  ;;  %v9228_v43 = vpop.permute.xlu0 %744 }
 0x1d5   : > { %13055 = vst [vmem:[#allocation138_spill] sm:$0xff] %v9226_v3 }
 0x1d6   : > { %992 = vbcast.lane.b32.xlu1 %v978_v46, 280  ;;  %988 = vbcast.lane.b32.xlu0 %v978_v46, 272 }
 0x1d8   : > { %v9230_v52 = vpop.permute.xlu1 %756  ;;  %v9232_v25 = vpop.permute.xlu0 %752 }
 0x1d9   : > { %13056 = vst [vmem:[#allocation139_spill] sm:$0xff] %v9230_v52  ;;  %13057 = vst [vmem:[#allocation140_spill] sm:$0xff] %v9232_v25 }
 0x1da   : > { %1000 = vbcast.lane.b32.xlu1 %v978_v46, 296  ;;  %996 = vbcast.lane.b32.xlu0 %v978_v46, 288 }
 0x1dc   : > { %v9234_v63 = vpop.permute.xlu1 %764  ;;  %v9236_v23 = vpop.permute.xlu0 %760 }
 0x1dd   : > { %13058 = vst [vmem:[#allocation141_spill] sm:$0xff] %v9234_v63  ;;  %13059 = vst [vmem:[#allocation142_spill] sm:$0xff] %v9236_v23 }
 0x1de   : > { %1008 = vbcast.lane.b32.xlu1 %v978_v46, 312  ;;  %1004 = vbcast.lane.b32.xlu0 %v978_v46, 304 }
 0x1e0   : > { %v9238_v42 = vpop.permute.xlu1 %772  ;;  %v9240_v60 = vpop.permute.xlu0 %768 }
 0x1e1   : > { %13060 = vst [vmem:[#allocation143_spill] sm:$0xff] %v9238_v42  ;;  %13061 = vst [vmem:[#allocation144_spill] sm:$0xff] %v9240_v60  ;;  %v1045_v42 = vrot.slane %v9078_v1, %v8958_v41 }
 0x1e2   : > { %1016 = vbcast.lane.b32.xlu1 %v978_v46, 328  ;;  %1012 = vbcast.lane.b32.xlu0 %v978_v46, 320 }
 0x1e4   : > { %v9242_v3 = vpop.permute.xlu1 %783  ;;  %v9244_v17 = vpop.permute.xlu0 %779 }
 0x1e6   : > { %1024 = vbcast.lane.b32.xlu1 %v978_v46, 344  ;;  %1020 = vbcast.lane.b32.xlu0 %v978_v46, 336 }
 0x1e8   : > { %v9246_v25 = vpop.permute.xlu1 %791  ;;  %v9248_v52 = vpop.permute.xlu0 %787 }
 0x1e9   : > { %13062 = vst [vmem:[#allocation145_spill] sm:$0xff] %v9246_v25  ;;  %13063 = vst [vmem:[#allocation146_spill] sm:$0xff] %v9248_v52 }
 0x1ea   : > { %1032 = vbcast.lane.b32.xlu1 %v978_v46, 360  ;;  %1028 = vbcast.lane.b32.xlu0 %v978_v46, 352 }
 0x1ec   : > { %v9250_v23 = vpop.permute.xlu1 %799  ;;  %v9252_v63 = vpop.permute.xlu0 %795 }
 0x1ed   : > { %13064 = vst [vmem:[#allocation147_spill] sm:$0xff] %v9250_v23  ;;  %13065 = vst [vmem:[#allocation148_spill] sm:$0xff] %v9252_v63 }
 0x1ee   : > { %1040 = vbcast.lane.b32.xlu1 %v978_v46, 376  ;;  %1036 = vbcast.lane.b32.xlu0 %v978_v46, 368 }
 0x1f0   : > { %v9256_v60 = vpop.permute.xlu1 %807  ;;  %v9258_v13 = vpop.permute.xlu0 %803 }
 0x1f1   : > { %13066 = vst [vmem:[#allocation149_spill] sm:$0xff] %v9256_v60  ;;  %13067 = vst [vmem:[#allocation150_spill] sm:$0xff] %v9258_v13 }
 0x1f2   : > { %1051 = vbcast.lane.b32.xlu1 %v1045_v42, 264  ;;  %1047 = vbcast.lane.b32.xlu0 %v1045_v42, 256 }
 0x1f4   : > { %v9260_v10 = vpop.permute.xlu1 %815  ;;  %v9262_v44 = vpop.permute.xlu0 %811 }
 0x1f5   : > { %13068 = vst [vmem:[#allocation151_spill] sm:$0xff] %v9260_v10 }
 0x1f6   : > { %1059 = vbcast.lane.b32.xlu1 %v1045_v42, 280  ;;  %1055 = vbcast.lane.b32.xlu0 %v1045_v42, 272 }
 0x1f8   : > { %v9264_v23 = vpop.permute.xlu1 %823  ;;  %v9266_v63 = vpop.permute.xlu0 %819 }
 0x1f9   : > { %13069 = vst [vmem:[#allocation152_spill] sm:$0xff] %v9264_v23  ;;  %13070 = vst [vmem:[#allocation153_spill] sm:$0xff] %v9266_v63 }
 0x1fa   : > { %1067 = vbcast.lane.b32.xlu1 %v1045_v42, 296  ;;  %1063 = vbcast.lane.b32.xlu0 %v1045_v42, 288 }
 0x1fc   : > { %v9268_v46 = vpop.permute.xlu1 %831  ;;  %v9270_v41 = vpop.permute.xlu0 %827 }
 0x1fd   : > { %13071 = vst [vmem:[#allocation154_spill] sm:$0xff] %v9268_v46  ;;  %13072 = vst [vmem:[#allocation155_spill] sm:$0xff] %v9270_v41 }
 0x1fe   : > { %1075 = vbcast.lane.b32.xlu1 %v1045_v42, 312  ;;  %1071 = vbcast.lane.b32.xlu0 %v1045_v42, 304 }
 0x200   : > { %v9272_v60 = vpop.permute.xlu1 %839  ;;  %v9274_v13 = vpop.permute.xlu0 %835 }
 0x201   : > { %13073 = vst [vmem:[#allocation156_spill] sm:$0xff] %v9272_v60  ;;  %13074 = vst [vmem:[#allocation157_spill] sm:$0xff] %v9274_v13  ;;  %v1112_v60 = vrot.slane %v9078_v1, %v8995_v59 }
 0x202   : > { %1083 = vbcast.lane.b32.xlu1 %v1045_v42, 328  ;;  %1079 = vbcast.lane.b32.xlu0 %v1045_v42, 320 }
 0x204   : > { %v9276_v10 = vpop.permute.xlu1 %850  ;;  %v9278_v15 = vpop.permute.xlu0 %846 }
 0x206   : > { %1091 = vbcast.lane.b32.xlu1 %v1045_v42, 344  ;;  %1087 = vbcast.lane.b32.xlu0 %v1045_v42, 336 }
 0x208   : > { %v9280_v23 = vpop.permute.xlu1 %858  ;;  %v9282_v63 = vpop.permute.xlu0 %854 }
 0x209   : > { %13075 = vst [vmem:[#allocation158_spill] sm:$0xff] %v9280_v23  ;;  %13076 = vst [vmem:[#allocation159_spill] sm:$0xff] %v9282_v63 }
 0x20a   : > { %1099 = vbcast.lane.b32.xlu1 %v1045_v42, 360  ;;  %1095 = vbcast.lane.b32.xlu0 %v1045_v42, 352 }
 0x20c   : > { %v9284_v46 = vpop.permute.xlu1 %866  ;;  %v9286_v41 = vpop.permute.xlu0 %862 }
 0x20d   : > { %13077 = vst [vmem:[#allocation160_spill] sm:$0xff] %v9284_v46  ;;  %13078 = vst [vmem:[#allocation161_spill] sm:$0xff] %v9286_v41 }
 0x20e   : > { %1107 = vbcast.lane.b32.xlu1 %v1045_v42, 376  ;;  %1103 = vbcast.lane.b32.xlu0 %v1045_v42, 368 }
 0x210   : > { %v9290_v13 = vpop.permute.xlu1 %874  ;;  %v9292_v61 = vpop.permute.xlu0 %870 }
 0x211   : > { %13079 = vst [vmem:[#allocation162_spill] sm:$0xff] %v9290_v13  ;;  %13080 = vst [vmem:[#allocation163_spill] sm:$0xff] %v9292_v61 }
 0x212   : > { %1118 = vbcast.lane.b32.xlu1 %v1112_v60, 264  ;;  %1114 = vbcast.lane.b32.xlu0 %v1112_v60, 256 }
 0x214   : > { %v9294_v33 = vpop.permute.xlu1 %882  ;;  %v9296_v39 = vpop.permute.xlu0 %878 }
 0x215   : > { %13081 = vst [vmem:[#allocation164_spill] sm:$0xff] %v9294_v33 }
 0x216   : > { %1126 = vbcast.lane.b32.xlu1 %v1112_v60, 280  ;;  %1122 = vbcast.lane.b32.xlu0 %v1112_v60, 272 }
 0x218   : > { %v9298_v46 = vpop.permute.xlu1 %890  ;;  %v9300_v41 = vpop.permute.xlu0 %886 }
 0x219   : > { %13082 = vst [vmem:[#allocation165_spill] sm:$0xff] %v9298_v46  ;;  %13083 = vst [vmem:[#allocation166_spill] sm:$0xff] %v9300_v41 }
 0x21a   : > { %1134 = vbcast.lane.b32.xlu1 %v1112_v60, 296  ;;  %1130 = vbcast.lane.b32.xlu0 %v1112_v60, 288 }
 0x21c   : > { %v9302_v59 = vpop.permute.xlu1 %898  ;;  %v9304_v42 = vpop.permute.xlu0 %894 }
 0x21d   : > { %13084 = vst [vmem:[#allocation167_spill] sm:$0xff] %v9302_v59  ;;  %13085 = vst [vmem:[#allocation168_spill] sm:$0xff] %v9304_v42 }
 0x21e   : > { %1142 = vbcast.lane.b32.xlu1 %v1112_v60, 312  ;;  %1138 = vbcast.lane.b32.xlu0 %v1112_v60, 304 }
 0x220   : > { %v9306_v13 = vpop.permute.xlu1 %906  ;;  %v9308_v61 = vpop.permute.xlu0 %902 }
 0x221   : > { %13086 = vst [vmem:[#allocation169_spill] sm:$0xff] %v9306_v13  ;;  %13087 = vst [vmem:[#allocation170_spill] sm:$0xff] %v9308_v61  ;;  %v1179_v13 = vrot.slane %v9078_v1, %v9032_v54 }
 0x222   : > { %1150 = vbcast.lane.b32.xlu1 %v1112_v60, 328  ;;  %1146 = vbcast.lane.b32.xlu0 %v1112_v60, 320 }
 0x224   : > { %v9310_v33 = vpop.permute.xlu1 %917  ;;  %v9312_v25 = vpop.permute.xlu0 %913 }
 0x226   : > { %1158 = vbcast.lane.b32.xlu1 %v1112_v60, 344  ;;  %1154 = vbcast.lane.b32.xlu0 %v1112_v60, 336 }
 0x228   : > { %v9314_v46 = vpop.permute.xlu1 %925  ;;  %v9316_v41 = vpop.permute.xlu0 %921 }
 0x229   : > { %13088 = vst [vmem:[#allocation171_spill] sm:$0xff] %v9314_v46 }
 0x22a   : > { %1166 = vbcast.lane.b32.xlu1 %v1112_v60, 360  ;;  %1162 = vbcast.lane.b32.xlu0 %v1112_v60, 352 }
 0x22c   : > { %v9318_v59 = vpop.permute.xlu1 %933  ;;  %v9320_v42 = vpop.permute.xlu0 %929 }
 0x22d   : > { %13089 = vst [vmem:[#allocation172_spill] sm:$0xff] %v9318_v59  ;;  %13090 = vst [vmem:[#allocation173_spill] sm:$0xff] %v9320_v42 }
 0x22e   : > { %1174 = vbcast.lane.b32.xlu1 %v1112_v60, 376  ;;  %1170 = vbcast.lane.b32.xlu0 %v1112_v60, 368 }
 0x230   : > { %v9324_v61 = vpop.permute.xlu1 %941  ;;  %v9326_v21 = vpop.permute.xlu0 %937 }
 0x231   : > { %13091 = vst [vmem:[#allocation174_spill] sm:$0xff] %v9324_v61  ;;  %13092 = vst [vmem:[#allocation175_spill] sm:$0xff] %v9326_v21 }
 0x232   : > { %1185 = vbcast.lane.b32.xlu1 %v1179_v13, 264  ;;  %1181 = vbcast.lane.b32.xlu0 %v1179_v13, 256 }
 0x234   : > { %v9328_v36 = vpop.permute.xlu1 %949  ;;  %v9330_v27 = vpop.permute.xlu0 %945 }
 0x235   : > { %13093 = vst [vmem:[#allocation176_spill] sm:$0xff] %v9328_v36 }
 0x236   : > { %1193 = vbcast.lane.b32.xlu1 %v1179_v13, 280  ;;  %1189 = vbcast.lane.b32.xlu0 %v1179_v13, 272 }
 0x238   : > { %v9332_v59 = vpop.permute.xlu1 %957  ;;  %v9334_v42 = vpop.permute.xlu0 %953 }
 0x239   : > { %13094 = vst [vmem:[#allocation177_spill] sm:$0xff] %v9332_v59  ;;  %13095 = vst [vmem:[#allocation178_spill] sm:$0xff] %v9334_v42 }
 0x23a   : > { %1201 = vbcast.lane.b32.xlu1 %v1179_v13, 296  ;;  %1197 = vbcast.lane.b32.xlu0 %v1179_v13, 288 }
 0x23c   : > { %v9336_v1 = vpop.permute.xlu1 %965  ;;  %v9338_v60 = vpop.permute.xlu0 %961 }
 0x23d   : > { %13096 = vst [vmem:[#allocation179_spill] sm:$0xff] %v9336_v1  ;;  %13097 = vst [vmem:[#allocation180_spill] sm:$0xff] %v9338_v60 }
 0x23e   : > { %1209 = vbcast.lane.b32.xlu1 %v1179_v13, 312  ;;  %1205 = vbcast.lane.b32.xlu0 %v1179_v13, 304 }
 0x240   : > { %v9340_v54 = vpop.permute.xlu1 %973  ;;  %v9342_v61 = vpop.permute.xlu0 %969 }
 0x241   : > { %13098 = vst [vmem:[#allocation181_spill] sm:$0xff] %v9340_v54  ;;  %13099 = vst [vmem:[#allocation182_spill] sm:$0xff] %v9342_v61 }
 0x242   : > { %1217 = vbcast.lane.b32.xlu1 %v1179_v13, 328  ;;  %1213 = vbcast.lane.b32.xlu0 %v1179_v13, 320 }
 0x244   : > { %v9344_v36 = vpop.permute.xlu1 %984  ;;  %v9346_v21 = vpop.permute.xlu0 %980 }
 0x246   : > { %1225 = vbcast.lane.b32.xlu1 %v1179_v13, 344  ;;  %1221 = vbcast.lane.b32.xlu0 %v1179_v13, 336 }
 0x248   : > { %v9348_v59 = vpop.permute.xlu1 %992  ;;  %v9350_v42 = vpop.permute.xlu0 %988 }
 0x249   : > { %13100 = vst [vmem:[#allocation183_spill] sm:$0xff] %v9348_v59  ;;  %13101 = vst [vmem:[#allocation184_spill] sm:$0xff] %v9350_v42 }
 0x24a   : > { %1233 = vbcast.lane.b32.xlu1 %v1179_v13, 360  ;;  %1229 = vbcast.lane.b32.xlu0 %v1179_v13, 352 }
 0x24c   : > { %v9352_v1 = vpop.permute.xlu1 %1000  ;;  %v9354_v60 = vpop.permute.xlu0 %996 }
 0x24d   : > { %13102 = vst [vmem:[#allocation185_spill] sm:$0xff] %v9352_v1  ;;  %13103 = vst [vmem:[#allocation186_spill] sm:$0xff] %v9354_v60 }
 0x24e   : > { %1241 = vbcast.lane.b32.xlu1 %v1179_v13, 376  ;;  %1237 = vbcast.lane.b32.xlu0 %v1179_v13, 368 }
 0x250   : > { %v9356_v54 = vpop.permute.xlu1 %1008  ;;  %v9358_v61 = vpop.permute.xlu0 %1004 }
 0x251   : > { %13104 = vst [vmem:[#allocation187_spill] sm:$0xff] %v9356_v54  ;;  %13105 = vst [vmem:[#allocation188_spill] sm:$0xff] %v9358_v61 }
 0x254   : > { %v9360_v11 = vpop.permute.xlu1 %1016  ;;  %v9362_v53 = vpop.permute.xlu0 %1012 }
 0x255   : > { %13106 = vst [vmem:[#allocation189_spill] sm:$0xff] %v9360_v11 }
 0x258   : > { %v9364_v46 = vpop.permute.xlu1 %1024  ;;  %v9366_v59 = vpop.permute.xlu0 %1020 }
 0x259   : > { %13107 = vst [vmem:[#allocation190_spill] sm:$0xff] %v9364_v46  ;;  %13108 = vst [vmem:[#allocation191_spill] sm:$0xff] %v9366_v59 }
 0x25c   : > { %v9368_v16 = vpop.permute.xlu1 %1032  ;;  %v9370_v57 = vpop.permute.xlu0 %1028 }
 0x25d   : > { %13109 = vst [vmem:[#allocation192_spill] sm:$0xff] %v9368_v16  ;;  %13110 = vst [vmem:[#allocation193_spill] sm:$0xff] %v9370_v57 }
 0x260   : > { %v9372_v1 = vpop.permute.xlu1 %1040  ;;  %v9374_v60 = vpop.permute.xlu0 %1036 }
 0x261   : > { %13111 = vst [vmem:[#allocation194_spill] sm:$0xff] %v9372_v1  ;;  %13112 = vst [vmem:[#allocation195_spill] sm:$0xff] %v9374_v60 }
 0x264   : > { %v9376_v13 = vpop.permute.xlu1 %1051  ;;  %v1048_v54 = vpop.permute.xlu0 %1047 }
 0x268   : > { %v9378_v61 = vpop.permute.xlu1 %1059  ;;  %v9380_v11 = vpop.permute.xlu0 %1055 }
 0x269   : > { %13113 = vst [vmem:[#allocation196_spill] sm:$0xff] %v9378_v61 }
 0x26c   : > { %v9382_v23 = vpop.permute.xlu1 %1067  ;;  %v9384_v46 = vpop.permute.xlu0 %1063 }
 0x26d   : > { %13114 = vst [vmem:[#allocation197_spill] sm:$0xff] %v9382_v23  ;;  %13115 = vst [vmem:[#allocation198_spill] sm:$0xff] %v9384_v46 }
 0x270   : > { %v9386_v59 = vpop.permute.xlu1 %1075  ;;  %v9388_v16 = vpop.permute.xlu0 %1071 }
 0x271   : > { %13116 = vst [vmem:[#allocation199_spill] sm:$0xff] %v9386_v59  ;;  %13117 = vst [vmem:[#allocation200_spill] sm:$0xff] %v9388_v16 }
 0x274   : > { %v9390_v57 = vpop.permute.xlu1 %1083  ;;  %v9392_v1 = vpop.permute.xlu0 %1079 }
 0x275   : > { %13118 = vst [vmem:[#allocation201_spill] sm:$0xff] %v9390_v57 }
 0x278   : > { %v9394_v60 = vpop.permute.xlu1 %1091  ;;  %v9396_v19 = vpop.permute.xlu0 %1087 }
 0x279   : > { %13119 = vst [vmem:[#allocation202_spill] sm:$0xff] %v9394_v60  ;;  %13120 = vst [vmem:[#allocation203_spill] sm:$0xff] %v9396_v19 }
 0x27c   : > { %v9398_v26 = vpop.permute.xlu1 %1099  ;;  %v9400_v61 = vpop.permute.xlu0 %1095 }
 0x27d   : > { %13121 = vst [vmem:[#allocation204_spill] sm:$0xff] %v9398_v26  ;;  %13122 = vst [vmem:[#allocation205_spill] sm:$0xff] %v9400_v61 }
 0x280   : > { %v9402_v12 = vpop.permute.xlu1 %1107  ;;  %v9404_v23 = vpop.permute.xlu0 %1103 }
 0x281   : > { %13123 = vst [vmem:[#allocation206_spill] sm:$0xff] %v9402_v12  ;;  %13124 = vst [vmem:[#allocation207_spill] sm:$0xff] %v9404_v23  ;;  %v8672_v23 = vmov 1983009808  }
 0x282   : > { %v1375_v58 = vunpack.c.l.s4 %v8672_v23 }
 0x284   : > { %v9406_v46 = vpop.permute.xlu1 %1118  ;;  %v1115_v59 = vpop.permute.xlu0 %1114 }
 0x288   : > { %v9408_v16 = vpop.permute.xlu1 %1126  ;;  %v9410_v57 = vpop.permute.xlu0 %1122 }
 0x289   : > { %13125 = vst [vmem:[#allocation208_spill] sm:$0xff] %v9408_v16 }
 0x28c   : > { %v9412_v42 = vpop.permute.xlu0 %1130  ;;  %v9414_v60 = vpop.permute.xlu1 %1134 }
 0x28d   : > { %13126 = vst [vmem:[#allocation209_spill] sm:$0xff] %v9412_v42  ;;  %13127 = vst [vmem:[#allocation210_spill] sm:$0xff] %v9414_v60  ;;  %v1292_v42 = vsel %vm12890_vm0, %v9025_v8, %v9312_v25  ;;  %v1376_v60 = vunpack.c.0.s8 %v1375_v58  ;;  %v1244_v8 = vsel %vm12890_vm0, %v8914_v20, %v9210_v47  ;;  %v1340_v25 = vsel %vm12890_vm0, %v9142_v50, %v1115_v59 }
 0x290   : > { %v9416_v19 = vpop.permute.xlu0 %1138  ;;  %v9418_v26 = vpop.permute.xlu1 %1142 }
 0x291   : > { %13128 = vst [vmem:[#allocation211_spill] sm:$0xff] %v9416_v19  ;;  %13129 = vst [vmem:[#allocation212_spill] sm:$0xff] %v9418_v26  ;;  %v1260_v26 = vsel %vm12890_vm0, %v8951_v38, %v9244_v17  ;;  %v8673_v19 = vmov 1934713408   ;;  %v9447_v17 = vsub.s32 %v1376_v60, %v8876_v4 }
 0x292   : > { %v1439_v23 = vunpack.c.l.s4 %v8673_v19  ;;  %v1388_v40 = vcombine.low %v1260_v26, %v1292_v42 }
 0x294   : > { %v9420_v61 = vpop.permute.xlu0 %1146  ;;  %v9424_v63 = vpop.permute.xlu1 %1150  ;;  %v1440_v19 = vunpack.c.0.s8 %v1439_v23 }
 0x295   : > { %13131 = vst [vmem:[#allocation214_spill] sm:$0xff] %v9424_v63 }
 0x296   : > { %v9461_v60 = vsub.s32 %v1440_v19, %v8876_v4 }
 0x298   : > { %v9422_v12 = vpop.permute.xlu0 %1154  ;;  %v9437_v63 = vpop.permute.xlu1 %1158 }
 0x299   : > { %13130 = vst [vmem:[#allocation213_spill] sm:$0xff] %v9422_v12  ;;  %v1276_v12 = vsel %vm12890_vm0, %v8988_v56, %v9278_v15  ;;  %13133 = vst [vmem:[#allocation216_spill] sm:$0xff] %v9437_v63  ;;  %v1308_v15 = vsel %vm12890_vm0, %v9066_v14, %v9346_v21  ;;  %v1396_v56 = vrot.slane %v1388_v40, %v9447_v17 }
 0x29a   : > { %v1372_v38 = vcombine.low %v1244_v8, %v1276_v12  ;;  %v1404_v58 = vcombine.low %v1308_v15, %v1340_v25  ;;  %v1405_v4 = vcombine.high %v1308_v15, %v1340_v25 }
 0x29c   : > { %v9426_v16 = vpop.permute.xlu0 %1162  ;;  %v1380_v59 = vrot.slane %v1372_v38, %v9447_v17  ;;  %v9458_v50 = vpop.permute.xlu1 %1166  ;;  %v1412_v14 = vrot.slane %v1404_v58, %v9447_v17  ;;  %v1389_v38 = vcombine.high %v1260_v26, %v1292_v42 }
 0x29d   : > { %13132 = vst [vmem:[#allocation215_spill] sm:$0xff] %v9426_v16  ;;  %v1324_v16 = vsel %vm12890_vm0, %v9108_v6, %v1048_v54  ;;  %13135 = vst [vmem:[#allocation218_spill] sm:$0xff] %v9458_v50  ;;  %v1373_v50 = vcombine.high %v1244_v8, %v1276_v12  ;;  %v9492_v8 = vsel %vm12890_vm0, %v9023_v9, %v9310_v33 }
 0x29e   : > { %v1436_v21 = vcombine.low %v1380_v59, %v1396_v56  ;;  %v9509_v9 = vsel %vm12890_vm0, %v8949_v37, %v9242_v3  ;;  %v9514_v33 = vsel %vm12890_vm0, %v8986_v55, %v9276_v10  ;;  %v9527_v37 = vsel %vm12890_vm0, %v9064_v49, %v9344_v36 }
 0x29f   : > { %v1387_v26 = vrot.slane %v1373_v50, %v9447_v17  ;;  %v9499_v50 = vsel %vm12890_vm0, %v9106_v32, %v9376_v13  ;;  %v9533_v10 = vsel %vm12890_vm0, %v8918_v22, %v9208_v24  ;;  %v9543_v49 = vsel %vm12890_vm0, %v9046_v18, %v9330_v27 }
 0x2a0   : > { %v9439_v52 = vpop.permute.xlu0 %1170  ;;  %v9466_v63 = vrot.slane %v1436_v21, %v9461_v60  ;;  %v9468_v54 = vpop.permute.xlu1 %1174  ;;  %v1403_v21 = vrot.slane %v1389_v38, %v9447_v17  ;;  %v1508_v13 = vcombine.low %v9533_v10, %v9514_v33  ;;  %v9551_v22 = vsel %vm12890_vm0, %v8972_v48, %v9262_v44 }
 0x2a1   : > { %13134 = vst [vmem:[#allocation217_spill] sm:$0xff] %v9439_v52  ;;  %13136 = vst [vmem:[#allocation219_spill] sm:$0xff] %v9468_v54  ;;  %v1419_v54 = vrot.slane %v1405_v4, %v9447_v17  ;;  %v9556_v24 = vsel %vm12890_vm0, %v9009_v7, %v9296_v39  ;;  %v2476_v18 = vcombine.low %v9551_v22, %v9543_v49 }
 0x2a2   : > { %v1452_v15 = vcombine.low %v1387_v26, %v1403_v21  ;;  %v1453_v27 = vcombine.high %v1387_v26, %v1403_v21  ;;  %v9568_v48 = vsel %vm12890_vm0, %v8935_v30, %v9228_v43  ;;  %v1516_v39 = vrot.slane %v1508_v13, %v9447_v17 }
 0x2a3   : > { %v9574_v7 = vsel %vm12890_vm0, %v9160_v29, %v9420_v61  ;;  %v2460_v44 = vcombine.low %v9568_v48, %v9556_v24  ;;  %v9584_v30 = vsel %vm12890_vm0, %v9092_v31, %v9362_v53  ;;  %v9592_v61 = vrot.slane %v2476_v18, %v9447_v17  ;;  %v13139_v18 = vld [vmem:[#allocation40_spill] sm:$0xff] }
 0x2a4   : > { %v1182_v52 = vpop.permute.xlu0 %1181  ;;  %v1460_v55 = vrot.slane %v1452_v15, %v9461_v60  ;;  %v1467_v29 = vrot.slane %v1453_v27, %v9461_v60  ;;  %v9599_v26 = vsel %vm12890_vm0, %v9126_v45, %v9392_v1 }
 0x2a5   : > { %v1356_v20 = vsel %vm12890_vm0, %v9176_v2, %v1182_v52  ;;  %v9603_v31 = vrot.slane %v2460_v44, %v9447_v17  ;;  %v13140_v44 = vld [vmem:[#allocation159_spill] sm:$0xff] }
 0x2a6   : > { %v1420_v47 = vcombine.low %v1324_v16, %v1356_v20  ;;  %v1421_v6 = vcombine.high %v1324_v16, %v1356_v20  ;;  %v1186_v16 = vpop.permute.xlu1 %1185 }
 0x2a7   : > { %v9487_v12 = vsel %vm12890_vm0, %v9174_v28, %v1186_v16  ;;  %v9504_v28 = vsel %vm12890_vm0, %v9140_v34, %v9406_v46  ;;  %v1524_v46 = vcombine.low %v9509_v9, %v9492_v8  ;;  %v2492_v16 = vcombine.low %v9584_v30, %v9574_v7 }
 0x2a8   : > { %v1428_v40 = vrot.slane %v1420_v47, %v9447_v17  ;;  %v9473_v52 = vpop.permute.xlu0 %1189  ;;  %v1437_v47 = vcombine.high %v1380_v59, %v1396_v56  ;;  %v1435_v51 = vrot.slane %v1421_v6, %v9447_v17  ;;  %v1540_v3 = vcombine.low %v9527_v37, %v9504_v28 }
 0x2a9   : > { %v9559_v38 = vrot.slane %v1524_v46, %v9447_v17  ;;  %v9612_v45 = vrot.slane %v2492_v16, %v9447_v17  ;;  %v1557_v1 = vcombine.high %v9499_v50, %v9487_v12 }
 0x2aa   : > { %v1468_v23 = vcombine.low %v1412_v14, %v1428_v40  ;;  %v1469_v19 = vcombine.high %v1412_v14, %v1428_v40  ;;  %v1451_v42 = vrot.slane %v1437_v47, %v9461_v60  ;;  %v1484_v25 = vcombine.low %v1419_v54, %v1435_v51 }
 0x2ab   : > { %v1556_v14 = vcombine.low %v9499_v50, %v9487_v12  ;;  %v1485_v40 = vcombine.high %v1419_v54, %v1435_v51  ;;  %v1548_v51 = vrot.slane %v1540_v3, %v9447_v17  ;;  %v1572_v47 = vcombine.low %v1516_v39, %v9559_v38 }
 0x2ac   : > { %v9471_v2 = vrot.slane %v1468_v23, %v9461_v60  ;;  %v1483_v20 = vrot.slane %v1469_v19, %v9461_v60  ;;  %v9481_v23 = vpop.permute.xlu0 %1197  ;;  %v1492_v32 = vrot.slane %v1484_v25, %v9461_v60  ;;  %v2524_v25 = vcombine.low %v9603_v31, %v9592_v61 }
 0x2ad   : > { %v9546_v36 = vrot.slane %v1556_v14, %v9447_v17  ;;  %v1499_v19 = vrot.slane %v1485_v40, %v9461_v60  ;;  %v1541_v14 = vcombine.high %v9527_v37, %v9504_v28  ;;  %v1509_v12 = vcombine.high %v9533_v10, %v9514_v33 }
 0x2ae   : > { %v1500_v58 = vcombine.low %v9466_v63, %v9471_v2  ;;  %v1502_v56 = vcombine.low %v1451_v42, %v1483_v20  ;;  %v1501_v59 = vcombine.high %v9466_v63, %v9471_v2  ;;  %v1504_v6 = vcombine.low %v1460_v55, %v1492_v32  ;;  %v13228_v2 = vld [vmem:[#allocation189_spill] sm:$0xff] }
 0x2af   : > { %v1604_v4 = vcombine.low %v1548_v51, %v9546_v36  ;;  %v1503_v43 = vcombine.high %v1451_v42, %v1483_v20  ;;  %v1506_v20 = vcombine.low %v1467_v29, %v1499_v19  ;;  %v1580_v42 = vrot.slane %v1572_v47, %v9461_v60  ;;  %v13143_v47 = vld [vmem:[#allocation83_spill] sm:$0xff] }
 0x2b0   : > { %3553 = vrot.lane.b32.xlu1 %v1502_v56, %s12850_s18  ;;  %v9520_v34 = vpop.permute.xlu0 %1205  ;;  %3549 = vrot.lane.b32.xlu0 %v1501_v59, %s12803_s27  ;;  %v1525_v56 = vcombine.high %v9509_v9, %v9492_v8  ;;  %v1505_v59 = vcombine.high %v1460_v55, %v1492_v32  ;;  %v9630_v50 = vrot.slane %v2524_v25, %v9461_v60 }
 0x2b1   : > { %v1612_v53 = vrot.slane %v1604_v4, %v9461_v60  ;;  %v1571_v13 = vrot.slane %v1557_v1, %v9447_v17  ;;  %v1605_v8 = vcombine.high %v1548_v51, %v9546_v36  ;;  %v1573_v33 = vcombine.high %v1516_v39, %v9559_v38  ;;  %v13141_v4 = vld [vmem:[#allocation54_spill] sm:$0xff] }
 0x2b2   : > { %v1539_v28 = vrot.slane %v1525_v56, %v9447_v17  ;;  %v1555_v32 = vrot.slane %v1541_v14, %v9447_v17  ;;  %v1358_v37 = vsel %vm12890_vm0, %v9180_v0, %v9473_v52  ;;  %v1523_v55 = vrot.slane %v1509_v12, %v9447_v17  ;;  %v13138_v52 = vld [vmem:[#allocation146_spill] sm:$0xff] }
 0x2b3   : > { %v1636_v3 = vcombine.low %v1580_v42, %v1612_v53  ;;  %v1294_v36 = vsel %vm12890_vm0, %v9029_v35, %v9316_v41  ;;  %v1326_v40 = vsel %vm12890_vm0, %v9112_v62, %v9380_v11  ;;  %v1619_v27 = vrot.slane %v1605_v8, %v9461_v60  ;;  %v13142_v11 = vld [vmem:[#allocation184_spill] sm:$0xff] }
 0x2b4   : > { %3561 = vrot.lane.b32.xlu1 %v1504_v6, %s12847_s29  ;;  %v1214_v54 = vpop.permute.xlu0 %1213  ;;  %3557 = vrot.lane.b32.xlu0 %v1503_v43, %s12844_s30  ;;  %v13137_v6 = vld [vmem:[#allocation108_spill] sm:$0xff]  ;;  %v1620_v0 = vcombine.low %v1555_v32, %v1571_v13  ;;  %v1262_v51 = vsel %vm12890_vm0, %v13139_v18, %v13138_v52  ;;  %v1507_v39 = vcombine.high %v1467_v29, %v1499_v19  ;;  %v1194_v18 = vpop.permute.xlu1 %1193 }
 0x2b5   : > { %v9588_v21 = vsel %vm12890_vm0, %v9194_v5, %v1214_v54  ;;  %v1342_v38 = vsel %vm12890_vm0, %v13137_v6, %v9410_v57  ;;  %v1692_v54 = vcombine.low %v1326_v40, %v1358_v37  ;;  %v1278_v35 = vsel %vm12890_vm0, %v13141_v4, %v13140_v44 }
 0x2b6   : > { %v2508_v5 = vcombine.low %v9599_v26, %v9588_v21  ;;  %v1587_v41 = vrot.slane %v1573_v33, %v9461_v60  ;;  %v1588_v62 = vcombine.low %v1523_v55, %v1539_v28  ;;  %v1310_v57 = vsel %vm12890_vm0, %v13143_v47, %v13142_v11  ;;  %v13146_v11 = vld [vmem:[#allocation158_spill] sm:$0xff]  ;;  %v13148_v47 = vld [vmem:[#allocation120_spill] sm:$0xff] }
 0x2b7   : > { %v1660_v43 = vcombine.low %v1262_v51, %v1294_v36  ;;  %v1676_v16 = vcombine.low %v1310_v57, %v1342_v38  ;;  %v1628_v29 = vrot.slane %v1620_v0, %v9461_v60  ;;  %v1621_v56 = vcombine.high %v1555_v32, %v1571_v13 }
 0x2b8   : > { %v9617_v15 = vrot.slane %v2508_v5, %v9447_v17  ;;  %3569 = vrot.lane.b32.xlu1 %v1506_v20, %s12841_s2  ;;  %3565 = vrot.lane.b32.xlu0 %v1505_v59, %s12838_s5  ;;  %v13144_v5 = vld [vmem:[#allocation133_spill] sm:$0xff]  ;;  %v1638_v25 = vcombine.low %v1587_v41, %v1619_v27  ;;  %v1700_v59 = vrot.slane %v1692_v54, %v9447_v17 }
 0x2b9   : > { %v13145_v20 = vld [vmem:[#allocation25_spill] sm:$0xff]  ;;  %v1637_v14 = vcombine.high %v1580_v42, %v1612_v53  ;;  %v1668_v12 = vrot.slane %v1660_v43, %v9447_v17  ;;  %v1684_v8 = vrot.slane %v1676_v16, %v9447_v17  ;;  %v1635_v13 = vrot.slane %v1621_v56, %v9461_v60  ;;  %v13150_v43 = vld [vmem:[#allocation67_spill] sm:$0xff] }
 0x2ba   : > { %v2556_v46 = vcombine.low %v9612_v45, %v9617_v15  ;;  %v1246_v19 = vsel %vm12890_vm0, %v13145_v20, %v13144_v5  ;;  %v1693_v32 = vcombine.high %v1326_v40, %v1358_v37  ;;  %v1677_v52 = vcombine.high %v1310_v57, %v1342_v38  ;;  %v13147_v37 = vld [vmem:[#allocation53_spill] sm:$0xff]  ;;  %v13149_v57 = vld [vmem:[#allocation171_spill] sm:$0xff]  ;;  %v13151_v5 = vld [vmem:[#allocation196_spill] sm:$0xff] }
 0x2bb   : > { %v1644_v1 = vcombine.low %v1246_v19, %v1278_v35  ;;  %v1740_v53 = vcombine.low %v1684_v8, %v1700_v59  ;;  %v1645_v42 = vcombine.high %v1246_v19, %v1278_v35  ;;  %v1639_v54 = vcombine.high %v1587_v41, %v1619_v27  ;;  %v13152_v20 = vld [vmem:[#allocation95_spill] sm:$0xff] }
 0x2bc   : > { %v9635_v9 = vrot.slane %v2556_v46, %v9461_v60  ;;  %3577 = vrot.lane.b32.xlu1 %v1636_v3, %s12835_s12  ;;  %3573 = vrot.lane.b32.xlu0 %v1507_v39, %s12832_s13  ;;  %v1596_v46 = vrot.slane %v1588_v62, %v9461_v60  ;;  %v1589_v3 = vcombine.high %v1523_v55, %v1539_v28 }
 0x2bd   : > { %v1652_v6 = vrot.slane %v1644_v1, %v9447_v17  ;;  %v1661_v55 = vcombine.high %v1262_v51, %v1294_v36  ;;  %v1707_v39 = vrot.slane %v1693_v32, %v9447_v17  ;;  %v1741_v44 = vcombine.high %v1684_v8, %v1700_v59  ;;  %v13154_v1 = vld [vmem:[#allocation107_spill] sm:$0xff] }
 0x2be   : > { %v2588_v10 = vcombine.low %v9630_v50, %v9635_v9  ;;  %v1640_v33 = vcombine.low %v1596_v46, %v1628_v29  ;;  %v1603_v28 = vrot.slane %v1589_v3, %v9461_v60  ;;  %v1748_v4 = vrot.slane %v1740_v53, %v9461_v60  ;;  %v13157_v53 = vld [vmem:[#allocation145_spill] sm:$0xff] }
 0x2bf   : > { %v1708_v0 = vcombine.low %v1652_v6, %v1668_v12  ;;  %v9687_v40 = vsel %vm12890_vm0, %v13147_v37, %v13146_v11  ;;  %v1659_v35 = vrot.slane %v1645_v42, %v9447_v17  ;;  %v1359_v36 = vsel %vm12890_vm0, %v13148_v47, %v1194_v18  ;;  %v13158_v42 = vld [vmem:[#allocation39_spill] sm:$0xff] }
 0x2c0   : > { %3585 = vrot.lane.b32.xlu1 %v1638_v25, %s12829_s15  ;;  %3581 = vrot.lane.b32.xlu0 %v1637_v14, %s12826_s16  ;;  %v1642_v62 = vcombine.low %v1603_v28, %v1635_v13  ;;  %v1675_v38 = vrot.slane %v1661_v55, %v9447_v17  ;;  %v1709_v27 = vcombine.high %v1652_v6, %v1668_v12  ;;  %v13153_v25 = vld [vmem:[#allocation208_spill] sm:$0xff]  ;;  %v13156_v6 = vld [vmem:[#allocation26_spill] sm:$0xff] }
 0x2c1   : > { %v1716_v51 = vrot.slane %v1708_v0, %v9461_v60  ;;  %v1691_v41 = vrot.slane %v1677_v52, %v9447_v17  ;;  %v1295_v16 = vsel %vm12890_vm0, %v13150_v43, %v13149_v57  ;;  %v1327_v19 = vsel %vm12890_vm0, %v13152_v20, %v13151_v5  ;;  %v13159_v0 = vld [vmem:[#allocation183_spill] sm:$0xff]  ;;  %v13160_v52 = vld [vmem:[#allocation82_spill] sm:$0xff] }
 0x2c2   : > { %v1343_v56 = vsel %vm12890_vm0, %v13154_v1, %v13153_v25  ;;  %v1641_v59 = vcombine.high %v1596_v46, %v1628_v29  ;;  %v1828_v14 = vcombine.low %v1327_v19, %v1359_v36  ;;  %v1755_v3 = vrot.slane %v1741_v44, %v9461_v60 }
 0x2c3   : > { %v1756_v12 = vcombine.low %v1691_v41, %v1707_v39  ;;  %v1772_v8 = vcombine.low %v1716_v51, %v1748_v4  ;;  %v1263_v55 = vsel %vm12890_vm0, %v13158_v42, %v13157_v53  ;;  %v1311_v18 = vsel %vm12890_vm0, %v13160_v52, %v13159_v0  ;;  %v13163_v53 = vld [vmem:[#allocation122_spill] sm:$0xff]  ;;  %v13164_v52 = vld [vmem:[#allocation173_spill] sm:$0xff] }
 0x2c4   : > { %3593 = vrot.lane.b32.xlu1 %v1640_v33, %s12823_s17  ;;  %3589 = vrot.lane.b32.xlu0 %v1639_v54, %s12820_s22  ;;  %v13155_v33 = vld [vmem:[#allocation132_spill] sm:$0xff]  ;;  %v1796_v29 = vcombine.low %v1263_v55, %v1295_v16  ;;  %v1723_v46 = vrot.slane %v1709_v27, %v9461_v60  ;;  %v1724_v54 = vcombine.low %v1659_v35, %v1675_v38 }
 0x2c5   : > { %v1247_v32 = vsel %vm12890_vm0, %v13156_v6, %v13155_v33  ;;  %v1812_v44 = vcombine.low %v1311_v18, %v1343_v56  ;;  %v1643_v11 = vcombine.high %v1603_v28, %v1635_v13  ;;  %v1836_v37 = vrot.slane %v1828_v14, %v9447_v17  ;;  %v13161_v6 = vld [vmem:[#allocation161_spill] sm:$0xff] }
 0x2c6   : > { %v1757_v47 = vcombine.high %v1691_v41, %v1707_v39  ;;  %v1764_v57 = vrot.slane %v1756_v12, %v9461_v60  ;;  %v1774_v43 = vcombine.low %v1723_v46, %v1755_v3  ;;  %v1804_v5 = vrot.slane %v1796_v29, %v9447_v17 }
 0x2c7   : > { %v1725_v27 = vcombine.high %v1659_v35, %v1675_v38  ;;  %v1732_v20 = vrot.slane %v1724_v54, %v9461_v60  ;;  %v1820_v25 = vrot.slane %v1812_v44, %v9447_v17  ;;  %v1773_v28 = vcombine.high %v1716_v51, %v1748_v4  ;;  %v13167_v54 = vld [vmem:[#allocation97_spill] sm:$0xff] }
 0x2c8   : > { %3601 = vrot.lane.b32.xlu1 %v1642_v62, %s12817_s23  ;;  %3597 = vrot.lane.b32.xlu0 %v1641_v59, %s12814_s24  ;;  %v1780_v62 = vcombine.low %v1247_v32, %v9687_v40  ;;  %v1829_v39 = vcombine.high %v1327_v19, %v1359_v36  ;;  %v1771_v1 = vrot.slane %v1757_v47, %v9461_v60  ;;  %v13168_v44 = vld [vmem:[#allocation209_spill] sm:$0xff] }
 0x2c9   : > { %v1876_v41 = vcombine.low %v1820_v25, %v1836_v37  ;;  %v1776_v59 = vcombine.low %v1732_v20, %v1764_v57  ;;  %v1781_v14 = vcombine.high %v1247_v32, %v9687_v40  ;;  %v1797_v35 = vcombine.high %v1263_v55, %v1295_v16  ;;  %v13162_v32 = vld [vmem:[#allocation57_spill] sm:$0xff] }
 0x2ca   : > { %v1788_v13 = vrot.slane %v1780_v62, %v9447_v17  ;;  %v1739_v12 = vrot.slane %v1725_v27, %v9461_v60  ;;  %v1775_v33 = vcombine.high %v1723_v46, %v1755_v3  ;;  %v1843_v4 = vrot.slane %v1829_v39, %v9447_v17  ;;  %v13166_v46 = vld [vmem:[#allocation198_spill] sm:$0xff]  ;;  %v13172_v39 = vld [vmem:[#allocation148_spill] sm:$0xff] }
 0x2cb   : > { %v1877_v36 = vcombine.high %v1820_v25, %v1836_v37  ;;  %v1884_v51 = vrot.slane %v1876_v41, %v9461_v60  ;;  %v1795_v40 = vrot.slane %v1781_v14, %v9447_v17  ;;  %v9739_v16 = vsel %vm12890_vm0, %v13162_v32, %v13161_v6  ;;  %v13169_v62 = vld [vmem:[#allocation110_spill] sm:$0xff]  ;;  %v13170_v25 = vld [vmem:[#allocation135_spill] sm:$0xff] }
 0x2cc   : > { %3609 = vrot.lane.b32.xlu1 %v1772_v8, %s12715_s25  ;;  %3605 = vrot.lane.b32.xlu0 %v1643_v11, %s12811_s3  ;;  %v1844_v38 = vcombine.low %v1788_v13, %v1804_v5  ;;  %v1813_v8 = vcombine.high %v1311_v18, %v1343_v56  ;;  %s12719_s25 = smov 40   ;;  %v1778_v19 = vcombine.low %v1739_v12, %v1771_v1  ;;  %v13165_v18 = vld [vmem:[#allocation70_spill] sm:$0xff]  ;;  %v13173_v41 = vld [vmem:[#allocation43_spill] sm:$0xff] }
 0x2cd   : > { %v1360_v56 = vsel %vm12890_vm0, %v13163_v53, %v9481_v23  ;;  %v1811_v3 = vrot.slane %v1797_v35, %v9447_v17  ;;  %v1845_v42 = vcombine.high %v1788_v13, %v1804_v5  ;;  %v1296_v29 = vsel %vm12890_vm0, %v13165_v18, %v13164_v52  ;;  %v13171_v13 = vld [vmem:[#allocation29_spill] sm:$0xff]  ;;  %v13174_v14 = vld [vmem:[#allocation186_spill] sm:$0xff] }
 0x2ce   : > { %v1852_v55 = vrot.slane %v1844_v38, %v9461_v60  ;;  %v1827_v0 = vrot.slane %v1813_v8, %v9447_v17  ;;  %v1328_v23 = vsel %vm12890_vm0, %v13167_v54, %v13166_v46  ;;  %v1344_v11 = vsel %vm12890_vm0, %v13169_v62, %v13168_v44  ;;  %v13175_v35 = vld [vmem:[#allocation85_spill] sm:$0xff] }
 0x2cf   : > { %v1777_v37 = vcombine.high %v1732_v20, %v1764_v57  ;;  %v1891_v47 = vrot.slane %v1877_v36, %v9461_v60  ;;  %v1964_v5 = vcombine.low %v1328_v23, %v1360_v56  ;;  %v1312_v38 = vsel %vm12890_vm0, %v13175_v35, %v13174_v14  ;;  %v13179_v35 = vld [vmem:[#allocation172_spill] sm:$0xff] }
 0x2d0   : > { %3617 = vrot.lane.b32.xlu1 %v1774_v43, %s12717_s4  ;;  %3613 = vrot.lane.b32.xlu0 %v1773_v28, %s12725_s28  ;;  %s12723_s4 = smov 38   ;;  %v1892_v43 = vcombine.low %v1827_v0, %v1843_v4  ;;  %v1908_v27 = vcombine.low %v1852_v55, %v1884_v51  ;;  %v1248_v28 = vsel %vm12890_vm0, %v13171_v13, %v13170_v25  ;;  %s12729_s28 = smov 46   ;;  %v13177_v13 = vld [vmem:[#allocation56_spill] sm:$0xff] }
 0x2d1   : > { %v1859_v57 = vrot.slane %v1845_v42, %v9461_v60  ;;  %v1860_v20 = vcombine.low %v1795_v40, %v1811_v3  ;;  %v1916_v36 = vcombine.low %v1248_v28, %v9739_v16  ;;  %v1893_v6 = vcombine.high %v1827_v0, %v1843_v4 }
 0x2d2   : > { %v1900_v32 = vrot.slane %v1892_v43, %v9461_v60  ;;  %v1972_v53 = vrot.slane %v1964_v5, %v9447_v17  ;;  %v1861_v18 = vcombine.high %v1795_v40, %v1811_v3  ;;  %v1965_v0 = vcombine.high %v1328_v23, %v1360_v56 }
 0x2d3   : > { %v1910_v52 = vcombine.low %v1859_v57, %v1891_v47  ;;  %v1868_v42 = vrot.slane %v1860_v20, %v9461_v60  ;;  %v1907_v4 = vrot.slane %v1893_v6, %v9461_v60  ;;  %v1949_v5 = vcombine.high %v1312_v38, %v1344_v11  ;;  %v13181_v20 = vld [vmem:[#allocation197_spill] sm:$0xff] }
 0x2d4   : > { %3625 = vrot.lane.b32.xlu1 %v1776_v59, %s12719_s25  ;;  %3621 = vrot.lane.b32.xlu0 %v1775_v33, %s12723_s4  ;;  %s12721_s25 = smov 44   ;;  %v1264_v59 = vsel %vm12890_vm0, %v13173_v41, %v13172_v39  ;;  %v1948_v33 = vcombine.low %v1312_v38, %v1344_v11  ;;  %s12727_s4 = smov 48   ;;  %v1875_v40 = vrot.slane %v1861_v18, %v9461_v60  ;;  %v13178_v39 = vld [vmem:[#allocation121_spill] sm:$0xff] }
 0x2d5   : > { %v1932_v8 = vcombine.low %v1264_v59, %v1296_v29  ;;  %v1912_v62 = vcombine.low %v1868_v42, %v1900_v32  ;;  %v1933_v3 = vcombine.high %v1264_v59, %v1296_v29  ;;  %v1963_v14 = vrot.slane %v1949_v5, %v9447_v17  ;;  %v13180_v38 = vld [vmem:[#allocation69_spill] sm:$0xff] }
 0x2d6   : > { %v1956_v54 = vrot.slane %v1948_v33, %v9447_v17  ;;  %v1914_v25 = vcombine.low %v1875_v40, %v1907_v4  ;;  %v2525_v63 = vcombine.high %v9603_v31, %v9592_v61 }
 0x2d7   : > { %v1940_v46 = vrot.slane %v1932_v8, %v9447_v17  ;;  %v13182_v8 = vld [vmem:[#allocation96_spill] sm:$0xff] }
 0x2d8   : > { %3633 = vrot.lane.b32.xlu1 %v1778_v19, %s12721_s25  ;;  %s12741_s25 = smov 42   ;;  %v1779_v19 = vcombine.high %v1739_v12, %v1771_v1  ;;  %v1924_v1 = vrot.slane %v1916_v36, %v9447_v17  ;;  %v1909_v12 = vcombine.high %v1852_v55, %v1884_v51  ;;  %v2012_v44 = vcombine.low %v1956_v54, %v1972_v53  ;;  %v13183_v36 = vld [vmem:[#allocation210_spill] sm:$0xff] }
 0x2d9   : > { %3629 = vrot.lane.b32.xlu0 %v1777_v37, %s12741_s25  ;;  %v1917_v37 = vcombine.high %v1248_v28, %v9739_v16  ;;  %v1911_v51 = vcombine.high %v1859_v57, %v1891_v47  ;;  %v1979_v55 = vrot.slane %v1965_v0, %v9447_v17  ;;  %v2013_v56 = vcombine.high %v1956_v54, %v1972_v53  ;;  %v13176_v16 = vld [vmem:[#allocation160_spill] sm:$0xff]  ;;  %s12745_s25 = smov 62  }
 0x2da   : > { %v1980_v43 = vcombine.low %v1924_v1, %v1940_v46  ;;  %v2020_v23 = vrot.slane %v2012_v44, %v9461_v60  ;;  %v9790_v28 = vsel %vm12890_vm0, %v13177_v13, %v13176_v16  ;;  %v1947_v47 = vrot.slane %v1933_v3, %v9447_v17  ;;  %v13187_v44 = vld [vmem:[#allocation147_spill] sm:$0xff]  ;;  %v13189_v3 = vld [vmem:[#allocation185_spill] sm:$0xff] }
 0x2db   : > { %v1931_v29 = vrot.slane %v1917_v37, %v9447_v17  ;;  %v1981_v41 = vcombine.high %v1924_v1, %v1940_v46  ;;  %v1297_v57 = vsel %vm12890_vm0, %v13180_v38, %v13179_v35  ;;  %v1329_v33 = vsel %vm12890_vm0, %v13182_v8, %v13181_v20  ;;  %v13185_v1 = vld [vmem:[#allocation134_spill] sm:$0xff] }
 0x2dc   : > { %3641 = vrot.lane.b32.xlu1 %v1908_v27, %s12727_s4  ;;  %s12731_s4 = smov 52   ;;  %v1202_v27 = vpop.permute.xlu1 %1201  ;;  %v1988_v59 = vrot.slane %v1980_v43, %v9461_v60  ;;  %v1913_v53 = vcombine.high %v1868_v42, %v1900_v32  ;;  %v2027_v18 = vrot.slane %v2013_v56, %v9461_v60  ;;  %v2028_v46 = vcombine.low %v1963_v14, %v1979_v55  ;;  %v13190_v43 = vld [vmem:[#allocation84_spill] sm:$0xff] }
 0x2dd   : > { %3637 = vrot.lane.b32.xlu0 %v1779_v19, %s12729_s28  ;;  %s12733_s28 = smov 50   ;;  %v1361_v11 = vsel %vm12890_vm0, %v13178_v39, %v1202_v27  ;;  %v13184_v19 = vld [vmem:[#allocation109_spill] sm:$0xff]  ;;  %v1313_v5 = vsel %vm12890_vm0, %v13190_v43, %v13189_v3  ;;  %v1995_v42 = vrot.slane %v1981_v41, %v9461_v60  ;;  %v1996_v27 = vcombine.low %v1931_v29, %v1947_v47  ;;  %v13194_v3 = vld [vmem:[#allocation175_spill] sm:$0xff]  ;;  %v13195_v43 = vld [vmem:[#allocation72_spill] sm:$0xff] }
 0x2de   : > { %v1345_v6 = vsel %vm12890_vm0, %v13184_v19, %v13183_v36  ;;  %v2044_v54 = vcombine.low %v1988_v59, %v2020_v23  ;;  %v2029_v13 = vcombine.high %v1963_v14, %v1979_v55  ;;  %v2036_v39 = vrot.slane %v2028_v46, %v9461_v60 }
 0x2df   : > { %v2046_v35 = vcombine.low %v1995_v42, %v2027_v18  ;;  %v1997_v41 = vcombine.high %v1931_v29, %v1947_v47  ;;  %v2004_v20 = vrot.slane %v1996_v27, %v9461_v60  ;;  %v2101_v55 = vcombine.high %v1329_v33, %v1361_v11  ;;  %v13198_v27 = vld [vmem:[#allocation211_spill] sm:$0xff] }
 0x2e0   : > { %3649 = vrot.lane.b32.xlu1 %v1910_v52, %s12731_s4  ;;  %s12735_s4 = smov 56   ;;  %v2100_v52 = vcombine.low %v1329_v33, %v1361_v11  ;;  %v2043_v36 = vrot.slane %v2029_v13, %v9461_v60  ;;  %v2085_v46 = vcombine.high %v1313_v5, %v1345_v6 }
 0x2e1   : > { %3645 = vrot.lane.b32.xlu0 %v1909_v12, %s12733_s28  ;;  %s12739_s28 = smov 54   ;;  %v13186_v12 = vld [vmem:[#allocation28_spill] sm:$0xff]  ;;  %v2048_v19 = vcombine.low %v2004_v20, %v2036_v39 }
 0x2e2   : > { %v1249_v0 = vsel %vm12890_vm0, %v13186_v12, %v13185_v1  ;;  %v2108_v16 = vrot.slane %v2100_v52, %v9447_v17  ;;  %v2011_v52 = vrot.slane %v1997_v41, %v9461_v60  ;;  %v13191_v1 = vld [vmem:[#allocation163_spill] sm:$0xff]  ;;  %v13200_v41 = vld [vmem:[#allocation137_spill] sm:$0xff] }
 0x2e3   : > { %v2052_v56 = vcombine.low %v1249_v0, %v9790_v28  ;;  %v13192_v12 = vld [vmem:[#allocation59_spill] sm:$0xff] }
 0x2e4   : > { %3657 = vrot.lane.b32.xlu1 %v1912_v62, %s12735_s4  ;;  %s12737_s4 = smov 60   ;;  %v13188_v62 = vld [vmem:[#allocation42_spill] sm:$0xff]  ;;  %v2050_v33 = vcombine.low %v2011_v52, %v2043_v36 }
 0x2e5   : > { %3653 = vrot.lane.b32.xlu0 %v1911_v51, %s12739_s28  ;;  %v1265_v37 = vsel %vm12890_vm0, %v13188_v62, %v13187_v44  ;;  %v2084_v51 = vcombine.low %v1313_v5, %v1345_v6  ;;  %s12743_s28 = smov 64   ;;  %v1298_v5 = vsel %vm12890_vm0, %v13195_v43, %v13194_v3 }
 0x2e6   : > { %v2068_v32 = vcombine.low %v1265_v37, %v1297_v57  ;;  %v2069_v29 = vcombine.high %v1265_v37, %v1297_v57  ;;  %v9842_v57 = vsel %vm12890_vm0, %v13192_v12, %v13191_v1  ;;  %v2099_v37 = vrot.slane %v2085_v46, %v9447_v17 }
 0x2e7   : > { %v2092_v8 = vrot.slane %v2084_v51, %v9447_v17  ;;  %v13199_v51 = vld [vmem:[#allocation112_spill] sm:$0xff] }
 0x2e8   : > { %3665 = vrot.lane.b32.xlu1 %v1914_v25, %s12737_s4  ;;  %s12747_s4 = smov 58   ;;  %v1915_v25 = vcombine.high %v1875_v40, %v1907_v4  ;;  %v2076_v38 = vrot.slane %v2068_v32, %v9447_v17  ;;  %v2060_v4 = vrot.slane %v2052_v56, %v9447_v17  ;;  %v2045_v40 = vcombine.high %v1988_v59, %v2020_v23  ;;  %v13196_v32 = vld [vmem:[#allocation200_spill] sm:$0xff] }
 0x2e9   : > { %3661 = vrot.lane.b32.xlu0 %v1913_v53, %s12747_s4  ;;  %v2148_v14 = vcombine.low %v2092_v8, %v2108_v16  ;;  %v2053_v53 = vcombine.high %v1249_v0, %v9790_v28  ;;  %s12751_s4 = smov 72   ;;  %v2115_v23 = vrot.slane %v2101_v55, %v9447_v17  ;;  %v2149_v11 = vcombine.high %v2092_v8, %v2108_v16  ;;  %v13193_v0 = vld [vmem:[#allocation124_spill] sm:$0xff]  ;;  %v13201_v8 = vld [vmem:[#allocation31_spill] sm:$0xff]  ;;  %v13203_v55 = vld [vmem:[#allocation45_spill] sm:$0xff] }
 0x2ea   : > { %v2116_v47 = vcombine.low %v2060_v4, %v2076_v38  ;;  %v1362_v6 = vsel %vm12890_vm0, %v13193_v0, %v9520_v34  ;;  %v2117_v44 = vcombine.high %v2060_v4, %v2076_v38  ;;  %v1346_v56 = vsel %vm12890_vm0, %v13199_v51, %v13198_v27 }
 0x2eb   : > { %v2156_v59 = vrot.slane %v2148_v14, %v9461_v60  ;;  %v2067_v28 = vrot.slane %v2053_v53, %v9447_v17  ;;  %v2163_v16 = vrot.slane %v2149_v11, %v9461_v60  ;;  %v2164_v13 = vcombine.low %v2099_v37, %v2115_v23  ;;  %v13205_v53 = vld [vmem:[#allocation87_spill] sm:$0xff]  ;;  %v1210_v11 = vpop.permute.xlu1 %1209 }
 0x2ec   : > { %3673 = vrot.lane.b32.xlu1 %v2044_v54, %s12743_s28  ;;  %s12749_s28 = smov 68   ;;  %v2047_v54 = vcombine.high %v1995_v42, %v2027_v18  ;;  %v2083_v18 = vrot.slane %v2069_v29, %v9447_v17  ;;  %v2124_v62 = vrot.slane %v2116_v47, %v9461_v60  ;;  %v13197_v42 = vld [vmem:[#allocation99_spill] sm:$0xff]  ;;  %v1250_v4 = vsel %vm12890_vm0, %v13201_v8, %v13200_v41  ;;  %v13206_v41 = vld [vmem:[#allocation162_spill] sm:$0xff] }
 0x2ed   : > { %3669 = vrot.lane.b32.xlu0 %v1915_v25, %s12745_s25  ;;  %s12757_s25 = smov 66   ;;  %v1330_v34 = vsel %vm12890_vm0, %v13197_v42, %v13196_v32  ;;  %v2049_v25 = vcombine.high %v2004_v20, %v2036_v39  ;;  %v2131_v39 = vrot.slane %v2117_v44, %v9461_v60  ;;  %v2165_v1 = vcombine.high %v2099_v37, %v2115_v23  ;;  %v13207_v8 = vld [vmem:[#allocation58_spill] sm:$0xff] }
 0x2ee   : > { %v2180_v38 = vcombine.low %v2124_v62, %v2156_v59  ;;  %v2132_v20 = vcombine.low %v2067_v28, %v2083_v18  ;;  %v2172_v12 = vrot.slane %v2164_v13, %v9461_v60  ;;  %v2133_v44 = vcombine.high %v2067_v28, %v2083_v18 }
 0x2ef   : > { %v2182_v3 = vcombine.low %v2131_v39, %v2163_v16  ;;  %v2179_v23 = vrot.slane %v2165_v1, %v9461_v60  ;;  %v2237_v37 = vcombine.high %v1330_v34, %v1362_v6  ;;  %v9885_v28 = vpop.permute.xlu1 %1217 }
 0x2f0   : > { %3681 = vrot.lane.b32.xlu1 %v2046_v35, %s12749_s28  ;;  %s12755_s28 = smov 70   ;;  %v2236_v35 = vcombine.low %v1330_v34, %v1362_v6  ;;  %v2140_v43 = vrot.slane %v2132_v20, %v9461_v60  ;;  %v2147_v18 = vrot.slane %v2133_v44, %v9461_v60  ;;  %v13211_v20 = vld [vmem:[#allocation199_spill] sm:$0xff] }
 0x2f1   : > { %3677 = vrot.lane.b32.xlu0 %v2045_v40, %s12757_s25  ;;  %v13202_v40 = vld [vmem:[#allocation150_spill] sm:$0xff]  ;;  %s12761_s25 = smov 78   ;;  %v2251_v6 = vrot.slane %v2237_v37, %v9447_v17 }
 0x2f2   : > { %v1266_v14 = vsel %vm12890_vm0, %v13203_v55, %v13202_v40  ;;  %v2244_v0 = vrot.slane %v2236_v35, %v9447_v17  ;;  %v2184_v51 = vcombine.low %v2140_v43, %v2172_v12 }
 0x2f3   : > { %v2204_v47 = vcombine.low %v1266_v14, %v1298_v5  ;;  %v2205_v13 = vcombine.high %v1266_v14, %v1298_v5  ;;  %v13208_v5 = vld [vmem:[#allocation123_spill] sm:$0xff]  ;;  %v9916_v1 = vpop.permute.xlu1 %1225 }
 0x2f4   : > { %3689 = vrot.lane.b32.xlu1 %v2048_v19, %s12751_s4  ;;  %s12753_s4 = smov 76   ;;  %v13204_v19 = vld [vmem:[#allocation188_spill] sm:$0xff] }
 0x2f5   : > { %3685 = vrot.lane.b32.xlu0 %v2047_v54, %s12755_s28  ;;  %v1314_v29 = vsel %vm12890_vm0, %v13205_v53, %v13204_v19  ;;  %s12759_s28 = smov 80   ;;  %v2188_v54 = vcombine.low %v1250_v4, %v9842_v57  ;;  %v2212_v32 = vrot.slane %v2204_v47, %v9447_v17  ;;  %v13209_v53 = vld [vmem:[#allocation174_spill] sm:$0xff] }
 0x2f6   : > { %v2220_v46 = vcombine.low %v1314_v29, %v1346_v56  ;;  %v13212_v47 = vld [vmem:[#allocation98_spill] sm:$0xff] }
 0x2f8   : > { %3697 = vrot.lane.b32.xlu1 %v2050_v33, %s12753_s4  ;;  %s12787_s4 = smov 74   ;;  %v2051_v33 = vcombine.high %v2011_v52, %v2043_v36  ;;  %v2228_v42 = vrot.slane %v2220_v46, %v9447_v17  ;;  %v2196_v36 = vrot.slane %v2188_v54, %v9447_v17  ;;  %v2181_v52 = vcombine.high %v2124_v62, %v2156_v59  ;;  %v13213_v54 = vld [vmem:[#allocation212_spill] sm:$0xff] }
 0x2f9   : > { %3693 = vrot.lane.b32.xlu0 %v2049_v25, %s12787_s4  ;;  %v2189_v25 = vcombine.high %v1250_v4, %v9842_v57  ;;  %v2183_v59 = vcombine.high %v2131_v39, %v2163_v16  ;;  %v2186_v57 = vcombine.low %v2147_v18, %v2179_v23  ;;  %v9895_v4 = vsel %vm12890_vm0, %v13207_v8, %v13206_v41  ;;  %s12793_s4 = smov 112  }
 0x2fa   : > { %v2284_v27 = vcombine.low %v2228_v42, %v2244_v0  ;;  %v2252_v35 = vcombine.low %v2196_v36, %v2212_v32  ;;  %v2285_v62 = vcombine.high %v2228_v42, %v2244_v0  ;;  %v2219_v16 = vrot.slane %v2205_v13, %v9447_v17  ;;  %v13219_v13 = vld [vmem:[#allocation187_spill] sm:$0xff] }
 0x2fb   : > { %v2203_v40 = vrot.slane %v2189_v25, %v9447_v17  ;;  %v2253_v55 = vcombine.high %v2196_v36, %v2212_v32  ;;  %v1331_v46 = vsel %vm12890_vm0, %v13212_v47, %v13211_v20  ;;  %v2185_v0 = vcombine.high %v2140_v43, %v2172_v12  ;;  %v13215_v36 = vld [vmem:[#allocation136_spill] sm:$0xff]  ;;  %v9937_v47 = vpop.permute.xlu1 %1233 }
 0x2fc   : > { %3705 = vrot.lane.b32.xlu1 %v2180_v38, %s12759_s28  ;;  %s12763_s28 = smov 84   ;;  %v2221_v38 = vcombine.high %v1314_v29, %v1346_v56  ;;  %v2292_v34 = vrot.slane %v2284_v27, %v9461_v60  ;;  %v9900_v56 = vsel %vm12890_vm0, %v13208_v5, %v1210_v11  ;;  %v2260_v14 = vrot.slane %v2252_v35, %v9461_v60  ;;  %v13210_v29 = vld [vmem:[#allocation71_spill] sm:$0xff]  ;;  %v13217_v27 = vld [vmem:[#allocation149_spill] sm:$0xff]  ;;  %v13220_v35 = vld [vmem:[#allocation86_spill] sm:$0xff] }
 0x2fd   : > { %3701 = vrot.lane.b32.xlu0 %v2051_v33, %s12761_s25  ;;  %s12765_s25 = smov 82   ;;  %v1299_v39 = vsel %vm12890_vm0, %v13210_v29, %v13209_v53  ;;  %v13214_v11 = vld [vmem:[#allocation111_spill] sm:$0xff]  ;;  %v2299_v44 = vrot.slane %v2285_v62, %v9461_v60  ;;  %v2267_v43 = vrot.slane %v2253_v55, %v9461_v60  ;;  %v2187_v8 = vcombine.high %v2147_v18, %v2179_v23 }
 0x2fe   : > { %v2235_v19 = vrot.slane %v2221_v38, %v9447_v17  ;;  %v1347_v33 = vsel %vm12890_vm0, %v13214_v11, %v13213_v54  ;;  %v2316_v42 = vcombine.low %v2260_v14, %v2292_v34  ;;  %v1315_v38 = vsel %vm12890_vm0, %v13220_v35, %v13219_v13 }
 0x2ff   : > { %v2356_v62 = vcombine.low %v1315_v38, %v1347_v33  ;;  %v2318_v20 = vcombine.low %v2267_v43, %v2299_v44  ;;  %v2269_v54 = vcombine.high %v2203_v40, %v2219_v16  ;;  %v2317_v18 = vcombine.high %v2260_v14, %v2292_v34 }
 0x300   : > { %3713 = vrot.lane.b32.xlu1 %v2182_v3, %s12763_s28  ;;  %s12767_s28 = smov 88   ;;  %v2372_v3 = vcombine.low %v1331_v46, %v9900_v56  ;;  %v2300_v32 = vcombine.low %v2235_v19, %v2251_v6  ;;  %v2301_v53 = vcombine.high %v2235_v19, %v2251_v6  ;;  %v2373_v6 = vcombine.high %v1331_v46, %v9900_v56  ;;  %v9953_v56 = vpop.permute.xlu1 %1241 }
 0x301   : > { %3709 = vrot.lane.b32.xlu0 %v2181_v52, %s12765_s25  ;;  %s12771_s25 = smov 86   ;;  %v13216_v52 = vld [vmem:[#allocation30_spill] sm:$0xff]  ;;  %v2319_v14 = vcombine.high %v2267_v43, %v2299_v44 }
 0x302   : > { %v1251_v37 = vsel %vm12890_vm0, %v13216_v52, %v13215_v36  ;;  %v2380_v5 = vrot.slane %v2372_v3, %v9447_v17  ;;  %v2308_v29 = vrot.slane %v2300_v32, %v9461_v60  ;;  %v2315_v3 = vrot.slane %v2301_v53, %v9461_v60 }
 0x303   : > { %v2324_v41 = vcombine.low %v1251_v37, %v9895_v4  ;;  %v2283_v36 = vrot.slane %v2269_v54, %v9461_v60  ;;  %v2357_v52 = vcombine.high %v1315_v38, %v1347_v33  ;;  %v2325_v34 = vcombine.high %v1251_v37, %v9895_v4 }
 0x304   : > { %3721 = vrot.lane.b32.xlu1 %v2184_v51, %s12767_s28  ;;  %s12769_s28 = smov 92   ;;  %v13218_v51 = vld [vmem:[#allocation44_spill] sm:$0xff]  ;;  %v2387_v46 = vrot.slane %v2373_v6, %v9447_v17 }
 0x305   : > { %3717 = vrot.lane.b32.xlu0 %v2183_v59, %s12771_s25  ;;  %v1267_v25 = vsel %vm12890_vm0, %v13218_v51, %v13217_v27  ;;  %v2268_v59 = vcombine.low %v2203_v40, %v2219_v16  ;;  %s12775_s25 = smov 96   ;;  %v2332_v23 = vrot.slane %v2324_v41, %v9447_v17  ;;  %v2322_v13 = vcombine.low %v2283_v36, %v2315_v3 }
 0x306   : > { %v2340_v12 = vcombine.low %v1267_v25, %v1299_v39  ;;  %v2341_v40 = vcombine.high %v1267_v25, %v1299_v39  ;;  %v2371_v35 = vrot.slane %v2357_v52, %v9447_v17  ;;  %v2339_v38 = vrot.slane %v2325_v34, %v9447_v17 }
 0x307   : > { %v2276_v11 = vrot.slane %v2268_v59, %v9461_v60 }
 0x308   : > { %3729 = vrot.lane.b32.xlu1 %v2186_v57, %s12769_s28  ;;  %s12773_s28 = smov 90   ;;  %v9931_v57 = vpop.permute.xlu0 %1221  ;;  %v2348_v55 = vrot.slane %v2340_v12, %v9447_v17  ;;  %v2355_v39 = vrot.slane %v2341_v40, %v9447_v17  ;;  %v2436_v43 = vcombine.low %v2371_v35, %v2387_v46  ;;  %v2437_v53 = vcombine.high %v2371_v35, %v2387_v46  ;;  %v13231_v35 = vld [vmem:[#allocation100_spill] sm:$0xff] }
 0x309   : > { %3725 = vrot.lane.b32.xlu0 %v2185_v0, %s12773_s28  ;;  %s12777_s28 = smov 94   ;;  %v2364_v0 = vrot.slane %v2356_v62, %v9447_v17  ;;  %v2321_v44 = vcombine.high %v2276_v11, %v2308_v29  ;;  %v2493_v40 = vcombine.high %v9584_v30, %v9574_v7  ;;  %v2557_v46 = vcombine.high %v9612_v45, %v9617_v15  ;;  %v13230_v15 = vld [vmem:[#allocation201_spill] sm:$0xff] }
 0x30a   : > { %v2388_v16 = vcombine.low %v2332_v23, %v2348_v55  ;;  %v2389_v33 = vcombine.high %v2332_v23, %v2348_v55  ;;  %v2404_v41 = vcombine.low %v2339_v38, %v2355_v39  ;;  %v2405_v54 = vcombine.high %v2339_v38, %v2355_v39  ;;  %v13227_v39 = vld [vmem:[#allocation73_spill] sm:$0xff]  ;;  %v13232_v38 = vld [vmem:[#allocation214_spill] sm:$0xff] }
 0x30b   : > { %v2420_v19 = vcombine.low %v2364_v0, %v2380_v5  ;;  %v2421_v27 = vcombine.high %v2364_v0, %v2380_v5  ;;  %v2323_v5 = vcombine.high %v2283_v36, %v2315_v3  ;;  %v2461_v0 = vcombine.high %v9568_v48, %v9556_v24  ;;  %v13221_v24 = vld [vmem:[#allocation138_spill] sm:$0xff]  ;;  %v13222_v48 = vld [vmem:[#allocation32_spill] sm:$0xff] }
 0x30c   : > { %3737 = vrot.lane.b32.xlu1 %v2316_v42, %s12775_s25  ;;  %s12779_s25 = smov 100   ;;  %v9947_v32 = vpop.permute.xlu0 %1229  ;;  %v2320_v42 = vcombine.low %v2276_v11, %v2308_v29  ;;  %v2396_v25 = vrot.slane %v2388_v16, %v9461_v60  ;;  %v2403_v62 = vrot.slane %v2389_v33, %v9461_v60  ;;  %v2444_v29 = vrot.slane %v2436_v43, %v9461_v60  ;;  %v13224_v16 = vld [vmem:[#allocation60_spill] sm:$0xff] }
 0x30d   : > { %3733 = vrot.lane.b32.xlu0 %v2187_v8, %s12777_s28  ;;  %s12781_s28 = smov 98   ;;  %v2428_v51 = vrot.slane %v2420_v19, %v9461_v60  ;;  %v2435_v12 = vrot.slane %v2421_v27, %v9461_v60  ;;  %v2412_v11 = vrot.slane %v2404_v41, %v9461_v60  ;;  %v2509_v23 = vcombine.high %v9599_v26, %v9588_v21  ;;  %v13223_v26 = vld [vmem:[#allocation164_spill] sm:$0xff] }
 0x30e   : > { %v9982_v6 = vrot.slane %v2437_v53, %v9461_v60  ;;  %v9992_v21 = vsel %vm12890_vm0, %v13222_v48, %v13221_v24  ;;  %v9997_v36 = vsel %vm12890_vm0, %v13224_v16, %v13223_v26  ;;  %v2419_v52 = vrot.slane %v2405_v54, %v9461_v60  ;;  %v13235_v54 = vld [vmem:[#allocation46_spill] sm:$0xff] }
 0x30f   : > { %v2452_v59 = vcombine.low %v2396_v25, %v2428_v51  ;;  %v2456_v19 = vcombine.low %v2412_v11, %v2444_v29  ;;  %v10010_v30 = vrot.slane %v2509_v23, %v9447_v17  ;;  %v2455_v34 = vcombine.high %v2403_v62, %v2435_v12 }
 0x310   : > { %3745 = vrot.lane.b32.xlu1 %v2318_v20, %s12779_s25  ;;  %s12783_s25 = smov 104   ;;  %v9961_v4 = vpop.permute.xlu0 %1237  ;;  %v2454_v20 = vcombine.low %v2403_v62, %v2435_v12  ;;  %v13233_v12 = vld [vmem:[#allocation113_spill] sm:$0xff]  ;;  %v2457_v41 = vcombine.high %v2412_v11, %v2444_v29  ;;  %v2589_v53 = vcombine.high %v9630_v50, %v9635_v9  ;;  %v2596_v23 = vcombine.low %v9992_v21, %v9997_v36  ;;  %v13236_v29 = vld [vmem:[#allocation139_spill] sm:$0xff] }
 0x311   : > { %3741 = vrot.lane.b32.xlu0 %v2317_v18, %s12781_s28  ;;  %s12785_s28 = smov 102   ;;  %v2453_v18 = vcombine.high %v2396_v25, %v2428_v51  ;;  %v2458_v51 = vcombine.low %v2419_v52, %v9982_v6  ;;  %v2507_v25 = vrot.slane %v2493_v40, %v9447_v17  ;;  %v10044_v43 = vsel %vm12890_vm0, %v13233_v12, %v13232_v38  ;;  %v13237_v11 = vld [vmem:[#allocation33_spill] sm:$0xff]  ;;  %v13241_v12 = vld [vmem:[#allocation62_spill] sm:$0xff] }
 0x312   : > { %v2459_v16 = vcombine.high %v2419_v52, %v9982_v6 }
 0x313   : > { %v2572_v31 = vcombine.low %v2507_v25, %v10010_v30  ;;  %v2573_v48 = vcombine.high %v2507_v25, %v10010_v30 }
 0x314   : > { %3753 = vrot.lane.b32.xlu1 %v2320_v42, %s12783_s25  ;;  %s12789_s25 = smov 108   ;;  %v2477_v42 = vcombine.high %v9551_v22, %v9543_v49  ;;  %v10002_v49 = vrot.slane %v2461_v0, %v9447_v17  ;;  %v13225_v22 = vld [vmem:[#allocation125_spill] sm:$0xff] }
 0x315   : > { %3749 = vrot.lane.b32.xlu0 %v2319_v14, %s12785_s28  ;;  %s12791_s28 = smov 106   ;;  %v10007_v7 = vsel %vm12890_vm0, %v13225_v22, %v9885_v28  ;;  %v2580_v22 = vrot.slane %v2572_v31, %v9461_v60 }
 0x316   : > { %v10025_v33 = vrot.slane %v2477_v42, %v9447_v17  ;;  %v2539_v42 = vrot.slane %v2525_v63, %v9461_v60 }
 0x318   : > { %3761 = vrot.lane.b32.xlu1 %v2322_v13, %s12789_s25  ;;  %s12862_s25 = smov 110   ;;  %v13226_v13 = vld [vmem:[#allocation176_spill] sm:$0xff]  ;;  %v2540_v40 = vcombine.low %v10002_v49, %v10025_v33  ;;  %v2541_v52 = vcombine.high %v10002_v49, %v10025_v33  ;;  %v13239_v49 = vld [vmem:[#allocation34_spill] sm:$0xff] }
 0x319   : > { %3757 = vrot.lane.b32.xlu0 %v2321_v44, %s12791_s28  ;;  %s12795_s28 = smov 116   ;;  %v10022_v28 = vsel %vm12890_vm0, %v13227_v39, %v13226_v13  ;;  %v10039_v44 = vsel %vm12890_vm0, %v13231_v35, %v13230_v15  ;;  %v10084_v13 = vrot.slane %v2596_v23, %v9447_v17  ;;  %v13238_v35 = vld [vmem:[#allocation140_spill] sm:$0xff] }
 0x31a   : > { %v2644_v61 = vcombine.low %v10039_v44, %v10007_v7  ;;  %v2548_v39 = vrot.slane %v2540_v40, %v9461_v60  ;;  %v10102_v33 = vsel %vm12890_vm0, %v13239_v49, %v13238_v35  ;;  %v13245_v40 = vld [vmem:[#allocation203_spill] sm:$0xff] }
 0x31c   : > { %3769 = vrot.lane.b32.xlu1 %v2452_v59, %s12793_s4  ;;  %s12859_s4 = smov 114   ;;  %v2652_v24 = vrot.slane %v2644_v61, %v9447_v17  ;;  %v2593_v15 = vcombine.high %v2548_v39, %v2580_v22 }
 0x31d   : > { %3765 = vrot.lane.b32.xlu0 %v2323_v5, %s12862_s25  ;;  %s13313_s25 = smov 64  }
 0x320   : > { %3777 = vrot.lane.b32.xlu1 %v2454_v20, %s12795_s28  ;;  %s12797_s28 = smov 120   ;;  %v13234_v20 = vld [vmem:[#allocation151_spill] sm:$0xff] }
 0x321   : > { %3773 = vrot.lane.b32.xlu0 %v2453_v18, %s12859_s4  ;;  %v1269_v0 = vsel %vm12890_vm0, %v13235_v54, %v13234_v20  ;;  %s13312_s4 = smov 66  }
 0x322   : > { %v9964_v37 = vpop.permute.xlu1 %3553  ;;  %v3550_v8 = vpop.permute.xlu0 %3549 }
 0x323   : > { %v4053_v27 = vsel %vm4052_vm1, %v1500_v58, %v3550_v8  ;;  %v13229_v58 = vld [vmem:[#allocation88_spill] sm:$0xff]  ;;  %v2571_v8 = vrot.slane %v2557_v46, %v9461_v60 }
 0x324   : > { %3785 = vrot.lane.b32.xlu1 %v2456_v19, %s12797_s28  ;;  %s12799_s28 = smov 118   ;;  %v10034_v45 = vsel %vm12890_vm0, %v13229_v58, %v13228_v2  ;;  %v4055_v62 = vsel %vm4054_vm2, %v4053_v27, %v9964_v37  ;;  %v10067_v19 = vsel %vm12890_vm0, %v13237_v11, %v13236_v29  ;;  %v2587_v58 = vrot.slane %v2573_v48, %v9461_v60  ;;  %v13243_v11 = vld [vmem:[#allocation178_spill] sm:$0xff] }
 0x325   : > { %3781 = vrot.lane.b32.xlu0 %v2455_v34, %s12799_s28  ;;  %s12801_s28 = smov 124   ;;  %v2628_v18 = vcombine.low %v10034_v45, %v10044_v43  ;;  %v2591_v27 = vcombine.high %v2539_v42, %v2571_v8  ;;  %v2590_v63 = vcombine.low %v2539_v42, %v2571_v8  ;;  %v2592_v8 = vcombine.low %v2548_v39, %v2580_v22  ;;  %v13250_v39 = vld [vmem:[#allocation48_spill] sm:$0xff] }
 0x326   : > { %v9973_v55 = vpop.permute.xlu1 %3561  ;;  %v3558_v3 = vpop.permute.xlu0 %3557 }
 0x327   : > { %v4057_v5 = vsel %vm4056_vm3, %v4055_v62, %v3558_v3  ;;  %v2612_v3 = vcombine.low %v1269_v0, %v10022_v28  ;;  %v2636_v30 = vrot.slane %v2628_v18, %v9447_v17  ;;  %v2555_v62 = vrot.slane %v2541_v52, %v9461_v60  ;;  %v13242_v18 = vld [vmem:[#allocation127_spill] sm:$0xff]  ;;  %v13249_v52 = vld [vmem:[#allocation153_spill] sm:$0xff] }
 0x328   : > { %3793 = vrot.lane.b32.xlu1 %v2458_v51, %s12801_s28  ;;  %s12856_s28 = smov 122   ;;  %v4059_v26 = vsel %vm4058_vm4, %v4057_v5, %v9973_v55  ;;  %v2597_v51 = vcombine.high %v9992_v21, %v9997_v36  ;;  %v2613_v55 = vcombine.high %v1269_v0, %v10022_v28  ;;  %v2645_v21 = vcombine.high %v10039_v44, %v10007_v7  ;;  %v13240_v44 = vld [vmem:[#allocation166_spill] sm:$0xff] }
 0x329   : > { %3789 = vrot.lane.b32.xlu0 %v2457_v41, %s12856_s28  ;;  %v2620_v6 = vrot.slane %v2612_v3, %v9447_v17  ;;  %v2692_v36 = vcombine.low %v2636_v30, %v2652_v24  ;;  %v2629_v7 = vcombine.high %v10034_v45, %v10044_v43  ;;  %v2693_v43 = vcombine.high %v2636_v30, %v2652_v24  ;;  %v13244_v3 = vld [vmem:[#allocation75_spill] sm:$0xff]  ;;  %v13246_v24 = vld [vmem:[#allocation102_spill] sm:$0xff]  ;;  %s13311_s28 = smov 60  }
 0x32a   : > { %v3570_v14 = vpop.permute.xlu1 %3569  ;;  %v3566_v59 = vpop.permute.xlu0 %3565  ;;  %v10105_v38 = vrot.slane %v2597_v51, %v9447_v17  ;;  %v10116_v61 = vrot.slane %v2613_v55, %v9447_v17  ;;  %v2659_v45 = vrot.slane %v2645_v21, %v9447_v17  ;;  %v2595_v54 = vcombine.high %v2555_v62, %v2587_v58 }
 0x32b   : > { %v4061_v34 = vsel %vm12902_vm5, %v4059_v26, %v3566_v59  ;;  %v10113_v59 = vsel %vm12890_vm0, %v13241_v12, %v13240_v44  ;;  %v2660_v31 = vcombine.low %v10084_v13, %v2620_v6  ;;  %v2661_v0 = vcombine.high %v10084_v13, %v2620_v6  ;;  %v13247_v26 = vld [vmem:[#allocation213_spill] sm:$0xff] }
 0x32c   : > { %3801 = vrot.lane.b32.xlu1 %v2589_v53, %s12803_s27  ;;  %s12853_s27 = smov 126   ;;  %v4063_v25 = vsel %vm12901_vm6, %v4061_v34, %v3570_v14  ;;  %v2700_v53 = vrot.slane %v2692_v36, %v9461_v60  ;;  %v2643_v23 = vrot.slane %v2629_v7, %v9447_v17  ;;  %v10130_v29 = vsel %vm12890_vm0, %v13242_v18, %v9931_v57 }
 0x32d   : > { %3797 = vrot.lane.b32.xlu0 %v2459_v16, %s12853_s27  ;;  %v10137_v42 = vsel %vm12890_vm0, %v13244_v3, %v13243_v11  ;;  %v10142_v48 = vsel %vm12890_vm0, %v13246_v24, %v13245_v40  ;;  %v13248_v16 = vld [vmem:[#allocation115_spill] sm:$0xff]  ;;  %v2707_v22 = vrot.slane %v2693_v43, %v9461_v60  ;;  %v2594_v51 = vcombine.low %v2555_v62, %v2587_v58  ;;  %s13308_s27 = smov 62  }
 0x32e   : > { %v3578_v37 = vpop.permute.xlu1 %3577  ;;  %v3574_v46 = vpop.permute.xlu0 %3573  ;;  %v10147_v57 = vsel %vm12890_vm0, %v13248_v16, %v13247_v26  ;;  %v2708_v34 = vcombine.low %v2643_v23, %v2659_v45  ;;  %v2780_v13 = vcombine.low %v10142_v48, %v10130_v29  ;;  %v1270_v21 = vsel %vm12890_vm0, %v13250_v39, %v13249_v52 }
 0x32f   : > { %v4065_v28 = vsel %vm12904_vm7, %v4063_v25, %v3574_v46  ;;  %v2732_v36 = vcombine.low %v10102_v33, %v10113_v59  ;;  %v13251_v25 = vld [vmem:[#allocation191_spill] sm:$0xff]  ;;  %v2675_v58 = vrot.slane %v2661_v0, %v9461_v60  ;;  %v2709_v49 = vcombine.high %v2643_v23, %v2659_v45 }
 0x330   : > { %3809 = vrot.lane.b32.xlu1 %v2591_v27, %s12844_s30  ;;  %v4067_v41 = vsel %vm12903_vm8, %v4065_v28, %v3578_v37  ;;  %v2668_v37 = vrot.slane %v2660_v31, %v9461_v60  ;;  %v2676_v28 = vcombine.low %v10105_v38, %v10116_v61  ;;  %v2716_v7 = vrot.slane %v2708_v34, %v9461_v60  ;;  %s13296_s30 = smov 52  }
 0x331   : > { %3805 = vrot.lane.b32.xlu0 %v2590_v63, %s12850_s18  ;;  %v13252_v63 = vld [vmem:[#allocation90_spill] sm:$0xff]  ;;  %v2788_v31 = vrot.slane %v2780_v13, %v9447_v17  ;;  %v2733_v45 = vcombine.high %v10102_v33, %v10113_v59  ;;  %v10182_v0 = vrot.slane %v2732_v36, %v9447_v17  ;;  %v2781_v33 = vcombine.high %v10142_v48, %v10130_v29  ;;  %v13255_v48 = vld [vmem:[#allocation177_spill] sm:$0xff]  ;;  %s13301_s18 = smov 56  }
 0x332   : > { %v3586_v2 = vpop.permute.xlu1 %3585  ;;  %v3582_v14 = vpop.permute.xlu0 %3581  ;;  %v2725_v6 = vcombine.high %v2668_v37, %v2700_v53  ;;  %v2724_v12 = vcombine.low %v2668_v37, %v2700_v53  ;;  %v2684_v53 = vrot.slane %v2676_v28, %v9461_v60  ;;  %v2723_v37 = vrot.slane %v2709_v49, %v9461_v60  ;;  %v13259_v28 = vld [vmem:[#allocation89_spill] sm:$0xff] }
 0x333   : > { %v4069_v20 = vsel %vm12906_vm9, %v4067_v41, %v3582_v14  ;;  %v2727_v41 = vcombine.high %v2675_v58, %v2707_v22  ;;  %v2726_v3 = vcombine.low %v2675_v58, %v2707_v22  ;;  %v10197_v26 = vrot.slane %v2733_v45, %v9447_v17  ;;  %v13256_v22 = vld [vmem:[#allocation74_spill] sm:$0xff]  ;;  %v13261_v49 = vld [vmem:[#allocation101_spill] sm:$0xff] }
 0x334   : > { %3817 = vrot.lane.b32.xlu1 %v2593_v15, %s12838_s5  ;;  %v4071_v46 = vsel %vm12905_vm10, %v4069_v20, %v3586_v2  ;;  %v1318_v2 = vsel %vm12890_vm0, %v13252_v63, %v13251_v25  ;;  %v2748_v15 = vcombine.low %v1270_v21, %v10137_v42  ;;  %v13254_v20 = vld [vmem:[#allocation61_spill] sm:$0xff]  ;;  %v2729_v24 = vcombine.high %v2684_v53, %v2716_v7  ;;  %v13258_v58 = vld [vmem:[#allocation190_spill] sm:$0xff]  ;;  %s13294_s5 = smov 48  }
 0x335   : > { %3813 = vrot.lane.b32.xlu0 %v2592_v8, %s12847_s29  ;;  %v2764_v35 = vcombine.low %v1318_v2, %v10147_v57  ;;  %v13253_v8 = vld [vmem:[#allocation165_spill] sm:$0xff]  ;;  %v2749_v16 = vcombine.high %v1270_v21, %v10137_v42  ;;  %v2765_v34 = vcombine.high %v1318_v2, %v10147_v57  ;;  %v10216_v42 = vrot.slane %v2781_v33, %v9447_v17  ;;  %v13266_v33 = vld [vmem:[#allocation152_spill] sm:$0xff]  ;;  %s13300_s29 = smov 58  }
 0x336   : > { %v3594_v5 = vpop.permute.xlu1 %3593  ;;  %v3590_v27 = vpop.permute.xlu0 %3589  ;;  %v2756_v23 = vrot.slane %v2748_v15, %v9447_v17  ;;  %v10231_v15 = vsel %vm12890_vm0, %v13259_v28, %v13258_v58 }
 0x337   : > { %v4073_v30 = vsel %vm12846_vm11, %v4071_v46, %v3590_v27  ;;  %v2772_v18 = vrot.slane %v2764_v35, %v9447_v17  ;;  %v10206_v46 = vsel %vm12890_vm0, %v13256_v22, %v13255_v48  ;;  %v2779_v63 = vrot.slane %v2765_v34, %v9447_v17  ;;  %v13260_v35 = vld [vmem:[#allocation202_spill] sm:$0xff] }
 0x338   : > { %3825 = vrot.lane.b32.xlu1 %v2595_v54, %s12832_s13  ;;  %v4075_v14 = vsel %vm12806_vm12, %v4073_v30, %v3594_v5  ;;  %v10177_v54 = vsel %vm12890_vm0, %v13254_v20, %v13253_v8  ;;  %v2677_v5 = vcombine.high %v10105_v38, %v10116_v61  ;;  %vm12809_vm12 = vcmask 277504   ;;  %s13290_s13 = smov 44  }
 0x339   : > { %3821 = vrot.lane.b32.xlu0 %v2594_v51, %s12841_s2  ;;  %v2828_v40 = vcombine.low %v2772_v18, %v2788_v31  ;;  %v2796_v27 = vcombine.low %v10182_v0, %v2756_v23  ;;  %v13257_v51 = vld [vmem:[#allocation126_spill] sm:$0xff]  ;;  %v2829_v57 = vcombine.high %v2772_v18, %v2788_v31  ;;  %v2797_v25 = vcombine.high %v10182_v0, %v2756_v23  ;;  %v13265_v23 = vld [vmem:[#allocation35_spill] sm:$0xff]  ;;  %s13295_s2 = smov 54  }
 0x33a   : > { %v3602_v55 = vpop.permute.xlu1 %3601  ;;  %v3598_v44 = vpop.permute.xlu0 %3597  ;;  %v2691_v29 = vrot.slane %v2677_v5, %v9461_v60  ;;  %v10212_v13 = vsel %vm12890_vm0, %v13257_v51, %v9916_v1  ;;  %v10222_v1 = vrot.slane %v2749_v16, %v9447_v17  ;;  %v2845_v16 = vcombine.high %v2779_v63, %v10216_v42 }
 0x33b   : > { %v4077_v62 = vsel %vm12805_vm13, %v4075_v14, %v3598_v44  ;;  %vm4082_vm13 = vcmask 261120   ;;  %v2836_v52 = vrot.slane %v2828_v40, %v9461_v60  ;;  %v2804_v2 = vrot.slane %v2796_v27, %v9461_v60  ;;  %v13262_v14 = vld [vmem:[#allocation216_spill] sm:$0xff]  ;;  %v13263_v44 = vld [vmem:[#allocation114_spill] sm:$0xff] }
 0x33c   : > { %3833 = vrot.lane.b32.xlu1 %v2725_v6, %s12826_s16  ;;  %v4079_v59 = vsel %vm12808_vm14, %v4077_v62, %v3602_v55  ;;  %v2728_v6 = vcombine.low %v2684_v53, %v2716_v7  ;;  %v2731_v36 = vcombine.high %v2691_v29, %v2723_v37  ;;  %vm12813_vm14 = vcmask 310272   ;;  %v13264_v53 = vld [vmem:[#allocation141_spill] sm:$0xff]  ;;  %s13280_s16 = smov 40  }
 0x33d   : > { %3829 = vrot.lane.b32.xlu0 %v2724_v12, %s12835_s12  ;;  %v10236_v7 = vsel %vm12890_vm0, %v13261_v49, %v13260_v35  ;;  %v10241_v12 = vsel %vm12890_vm0, %v13263_v44, %v13262_v14  ;;  %v2844_v62 = vcombine.low %v2779_v63, %v10216_v42  ;;  %v2730_v8 = vcombine.low %v2691_v29, %v2723_v37  ;;  %v13275_v44 = vld [vmem:[#allocation64_spill] sm:$0xff]  ;;  %s13291_s12 = smov 50  }
 0x33e   : > { %v3610_v43 = vpop.permute.xlu1 %3609  ;;  %v3606_v11 = vpop.permute.xlu0 %3605  ;;  %v2916_v31 = vcombine.low %v10236_v7, %v10212_v13  ;;  %v2843_v20 = vrot.slane %v2829_v57, %v9461_v60  ;;  %v2861_v5 = vcombine.high %v2804_v2, %v2836_v52  ;;  %v10253_v18 = vsel %vm12890_vm0, %v13265_v23, %v13264_v53 }
 0x33f   : > { %v4081_v38 = vsel %vm12807_vm15, %v4079_v59, %v3606_v11  ;;  %vm12810_vm15 = vcmask 293888   ;;  %v13267_v59 = vld [vmem:[#allocation47_spill] sm:$0xff]  ;;  %v2868_v37 = vcombine.low %v10067_v19, %v10177_v54  ;;  %v2860_v48 = vcombine.low %v2804_v2, %v2836_v52 }
 0x340   : > { %3841 = vrot.lane.b32.xlu1 %v2727_v41, %s12820_s22  ;;  %v4083_v30 = vsel %vm4082_vm13, %v4081_v38, %v3610_v43  ;;  %v1271_v11 = vsel %vm12890_vm0, %v13267_v59, %v13266_v33  ;;  %v2811_v38 = vrot.slane %v2797_v25, %v9461_v60  ;;  %v2852_v22 = vrot.slane %v2844_v62, %v9461_v60  ;;  %s13273_s22 = smov 36  }
 0x341   : > { %3837 = vrot.lane.b32.xlu0 %v2726_v3, %s12829_s15  ;;  %v2900_v3 = vcombine.low %v10231_v15, %v10241_v12  ;;  %v2884_v40 = vcombine.low %v1271_v11, %v10206_v46  ;;  %v2876_v52 = vrot.slane %v2868_v37, %v9447_v17  ;;  %v2917_v63 = vcombine.high %v10236_v7, %v10212_v13  ;;  %v13274_v7 = vld [vmem:[#allocation168_spill] sm:$0xff]  ;;  %s13285_s15 = smov 46  }
 0x342   : > { %v3618_v61 = vpop.permute.xlu1 %3617  ;;  %v3614_v55 = vpop.permute.xlu0 %3613  ;;  %v2863_v57 = vcombine.high %v2811_v38, %v2843_v20  ;;  %v2862_v58 = vcombine.low %v2811_v38, %v2843_v20  ;;  %v2859_v28 = vrot.slane %v2845_v16, %v9461_v60  ;;  %v2901_v13 = vcombine.high %v10231_v15, %v10241_v12 }
 0x343   : > { %v4085_v39 = vsel %vm12809_vm12, %v4083_v30, %v3614_v55  ;;  %vm12816_vm12 = vcmask 326656   ;;  %v13269_v30 = vld [vmem:[#allocation142_spill] sm:$0xff]  ;;  %v13270_v55 = vld [vmem:[#allocation36_spill] sm:$0xff]  ;;  %v2908_v42 = vrot.slane %v2900_v3, %v9447_v17  ;;  %v13279_v3 = vld [vmem:[#allocation129_spill] sm:$0xff]  ;;  %vm12855_vm11 = vcmask 539648  }
 0x344   : > { %3849 = vrot.lane.b32.xlu1 %v2729_v24, %s12814_s24  ;;  %v4087_v43 = vsel %vm12810_vm15, %v4085_v39, %v3618_v61  ;;  %vm12819_vm15 = vcmask 343040   ;;  %v2812_v61 = vcombine.low %v10197_v26, %v10222_v1  ;;  %v2924_v24 = vrot.slane %v2916_v31, %v9447_v17  ;;  %s13271_s24 = smov 32  }
 0x345   : > { %3845 = vrot.lane.b32.xlu0 %v2728_v6, %s12823_s17  ;;  %v10276_v6 = vsel %vm12890_vm0, %v13270_v55, %v13269_v30  ;;  %v2869_v39 = vcombine.high %v10067_v19, %v10177_v54  ;;  %v10303_v31 = vsel %vm12890_vm0, %v13275_v44, %v13274_v7  ;;  %s13278_s17 = smov 42   ;;  %v10323_v37 = vsel %vm12890_vm0, %v13279_v3, %v9947_v32 }
 0x346   : > { %v3626_v21 = vpop.permute.xlu1 %3625  ;;  %v3622_v41 = vpop.permute.xlu0 %3621  ;;  %v2820_v25 = vrot.slane %v2812_v61, %v9461_v60  ;;  %v2964_v19 = vcombine.low %v2908_v42, %v2924_v24  ;;  %v2965_v15 = vcombine.high %v2908_v42, %v2924_v24  ;;  %v13281_v61 = vld [vmem:[#allocation205_spill] sm:$0xff]  ;;  %v13282_v24 = vld [vmem:[#allocation104_spill] sm:$0xff] }
 0x347   : > { %v4089_v45 = vsel %vm12813_vm14, %v4087_v43, %v3622_v41  ;;  %vm12822_vm14 = vcmask 359424   ;;  %v13276_v41 = vld [vmem:[#allocation180_spill] sm:$0xff]  ;;  %v10330_v16 = vsel %vm12890_vm0, %v13282_v24, %v13281_v61 }
 0x348   : > { %3857 = vrot.lane.b32.xlu1 %v2731_v36, %s12811_s3  ;;  %s13268_s3 = smov 34   ;;  %v4091_v34 = vsel %vm12816_vm12, %v4089_v45, %v3626_v21  ;;  %vm12825_vm12 = vcmask 375808   ;;  %v2892_v21 = vrot.slane %v2884_v40, %v9447_v17  ;;  %v2813_v36 = vcombine.high %v10197_v26, %v10222_v1 }
 0x349   : > { %3853 = vrot.lane.b32.xlu0 %v2730_v8, %s12817_s23  ;;  %s13272_s23 = smov 38   ;;  %v2865_v14 = vcombine.high %v2820_v25, %v2852_v22  ;;  %v10294_v26 = vrot.slane %v2869_v39, %v9447_v17  ;;  %v2885_v1 = vcombine.high %v1271_v11, %v10206_v46  ;;  %v13277_v8 = vld [vmem:[#allocation77_spill] sm:$0xff]  ;;  %v2931_v46 = vrot.slane %v2917_v63, %v9447_v17 }
 0x34a   : > { %v3634_v0 = vpop.permute.xlu1 %3633  ;;  %v2932_v62 = vcombine.low %v2876_v52, %v2892_v21  ;;  %v2827_v43 = vrot.slane %v2813_v36, %v9461_v60  ;;  %v10309_v20 = vsel %vm12890_vm0, %v13277_v8, %v13276_v41  ;;  %v2915_v11 = vrot.slane %v2901_v13, %v9447_v17  ;;  %v13288_v63 = vld [vmem:[#allocation193_spill] sm:$0xff]  ;;  %v13292_v8 = vld [vmem:[#allocation167_spill] sm:$0xff] }
 0x34b   : > { %v3630_v29 = vpop.permute.xlu0 %3629  ;;  %v10317_v59 = vrot.slane %v2885_v1, %v9447_v17  ;;  %v2933_v40 = vcombine.high %v2876_v52, %v2892_v21  ;;  %v2979_v32 = vrot.slane %v2965_v15, %v9461_v60  ;;  %v3052_v30 = vcombine.low %v10330_v16, %v10323_v37  ;;  %v13286_v52 = vld [vmem:[#allocation155_spill] sm:$0xff]  ;;  %v13287_v21 = vld [vmem:[#allocation50_spill] sm:$0xff] }
 0x34c   : > { %3865 = vrot.lane.b32.xlu1 %v2861_v5, %s13268_s3  ;;  %v4093_v27 = vsel %vm12819_vm15, %v4091_v34, %v3630_v29  ;;  %vm12828_vm15 = vcmask 392192   ;;  %v2972_v5 = vrot.slane %v2964_v19, %v9461_v60  ;;  %v2867_v33 = vcombine.high %v2827_v43, %v2859_v28  ;;  %v13283_v34 = vld [vmem:[#allocation215_spill] sm:$0xff]  ;;  %v13284_v29 = vld [vmem:[#allocation117_spill] sm:$0xff]  ;;  %v13289_v19 = vld [vmem:[#allocation92_spill] sm:$0xff] }
 0x34d   : > { %3861 = vrot.lane.b32.xlu0 %v2860_v48, %s13271_s24  ;;  %v4095_v54 = vsel %vm12822_vm14, %v4093_v27, %v3634_v0  ;;  %vm12831_vm14 = vcmask 408576   ;;  %v2864_v0 = vcombine.low %v2820_v25, %v2852_v22  ;;  %v2940_v38 = vrot.slane %v2932_v62, %v9461_v60  ;;  %v13293_v15 = vld [vmem:[#allocation63_spill] sm:$0xff] }
 0x34e   : > { %v3642_v51 = vpop.permute.xlu1 %3641  ;;  %v10335_v48 = vsel %vm12890_vm0, %v13284_v29, %v13283_v34  ;;  %v2980_v22 = vcombine.low %v2915_v11, %v2931_v46  ;;  %v1272_v36 = vsel %vm12890_vm0, %v13287_v21, %v13286_v52  ;;  %v3004_v25 = vcombine.low %v10276_v6, %v10303_v31  ;;  %v13298_v29 = vld [vmem:[#allocation76_spill] sm:$0xff] }
 0x34f   : > { %v3638_v2 = vpop.permute.xlu0 %3637  ;;  %v2997_v42 = vcombine.high %v2940_v38, %v2972_v5  ;;  %v2996_v7 = vcombine.low %v2940_v38, %v2972_v5  ;;  %v3060_v44 = vrot.slane %v3052_v30, %v9447_v17  ;;  %v3021_v24 = vcombine.high %v1272_v36, %v10309_v20 }
 0x350   : > { %3873 = vrot.lane.b32.xlu1 %v2863_v57, %s13272_s23  ;;  %v4097_v35 = vsel %vm12825_vm12, %v4095_v54, %v3638_v2  ;;  %vm12834_vm12 = vcmask 424960   ;;  %v2866_v57 = vcombine.low %v2827_v43, %v2859_v28  ;;  %v1320_v54 = vsel %vm12890_vm0, %v13289_v19, %v13288_v63  ;;  %v13302_v19 = vld [vmem:[#allocation192_spill] sm:$0xff] }
 0x351   : > { %3869 = vrot.lane.b32.xlu0 %v2862_v58, %s13273_s22  ;;  %v4099_v12 = vsel %vm12828_vm15, %v4097_v35, %v3642_v51  ;;  %vm12837_vm15 = vcmask 441344   ;;  %v2947_v2 = vrot.slane %v2933_v40, %v9461_v60  ;;  %v2948_v58 = vcombine.low %v10294_v26, %v10317_v59 }
 0x352   : > { %v3650_v49 = vpop.permute.xlu1 %3649  ;;  %v3020_v28 = vcombine.low %v1272_v36, %v10309_v20  ;;  %v3036_v35 = vcombine.low %v1320_v54, %v10335_v48  ;;  %v3037_v34 = vcombine.high %v1320_v54, %v10335_v48  ;;  %v13303_v54 = vld [vmem:[#allocation91_spill] sm:$0xff] }
 0x353   : > { %v3646_v45 = vpop.permute.xlu0 %3645  ;;  %v2999_v41 = vcombine.high %v2947_v2, %v2979_v32  ;;  %v2956_v5 = vrot.slane %v2948_v58, %v9461_v60  ;;  %v2998_v3 = vcombine.low %v2947_v2, %v2979_v32  ;;  %v10419_v2 = vsel %vm12890_vm0, %v13303_v54, %v13302_v19  ;;  %v13304_v58 = vld [vmem:[#allocation204_spill] sm:$0xff]  ;;  %v13319_v19 = vld [vmem:[#allocation66_spill] sm:$0xff] }
 0x354   : > { %3881 = vrot.lane.b32.xlu1 %v2865_v14, %s13278_s17  ;;  %v4101_v53 = vsel %vm12831_vm14, %v4099_v12, %v3646_v45  ;;  %vm12840_vm14 = vcmask 457728   ;;  %v2988_v14 = vrot.slane %v2980_v22, %v9461_v60  ;;  %v10365_v12 = vsel %vm12890_vm0, %v13293_v15, %v13292_v8 }
 0x355   : > { %3877 = vrot.lane.b32.xlu0 %v2864_v0, %s13280_s16  ;;  %v4103_v27 = vsel %vm12834_vm12, %v4101_v53, %v3650_v49  ;;  %vm12843_vm12 = vcmask 474112   ;;  %v2981_v49 = vcombine.high %v2915_v11, %v2931_v46  ;;  %v3005_v46 = vcombine.high %v10276_v6, %v10303_v31 }
 0x356   : > { %v3658_v23 = vpop.permute.xlu1 %3657  ;;  %v10370_v45 = vrot.slane %v3004_v25, %v9447_v17  ;;  %v2949_v0 = vcombine.high %v10294_v26, %v10317_v59  ;;  %v3028_v53 = vrot.slane %v3020_v28, %v9447_v17  ;;  %v3053_v6 = vcombine.high %v10330_v16, %v10323_v37  ;;  %v13297_v16 = vld [vmem:[#allocation179_spill] sm:$0xff] }
 0x357   : > { %v3654_v51 = vpop.permute.xlu0 %3653  ;;  %v3001_v38 = vcombine.high %v2956_v5, %v2988_v14  ;;  %v10385_v61 = vrot.slane %v3005_v46, %v9447_v17  ;;  %v10394_v32 = vsel %vm12890_vm0, %v13298_v29, %v13297_v16  ;;  %v3051_v25 = vrot.slane %v3037_v34, %v9447_v17  ;;  %v13305_v28 = vld [vmem:[#allocation103_spill] sm:$0xff] }
 0x358   : > { %3889 = vrot.lane.b32.xlu1 %v2867_v33, %s13285_s15  ;;  %v4105_v55 = vsel %vm12837_vm15, %v4103_v27, %v3654_v51  ;;  %vm12852_vm15 = vcmask 490496   ;;  %v2995_v33 = vrot.slane %v2981_v49, %v9461_v60  ;;  %v2963_v37 = vrot.slane %v2949_v0, %v9461_v60  ;;  %v13299_v27 = vld [vmem:[#allocation128_spill] sm:$0xff]  ;;  %v13306_v49 = vld [vmem:[#allocation218_spill] sm:$0xff]  ;;  %v13310_v0 = vld [vmem:[#allocation49_spill] sm:$0xff] }
 0x359   : > { %3885 = vrot.lane.b32.xlu0 %v2866_v57, %s13290_s13  ;;  %v4107_v1 = vsel %vm12840_vm14, %v4105_v55, %v3658_v23  ;;  %vm12849_vm14 = vcmask 506880   ;;  %v3044_v23 = vrot.slane %v3036_v35, %v9447_v17  ;;  %v3068_v22 = vcombine.low %v10370_v45, %v3028_v53 }
 0x35a   : > { %v3666_v39 = vpop.permute.xlu1 %3665  ;;  %v10400_v51 = vsel %vm12890_vm0, %v13299_v27, %v9937_v47  ;;  %v10404_v20 = vrot.slane %v3053_v6, %v9447_v17  ;;  %v3000_v55 = vcombine.low %v2956_v5, %v2988_v14  ;;  %v3003_v21 = vcombine.high %v2963_v37, %v2995_v33  ;;  %v13307_v14 = vld [vmem:[#allocation116_spill] sm:$0xff] }
 0x35b   : > { %v3662_v13 = vpop.permute.xlu0 %3661  ;;  %v3100_v40 = vcombine.low %v3044_v23, %v3060_v44  ;;  %v3101_v48 = vcombine.high %v3044_v23, %v3060_v44  ;;  %v10410_v47 = vrot.slane %v3021_v24, %v9447_v17  ;;  %v3069_v36 = vcombine.high %v10370_v45, %v3028_v53  ;;  %v13309_v45 = vld [vmem:[#allocation154_spill] sm:$0xff] }
 0x35c   : > { %3897 = vrot.lane.b32.xlu1 %v2997_v42, %s13291_s12  ;;  %v4109_v62 = vsel %vm12843_vm12, %v4107_v1, %v3662_v13  ;;  %vm12883_vm12 = vcmask 523264   ;;  %v3076_v63 = vrot.slane %v3068_v22, %v9461_v60  ;;  %v10424_v35 = vsel %vm12890_vm0, %v13305_v28, %v13304_v58 }
 0x35d   : > { %3893 = vrot.lane.b32.xlu0 %v2996_v7, %s13294_s5  ;;  %v4111_v31 = vsel %vm12852_vm15, %v4109_v62, %v3666_v39  ;;  %v3108_v39 = vrot.slane %v3100_v40, %v9461_v60  ;;  %vm12861_vm15 = vcmask 572416   ;;  %v10429_v1 = vsel %vm12890_vm0, %v13307_v14, %v13306_v49 }
 0x35e   : > { %v3674_v43 = vpop.permute.xlu1 %3673  ;;  %v3188_v13 = vcombine.low %v10424_v35, %v10400_v51  ;;  %v3116_v7 = vcombine.low %v3051_v25, %v10404_v20  ;;  %v1273_v5 = vsel %vm12890_vm0, %v13310_v0, %v13309_v45  ;;  %v3140_v53 = vcombine.low %v10253_v18, %v10365_v12  ;;  %v13323_v0 = vld [vmem:[#allocation182_spill] sm:$0xff] }
 0x35f   : > { %v3670_v11 = vpop.permute.xlu0 %3669  ;;  %v3133_v46 = vcombine.high %v3076_v63, %v3108_v39  ;;  %v3172_v23 = vcombine.low %v10419_v2, %v10429_v1  ;;  %v3083_v6 = vrot.slane %v3069_v36, %v9461_v60  ;;  %v3141_v16 = vcombine.high %v10253_v18, %v10365_v12 }
 0x360   : > { %3905 = vrot.lane.b32.xlu1 %v2999_v41, %s13295_s2  ;;  %v4113_v26 = vsel %vm12849_vm14, %v4111_v31, %v3670_v11  ;;  %vm12858_vm14 = vcmask 556032   ;;  %v3115_v41 = vrot.slane %v3101_v48, %v9461_v60  ;;  %v3084_v31 = vcombine.low %v10385_v61, %v10410_v47 }
 0x361   : > { %3901 = vrot.lane.b32.xlu0 %v2998_v3, %s13296_s30  ;;  %v4115_v57 = vsel %vm12883_vm12, %v4113_v26, %v3674_v43  ;;  %v3002_v43 = vcombine.low %v2963_v37, %v2995_v33  ;;  %v3156_v33 = vcombine.low %v1273_v5, %v10394_v32  ;;  %v3196_v11 = vrot.slane %v3188_v13, %v9447_v17 }
 0x362   : > { %v3682_v59 = vpop.permute.xlu1 %3681  ;;  %v3117_v3 = vcombine.high %v3051_v25, %v10404_v20  ;;  %v3135_v37 = vcombine.high %v3083_v6, %v3115_v41  ;;  %v10459_v29 = vrot.slane %v3140_v53, %v9447_v17  ;;  %v3180_v22 = vrot.slane %v3172_v23, %v9447_v17  ;;  %v13325_v23 = vld [vmem:[#allocation207_spill] sm:$0xff] }
 0x363   : > { %v3678_v30 = vpop.permute.xlu0 %3677  ;;  %v3157_v27 = vcombine.high %v1273_v5, %v10394_v32  ;;  %v3164_v20 = vrot.slane %v3156_v33, %v9447_v17  ;;  %v3085_v48 = vcombine.high %v10385_v61, %v10410_v47  ;;  %v3189_v18 = vcombine.high %v10424_v35, %v10400_v51  ;;  %v13315_v61 = vld [vmem:[#allocation144_spill] sm:$0xff]  ;;  %v13316_v47 = vld [vmem:[#allocation38_spill] sm:$0xff]  ;;  %v13324_v5 = vld [vmem:[#allocation79_spill] sm:$0xff] }
 0x364   : > { %3913 = vrot.lane.b32.xlu1 %v3001_v38, %s13300_s29  ;;  %v4117_v42 = vsel %vm12855_vm11, %v4115_v57, %v3678_v30  ;;  %vm12864_vm11 = vcmask 588800   ;;  %v3124_v38 = vrot.slane %v3116_v7, %v9461_v60  ;;  %v3092_v57 = vrot.slane %v3084_v31, %v9461_v60  ;;  %v13326_v33 = vld [vmem:[#allocation106_spill] sm:$0xff]  ;;  %v13327_v31 = vld [vmem:[#allocation217_spill] sm:$0xff] }
 0x365   : > { %3909 = vrot.lane.b32.xlu0 %v3000_v55, %s13301_s18  ;;  %v4119_v44 = vsel %vm12858_vm14, %v4117_v42, %v3682_v59  ;;  %vm12865_vm14 = vcmask 605184   ;;  %v3132_v59 = vcombine.low %v3076_v63, %v3108_v39  ;;  %v3236_v12 = vcombine.low %v3180_v22, %v3196_v11  ;;  %v13318_v63 = vld [vmem:[#allocation170_spill] sm:$0xff] }
 0x366   : > { %v3690_v52 = vpop.permute.xlu1 %3689  ;;  %v3134_v39 = vcombine.low %v3083_v6, %v3115_v41  ;;  %v3131_v42 = vrot.slane %v3117_v3, %v9461_v60  ;;  %v10477_v36 = vsel %vm12890_vm0, %v13316_v47, %v13315_v61  ;;  %v10480_v25 = vrot.slane %v3141_v16, %v9447_v17 }
 0x367   : > { %v3686_v62 = vpop.permute.xlu0 %3685  ;;  %v3173_v51 = vcombine.high %v10419_v2, %v10429_v1  ;;  %v10488_v54 = vsel %vm12890_vm0, %v13319_v19, %v13318_v63  ;;  %v10491_v58 = vrot.slane %v3157_v27, %v9447_v17  ;;  %v3204_v28 = vcombine.low %v10459_v29, %v3164_v20 }
 0x368   : > { %3921 = vrot.lane.b32.xlu1 %v3003_v21, %s13308_s27  ;;  %v4121_v8 = vsel %vm12861_vm15, %v4119_v44, %v3686_v62  ;;  %vm12867_vm15 = vcmask 621568   ;;  %v3137_v21 = vcombine.high %v3092_v57, %v3124_v38  ;;  %v3099_v35 = vrot.slane %v3085_v48, %v9461_v60  ;;  %v13332_v48 = vld [vmem:[#allocation195_spill] sm:$0xff] }
 0x369   : > { %3917 = vrot.lane.b32.xlu0 %v3002_v43, %s13311_s28  ;;  %v4123_v40 = vsel %vm12864_vm11, %v4121_v8, %v3690_v52  ;;  %vm12869_vm11 = vcmask 637952   ;;  %v3203_v49 = vrot.slane %v3189_v18, %v9447_v17  ;;  %v3237_v2 = vcombine.high %v3180_v22, %v3196_v11  ;;  %v13328_v11 = vld [vmem:[#allocation119_spill] sm:$0xff]  ;;  %v13331_v22 = vld [vmem:[#allocation52_spill] sm:$0xff] }
 0x36a   : > { %v3698_v15 = vpop.permute.xlu1 %3697  ;;  %v3136_v13 = vcombine.low %v3092_v57, %v3124_v38  ;;  %v3244_v7 = vrot.slane %v3236_v12, %v9461_v60  ;;  %v3139_v43 = vcombine.high %v3099_v35, %v3131_v42  ;;  %v3205_v41 = vcombine.high %v10459_v29, %v3164_v20  ;;  %v13330_v29 = vld [vmem:[#allocation157_spill] sm:$0xff]  ;;  %v13333_v57 = vld [vmem:[#allocation94_spill] sm:$0xff] }
 0x36b   : > { %v3694_v26 = vpop.permute.xlu0 %3693  ;;  %v3187_v8 = vrot.slane %v3173_v51, %v9447_v17  ;;  %v3212_v45 = vrot.slane %v3204_v28, %v9461_v60  ;;  %v10512_v53 = vsel %vm12890_vm0, %v13324_v5, %v13323_v0  ;;  %v10517_v6 = vsel %vm12890_vm0, %v13326_v33, %v13325_v23  ;;  %v13336_v28 = vld [vmem:[#allocation169_spill] sm:$0xff]  ;;  %v13342_v33 = vld [vmem:[#allocation78_spill] sm:$0xff] }
 0x36c   : > { %3929 = vrot.lane.b32.xlu1 %v3133_v46, %s13312_s4  ;;  %v4125_v24 = vsel %vm12865_vm14, %v4123_v40, %v3694_v26  ;;  %vm12870_vm14 = vcmask 654336   ;;  %v3251_v3 = vrot.slane %v3237_v2, %v9461_v60  ;;  %v3138_v38 = vcombine.low %v3099_v35, %v3131_v42  ;;  %v13337_v35 = vld [vmem:[#allocation65_spill] sm:$0xff] }
 0x36d   : > { %3925 = vrot.lane.b32.xlu0 %v3132_v59, %s13313_s25  ;;  %v4127_v30 = vsel %vm12867_vm15, %v4125_v24, %v3698_v15  ;;  %vm12872_vm15 = vcmask 670720   ;;  %v13321_v15 = vld [vmem:[#allocation131_spill] sm:$0xff]  ;;  %v3252_v40 = vcombine.low %v3187_v8, %v3203_v49  ;;  %v3269_v16 = vcombine.high %v3212_v45, %v3244_v7  ;;  %v13341_v23 = vld [vmem:[#allocation181_spill] sm:$0xff] }
 0x36e   : > { %v3706_v34 = vpop.permute.xlu1 %3705  ;;  %v10505_v46 = vsel %vm12890_vm0, %v13321_v15, %v9961_v4  ;;  %v10522_v4 = vsel %vm12890_vm0, %v13328_v11, %v13327_v31  ;;  %v1274_v27 = vsel %vm12890_vm0, %v13331_v22, %v13330_v29  ;;  %v3276_v20 = vcombine.low %v10477_v36, %v10488_v54  ;;  %v13343_v11 = vld [vmem:[#allocation130_spill] sm:$0xff] }
 0x36f   : > { %v3702_v55 = vpop.permute.xlu0 %3701  ;;  %v3324_v24 = vcombine.low %v10517_v6, %v10505_v46  ;;  %v1322_v18 = vsel %vm12890_vm0, %v13333_v57, %v13332_v48  ;;  %v3219_v12 = vrot.slane %v3205_v41, %v9461_v60  ;;  %v3253_v42 = vcombine.high %v3187_v8, %v3203_v49  ;;  %v13348_v57 = vld [vmem:[#allocation206_spill] sm:$0xff] }
 0x370   : > { %3937 = vrot.lane.b32.xlu1 %v3135_v37, %s13314_s0  ;;  %v4129_v32 = vsel %vm12869_vm11, %v4127_v30, %v3702_v55  ;;  %vm12874_vm11 = vcmask 687104   ;;  %v3220_v30 = vcombine.low %v10480_v25, %v10491_v58  ;;  %v3292_v55 = vcombine.low %v1274_v27, %v10512_v53 }
 0x371   : > { %3933 = vrot.lane.b32.xlu0 %v3134_v39, %s13317_s14  ;;  %v4131_v14 = vsel %vm12870_vm14, %v4129_v32, %v3706_v34  ;;  %vm12877_vm14 = vcmask 703488   ;;  %v3308_v39 = vcombine.low %v1322_v18, %v10522_v4  ;;  %v3260_v32 = vrot.slane %v3252_v40, %v9461_v60 }
 0x372   : > { %v3714_v52 = vpop.permute.xlu1 %3713  ;;  %v3268_v61 = vcombine.low %v3212_v45, %v3244_v7  ;;  %v3332_v47 = vrot.slane %v3324_v24, %v9447_v17  ;;  %v3271_v19 = vcombine.high %v3219_v12, %v3251_v3  ;;  %v10552_v2 = vsel %vm12890_vm0, %v13337_v35, %v13336_v28  ;;  %v13353_v28 = vld [vmem:[#allocation143_spill] sm:$0xff]  ;;  %v13354_v35 = vld [vmem:[#allocation37_spill] sm:$0xff] }
 0x373   : > { %v3710_v1 = vpop.permute.xlu0 %3709  ;;  %v3277_v49 = vcombine.high %v10477_v36, %v10488_v54  ;;  %v3300_v7 = vrot.slane %v3292_v55, %v9447_v17  ;;  %v3325_v36 = vcombine.high %v10517_v6, %v10505_v46  ;;  %v3270_v41 = vcombine.low %v3219_v12, %v3251_v3  ;;  %v13351_v55 = vld [vmem:[#allocation118_spill] sm:$0xff] }
 0x374   : > { %3945 = vrot.lane.b32.xlu1 %v3137_v21, %s13320_s10  ;;  %v4133_v44 = vsel %vm12872_vm15, %v4131_v14, %v3710_v1  ;;  %vm12879_vm15 = vcmask 719872   ;;  %v10557_v14 = vrot.slane %v3276_v20, %v9447_v17  ;;  %v3221_v1 = vcombine.high %v10480_v25, %v10491_v58  ;;  %v13347_v20 = vld [vmem:[#allocation93_spill] sm:$0xff] }
 0x375   : > { %3941 = vrot.lane.b32.xlu0 %v3136_v13, %s13322_s20  ;;  %v4135_v26 = vsel %vm12874_vm11, %v4133_v44, %v3714_v52  ;;  %vm12881_vm11 = vcmask 736256   ;;  %v3228_v13 = vrot.slane %v3220_v30, %v9461_v60  ;;  %v3316_v44 = vrot.slane %v3308_v39, %v9447_v17  ;;  %v13350_v30 = vld [vmem:[#allocation219_spill] sm:$0xff] }
 0x376   : > { %v3722_v62 = vpop.permute.xlu1 %3721  ;;  %v10572_v45 = vrot.slane %v3277_v49, %v9447_v17  ;;  %v3293_v0 = vcombine.high %v1274_v27, %v10512_v53  ;;  %v3309_v5 = vcombine.high %v1322_v18, %v10522_v4  ;;  %vm12888_vm12 = vcmask 801792   ;;  %v13346_v27 = vld [vmem:[#allocation194_spill] sm:$0xff]  ;;  %v13349_v18 = vld [vmem:[#allocation105_spill] sm:$0xff] }
 0x377   : > { %v3718_v59 = vpop.permute.xlu0 %3717  ;;  %v3372_v8 = vcombine.low %v3316_v44, %v3332_v47  ;;  %v3273_v15 = vcombine.high %v3228_v13, %v3260_v32  ;;  %v3235_v46 = vrot.slane %v3221_v1, %v9461_v60  ;;  %v10581_v6 = vsel %vm12890_vm0, %v13342_v33, %v13341_v23  ;;  %v13356_v1 = vld [vmem:[#allocation51_spill] sm:$0xff] }
 0x378   : > { %3953 = vrot.lane.b32.xlu1 %v3139_v43, %s13329_s8  ;;  %v4137_v34 = vsel %vm12877_vm14, %v4135_v26, %v3718_v59  ;;  %vm12887_vm14 = vcmask 752640   ;;  %v3340_v31 = vcombine.low %v10557_v14, %v3300_v7  ;;  %v10587_v3 = vsel %vm12890_vm0, %v13343_v11, %v9953_v56 }
 0x379   : > { %3949 = vrot.lane.b32.xlu0 %v3138_v38, %s13334_s7  ;;  %v4139_v52 = vsel %vm12879_vm15, %v4137_v34, %v3722_v62  ;;  %vm12886_vm15 = vcmask 769024   ;;  %v3267_v62 = vrot.slane %v3253_v42, %v9461_v60  ;;  %v10591_v53 = vrot.slane %v3325_v36, %v9447_v17 }
 0x37a   : > { %v3730_v37 = vpop.permute.xlu1 %3729  ;;  %v3373_v4 = vcombine.high %v3316_v44, %v3332_v47  ;;  %v3272_v59 = vcombine.low %v3228_v13, %v3260_v32  ;;  %v3380_v38 = vrot.slane %v3372_v8, %v9461_v60  ;;  %v10597_v56 = vrot.slane %v3293_v0, %v9447_v17 }
 0x37b   : > { %v3726_v21 = vpop.permute.xlu0 %3725  ;;  %v3323_v29 = vrot.slane %v3309_v5, %v9447_v17  ;;  %v3348_v22 = vrot.slane %v3340_v31, %v9461_v60  ;;  %v10606_v48 = vsel %vm12890_vm0, %v13347_v20, %v13346_v27  ;;  %v1339_v12 = vsel %vm12890_vm0, %v13349_v18, %v13348_v57 }
 0x37c   : > { %3961 = vrot.lane.b32.xlu1 %v3269_v16, %s13335_s11  ;;  %v4141_v51 = vsel %vm12881_vm11, %v4139_v52, %v3726_v21  ;;  %vm4146_vm11 = vcmask 785408   ;;  %v3341_v16 = vcombine.high %v10557_v14, %v3300_v7  ;;  %v10614_v39 = vsel %vm12890_vm0, %v13351_v55, %v13350_v30  ;;  %v13355_v14 = vld [vmem:[#allocation156_spill] sm:$0xff] }
 0x37d   : > { %3957 = vrot.lane.b32.xlu0 %v3268_v61, %s13338_s21  ;;  %v4143_v54 = vsel %vm12887_vm14, %v4141_v51, %v3730_v37  ;;  %v3275_v37 = vcombine.high %v3235_v46, %v3267_v62  ;;  %vm12891_vm14 = vcmask 834560   ;;  %v3460_v42 = vcombine.low %v1339_v12, %v10587_v3 }
 0x37e   : > { %v3738_v63 = vpop.permute.xlu1 %3737  ;;  %v3388_v32 = vcombine.low %v3323_v29, %v10591_v53  ;;  %v3274_v61 = vcombine.low %v3235_v46, %v3267_v62  ;;  %v3387_v47 = vrot.slane %v3373_v4, %v9461_v60  ;;  %v10625_v49 = vsel %vm12890_vm0, %v13354_v35, %v13353_v28 }
 0x37f   : > { %v3734_v43 = vpop.permute.xlu0 %3733  ;;  %v1275_v13 = vsel %vm12890_vm0, %v13356_v1, %v13355_v14  ;;  %v3444_v7 = vcombine.low %v10606_v48, %v10614_v39  ;;  %v3412_v44 = vcombine.low %v10625_v49, %v10552_v2  ;;  %v3355_v36 = vrot.slane %v3341_v16, %v9461_v60 }
 0x380   : > { %3969 = vrot.lane.b32.xlu1 %v3271_v19, %s13339_s6  ;;  %v4145_v25 = vsel %vm12886_vm15, %v4143_v54, %v3734_v43  ;;  %vm12889_vm15 = vcmask 818176   ;;  %v3405_v19 = vcombine.high %v3348_v22, %v3380_v38  ;;  %v3428_v62 = vcombine.low %v1275_v13, %v10581_v6  ;;  %s13358_s6 = smov 98  }
 0x381   : > { %3965 = vrot.lane.b32.xlu0 %v3270_v41, %s13340_s1  ;;  %v4147_v40 = vsel %vm4146_vm11, %v4145_v25, %v3738_v63  ;;  %v3356_v54 = vcombine.low %v10572_v45, %v10597_v56  ;;  %v3468_v43 = vrot.slane %v3460_v42, %v9447_v17  ;;  %v3389_v41 = vcombine.high %v3323_v29, %v10591_v53 }
 0x382   : > { %v3746_v58 = vpop.permute.xlu1 %3745  ;;  %vm12895_vm0 = vcmask 883712   ;;  %v3407_v46 = vcombine.high %v3355_v36, %v3387_v47  ;;  %v3452_v23 = vrot.slane %v3444_v7, %v9447_v17  ;;  %v3420_v33 = vrot.slane %v3412_v44, %v9447_v17 }
 0x383   : > { %v3742_v26 = vpop.permute.xlu0 %3741  ;;  %v3436_v31 = vrot.slane %v3428_v62, %v9447_v17  ;;  %v3357_v11 = vcombine.high %v10572_v45, %v10597_v56  ;;  %v3364_v53 = vrot.slane %v3356_v54, %v9461_v60  ;;  %v3461_v4 = vcombine.high %v1339_v12, %v10587_v3 }
 0x384   : > { %3977 = vrot.lane.b32.xlu1 %v3273_v15, %s13344_s19  ;;  %v4149_v24 = vsel %vm12888_vm12, %v4147_v40, %v3742_v26  ;;  %s13352_s19 = smov 94   ;;  %vm12893_vm12 = vcmask 850944   ;;  %v3396_v15 = vrot.slane %v3388_v32, %v9461_v60  ;;  %v3508_v40 = vcombine.low %v3452_v23, %v3468_v43 }
 0x385   : > { %3973 = vrot.lane.b32.xlu0 %v3272_v59, %s13345_s9  ;;  %v4151_v52 = vsel %vm12889_vm15, %v4149_v24, %v3746_v58  ;;  %vm12892_vm15 = vcmask 867328   ;;  %v3404_v58 = vcombine.low %v3348_v22, %v3380_v38  ;;  %v3406_v38 = vcombine.low %v3355_v36, %v3387_v47  ;;  %s13370_s9 = sshll.u32 %s8860_s26, 5  ;;  %s13377_s26 = smov 126  }
 0x386   : > { %v3754_v34 = vpop.permute.xlu1 %3753  ;;  %v3403_v24 = vrot.slane %v3389_v41, %v9461_v60  ;;  %v3409_v16 = vcombine.high %v3364_v53, %v3396_v15  ;;  %v3445_v45 = vcombine.high %v10606_v48, %v10614_v39  ;;  %v3413_v3 = vcombine.high %v10625_v49, %v10552_v2  ;;  %s10694_s11 = scalar_lea.vmem [#allocation5], %s13370_s9  ;;  %s13376_s9 = smov 120  }
 0x387   : > { %v3750_v21 = vpop.permute.xlu0 %3749  ;;  %v3429_v56 = vcombine.high %v1275_v13, %v10581_v6  ;;  %v3476_v29 = vcombine.low %v3420_v33, %v3436_v31  ;;  %v3371_v22 = vrot.slane %v3357_v11, %v9461_v60  ;;  %v3475_v27 = vrot.slane %v3461_v4, %v9447_v17  ;;  %13371 = sst [smem:[#allocation220_spill]] %s10694_s11  ;;  %v13375_v11 = vld [vmem:[#allocation20_spill] sm:$0xff] }
 0x388   : > { %3985 = vrot.lane.b32.xlu1 %v3275_v37, %s13352_s19  ;;  %v4153_v51 = vsel %vm12891_vm14, %v4151_v52, %v3750_v21  ;;  %s13357_s19 = smov 92   ;;  %vm12894_vm14 = vcmask 900096   ;;  %v3509_v20 = vcombine.high %v3452_v23, %v3468_v43  ;;  %v3408_v48 = vcombine.low %v3364_v53, %v3396_v15 }
 0x389   : > { %3981 = vrot.lane.b32.xlu0 %v3274_v61, %s13357_s19  ;;  %v4155_v8 = vsel %vm12893_vm12, %v4153_v51, %v3754_v34  ;;  %s13359_s19 = smov 96   ;;  %vm12896_vm12 = vcmask 932864   ;;  %v3516_v12 = vrot.slane %v3508_v40, %v9461_v60  ;;  %v3411_v2 = vcombine.high %v3371_v22, %v3403_v24 }
 0x38a   : > { %v3762_v63 = vpop.permute.xlu1 %3761  ;;  %v3459_v6 = vrot.slane %v3445_v45, %v9447_v17  ;;  %v3443_v39 = vrot.slane %v3429_v56, %v9447_v17  ;;  %v3477_v42 = vcombine.high %v3420_v33, %v3436_v31  ;;  %v3484_v32 = vrot.slane %v3476_v29, %v9461_v60  ;;  %v13374_v31 = vld [vmem:[#allocation19_spill] sm:$0xff] }
 0x38b   : > { %v3758_v25 = vpop.permute.xlu0 %3757  ;;  %v3427_v52 = vrot.slane %v3413_v3, %v9447_v17  ;;  %v3410_v51 = vcombine.low %v3371_v22, %v3403_v24  ;;  %v10704_v53 = vadd.f32 %v13375_v11, %v13374_v31 }
 0x38c   : > { %3993 = vrot.lane.b32.xlu1 %v3405_v19, %s13358_s6  ;;  %v4157_v0 = vsel %vm12892_vm15, %v4155_v8, %v3758_v25  ;;  %s13360_s6 = smov 102   ;;  %vm12897_vm15 = vcmask 916480   ;;  %v3524_v21 = vcombine.low %v3459_v6, %v3475_v27  ;;  %v3541_v35 = vcombine.high %v3484_v32, %v3516_v12 }
 0x38d   : > { %3989 = vrot.lane.b32.xlu0 %v3404_v58, %s13359_s19  ;;  %v4159_v26 = vsel %vm12895_vm0, %v4157_v0, %v3762_v63  ;;  %s13361_s19 = smov 100   ;;  %vm12898_vm0 = vcmask 965632   ;;  %v3523_v63 = vrot.slane %v3509_v20, %v9461_v60  ;;  %v3491_v49 = vrot.slane %v3477_v42, %v9461_v60 }
 0x38e   : > { %v3770_v5 = vpop.permute.xlu1 %3769  ;;  %v3492_v14 = vcombine.low %v3427_v52, %v3443_v39  ;;  %v3525_v1 = vcombine.high %v3459_v6, %v3475_v27  ;;  %v3540_v44 = vcombine.low %v3484_v32, %v3516_v12  ;;  %v3532_v62 = vrot.slane %v3524_v21, %v9461_v60 }
 0x38f   : > { %v3766_v59 = vpop.permute.xlu0 %3765  ;;  %v3543_v43 = vcombine.high %v3491_v49, %v3523_v63  ;;  %v3493_v41 = vcombine.high %v3427_v52, %v3443_v39  ;;  %v3542_v15 = vcombine.low %v3491_v49, %v3523_v63 }
 0x390   : > { %4001 = vrot.lane.b32.xlu1 %v3407_v46, %s13360_s6  ;;  %v4161_v34 = vsel %vm12894_vm14, %v4159_v26, %v3766_v59  ;;  %s13362_s6 = smov 106   ;;  %vm12899_vm14 = vcmask 949248   ;;  %v3500_v8 = vrot.slane %v3492_v14, %v9461_v60  ;;  %v3539_v0 = vrot.slane %v3525_v1, %v9461_v60  ;;  %v13387_v1 = vld [vmem:[#allocation22_spill] sm:$0xff] }
 0x391   : > { %3997 = vrot.lane.b32.xlu0 %v3406_v38, %s13361_s19  ;;  %v4163_v57 = vsel %vm12897_vm15, %v4161_v34, %v3770_v5  ;;  %s13363_s19 = smov 104   ;;  %vm4172_vm15 = vcmask 998400   ;;  %v3507_v33 = vrot.slane %v3493_v41, %v9461_v60  ;;  %v13378_v34 = vld [vmem:[#allocation21_spill] sm:$0xff] }
 0x392   : > { %v3778_v37 = vpop.permute.xlu1 %3777  ;;  %v3545_v23 = vcombine.high %v3500_v8, %v3532_v62  ;;  %v3544_v26 = vcombine.low %v3500_v8, %v3532_v62 }
 0x393   : > { %v3774_v18 = vpop.permute.xlu0 %3773  ;;  %v3547_v24 = vcombine.high %v3507_v33, %v3539_v0  ;;  %v3546_v3 = vcombine.low %v3507_v33, %v3539_v0 }
 0x394   : > { %4009 = vrot.lane.b32.xlu1 %v3409_v16, %s13362_s6  ;;  %v4165_v30 = vsel %vm12896_vm12, %v4163_v57, %v3774_v18  ;;  %s13364_s6 = smov 110   ;;  %vm4170_vm12 = vcmask 982016  }
 0x395   : > { %4005 = vrot.lane.b32.xlu0 %v3408_v48, %s13363_s19  ;;  %v4167_v61 = vsel %vm12899_vm14, %v4165_v30, %v3778_v37  ;;  %s13365_s19 = smov 108   ;;  %vm4176_vm14 = vcmask 1031168   ;;  %v4244_v37 = vrot.slane %v10704_v53, %v13378_v34 }
 0x396   : > { %v3786_v55 = vpop.permute.xlu1 %3785 }
 0x397   : > { %v3782_v47 = vpop.permute.xlu0 %3781 }
 0x398   : > { %4017 = vrot.lane.b32.xlu1 %v3411_v2, %s13364_s6  ;;  %v4169_v19 = vsel %vm12898_vm0, %v4167_v61, %v3782_v47  ;;  %s13366_s6 = smov 114   ;;  %vm4174_vm0 = vcmask 1014784  }
 0x399   : > { %4013 = vrot.lane.b32.xlu0 %v3410_v51, %s13365_s19  ;;  %v4171_v13 = vsel %vm4170_vm12, %v4169_v19, %v3786_v55  ;;  %s13367_s19 = smov 112  }
 0x39a   : > { %v3794_v28 = vpop.permute.xlu1 %3793 }
 0x39b   : > { %v3790_v7 = vpop.permute.xlu0 %3789 }
 0x39c   : > { %4025 = vrot.lane.b32.xlu1 %v3541_v35, %s13366_s6  ;;  %v4173_v36 = vsel %vm4172_vm15, %v4171_v13, %v3790_v7  ;;  %s13368_s6 = smov 118   ;;  %v4311_v13 = vrot.slane %v10704_v53, %v13387_v1 }
 0x39d   : > { %4021 = vrot.lane.b32.xlu0 %v3540_v44, %s13367_s19  ;;  %v4175_v25 = vsel %vm4174_vm0, %v4173_v36, %v3794_v28  ;;  %s13372_s19 = smov 116  }
 0x39e   : > { %v3802_v54 = vpop.permute.xlu1 %3801 }
 0x39f   : > { %v3798_v58 = vpop.permute.xlu0 %3797  ;;  %v4178_v4 = vsel %vm4052_vm1, %v2588_v10, %v3802_v54 }
 0x3a0   : > { %4033 = vrot.lane.b32.xlu1 %v3543_v43, %s13368_s6  ;;  %v10690_v5 = vsel %vm4176_vm14, %v4175_v25, %v3798_v58  ;;  %s13373_s6 = smov 122  }
 0x3a1   : > { %13369 = vst [vmem:[#allocation108_spill] sm:$0xff] %v10690_v5  ;;  %8247 = vst.msk [vmem:[%s10694_s11] sm:$0xff] %vm4082_vm13, %v10690_v5  ;;  %4029 = vrot.lane.b32.xlu0 %v3542_v15, %s13372_s19  ;;  %s13650_s19 = smov 12  }
 0x3a2   : > { %v3810_v46 = vpop.permute.xlu1 %3809 }
 0x3a3   : > { %v3806_v40 = vpop.permute.xlu0 %3805 }
 0x3a4   : > { %4041 = vrot.lane.b32.xlu1 %v3545_v23, %s13373_s6  ;;  %v4179_v59 = vsel %vm4054_vm2, %v4178_v4, %v3806_v40  ;;  %s13379_s6 = smov 124  }
 0x3a5   : > { %4037 = vrot.lane.b32.xlu0 %v3544_v26, %s13376_s9  ;;  %v4180_v16 = vsel %vm4056_vm3, %v4179_v59, %v3810_v46  ;;  %s13648_s9 = smov 6  }
 0x3a6   : > { %v3818_v38 = vpop.permute.xlu1 %3817 }
 0x3a7   : > { %v3814_v45 = vpop.permute.xlu0 %3813 }
 0x3a8   : > { %4049 = vrot.lane.b32.xlu1 %v3547_v24, %s13377_s26  ;;  %v4181_v50 = vsel %vm4058_vm4, %v4180_v16, %v3814_v45  ;;  %s13635_s26 = smov 2  }
 0x3a9   : > { %4045 = vrot.lane.b32.xlu0 %v3546_v3, %s13379_s6  ;;  %v4182_v10 = vsel %vm12902_vm5, %v4181_v50, %v3818_v38  ;;  %vm13381_vm5 = vcmask 195584   ;;  %s13647_s6 = smov 8  }
 0x3aa   : > { %v3826_v9 = vpop.permute.xlu1 %3825 }
 0x3ab   : > { %v3822_v56 = vpop.permute.xlu0 %3821 }
 0x3ac   : > { %4250 = vbcast.lane.b32.xlu1 %v4244_v37, 264  ;;  %v4183_v29 = vsel %vm12901_vm6, %v4182_v10, %v3822_v56  ;;  %vm13380_vm6 = vcmask 179200  }
 0x3ad   : > { %4246 = vbcast.lane.b32.xlu0 %v4244_v37, 256  ;;  %v4184_v27 = vsel %vm12904_vm7, %v4183_v29, %v3826_v9  ;;  %vm13383_vm7 = vcmask 228352  }
 0x3ae   : > { %v3834_v22 = vpop.permute.xlu1 %3833 }
 0x3af   : > { %v3830_v20 = vpop.permute.xlu0 %3829 }
 0x3b0   : > { %4258 = vbcast.lane.b32.xlu1 %v4244_v37, 280  ;;  %v4185_v57 = vsel %vm12903_vm8, %v4184_v27, %v3830_v20  ;;  %vm13382_vm8 = vcmask 211968  }
 0x3b1   : > { %4254 = vbcast.lane.b32.xlu0 %v4244_v37, 272  ;;  %v4186_v48 = vsel %vm12906_vm9, %v4185_v57, %v3834_v22  ;;  %vm13393_vm9 = vcmask 392192   ;;  %v13404_v22 = vld [vmem:[#allocation23_spill] sm:$0xff] }
 0x3b2   : > { %v3842_v18 = vpop.permute.xlu1 %3841  ;;  %v4378_v27 = vrot.slane %v10704_v53, %v13404_v22 }
 0x3b3   : > { %v3838_v12 = vpop.permute.xlu0 %3837 }
 0x3b4   : > { %4266 = vbcast.lane.b32.xlu1 %v4244_v37, 296  ;;  %v4187_v30 = vsel %vm12905_vm10, %v4186_v48, %v3838_v12  ;;  %vm13384_vm10 = vcmask 244736  }
 0x3b5   : > { %4262 = vbcast.lane.b32.xlu0 %v4244_v37, 288  ;;  %v4188_v2 = vsel %vm13380_vm6, %v4187_v30, %v3842_v18  ;;  %vm13386_vm6 = vcmask 293888  }
 0x3b6   : > { %v3850_v55 = vpop.permute.xlu1 %3849 }
 0x3b7   : > { %v3846_v6 = vpop.permute.xlu0 %3845 }
 0x3b8   : > { %4274 = vbcast.lane.b32.xlu1 %v4244_v37, 312  ;;  %v4189_v39 = vsel %vm13381_vm5, %v4188_v2, %v3846_v6  ;;  %vm13385_vm5 = vcmask 277504  }
 0x3b9   : > { %4270 = vbcast.lane.b32.xlu0 %v4244_v37, 304  ;;  %v4190_v32 = vsel %vm13382_vm8, %v4189_v39, %v3850_v55  ;;  %vm13389_vm8 = vcmask 326656  }
 0x3ba   : > { %v3858_v42 = vpop.permute.xlu1 %3857 }
 0x3bb   : > { %v3854_v52 = vpop.permute.xlu0 %3853 }
 0x3bc   : > { %4282 = vbcast.lane.b32.xlu1 %v4244_v37, 328  ;;  %v4191_v21 = vsel %vm13383_vm7, %v4190_v32, %v3854_v52  ;;  %vm13388_vm7 = vcmask 310272  }
 0x3bd   : > { %4278 = vbcast.lane.b32.xlu0 %v4244_v37, 320  ;;  %v4192_v47 = vsel %vm13384_vm10, %v4191_v21, %v3858_v42  ;;  %vm13390_vm10 = vcmask 343040  }
 0x3be   : > { %v3866_v61 = vpop.permute.xlu1 %3865 }
 0x3bf   : > { %v3862_v51 = vpop.permute.xlu0 %3861 }
 0x3c0   : > { %4290 = vbcast.lane.b32.xlu1 %v4244_v37, 344  ;;  %v4193_v63 = vsel %vm4082_vm13, %v4192_v47, %v3862_v51 }
 0x3c1   : > { %4286 = vbcast.lane.b32.xlu0 %v4244_v37, 336  ;;  %v4194_v28 = vsel %vm13385_vm5, %v4193_v63, %v3866_v61  ;;  %vm13391_vm5 = vcmask 359424  }
 0x3c2   : > { %v3874_v19 = vpop.permute.xlu1 %3873 }
 0x3c3   : > { %v3870_v35 = vpop.permute.xlu0 %3869 }
 0x3c4   : > { %4298 = vbcast.lane.b32.xlu1 %v4244_v37, 360  ;;  %v4195_v49 = vsel %vm13386_vm6, %v4194_v28, %v3870_v35  ;;  %vm13392_vm6 = vcmask 375808  }
 0x3c5   : > { %4294 = vbcast.lane.b32.xlu0 %v4244_v37, 352  ;;  %v4196_v7 = vsel %vm13388_vm7, %v4195_v49, %v3874_v19  ;;  %vm13394_vm7 = vcmask 408576  }
 0x3c6   : > { %v3882_v14 = vpop.permute.xlu1 %3881 }
 0x3c7   : > { %v3878_v44 = vpop.permute.xlu0 %3877 }
 0x3c8   : > { %4306 = vbcast.lane.b32.xlu1 %v4244_v37, 376  ;;  %v4197_v62 = vsel %vm13389_vm8, %v4196_v7, %v3878_v44  ;;  %vm13395_vm8 = vcmask 424960  }
 0x3c9   : > { %4302 = vbcast.lane.b32.xlu0 %v4244_v37, 368  ;;  %v4198_v54 = vsel %vm13390_vm10, %v4197_v62, %v3882_v14  ;;  %vm13396_vm10 = vcmask 441344  }
 0x3ca   : > { %v3890_v36 = vpop.permute.xlu1 %3889 }
 0x3cb   : > { %v3886_v43 = vpop.permute.xlu0 %3885 }
 0x3cc   : > { %4317 = vbcast.lane.b32.xlu1 %v4311_v13, 264  ;;  %v4199_v41 = vsel %vm13391_vm5, %v4198_v54, %v3886_v43  ;;  %vm13397_vm5 = vcmask 457728  }
 0x3cd   : > { %4313 = vbcast.lane.b32.xlu0 %v4311_v13, 256  ;;  %v4200_v25 = vsel %vm13392_vm6, %v4199_v41, %v3890_v36  ;;  %vm13399_vm6 = vcmask 490496  }
 0x3ce   : > { %v3898_v8 = vpop.permute.xlu1 %3897 }
 0x3cf   : > { %v3894_v58 = vpop.permute.xlu0 %3893 }
 0x3d0   : > { %4325 = vbcast.lane.b32.xlu1 %v4311_v13, 280  ;;  %v4201_v15 = vsel %vm13393_vm9, %v4200_v25, %v3894_v58  ;;  %vm13398_vm9 = vcmask 474112   ;;  %v13420_v25 = vld [vmem:[#allocation24_spill] sm:$0xff] }
 0x3d1   : > { %4321 = vbcast.lane.b32.xlu0 %v4311_v13, 272  ;;  %v4202_v46 = vsel %vm13394_vm7, %v4201_v15, %v3898_v8  ;;  %vm13400_vm7 = vcmask 506880   ;;  %v4445_v58 = vrot.slane %v10704_v53, %v13420_v25 }
 0x3d2   : > { %v3906_v0 = vpop.permute.xlu1 %3905 }
 0x3d3   : > { %v3902_v23 = vpop.permute.xlu0 %3901 }
 0x3d4   : > { %4333 = vbcast.lane.b32.xlu1 %v4311_v13, 296  ;;  %v4203_v33 = vsel %vm13395_vm8, %v4202_v46, %v3902_v23  ;;  %vm13401_vm8 = vcmask 523264  }
 0x3d5   : > { %4329 = vbcast.lane.b32.xlu0 %v4311_v13, 288  ;;  %v4204_v11 = vsel %vm13396_vm10, %v4203_v33, %v3906_v0  ;;  %vm13402_vm10 = vcmask 539648  }
 0x3d6   : > { %v3914_v31 = vpop.permute.xlu1 %3913 }
 0x3d7   : > { %v3910_v4 = vpop.permute.xlu0 %3909 }
 0x3d8   : > { %4341 = vbcast.lane.b32.xlu1 %v4311_v13, 312  ;;  %v4205_v40 = vsel %vm13397_vm5, %v4204_v11, %v3910_v4  ;;  %vm13403_vm5 = vcmask 556032  }
 0x3d9   : > { %4337 = vbcast.lane.b32.xlu0 %v4311_v13, 304  ;;  %v4206_v59 = vsel %vm13398_vm9, %v4205_v40, %v3914_v31  ;;  %vm13405_vm9 = vcmask 572416  }
 0x3da   : > { %v3922_v26 = vpop.permute.xlu1 %3921 }
 0x3db   : > { %v3918_v38 = vpop.permute.xlu0 %3917 }
 0x3dc   : > { %4349 = vbcast.lane.b32.xlu1 %v4311_v13, 328  ;;  %v4207_v24 = vsel %vm13399_vm6, %v4206_v59, %v3918_v38  ;;  %vm13406_vm6 = vcmask 588800  }
 0x3dd   : > { %4345 = vbcast.lane.b32.xlu0 %v4311_v13, 320  ;;  %v4208_v16 = vsel %vm13400_vm7, %v4207_v24, %v3922_v26  ;;  %vm13407_vm7 = vcmask 605184  }
 0x3de   : > { %v3930_v37 = vpop.permute.xlu1 %3929 }
 0x3df   : > { %v3926_v45 = vpop.permute.xlu0 %3925 }
 0x3e0   : > { %4357 = vbcast.lane.b32.xlu1 %v4311_v13, 344  ;;  %v4209_v3 = vsel %vm13401_vm8, %v4208_v16, %v3926_v45  ;;  %vm13408_vm8 = vcmask 621568  }
 0x3e1   : > { %4353 = vbcast.lane.b32.xlu0 %v4311_v13, 336  ;;  %v4210_v9 = vsel %vm13402_vm10, %v4209_v3, %v3930_v37  ;;  %vm13409_vm10 = vcmask 637952  }
 0x3e2   : > { %v3938_v50 = vpop.permute.xlu1 %3937 }
 0x3e3   : > { %v3934_v10 = vpop.permute.xlu0 %3933 }
 0x3e4   : > { %4365 = vbcast.lane.b32.xlu1 %v4311_v13, 360  ;;  %v4211_v56 = vsel %vm13403_vm5, %v4210_v9, %v3934_v10  ;;  %vm13410_vm5 = vcmask 654336  }
 0x3e5   : > { %4361 = vbcast.lane.b32.xlu0 %v4311_v13, 352  ;;  %v4212_v20 = vsel %vm13405_vm9, %v4211_v56, %v3938_v50  ;;  %vm13411_vm9 = vcmask 670720  }
 0x3e6   : > { %v3946_v29 = vpop.permute.xlu1 %3945 }
 0x3e7   : > { %v3942_v57 = vpop.permute.xlu0 %3941 }
 0x3e8   : > { %4373 = vbcast.lane.b32.xlu1 %v4311_v13, 376  ;;  %v4213_v18 = vsel %vm13406_vm6, %v4212_v20, %v3942_v57  ;;  %vm13412_vm6 = vcmask 687104  }
 0x3e9   : > { %4369 = vbcast.lane.b32.xlu0 %v4311_v13, 368  ;;  %v4214_v12 = vsel %vm13407_vm7, %v4213_v18, %v3946_v29  ;;  %vm13413_vm7 = vcmask 703488  }
 0x3ea   : > { %v3954_v48 = vpop.permute.xlu1 %3953 }
 0x3eb   : > { %v3950_v30 = vpop.permute.xlu0 %3949 }
 0x3ec   : > { %4384 = vbcast.lane.b32.xlu1 %v4378_v27, 264  ;;  %v4215_v55 = vsel %vm13408_vm8, %v4214_v12, %v3950_v30  ;;  %vm13414_vm8 = vcmask 719872  }
 0x3ed   : > { %4380 = vbcast.lane.b32.xlu0 %v4378_v27, 256  ;;  %v4216_v6 = vsel %vm13409_vm10, %v4215_v55, %v3954_v48  ;;  %vm13415_vm10 = vcmask 736256   ;;  %v13434_v55 = vld [vmem:[#allocation27_spill] sm:$0xff] }
 0x3ee   : > { %v3962_v2 = vpop.permute.xlu1 %3961 }
 0x3ef   : > { %v3958_v39 = vpop.permute.xlu0 %3957 }
 0x3f0   : > { %4392 = vbcast.lane.b32.xlu1 %v4378_v27, 280  ;;  %v4217_v42 = vsel %vm13410_vm5, %v4216_v6, %v3958_v39  ;;  %vm13416_vm5 = vcmask 752640  }
 0x3f1   : > { %4388 = vbcast.lane.b32.xlu0 %v4378_v27, 272  ;;  %v4218_v52 = vsel %vm13411_vm9, %v4217_v42, %v3962_v2  ;;  %vm13417_vm9 = vcmask 769024   ;;  %v4512_v2 = vrot.slane %v10704_v53, %v13434_v55 }
 0x3f2   : > { %v3970_v32 = vpop.permute.xlu1 %3969 }
 0x3f3   : > { %v3966_v21 = vpop.permute.xlu0 %3965 }
 0x3f4   : > { %4400 = vbcast.lane.b32.xlu1 %v4378_v27, 296  ;;  %v4219_v61 = vsel %vm13412_vm6, %v4218_v52, %v3966_v21  ;;  %vm13418_vm6 = vcmask 801792  }
 0x3f5   : > { %4396 = vbcast.lane.b32.xlu0 %v4378_v27, 288  ;;  %v4220_v51 = vsel %vm13413_vm7, %v4219_v61, %v3970_v32  ;;  %vm13419_vm7 = vcmask 818176  }
 0x3f6   : > { %v3978_v47 = vpop.permute.xlu1 %3977 }
 0x3f7   : > { %v3974_v63 = vpop.permute.xlu0 %3973 }
 0x3f8   : > { %4408 = vbcast.lane.b32.xlu1 %v4378_v27, 312  ;;  %v4221_v19 = vsel %vm13414_vm8, %v4220_v51, %v3974_v63  ;;  %vm13421_vm8 = vcmask 834560  }
 0x3f9   : > { %4404 = vbcast.lane.b32.xlu0 %v4378_v27, 304  ;;  %v4222_v35 = vsel %vm13415_vm10, %v4221_v19, %v3978_v47  ;;  %vm13422_vm10 = vcmask 850944  }
 0x3fa   : > { %v3986_v28 = vpop.permute.xlu1 %3985 }
 0x3fb   : > { %v3982_v49 = vpop.permute.xlu0 %3981 }
 0x3fc   : > { %4416 = vbcast.lane.b32.xlu1 %v4378_v27, 328  ;;  %v4223_v14 = vsel %vm13416_vm5, %v4222_v35, %v3982_v49  ;;  %vm13423_vm5 = vcmask 867328  }
 0x3fd   : > { %4412 = vbcast.lane.b32.xlu0 %v4378_v27, 320  ;;  %v4224_v7 = vsel %vm13417_vm9, %v4223_v14, %v3986_v28  ;;  %vm13424_vm9 = vcmask 883712  }
 0x3fe   : > { %v3994_v13 = vpop.permute.xlu1 %3993 }
 0x3ff   : > { %v3990_v44 = vpop.permute.xlu0 %3989 }
 0x400   : > { %4424 = vbcast.lane.b32.xlu1 %v4378_v27, 344  ;;  %v4225_v62 = vsel %vm4146_vm11, %v4224_v7, %v3990_v44  ;;  %v13448_v7 = vld [vmem:[#allocation41_spill] sm:$0xff] }
 0x401   : > { %4420 = vbcast.lane.b32.xlu0 %v4378_v27, 336  ;;  %v4226_v54 = vsel %vm13418_vm6, %v4225_v62, %v3994_v13  ;;  %vm13425_vm6 = vcmask 900096   ;;  %v4579_v44 = vrot.slane %v10704_v53, %v13448_v7 }
 0x402   : > { %v4002_v36 = vpop.permute.xlu1 %4001 }
 0x403   : > { %v3998_v43 = vpop.permute.xlu0 %3997 }
 0x404   : > { %4432 = vbcast.lane.b32.xlu1 %v4378_v27, 360  ;;  %v4227_v41 = vsel %vm13419_vm7, %v4226_v54, %v3998_v43  ;;  %vm13426_vm7 = vcmask 916480  }
 0x405   : > { %4428 = vbcast.lane.b32.xlu0 %v4378_v27, 352  ;;  %v4228_v15 = vsel %vm13421_vm8, %v4227_v41, %v4002_v36  ;;  %vm13427_vm8 = vcmask 932864  }
 0x406   : > { %v4010_v8 = vpop.permute.xlu1 %4009 }
 0x407   : > { %v4006_v0 = vpop.permute.xlu0 %4005 }
 0x408   : > { %4440 = vbcast.lane.b32.xlu1 %v4378_v27, 376  ;;  %v4229_v46 = vsel %vm13422_vm10, %v4228_v15, %v4006_v0  ;;  %vm13428_vm10 = vcmask 949248  }
 0x409   : > { %4436 = vbcast.lane.b32.xlu0 %v4378_v27, 368  ;;  %v4230_v33 = vsel %vm13423_vm5, %v4229_v46, %v4010_v8  ;;  %vm13429_vm5 = vcmask 965632  }
 0x40a   : > { %v4018_v23 = vpop.permute.xlu1 %4017 }
 0x40b   : > { %v4014_v31 = vpop.permute.xlu0 %4013 }
 0x40c   : > { %4451 = vbcast.lane.b32.xlu1 %v4445_v58, 264  ;;  %v4231_v11 = vsel %vm13424_vm9, %v4230_v33, %v4014_v31  ;;  %vm13621_vm9 = vcmask 7168  }
 0x40d   : > { %4447 = vbcast.lane.b32.xlu0 %v4445_v58, 256  ;;  %v4232_v40 = vsel %vm13425_vm6, %v4231_v11, %v4018_v23  ;;  %vm13622_vm6 = vmmov %vm13621_vm9 }
 0x40e   : > { %v4026_v4 = vpop.permute.xlu1 %4025 }
 0x40f   : > { %v4022_v26 = vpop.permute.xlu0 %4021 }
 0x410   : > { %4459 = vbcast.lane.b32.xlu1 %v4445_v58, 280  ;;  %v4233_v59 = vsel %vm13426_vm7, %v4232_v40, %v4022_v26  ;;  %v13462_v26 = vld [vmem:[#allocation55_spill] sm:$0xff]  ;;  %vm13623_vm7 = vmmov %vm13622_vm6 }
 0x411   : > { %4455 = vbcast.lane.b32.xlu0 %v4445_v58, 272  ;;  %v4234_v24 = vsel %vm13427_vm8, %v4233_v59, %v4026_v4  ;;  %v4646_v59 = vrot.slane %v10704_v53, %v13462_v26  ;;  %vm13626_vm8 = vmmov %vm13622_vm6 }
 0x412   : > { %v4034_v38 = vpop.permute.xlu1 %4033 }
 0x413   : > { %v4030_v37 = vpop.permute.xlu0 %4029 }
 0x414   : > { %4467 = vbcast.lane.b32.xlu1 %v4445_v58, 296  ;;  %v4235_v16 = vsel %vm13428_vm10, %v4234_v24, %v4030_v37  ;;  %vm13627_vm10 = vmmov %vm13622_vm6 }
 0x415   : > { %4463 = vbcast.lane.b32.xlu0 %v4445_v58, 288  ;;  %v4236_v3 = vsel %vm13429_vm5, %v4235_v16, %v4034_v38  ;;  %vm13628_vm5 = vmmov %vm13622_vm6 }
 0x416   : > { %v4042_v45 = vpop.permute.xlu1 %4041 }
 0x417   : > { %v4038_v50 = vpop.permute.xlu0 %4037 }
 0x418   : > { %4475 = vbcast.lane.b32.xlu1 %v4445_v58, 312  ;;  %v4237_v9 = vsel %vm4170_vm12, %v4236_v3, %v4038_v50 }
 0x419   : > { %4471 = vbcast.lane.b32.xlu0 %v4445_v58, 304  ;;  %v4238_v56 = vsel %vm4172_vm15, %v4237_v9, %v4042_v45 }
 0x41a   : > { %v4050_v10 = vpop.permute.xlu1 %4049 }
 0x41b   : > { %v4046_v29 = vpop.permute.xlu0 %4045 }
 0x41c   : > { %4483 = vbcast.lane.b32.xlu1 %v4445_v58, 328  ;;  %v4239_v27 = vsel %vm4174_vm0, %v4238_v56, %v4046_v29 }
 0x41d   : > { %4479 = vbcast.lane.b32.xlu0 %v4445_v58, 320  ;;  %v10785_v57 = vsel %vm4176_vm14, %v4239_v27, %v4050_v10 }
 0x41e   : > { %v10782_v20 = vpop.permute.xlu1 %4250  ;;  %13430 = vst [vmem:[#allocation146_spill] sm:$0xff] %v10785_v57  ;;  %8278 = vst.msk [vmem:[%s10694_s11 + $0x10] sm:$0xff] %vm4082_vm13, %v10785_v57  ;;  %s13633_s11 = smov 4  }
 0x41f   : > { %v10790_v18 = vpop.permute.xlu0 %4246 }
 0x420   : > { %4491 = vbcast.lane.b32.xlu1 %v4445_v58, 344 }
 0x421   : > { %4487 = vbcast.lane.b32.xlu0 %v4445_v58, 336 }
 0x422   : > { %v10792_v48 = vpop.permute.xlu1 %4258 }
 0x423   : > { %13431 = vst [vmem:[#allocation40_spill] sm:$0xff] %v10792_v48  ;;  %v10794_v12 = vpop.permute.xlu0 %4254 }
 0x424   : > { %4499 = vbcast.lane.b32.xlu1 %v4445_v58, 360  ;;  %13432 = vst [vmem:[#allocation159_spill] sm:$0xff] %v10794_v12 }
 0x425   : > { %4495 = vbcast.lane.b32.xlu0 %v4445_v58, 352 }
 0x426   : > { %v10796_v30 = vpop.permute.xlu1 %4266 }
 0x427   : > { %13433 = vst [vmem:[#allocation54_spill] sm:$0xff] %v10796_v30  ;;  %v10800_v6 = vpop.permute.xlu0 %4262 }
 0x428   : > { %4507 = vbcast.lane.b32.xlu1 %v4445_v58, 376  ;;  %13435 = vst [vmem:[#allocation184_spill] sm:$0xff] %v10800_v6 }
 0x429   : > { %4503 = vbcast.lane.b32.xlu0 %v4445_v58, 368 }
 0x42a   : > { %v10802_v39 = vpop.permute.xlu1 %4274 }
 0x42b   : > { %13436 = vst [vmem:[#allocation83_spill] sm:$0xff] %v10802_v39  ;;  %v10804_v42 = vpop.permute.xlu0 %4270 }
 0x42c   : > { %4518 = vbcast.lane.b32.xlu1 %v4512_v2, 264  ;;  %13437 = vst [vmem:[#allocation133_spill] sm:$0xff] %v10804_v42 }
 0x42d   : > { %4514 = vbcast.lane.b32.xlu0 %v4512_v2, 256 }
 0x42e   : > { %v10806_v32 = vpop.permute.xlu1 %4282 }
 0x42f   : > { %13438 = vst [vmem:[#allocation25_spill] sm:$0xff] %v10806_v32  ;;  %v10808_v52 = vpop.permute.xlu0 %4278 }
 0x430   : > { %4526 = vbcast.lane.b32.xlu1 %v4512_v2, 280 }
 0x431   : > { %4522 = vbcast.lane.b32.xlu0 %v4512_v2, 272 }
 0x432   : > { %v10810_v21 = vpop.permute.xlu1 %4290 }
 0x433   : > { %13439 = vst [vmem:[#allocation158_spill] sm:$0xff] %v10810_v21  ;;  %v10812_v61 = vpop.permute.xlu0 %4286 }
 0x434   : > { %4534 = vbcast.lane.b32.xlu1 %v4512_v2, 296  ;;  %13440 = vst [vmem:[#allocation53_spill] sm:$0xff] %v10812_v61 }
 0x435   : > { %4530 = vbcast.lane.b32.xlu0 %v4512_v2, 288 }
 0x436   : > { %v10814_v47 = vpop.permute.xlu1 %4298 }
 0x437   : > { %13441 = vst [vmem:[#allocation120_spill] sm:$0xff] %v10814_v47  ;;  %v10816_v51 = vpop.permute.xlu0 %4294 }
 0x438   : > { %4542 = vbcast.lane.b32.xlu1 %v4512_v2, 312  ;;  %13442 = vst [vmem:[#allocation171_spill] sm:$0xff] %v10816_v51 }
 0x439   : > { %4538 = vbcast.lane.b32.xlu0 %v4512_v2, 304 }
 0x43a   : > { %v10818_v63 = vpop.permute.xlu1 %4306 }
 0x43b   : > { %13443 = vst [vmem:[#allocation67_spill] sm:$0xff] %v10818_v63  ;;  %v10820_v19 = vpop.permute.xlu0 %4302 }
 0x43c   : > { %4550 = vbcast.lane.b32.xlu1 %v4512_v2, 328  ;;  %13444 = vst [vmem:[#allocation196_spill] sm:$0xff] %v10820_v19 }
 0x43d   : > { %4546 = vbcast.lane.b32.xlu0 %v4512_v2, 320 }
 0x43e   : > { %v10822_v28 = vpop.permute.xlu1 %4317 }
 0x43f   : > { %v10824_v35 = vpop.permute.xlu0 %4313 }
 0x440   : > { %4558 = vbcast.lane.b32.xlu1 %v4512_v2, 344 }
 0x441   : > { %4554 = vbcast.lane.b32.xlu0 %v4512_v2, 336 }
 0x442   : > { %v10826_v49 = vpop.permute.xlu1 %4325 }
 0x443   : > { %13445 = vst [vmem:[#allocation95_spill] sm:$0xff] %v10826_v49  ;;  %v10828_v14 = vpop.permute.xlu0 %4321 }
 0x444   : > { %4566 = vbcast.lane.b32.xlu1 %v4512_v2, 360  ;;  %13446 = vst [vmem:[#allocation208_spill] sm:$0xff] %v10828_v14 }
 0x445   : > { %4562 = vbcast.lane.b32.xlu0 %v4512_v2, 352 }
 0x446   : > { %v10830_v13 = vpop.permute.xlu1 %4333 }
 0x447   : > { %13447 = vst [vmem:[#allocation107_spill] sm:$0xff] %v10830_v13  ;;  %v10834_v62 = vpop.permute.xlu0 %4329 }
 0x448   : > { %4574 = vbcast.lane.b32.xlu1 %v4512_v2, 376  ;;  %13449 = vst [vmem:[#allocation132_spill] sm:$0xff] %v10834_v62 }
 0x449   : > { %4570 = vbcast.lane.b32.xlu0 %v4512_v2, 368 }
 0x44a   : > { %v10836_v36 = vpop.permute.xlu1 %4341 }
 0x44b   : > { %13450 = vst [vmem:[#allocation26_spill] sm:$0xff] %v10836_v36  ;;  %v10838_v54 = vpop.permute.xlu0 %4337 }
 0x44c   : > { %4585 = vbcast.lane.b32.xlu1 %v4579_v44, 264  ;;  %13451 = vst [vmem:[#allocation145_spill] sm:$0xff] %v10838_v54 }
 0x44d   : > { %4581 = vbcast.lane.b32.xlu0 %v4579_v44, 256 }
 0x44e   : > { %v10840_v43 = vpop.permute.xlu1 %4349 }
 0x44f   : > { %13452 = vst [vmem:[#allocation39_spill] sm:$0xff] %v10840_v43  ;;  %v10842_v41 = vpop.permute.xlu0 %4345 }
 0x450   : > { %4593 = vbcast.lane.b32.xlu1 %v4579_v44, 280 }
 0x451   : > { %4589 = vbcast.lane.b32.xlu0 %v4579_v44, 272 }
 0x452   : > { %v10844_v8 = vpop.permute.xlu1 %4357 }
 0x453   : > { %13453 = vst [vmem:[#allocation183_spill] sm:$0xff] %v10844_v8  ;;  %v10846_v58 = vpop.permute.xlu0 %4353 }
 0x454   : > { %4601 = vbcast.lane.b32.xlu1 %v4579_v44, 296  ;;  %13454 = vst [vmem:[#allocation82_spill] sm:$0xff] %v10846_v58 }
 0x455   : > { %4597 = vbcast.lane.b32.xlu0 %v4579_v44, 288 }
 0x456   : > { %v10848_v15 = vpop.permute.xlu1 %4365 }
 0x457   : > { %13455 = vst [vmem:[#allocation161_spill] sm:$0xff] %v10848_v15  ;;  %v10850_v0 = vpop.permute.xlu0 %4361  ;;  %v13488_v15 = vld [vmem:[#allocation81_spill] sm:$0xff] }
 0x458   : > { %4609 = vbcast.lane.b32.xlu1 %v4579_v44, 312  ;;  %13456 = vst [vmem:[#allocation57_spill] sm:$0xff] %v10850_v0 }
 0x459   : > { %4605 = vbcast.lane.b32.xlu0 %v4579_v44, 304 }
 0x45a   : > { %v10852_v46 = vpop.permute.xlu1 %4373 }
 0x45b   : > { %13457 = vst [vmem:[#allocation122_spill] sm:$0xff] %v10852_v46  ;;  %v10854_v23 = vpop.permute.xlu0 %4369 }
 0x45c   : > { %4617 = vbcast.lane.b32.xlu1 %v4579_v44, 328  ;;  %13458 = vst [vmem:[#allocation173_spill] sm:$0xff] %v10854_v23 }
 0x45d   : > { %4613 = vbcast.lane.b32.xlu0 %v4579_v44, 320 }
 0x45e   : > { %v10856_v33 = vpop.permute.xlu1 %4384 }
 0x45f   : > { %v10858_v31 = vpop.permute.xlu0 %4380 }
 0x460   : > { %4625 = vbcast.lane.b32.xlu1 %v4579_v44, 344 }
 0x461   : > { %4621 = vbcast.lane.b32.xlu0 %v4579_v44, 336 }
 0x462   : > { %v10860_v11 = vpop.permute.xlu1 %4392 }
 0x463   : > { %13459 = vst [vmem:[#allocation70_spill] sm:$0xff] %v10860_v11  ;;  %v10862_v4 = vpop.permute.xlu0 %4388 }
 0x464   : > { %4633 = vbcast.lane.b32.xlu1 %v4579_v44, 360  ;;  %13460 = vst [vmem:[#allocation198_spill] sm:$0xff] %v10862_v4 }
 0x465   : > { %4629 = vbcast.lane.b32.xlu0 %v4579_v44, 352 }
 0x466   : > { %v10864_v40 = vpop.permute.xlu1 %4400 }
 0x467   : > { %13461 = vst [vmem:[#allocation97_spill] sm:$0xff] %v10864_v40  ;;  %v10868_v38 = vpop.permute.xlu0 %4396 }
 0x468   : > { %4641 = vbcast.lane.b32.xlu1 %v4579_v44, 376  ;;  %13463 = vst [vmem:[#allocation209_spill] sm:$0xff] %v10868_v38 }
 0x469   : > { %4637 = vbcast.lane.b32.xlu0 %v4579_v44, 368 }
 0x46a   : > { %v10870_v24 = vpop.permute.xlu1 %4408 }
 0x46b   : > { %13464 = vst [vmem:[#allocation110_spill] sm:$0xff] %v10870_v24  ;;  %v10872_v37 = vpop.permute.xlu0 %4404 }
 0x46c   : > { %4652 = vbcast.lane.b32.xlu1 %v4646_v59, 264  ;;  %13465 = vst [vmem:[#allocation135_spill] sm:$0xff] %v10872_v37 }
 0x46d   : > { %4648 = vbcast.lane.b32.xlu0 %v4646_v59, 256 }
 0x46e   : > { %v10874_v16 = vpop.permute.xlu1 %4416 }
 0x46f   : > { %13466 = vst [vmem:[#allocation29_spill] sm:$0xff] %v10874_v16  ;;  %v10876_v45 = vpop.permute.xlu0 %4412 }
 0x470   : > { %4660 = vbcast.lane.b32.xlu1 %v4646_v59, 280 }
 0x471   : > { %4656 = vbcast.lane.b32.xlu0 %v4646_v59, 272 }
 0x472   : > { %v10878_v3 = vpop.permute.xlu1 %4424 }
 0x473   : > { %13467 = vst [vmem:[#allocation148_spill] sm:$0xff] %v10878_v3  ;;  %v10880_v50 = vpop.permute.xlu0 %4420 }
 0x474   : > { %4668 = vbcast.lane.b32.xlu1 %v4646_v59, 296  ;;  %13468 = vst [vmem:[#allocation43_spill] sm:$0xff] %v10880_v50 }
 0x475   : > { %4664 = vbcast.lane.b32.xlu0 %v4646_v59, 288 }
 0x476   : > { %v10882_v9 = vpop.permute.xlu1 %4432 }
 0x477   : > { %13469 = vst [vmem:[#allocation186_spill] sm:$0xff] %v10882_v9  ;;  %v10884_v10 = vpop.permute.xlu0 %4428 }
 0x478   : > { %4676 = vbcast.lane.b32.xlu1 %v4646_v59, 312  ;;  %13470 = vst [vmem:[#allocation85_spill] sm:$0xff] %v10884_v10 }
 0x479   : > { %4672 = vbcast.lane.b32.xlu0 %v4646_v59, 304 }
 0x47a   : > { %v10886_v56 = vpop.permute.xlu1 %4440 }
 0x47b   : > { %13471 = vst [vmem:[#allocation160_spill] sm:$0xff] %v10886_v56  ;;  %v10888_v29 = vpop.permute.xlu0 %4436  ;;  %v13475_v56 = vld [vmem:[#allocation68_spill] sm:$0xff] }
 0x47c   : > { %4684 = vbcast.lane.b32.xlu1 %v4646_v59, 328  ;;  %13472 = vst [vmem:[#allocation56_spill] sm:$0xff] %v10888_v29  ;;  %v4713_v46 = vrot.slane %v10704_v53, %v13475_v56 }
 0x47d   : > { %4680 = vbcast.lane.b32.xlu0 %v4646_v59, 320 }
 0x47e   : > { %v10890_v27 = vpop.permute.xlu1 %4451 }
 0x47f   : > { %v10892_v2 = vpop.permute.xlu0 %4447 }
 0x480   : > { %4692 = vbcast.lane.b32.xlu1 %v4646_v59, 344 }
 0x481   : > { %4688 = vbcast.lane.b32.xlu0 %v4646_v59, 336 }
 0x482   : > { %v10894_v44 = vpop.permute.xlu1 %4459 }
 0x483   : > { %13473 = vst [vmem:[#allocation121_spill] sm:$0xff] %v10894_v44  ;;  %v10896_v5 = vpop.permute.xlu0 %4455 }
 0x484   : > { %4700 = vbcast.lane.b32.xlu1 %v4646_v59, 360 }
 0x485   : > { %4696 = vbcast.lane.b32.xlu0 %v4646_v59, 352 }
 0x486   : > { %v10898_v57 = vpop.permute.xlu1 %4467 }
 0x487   : > { %13474 = vst [vmem:[#allocation172_spill] sm:$0xff] %v10898_v57  ;;  %v10902_v36 = vpop.permute.xlu0 %4463 }
 0x488   : > { %4708 = vbcast.lane.b32.xlu1 %v4646_v59, 376  ;;  %13476 = vst [vmem:[#allocation69_spill] sm:$0xff] %v10902_v36 }
 0x489   : > { %4704 = vbcast.lane.b32.xlu0 %v4646_v59, 368 }
 0x48a   : > { %v10904_v63 = vpop.permute.xlu1 %4475 }
 0x48b   : > { %13477 = vst [vmem:[#allocation197_spill] sm:$0xff] %v10904_v63  ;;  %v10906_v24 = vpop.permute.xlu0 %4471 }
 0x48c   : > { %4719 = vbcast.lane.b32.xlu1 %v4713_v46, 264  ;;  %13478 = vst [vmem:[#allocation96_spill] sm:$0xff] %v10906_v24 }
 0x48d   : > { %4715 = vbcast.lane.b32.xlu0 %v4713_v46, 256 }
 0x48e   : > { %v10908_v39 = vpop.permute.xlu1 %4483 }
 0x48f   : > { %13479 = vst [vmem:[#allocation210_spill] sm:$0xff] %v10908_v39  ;;  %v10910_v29 = vpop.permute.xlu0 %4479 }
 0x490   : > { %4727 = vbcast.lane.b32.xlu1 %v4713_v46, 280 }
 0x491   : > { %4723 = vbcast.lane.b32.xlu0 %v4713_v46, 272 }
 0x492   : > { %v10912_v37 = vpop.permute.xlu1 %4491 }
 0x493   : > { %13480 = vst [vmem:[#allocation109_spill] sm:$0xff] %v10912_v37  ;;  %v10914_v23 = vpop.permute.xlu0 %4487 }
 0x494   : > { %4735 = vbcast.lane.b32.xlu1 %v4713_v46, 296  ;;  %13481 = vst [vmem:[#allocation134_spill] sm:$0xff] %v10914_v23 }
 0x495   : > { %4731 = vbcast.lane.b32.xlu0 %v4713_v46, 288 }
 0x496   : > { %v10916_v53 = vpop.permute.xlu1 %4499 }
 0x497   : > { %13482 = vst [vmem:[#allocation28_spill] sm:$0xff] %v10916_v53  ;;  %v10918_v59 = vpop.permute.xlu0 %4495  ;;  %v13487_v53 = vld [vmem:[#allocation80_spill] sm:$0xff] }
 0x498   : > { %4743 = vbcast.lane.b32.xlu1 %v4713_v46, 312  ;;  %13483 = vst [vmem:[#allocation147_spill] sm:$0xff] %v10918_v59  ;;  %v10932_v47 = vadd.f32 %v13488_v15, %v13487_v53 }
 0x499   : > { %4739 = vbcast.lane.b32.xlu0 %v4713_v46, 304 }
 0x49a   : > { %v10920_v63 = vpop.permute.xlu1 %4507 }
 0x49b   : > { %13484 = vst [vmem:[#allocation42_spill] sm:$0xff] %v10920_v63  ;;  %v10922_v24 = vpop.permute.xlu0 %4503 }
 0x49c   : > { %4751 = vbcast.lane.b32.xlu1 %v4713_v46, 328  ;;  %13485 = vst [vmem:[#allocation185_spill] sm:$0xff] %v10922_v24  ;;  %v4780_v24 = vrot.slane %v10932_v47, %v13378_v34 }
 0x49d   : > { %4747 = vbcast.lane.b32.xlu0 %v4713_v46, 320 }
 0x49e   : > { %v10924_v54 = vpop.permute.xlu1 %4518 }
 0x49f   : > { %v10926_v19 = vpop.permute.xlu0 %4514 }
 0x4a0   : > { %4759 = vbcast.lane.b32.xlu1 %v4713_v46, 344 }
 0x4a1   : > { %4755 = vbcast.lane.b32.xlu0 %v4713_v46, 336 }
 0x4a2   : > { %v10928_v9 = vpop.permute.xlu1 %4526 }
 0x4a3   : > { %13486 = vst [vmem:[#allocation84_spill] sm:$0xff] %v10928_v9  ;;  %v10934_v42 = vpop.permute.xlu0 %4522 }
 0x4a4   : > { %4767 = vbcast.lane.b32.xlu1 %v4713_v46, 360  ;;  %13489 = vst [vmem:[#allocation163_spill] sm:$0xff] %v10934_v42 }
 0x4a5   : > { %4763 = vbcast.lane.b32.xlu0 %v4713_v46, 352 }
 0x4a6   : > { %v10936_v63 = vpop.permute.xlu1 %4534 }
 0x4a7   : > { %13490 = vst [vmem:[#allocation59_spill] sm:$0xff] %v10936_v63  ;;  %v10940_v59 = vpop.permute.xlu0 %4530 }
 0x4a8   : > { %4775 = vbcast.lane.b32.xlu1 %v4713_v46, 376  ;;  %13491 = vst [vmem:[#allocation124_spill] sm:$0xff] %v10940_v59 }
 0x4a9   : > { %4771 = vbcast.lane.b32.xlu0 %v4713_v46, 368 }
 0x4aa   : > { %v10942_v10 = vpop.permute.xlu1 %4542 }
 0x4ab   : > { %13492 = vst [vmem:[#allocation175_spill] sm:$0xff] %v10942_v10  ;;  %v10944_v0 = vpop.permute.xlu0 %4538 }
 0x4ac   : > { %4786 = vbcast.lane.b32.xlu1 %v4780_v24, 264  ;;  %13493 = vst [vmem:[#allocation72_spill] sm:$0xff] %v10944_v0 }
 0x4ad   : > { %4782 = vbcast.lane.b32.xlu0 %v4780_v24, 256 }
 0x4ae   : > { %v10946_v51 = vpop.permute.xlu1 %4550 }
 0x4af   : > { %13494 = vst [vmem:[#allocation200_spill] sm:$0xff] %v10946_v51  ;;  %v10948_v15 = vpop.permute.xlu0 %4546 }
 0x4b0   : > { %4794 = vbcast.lane.b32.xlu1 %v4780_v24, 280 }
 0x4b1   : > { %4790 = vbcast.lane.b32.xlu0 %v4780_v24, 272 }
 0x4b2   : > { %v10950_v53 = vpop.permute.xlu1 %4558 }
 0x4b3   : > { %13495 = vst [vmem:[#allocation99_spill] sm:$0xff] %v10950_v53  ;;  %v10952_v3 = vpop.permute.xlu0 %4554 }
 0x4b4   : > { %4802 = vbcast.lane.b32.xlu1 %v4780_v24, 296  ;;  %13496 = vst [vmem:[#allocation211_spill] sm:$0xff] %v10952_v3 }
 0x4b5   : > { %4798 = vbcast.lane.b32.xlu0 %v4780_v24, 288 }
 0x4b6   : > { %v10954_v34 = vpop.permute.xlu1 %4566 }
 0x4b7   : > { %13497 = vst [vmem:[#allocation112_spill] sm:$0xff] %v10954_v34  ;;  %v10956_v46 = vpop.permute.xlu0 %4562 }
 0x4b8   : > { %4810 = vbcast.lane.b32.xlu1 %v4780_v24, 312  ;;  %13498 = vst [vmem:[#allocation137_spill] sm:$0xff] %v10956_v46 }
 0x4b9   : > { %4806 = vbcast.lane.b32.xlu0 %v4780_v24, 304 }
 0x4ba   : > { %v10958_v10 = vpop.permute.xlu1 %4574 }
 0x4bb   : > { %13499 = vst [vmem:[#allocation31_spill] sm:$0xff] %v10958_v10  ;;  %v10960_v0 = vpop.permute.xlu0 %4570  ;;  %v4847_v10 = vrot.slane %v10932_v47, %v13387_v1 }
 0x4bc   : > { %4818 = vbcast.lane.b32.xlu1 %v4780_v24, 328  ;;  %13500 = vst [vmem:[#allocation150_spill] sm:$0xff] %v10960_v0 }
 0x4bd   : > { %4814 = vbcast.lane.b32.xlu0 %v4780_v24, 320 }
 0x4be   : > { %v10962_v37 = vpop.permute.xlu1 %4585 }
 0x4bf   : > { %v10964_v53 = vpop.permute.xlu0 %4581 }
 0x4c0   : > { %4826 = vbcast.lane.b32.xlu1 %v4780_v24, 344 }
 0x4c1   : > { %4822 = vbcast.lane.b32.xlu0 %v4780_v24, 336 }
 0x4c2   : > { %v10966_v8 = vpop.permute.xlu1 %4593 }
 0x4c3   : > { %13501 = vst [vmem:[#allocation45_spill] sm:$0xff] %v10966_v8  ;;  %v10968_v34 = vpop.permute.xlu0 %4589 }
 0x4c4   : > { %4834 = vbcast.lane.b32.xlu1 %v4780_v24, 360 }
 0x4c5   : > { %4830 = vbcast.lane.b32.xlu0 %v4780_v24, 352 }
 0x4c6   : > { %v10970_v21 = vpop.permute.xlu1 %4601 }
 0x4c7   : > { %13502 = vst [vmem:[#allocation188_spill] sm:$0xff] %v10970_v21  ;;  %v10974_v0 = vpop.permute.xlu0 %4597 }
 0x4c8   : > { %4842 = vbcast.lane.b32.xlu1 %v4780_v24, 376  ;;  %13503 = vst [vmem:[#allocation87_spill] sm:$0xff] %v10974_v0 }
 0x4c9   : > { %4838 = vbcast.lane.b32.xlu0 %v4780_v24, 368 }
 0x4ca   : > { %v10976_v46 = vpop.permute.xlu1 %4609 }
 0x4cb   : > { %13504 = vst [vmem:[#allocation162_spill] sm:$0xff] %v10976_v46  ;;  %v10978_v3 = vpop.permute.xlu0 %4605 }
 0x4cc   : > { %4853 = vbcast.lane.b32.xlu1 %v4847_v10, 264  ;;  %13505 = vst [vmem:[#allocation58_spill] sm:$0xff] %v10978_v3 }
 0x4cd   : > { %4849 = vbcast.lane.b32.xlu0 %v4847_v10, 256 }
 0x4ce   : > { %v10980_v58 = vpop.permute.xlu1 %4617 }
 0x4cf   : > { %13506 = vst [vmem:[#allocation123_spill] sm:$0xff] %v10980_v58  ;;  %v10982_v61 = vpop.permute.xlu0 %4613 }
 0x4d0   : > { %4861 = vbcast.lane.b32.xlu1 %v4847_v10, 280 }
 0x4d1   : > { %4857 = vbcast.lane.b32.xlu0 %v4847_v10, 272 }
 0x4d2   : > { %v10984_v23 = vpop.permute.xlu1 %4625 }
 0x4d3   : > { %13507 = vst [vmem:[#allocation174_spill] sm:$0xff] %v10984_v23  ;;  %v10986_v50 = vpop.permute.xlu0 %4621 }
 0x4d4   : > { %4869 = vbcast.lane.b32.xlu1 %v4847_v10, 296  ;;  %13508 = vst [vmem:[#allocation71_spill] sm:$0xff] %v10986_v50 }
 0x4d5   : > { %4865 = vbcast.lane.b32.xlu0 %v4847_v10, 288 }
 0x4d6   : > { %v10988_v1 = vpop.permute.xlu1 %4633 }
 0x4d7   : > { %13509 = vst [vmem:[#allocation199_spill] sm:$0xff] %v10988_v1  ;;  %v10990_v24 = vpop.permute.xlu0 %4629 }
 0x4d8   : > { %4877 = vbcast.lane.b32.xlu1 %v4847_v10, 312  ;;  %13510 = vst [vmem:[#allocation98_spill] sm:$0xff] %v10990_v24 }
 0x4d9   : > { %4873 = vbcast.lane.b32.xlu0 %v4847_v10, 304 }
 0x4da   : > { %v10992_v46 = vpop.permute.xlu1 %4641 }
 0x4db   : > { %13511 = vst [vmem:[#allocation212_spill] sm:$0xff] %v10992_v46  ;;  %v10994_v3 = vpop.permute.xlu0 %4637  ;;  %v4914_v46 = vrot.slane %v10932_v47, %v13404_v22 }
 0x4dc   : > { %4885 = vbcast.lane.b32.xlu1 %v4847_v10, 328  ;;  %13512 = vst [vmem:[#allocation111_spill] sm:$0xff] %v10994_v3 }
 0x4dd   : > { %4881 = vbcast.lane.b32.xlu0 %v4847_v10, 320 }
 0x4de   : > { %v10996_v51 = vpop.permute.xlu1 %4652 }
 0x4df   : > { %v10998_v23 = vpop.permute.xlu0 %4648 }
 0x4e0   : > { %4893 = vbcast.lane.b32.xlu1 %v4847_v10, 344 }
 0x4e1   : > { %4889 = vbcast.lane.b32.xlu0 %v4847_v10, 336 }
 0x4e2   : > { %v11000_v43 = vpop.permute.xlu1 %4660 }
 0x4e3   : > { %13513 = vst [vmem:[#allocation136_spill] sm:$0xff] %v11000_v43  ;;  %v11002_v1 = vpop.permute.xlu0 %4656 }
 0x4e4   : > { %4901 = vbcast.lane.b32.xlu1 %v4847_v10, 360 }
 0x4e5   : > { %4897 = vbcast.lane.b32.xlu0 %v4847_v10, 352 }
 0x4e6   : > { %v11004_v50 = vpop.permute.xlu1 %4668 }
 0x4e7   : > { %13514 = vst [vmem:[#allocation30_spill] sm:$0xff] %v11004_v50  ;;  %v11008_v3 = vpop.permute.xlu0 %4664 }
 0x4e8   : > { %4909 = vbcast.lane.b32.xlu1 %v4847_v10, 376  ;;  %13515 = vst [vmem:[#allocation149_spill] sm:$0xff] %v11008_v3 }
 0x4e9   : > { %4905 = vbcast.lane.b32.xlu0 %v4847_v10, 368 }
 0x4ea   : > { %v11010_v24 = vpop.permute.xlu1 %4676 }
 0x4eb   : > { %13516 = vst [vmem:[#allocation44_spill] sm:$0xff] %v11010_v24  ;;  %v11012_v32 = vpop.permute.xlu0 %4672 }
 0x4ec   : > { %4920 = vbcast.lane.b32.xlu1 %v4914_v46, 264  ;;  %13517 = vst [vmem:[#allocation187_spill] sm:$0xff] %v11012_v32 }
 0x4ed   : > { %4916 = vbcast.lane.b32.xlu0 %v4914_v46, 256 }
 0x4ee   : > { %v11014_v58 = vpop.permute.xlu1 %4684 }
 0x4ef   : > { %13518 = vst [vmem:[#allocation86_spill] sm:$0xff] %v11014_v58  ;;  %v11016_v39 = vpop.permute.xlu0 %4680 }
 0x4f0   : > { %4928 = vbcast.lane.b32.xlu1 %v4914_v46, 280 }
 0x4f1   : > { %4924 = vbcast.lane.b32.xlu0 %v4914_v46, 272 }
 0x4f2   : > { %v11018_v16 = vpop.permute.xlu1 %4692 }
 0x4f3   : > { %13519 = vst [vmem:[#allocation138_spill] sm:$0xff] %v11018_v16  ;;  %v11020_v63 = vpop.permute.xlu0 %4688 }
 0x4f4   : > { %4936 = vbcast.lane.b32.xlu1 %v4914_v46, 296  ;;  %13520 = vst [vmem:[#allocation32_spill] sm:$0xff] %v11020_v63 }
 0x4f5   : > { %4932 = vbcast.lane.b32.xlu0 %v4914_v46, 288 }
 0x4f6   : > { %v11022_v22 = vpop.permute.xlu1 %4700 }
 0x4f7   : > { %13521 = vst [vmem:[#allocation164_spill] sm:$0xff] %v11022_v22  ;;  %v11024_v10 = vpop.permute.xlu0 %4696 }
 0x4f8   : > { %4944 = vbcast.lane.b32.xlu1 %v4914_v46, 312  ;;  %13522 = vst [vmem:[#allocation60_spill] sm:$0xff] %v11024_v10 }
 0x4f9   : > { %4940 = vbcast.lane.b32.xlu0 %v4914_v46, 304 }
 0x4fa   : > { %v11026_v24 = vpop.permute.xlu1 %4708 }
 0x4fb   : > { %13523 = vst [vmem:[#allocation125_spill] sm:$0xff] %v11026_v24  ;;  %v11028_v32 = vpop.permute.xlu0 %4704  ;;  %v4981_v24 = vrot.slane %v10932_v47, %v13420_v25 }
 0x4fc   : > { %4952 = vbcast.lane.b32.xlu1 %v4914_v46, 328  ;;  %13524 = vst [vmem:[#allocation176_spill] sm:$0xff] %v11028_v32 }
 0x4fd   : > { %4948 = vbcast.lane.b32.xlu0 %v4914_v46, 320 }
 0x4fe   : > { %v11030_v58 = vpop.permute.xlu1 %4719 }
 0x4ff   : > { %v11032_v16 = vpop.permute.xlu0 %4715 }
 0x500   : > { %4960 = vbcast.lane.b32.xlu1 %v4914_v46, 344 }
 0x501   : > { %4956 = vbcast.lane.b32.xlu0 %v4914_v46, 336 }
 0x502   : > { %v11034_v13 = vpop.permute.xlu1 %4727 }
 0x503   : > { %13525 = vst [vmem:[#allocation73_spill] sm:$0xff] %v11034_v13  ;;  %v11036_v22 = vpop.permute.xlu0 %4723 }
 0x504   : > { %4968 = vbcast.lane.b32.xlu1 %v4914_v46, 360 }
 0x505   : > { %4964 = vbcast.lane.b32.xlu0 %v4914_v46, 352 }
 0x506   : > { %v11038_v63 = vpop.permute.xlu1 %4735 }
 0x507   : > { %13526 = vst [vmem:[#allocation189_spill] sm:$0xff] %v11038_v63  ;;  %v11042_v32 = vpop.permute.xlu0 %4731 }
 0x508   : > { %4976 = vbcast.lane.b32.xlu1 %v4914_v46, 376  ;;  %13527 = vst [vmem:[#allocation88_spill] sm:$0xff] %v11042_v32 }
 0x509   : > { %4972 = vbcast.lane.b32.xlu0 %v4914_v46, 368 }
 0x50a   : > { %v11044_v10 = vpop.permute.xlu1 %4743 }
 0x50b   : > { %13528 = vst [vmem:[#allocation201_spill] sm:$0xff] %v11044_v10  ;;  %v11046_v30 = vpop.permute.xlu0 %4739 }
 0x50c   : > { %4987 = vbcast.lane.b32.xlu1 %v4981_v24, 264  ;;  %13529 = vst [vmem:[#allocation100_spill] sm:$0xff] %v11046_v30 }
 0x50d   : > { %4983 = vbcast.lane.b32.xlu0 %v4981_v24, 256 }
 0x50e   : > { %v11048_v50 = vpop.permute.xlu1 %4751 }
 0x50f   : > { %13530 = vst [vmem:[#allocation214_spill] sm:$0xff] %v11048_v50  ;;  %v11050_v21 = vpop.permute.xlu0 %4747 }
 0x510   : > { %4995 = vbcast.lane.b32.xlu1 %v4981_v24, 280 }
 0x511   : > { %4991 = vbcast.lane.b32.xlu0 %v4981_v24, 272 }
 0x512   : > { %v11052_v57 = vpop.permute.xlu1 %4759 }
 0x513   : > { %13531 = vst [vmem:[#allocation113_spill] sm:$0xff] %v11052_v57  ;;  %v11054_v63 = vpop.permute.xlu0 %4755 }
 0x514   : > { %5003 = vbcast.lane.b32.xlu1 %v4981_v24, 296  ;;  %13532 = vst [vmem:[#allocation151_spill] sm:$0xff] %v11054_v63 }
 0x515   : > { %4999 = vbcast.lane.b32.xlu0 %v4981_v24, 288 }
 0x516   : > { %v11056_v25 = vpop.permute.xlu1 %4767 }
 0x517   : > { %13533 = vst [vmem:[#allocation46_spill] sm:$0xff] %v11056_v25  ;;  %v11058_v46 = vpop.permute.xlu0 %4763 }
 0x518   : > { %5011 = vbcast.lane.b32.xlu1 %v4981_v24, 312  ;;  %13534 = vst [vmem:[#allocation139_spill] sm:$0xff] %v11058_v46 }
 0x519   : > { %5007 = vbcast.lane.b32.xlu0 %v4981_v24, 304 }
 0x51a   : > { %v11060_v10 = vpop.permute.xlu1 %4775 }
 0x51b   : > { %13535 = vst [vmem:[#allocation33_spill] sm:$0xff] %v11060_v10  ;;  %v11062_v30 = vpop.permute.xlu0 %4771  ;;  %v5048_v10 = vrot.slane %v10932_v47, %v13434_v55 }
 0x51c   : > { %5019 = vbcast.lane.b32.xlu1 %v4981_v24, 328  ;;  %13536 = vst [vmem:[#allocation140_spill] sm:$0xff] %v11062_v30 }
 0x51d   : > { %5015 = vbcast.lane.b32.xlu0 %v4981_v24, 320 }
 0x51e   : > { %v11064_v50 = vpop.permute.xlu1 %4786 }
 0x51f   : > { %v11066_v57 = vpop.permute.xlu0 %4782 }
 0x520   : > { %5027 = vbcast.lane.b32.xlu1 %v4981_v24, 344 }
 0x521   : > { %5023 = vbcast.lane.b32.xlu0 %v4981_v24, 336 }
 0x522   : > { %v11068_v40 = vpop.permute.xlu1 %4794 }
 0x523   : > { %13537 = vst [vmem:[#allocation34_spill] sm:$0xff] %v11068_v40  ;;  %v11070_v25 = vpop.permute.xlu0 %4790 }
 0x524   : > { %5035 = vbcast.lane.b32.xlu1 %v4981_v24, 360  ;;  %13538 = vst [vmem:[#allocation166_spill] sm:$0xff] %v11070_v25 }
 0x525   : > { %5031 = vbcast.lane.b32.xlu0 %v4981_v24, 352 }
 0x526   : > { %v11072_v63 = vpop.permute.xlu1 %4802 }
 0x527   : > { %13539 = vst [vmem:[#allocation62_spill] sm:$0xff] %v11072_v63  ;;  %v11076_v30 = vpop.permute.xlu0 %4798 }
 0x528   : > { %5043 = vbcast.lane.b32.xlu1 %v4981_v24, 376  ;;  %13540 = vst [vmem:[#allocation127_spill] sm:$0xff] %v11076_v30 }
 0x529   : > { %5039 = vbcast.lane.b32.xlu0 %v4981_v24, 368 }
 0x52a   : > { %v11078_v46 = vpop.permute.xlu1 %4810 }
 0x52b   : > { %13541 = vst [vmem:[#allocation178_spill] sm:$0xff] %v11078_v46  ;;  %v11080_v59 = vpop.permute.xlu0 %4806 }
 0x52c   : > { %5054 = vbcast.lane.b32.xlu1 %v5048_v10, 264  ;;  %13542 = vst [vmem:[#allocation75_spill] sm:$0xff] %v11080_v59 }
 0x52d   : > { %5050 = vbcast.lane.b32.xlu0 %v5048_v10, 256 }
 0x52e   : > { %v11082_v62 = vpop.permute.xlu1 %4818 }
 0x52f   : > { %13543 = vst [vmem:[#allocation203_spill] sm:$0xff] %v11082_v62  ;;  %v11084_v6 = vpop.permute.xlu0 %4814 }
 0x530   : > { %5062 = vbcast.lane.b32.xlu1 %v5048_v10, 280 }
 0x531   : > { %5058 = vbcast.lane.b32.xlu0 %v5048_v10, 272 }
 0x532   : > { %v11086_v63 = vpop.permute.xlu1 %4826 }
 0x533   : > { %13544 = vst [vmem:[#allocation102_spill] sm:$0xff] %v11086_v63  ;;  %v11088_v3 = vpop.permute.xlu0 %4822 }
 0x534   : > { %5070 = vbcast.lane.b32.xlu1 %v5048_v10, 296  ;;  %13545 = vst [vmem:[#allocation213_spill] sm:$0xff] %v11088_v3 }
 0x535   : > { %5066 = vbcast.lane.b32.xlu0 %v5048_v10, 288 }
 0x536   : > { %v11090_v55 = vpop.permute.xlu1 %4834 }
 0x537   : > { %13546 = vst [vmem:[#allocation115_spill] sm:$0xff] %v11090_v55  ;;  %v11092_v24 = vpop.permute.xlu0 %4830 }
 0x538   : > { %5078 = vbcast.lane.b32.xlu1 %v5048_v10, 312  ;;  %13547 = vst [vmem:[#allocation153_spill] sm:$0xff] %v11092_v24 }
 0x539   : > { %5074 = vbcast.lane.b32.xlu0 %v5048_v10, 304 }
 0x53a   : > { %v11094_v46 = vpop.permute.xlu1 %4842 }
 0x53b   : > { %13548 = vst [vmem:[#allocation48_spill] sm:$0xff] %v11094_v46  ;;  %v11096_v59 = vpop.permute.xlu0 %4838  ;;  %v5115_v46 = vrot.slane %v10932_v47, %v13448_v7 }
 0x53c   : > { %5086 = vbcast.lane.b32.xlu1 %v5048_v10, 328  ;;  %13549 = vst [vmem:[#allocation191_spill] sm:$0xff] %v11096_v59 }
 0x53d   : > { %5082 = vbcast.lane.b32.xlu0 %v5048_v10, 320 }
 0x53e   : > { %v11098_v62 = vpop.permute.xlu1 %4853 }
 0x53f   : > { %v11100_v63 = vpop.permute.xlu0 %4849 }
 0x540   : > { %5094 = vbcast.lane.b32.xlu1 %v5048_v10, 344 }
 0x541   : > { %5090 = vbcast.lane.b32.xlu0 %v5048_v10, 336 }
 0x542   : > { %v11102_v30 = vpop.permute.xlu1 %4861 }
 0x543   : > { %13550 = vst [vmem:[#allocation90_spill] sm:$0xff] %v11102_v30  ;;  %v11104_v55 = vpop.permute.xlu0 %4857 }
 0x544   : > { %5102 = vbcast.lane.b32.xlu1 %v5048_v10, 360  ;;  %13551 = vst [vmem:[#allocation165_spill] sm:$0xff] %v11104_v55 }
 0x545   : > { %5098 = vbcast.lane.b32.xlu0 %v5048_v10, 352 }
 0x546   : > { %v11106_v3 = vpop.permute.xlu1 %4869 }
 0x547   : > { %13552 = vst [vmem:[#allocation61_spill] sm:$0xff] %v11106_v3  ;;  %v11110_v59 = vpop.permute.xlu0 %4865 }
 0x548   : > { %5110 = vbcast.lane.b32.xlu1 %v5048_v10, 376  ;;  %13553 = vst [vmem:[#allocation177_spill] sm:$0xff] %v11110_v59 }
 0x549   : > { %5106 = vbcast.lane.b32.xlu0 %v5048_v10, 368 }
 0x54a   : > { %v11112_v24 = vpop.permute.xlu1 %4877 }
 0x54b   : > { %13554 = vst [vmem:[#allocation74_spill] sm:$0xff] %v11112_v24  ;;  %v11114_v0 = vpop.permute.xlu0 %4873 }
 0x54c   : > { %5121 = vbcast.lane.b32.xlu1 %v5115_v46, 264  ;;  %13555 = vst [vmem:[#allocation126_spill] sm:$0xff] %v11114_v0 }
 0x54d   : > { %5117 = vbcast.lane.b32.xlu0 %v5115_v46, 256 }
 0x54e   : > { %v11116_v36 = vpop.permute.xlu1 %4885 }
 0x54f   : > { %13556 = vst [vmem:[#allocation190_spill] sm:$0xff] %v11116_v36  ;;  %v11118_v38 = vpop.permute.xlu0 %4881 }
 0x550   : > { %5129 = vbcast.lane.b32.xlu1 %v5115_v46, 280 }
 0x551   : > { %5125 = vbcast.lane.b32.xlu0 %v5115_v46, 272 }
 0x552   : > { %v11120_v3 = vpop.permute.xlu1 %4893 }
 0x553   : > { %13557 = vst [vmem:[#allocation89_spill] sm:$0xff] %v11120_v3  ;;  %v11122_v32 = vpop.permute.xlu0 %4889 }
 0x554   : > { %5137 = vbcast.lane.b32.xlu1 %v5115_v46, 296  ;;  %13558 = vst [vmem:[#allocation202_spill] sm:$0xff] %v11122_v32 }
 0x555   : > { %5133 = vbcast.lane.b32.xlu0 %v5115_v46, 288 }
 0x556   : > { %v11124_v7 = vpop.permute.xlu1 %4901 }
 0x557   : > { %13559 = vst [vmem:[#allocation101_spill] sm:$0xff] %v11124_v7  ;;  %v11126_v10 = vpop.permute.xlu0 %4897 }
 0x558   : > { %5145 = vbcast.lane.b32.xlu1 %v5115_v46, 312  ;;  %13560 = vst [vmem:[#allocation216_spill] sm:$0xff] %v11126_v10 }
 0x559   : > { %5141 = vbcast.lane.b32.xlu0 %v5115_v46, 304 }
 0x55a   : > { %v11128_v24 = vpop.permute.xlu1 %4909 }
 0x55b   : > { %13561 = vst [vmem:[#allocation114_spill] sm:$0xff] %v11128_v24  ;;  %v11130_v0 = vpop.permute.xlu0 %4905  ;;  %v5182_v24 = vrot.slane %v10932_v47, %v13462_v26 }
 0x55c   : > { %5153 = vbcast.lane.b32.xlu1 %v5115_v46, 328  ;;  %13562 = vst [vmem:[#allocation141_spill] sm:$0xff] %v11130_v0 }
 0x55d   : > { %5149 = vbcast.lane.b32.xlu0 %v5115_v46, 320 }
 0x55e   : > { %v11132_v36 = vpop.permute.xlu1 %4920 }
 0x55f   : > { %v11134_v3 = vpop.permute.xlu0 %4916 }
 0x560   : > { %5161 = vbcast.lane.b32.xlu1 %v5115_v46, 344 }
 0x561   : > { %5157 = vbcast.lane.b32.xlu0 %v5115_v46, 336 }
 0x562   : > { %v11136_v59 = vpop.permute.xlu1 %4928 }
 0x563   : > { %13563 = vst [vmem:[#allocation35_spill] sm:$0xff] %v11136_v59  ;;  %v11138_v7 = vpop.permute.xlu0 %4924 }
 0x564   : > { %5169 = vbcast.lane.b32.xlu1 %v5115_v46, 360  ;;  %13564 = vst [vmem:[#allocation152_spill] sm:$0xff] %v11138_v7 }
 0x565   : > { %5165 = vbcast.lane.b32.xlu0 %v5115_v46, 352 }
 0x566   : > { %v11140_v32 = vpop.permute.xlu1 %4936 }
 0x567   : > { %13565 = vst [vmem:[#allocation47_spill] sm:$0xff] %v11140_v32  ;;  %v11144_v0 = vpop.permute.xlu0 %4932 }
 0x568   : > { %5177 = vbcast.lane.b32.xlu1 %v5115_v46, 376  ;;  %13566 = vst [vmem:[#allocation142_spill] sm:$0xff] %v11144_v0 }
 0x569   : > { %5173 = vbcast.lane.b32.xlu0 %v5115_v46, 368 }
 0x56a   : > { %v11146_v10 = vpop.permute.xlu1 %4944 }
 0x56b   : > { %13567 = vst [vmem:[#allocation36_spill] sm:$0xff] %v11146_v10  ;;  %v11148_v9 = vpop.permute.xlu0 %4940 }
 0x56c   : > { %5188 = vbcast.lane.b32.xlu1 %v5182_v24, 264  ;;  %13568 = vst [vmem:[#allocation168_spill] sm:$0xff] %v11148_v9 }
 0x56d   : > { %5184 = vbcast.lane.b32.xlu0 %v5182_v24, 256 }
 0x56e   : > { %v11150_v49 = vpop.permute.xlu1 %4952 }
 0x56f   : > { %13569 = vst [vmem:[#allocation64_spill] sm:$0xff] %v11150_v49  ;;  %v11152_v30 = vpop.permute.xlu0 %4948 }
 0x570   : > { %5196 = vbcast.lane.b32.xlu1 %v5182_v24, 280 }
 0x571   : > { %5192 = vbcast.lane.b32.xlu0 %v5182_v24, 272 }
 0x572   : > { %v11154_v32 = vpop.permute.xlu1 %4960 }
 0x573   : > { %13570 = vst [vmem:[#allocation180_spill] sm:$0xff] %v11154_v32  ;;  %v11156_v48 = vpop.permute.xlu0 %4956 }
 0x574   : > { %5204 = vbcast.lane.b32.xlu1 %v5182_v24, 296  ;;  %13571 = vst [vmem:[#allocation77_spill] sm:$0xff] %v11156_v48 }
 0x575   : > { %5200 = vbcast.lane.b32.xlu0 %v5182_v24, 288 }
 0x576   : > { %v11158_v26 = vpop.permute.xlu1 %4968 }
 0x577   : > { %13572 = vst [vmem:[#allocation129_spill] sm:$0xff] %v11158_v26  ;;  %v11160_v46 = vpop.permute.xlu0 %4964 }
 0x578   : > { %5212 = vbcast.lane.b32.xlu1 %v5182_v24, 312  ;;  %13573 = vst [vmem:[#allocation205_spill] sm:$0xff] %v11160_v46 }
 0x579   : > { %5208 = vbcast.lane.b32.xlu0 %v5182_v24, 304 }
 0x57a   : > { %v11162_v10 = vpop.permute.xlu1 %4976 }
 0x57b   : > { %13574 = vst [vmem:[#allocation104_spill] sm:$0xff] %v11162_v10  ;;  %v11164_v9 = vpop.permute.xlu0 %4972  ;;  %v5249_v10 = vrot.slane %v10932_v47, %v13475_v56 }
 0x57c   : > { %5220 = vbcast.lane.b32.xlu1 %v5182_v24, 328  ;;  %13575 = vst [vmem:[#allocation215_spill] sm:$0xff] %v11164_v9 }
 0x57d   : > { %5216 = vbcast.lane.b32.xlu0 %v5182_v24, 320 }
 0x57e   : > { %v11166_v49 = vpop.permute.xlu1 %4987 }
 0x57f   : > { %v11168_v32 = vpop.permute.xlu0 %4983 }
 0x580   : > { %5228 = vbcast.lane.b32.xlu1 %v5182_v24, 344 }
 0x581   : > { %5224 = vbcast.lane.b32.xlu0 %v5182_v24, 336 }
 0x582   : > { %v11170_v0 = vpop.permute.xlu1 %4995 }
 0x583   : > { %13576 = vst [vmem:[#allocation117_spill] sm:$0xff] %v11170_v0  ;;  %v11172_v26 = vpop.permute.xlu0 %4991 }
 0x584   : > { %5236 = vbcast.lane.b32.xlu1 %v5182_v24, 360 }
 0x585   : > { %5232 = vbcast.lane.b32.xlu0 %v5182_v24, 352 }
 0x586   : > { %v11174_v48 = vpop.permute.xlu1 %5003 }
 0x587   : > { %13577 = vst [vmem:[#allocation155_spill] sm:$0xff] %v11174_v48  ;;  %v11178_v9 = vpop.permute.xlu0 %4999 }
 0x588   : > { %5244 = vbcast.lane.b32.xlu1 %v5182_v24, 376  ;;  %13578 = vst [vmem:[#allocation50_spill] sm:$0xff] %v11178_v9 }
 0x589   : > { %5240 = vbcast.lane.b32.xlu0 %v5182_v24, 368 }
 0x58a   : > { %v11180_v46 = vpop.permute.xlu1 %5011 }
 0x58b   : > { %13579 = vst [vmem:[#allocation193_spill] sm:$0xff] %v11180_v46  ;;  %v11182_v40 = vpop.permute.xlu0 %5007 }
 0x58c   : > { %5255 = vbcast.lane.b32.xlu1 %v5249_v10, 264  ;;  %13580 = vst [vmem:[#allocation92_spill] sm:$0xff] %v11182_v40 }
 0x58d   : > { %5251 = vbcast.lane.b32.xlu0 %v5249_v10, 256 }
 0x58e   : > { %v11184_v43 = vpop.permute.xlu1 %5019 }
 0x58f   : > { %13581 = vst [vmem:[#allocation167_spill] sm:$0xff] %v11184_v43  ;;  %v11186_v8 = vpop.permute.xlu0 %5015 }
 0x590   : > { %5263 = vbcast.lane.b32.xlu1 %v5249_v10, 280 }
 0x591   : > { %5259 = vbcast.lane.b32.xlu0 %v5249_v10, 272 }
 0x592   : > { %v11188_v48 = vpop.permute.xlu1 %5027 }
 0x593   : > { %13582 = vst [vmem:[#allocation63_spill] sm:$0xff] %v11188_v48  ;;  %v11190_v44 = vpop.permute.xlu0 %5023 }
 0x594   : > { %5271 = vbcast.lane.b32.xlu1 %v5249_v10, 296  ;;  %13583 = vst [vmem:[#allocation179_spill] sm:$0xff] %v11190_v44 }
 0x595   : > { %5267 = vbcast.lane.b32.xlu0 %v5249_v10, 288 }
 0x596   : > { %v11192_v47 = vpop.permute.xlu1 %5035 }
 0x597   : > { %13584 = vst [vmem:[#allocation76_spill] sm:$0xff] %v11192_v47  ;;  %v11194_v56 = vpop.permute.xlu0 %5031 }
 0x598   : > { %5279 = vbcast.lane.b32.xlu1 %v5249_v10, 312  ;;  %13585 = vst [vmem:[#allocation128_spill] sm:$0xff] %v11194_v56 }
 0x599   : > { %5275 = vbcast.lane.b32.xlu0 %v5249_v10, 304 }
 0x59a   : > { %v11196_v24 = vpop.permute.xlu1 %5043 }
 0x59b   : > { %13586 = vst [vmem:[#allocation192_spill] sm:$0xff] %v11196_v24  ;;  %v11198_v46 = vpop.permute.xlu0 %5039 }
 0x59c   : > { %5287 = vbcast.lane.b32.xlu1 %v5249_v10, 328  ;;  %13587 = vst [vmem:[#allocation91_spill] sm:$0xff] %v11198_v46 }
 0x59d   : > { %5283 = vbcast.lane.b32.xlu0 %v5249_v10, 320 }
 0x59e   : > { %v11200_v40 = vpop.permute.xlu1 %5054 }
 0x59f   : > { %v5051_v48 = vpop.permute.xlu0 %5050 }
 0x5a0   : > { %5295 = vbcast.lane.b32.xlu1 %v5249_v10, 344 }
 0x5a1   : > { %5291 = vbcast.lane.b32.xlu0 %v5249_v10, 336 }
 0x5a2   : > { %v11202_v43 = vpop.permute.xlu1 %5062 }
 0x5a3   : > { %13588 = vst [vmem:[#allocation204_spill] sm:$0xff] %v11202_v43  ;;  %v11204_v47 = vpop.permute.xlu0 %5058 }
 0x5a4   : > { %5303 = vbcast.lane.b32.xlu1 %v5249_v10, 360  ;;  %13589 = vst [vmem:[#allocation103_spill] sm:$0xff] %v11204_v47 }
 0x5a5   : > { %5299 = vbcast.lane.b32.xlu0 %v5249_v10, 352 }
 0x5a6   : > { %v11206_v44 = vpop.permute.xlu1 %5070 }
 0x5a7   : > { %13590 = vst [vmem:[#allocation218_spill] sm:$0xff] %v11206_v44  ;;  %v11208_v24 = vpop.permute.xlu0 %5066 }
 0x5a8   : > { %5311 = vbcast.lane.b32.xlu1 %v5249_v10, 376  ;;  %13591 = vst [vmem:[#allocation116_spill] sm:$0xff] %v11208_v24 }
 0x5a9   : > { %5307 = vbcast.lane.b32.xlu0 %v5249_v10, 368 }
 0x5aa   : > { %v11210_v56 = vpop.permute.xlu1 %5078 }
 0x5ab   : > { %13592 = vst [vmem:[#allocation154_spill] sm:$0xff] %v11210_v56  ;;  %v11212_v46 = vpop.permute.xlu0 %5074 }
 0x5ac   : > { %13593 = vst [vmem:[#allocation49_spill] sm:$0xff] %v11212_v46 }
 0x5ae   : > { %v11214_v9 = vpop.permute.xlu1 %5086 }
 0x5af   : > { %13594 = vst [vmem:[#allocation144_spill] sm:$0xff] %v11214_v9  ;;  %v11216_v0 = vpop.permute.xlu0 %5082 }
 0x5b2   : > { %v11218_v43 = vpop.permute.xlu1 %5094 }
 0x5b3   : > { %13595 = vst [vmem:[#allocation38_spill] sm:$0xff] %v11218_v43  ;;  %v11220_v13 = vpop.permute.xlu0 %5090 }
 0x5b4   : > { %13596 = vst [vmem:[#allocation170_spill] sm:$0xff] %v11220_v13 }
 0x5b6   : > { %v11222_v11 = vpop.permute.xlu1 %5102 }
 0x5b7   : > { %13597 = vst [vmem:[#allocation66_spill] sm:$0xff] %v11222_v11  ;;  %v11224_v44 = vpop.permute.xlu0 %5098 }
 0x5b8   : > { %13598 = vst [vmem:[#allocation131_spill] sm:$0xff] %v11224_v44 }
 0x5ba   : > { %v11226_v59 = vpop.permute.xlu1 %5110 }
 0x5bb   : > { %13599 = vst [vmem:[#allocation182_spill] sm:$0xff] %v11226_v59  ;;  %v11228_v24 = vpop.permute.xlu0 %5106 }
 0x5bc   : > { %13600 = vst [vmem:[#allocation79_spill] sm:$0xff] %v11228_v24 }
 0x5be   : > { %v11230_v56 = vpop.permute.xlu1 %5121 }
 0x5bf   : > { %v5118_v10 = vpop.permute.xlu0 %5117 }
 0x5c2   : > { %v11232_v46 = vpop.permute.xlu1 %5129 }
 0x5c3   : > { %13601 = vst [vmem:[#allocation207_spill] sm:$0xff] %v11232_v46  ;;  %v11234_v9 = vpop.permute.xlu0 %5125 }
 0x5c6   : > { %v11236_v42 = vpop.permute.xlu1 %5137 }
 0x5c7   : > { %13602 = vst [vmem:[#allocation106_spill] sm:$0xff] %v11236_v42  ;;  %v11238_v43 = vpop.permute.xlu0 %5133 }
 0x5c8   : > { %13603 = vst [vmem:[#allocation217_spill] sm:$0xff] %v11238_v43 }
 0x5ca   : > { %v11240_v13 = vpop.permute.xlu1 %5145 }
 0x5cb   : > { %13604 = vst [vmem:[#allocation119_spill] sm:$0xff] %v11240_v13  ;;  %v11242_v11 = vpop.permute.xlu0 %5141 }
 0x5cc   : > { %13605 = vst [vmem:[#allocation157_spill] sm:$0xff] %v11242_v11 }
 0x5ce   : > { %v11244_v44 = vpop.permute.xlu1 %5153 }
 0x5cf   : > { %13606 = vst [vmem:[#allocation52_spill] sm:$0xff] %v11244_v44  ;;  %v11246_v59 = vpop.permute.xlu0 %5149 }
 0x5d2   : > { %v11248_v24 = vpop.permute.xlu1 %5161 }
 0x5d3   : > { %13607 = vst [vmem:[#allocation195_spill] sm:$0xff] %v11248_v24  ;;  %v11250_v47 = vpop.permute.xlu0 %5157 }
 0x5d4   : > { %13608 = vst [vmem:[#allocation94_spill] sm:$0xff] %v11250_v47 }
 0x5d6   : > { %v11252_v14 = vpop.permute.xlu1 %5169 }
 0x5d7   : > { %13609 = vst [vmem:[#allocation169_spill] sm:$0xff] %v11252_v14  ;;  %v11254_v46 = vpop.permute.xlu0 %5165 }
 0x5d8   : > { %13610 = vst [vmem:[#allocation65_spill] sm:$0xff] %v11254_v46 }
 0x5da   : > { %v11256_v55 = vpop.permute.xlu1 %5177 }
 0x5db   : > { %13611 = vst [vmem:[#allocation181_spill] sm:$0xff] %v11256_v55  ;;  %v11258_v42 = vpop.permute.xlu0 %5173 }
 0x5dc   : > { %13612 = vst [vmem:[#allocation78_spill] sm:$0xff] %v11258_v42 }
 0x5de   : > { %v5189_v43 = vpop.permute.xlu1 %5188 }
 0x5df   : > { %v5185_v13 = vpop.permute.xlu0 %5184 }
 0x5e2   : > { %v11260_v12 = vpop.permute.xlu1 %5196 }
 0x5e3   : > { %13613 = vst [vmem:[#allocation130_spill] sm:$0xff] %v11260_v12  ;;  %v11262_v11 = vpop.permute.xlu0 %5192  ;;  %v5361_v12 = vsel %vm13621_vm9, %v10892_v2, %v11168_v32  ;;  %v5409_v32 = vsel %vm13627_vm10, %v10998_v23, %v5185_v13  ;;  %vm13629_vm9 = vmmov %vm13628_vm5 }
 0x5e4   : > { %vm13637_vm10 = vmmov %vm13628_vm5 }
 0x5e6   : > { %v11266_v25 = vpop.permute.xlu1 %5204 }
 0x5e7   : > { %v11264_v44 = vpop.permute.xlu0 %5200  ;;  %13615 = vst [vmem:[#allocation93_spill] sm:$0xff] %v11266_v25  ;;  %v5329_v25 = vsel %vm13622_vm6, %v10824_v35, %v11100_v63  ;;  %v5377_v63 = vsel %vm13628_vm5, %v10926_v19, %v5051_v48  ;;  %vm13631_vm6 = vmmov %vm13628_vm5 }
 0x5e8   : > { %13614 = vst [vmem:[#allocation194_spill] sm:$0xff] %v11264_v44  ;;  %v5457_v44 = vcombine.low %v5329_v25, %v5361_v12 }
 0x5ea   : > { %v11270_v47 = vpop.permute.xlu1 %5212  ;;  %v5465_v35 = vrot.slane %v5457_v44, %v9447_v17 }
 0x5eb   : > { %v11268_v24 = vpop.permute.xlu0 %5208  ;;  %13617 = vst [vmem:[#allocation105_spill] sm:$0xff] %v11270_v47  ;;  %v5345_v47 = vsel %vm13623_vm7, %v10858_v31, %v11134_v3  ;;  %v5393_v3 = vsel %vm13629_vm9, %v10964_v53, %v5118_v10  ;;  %vm13634_vm7 = vmmov %vm13628_vm5 }
 0x5ec   : > { %13616 = vst [vmem:[#allocation206_spill] sm:$0xff] %v11268_v24  ;;  %vm13638_vm9 = vmmov %vm13628_vm5 }
 0x5ee   : > { %v11276_v55 = vpop.permute.xlu1 %5220 }
 0x5ef   : > { %v11272_v14 = vpop.permute.xlu0 %5216  ;;  %13619 = vst [vmem:[#allocation118_spill] sm:$0xff] %v11276_v55  ;;  %v5473_v55 = vcombine.low %v5377_v63, %v5409_v32 }
 0x5f1   : > { %v5481_v23 = vrot.slane %v5473_v55, %v9447_v17 }
 0x5f2   : > { %v11289_v24 = vpop.permute.xlu1 %5228 }
 0x5f3   : > { %v11274_v46 = vpop.permute.xlu0 %5224  ;;  %13624 = vst [vmem:[#allocation37_spill] sm:$0xff] %v11289_v24 }
 0x5f4   : > { %13618 = vst [vmem:[#allocation219_spill] sm:$0xff] %v11274_v46 }
 0x5f6   : > { %v11303_v24 = vpop.permute.xlu1 %5236 }
 0x5f7   : > { %v11278_v42 = vpop.permute.xlu0 %5232  ;;  %13630 = vst [vmem:[#allocation51_spill] sm:$0xff] %v11303_v24 }
 0x5f8   : > { %13620 = vst [vmem:[#allocation143_spill] sm:$0xff] %v11278_v42  ;;  %v5313_v42 = vsel %vm13626_vm8, %v10790_v18, %v11066_v57  ;;  %vm13636_vm8 = vmmov %vm13628_vm5 }
 0x5f9   : > { %v5441_v2 = vcombine.low %v5313_v42, %v5345_v47 }
 0x5fa   : > { %v11310_v7 = vpop.permute.xlu1 %5244 }
 0x5fb   : > { %v11291_v46 = vpop.permute.xlu0 %5240  ;;  %v5449_v57 = vrot.slane %v5441_v2, %v9447_v17  ;;  %13632 = vst [vmem:[#allocation19_spill] sm:$0xff] %v11310_v7  ;;  %v5442_v7 = vcombine.high %v5313_v42, %v5345_v47  ;;  %v11340_v42 = vsel %vm13636_vm8, %v10890_v27, %v11166_v49  ;;  %vm13641_vm8 = vmmov %vm13628_vm5 }
 0x5fc   : > { %13625 = vst [vmem:[#allocation156_spill] sm:$0xff] %v11291_v46 }
 0x5fd   : > { %v5505_v13 = vcombine.low %v5449_v57, %v5465_v35  ;;  %v5506_v4 = vcombine.high %v5449_v57, %v5465_v35  ;;  %v5474_v35 = vcombine.high %v5377_v63, %v5409_v32  ;;  %v5456_v47 = vrot.slane %v5442_v7, %v9447_v17 }
 0x5fe   : > { %v5256_v57 = vpop.permute.xlu1 %5255 }
 0x5ff   : > { %v5252_v31 = vpop.permute.xlu0 %5251  ;;  %v11313_v53 = vrot.slane %v5505_v13, %v9461_v60 }
 0x600   : > { %v5425_v46 = vsel %vm13631_vm6, %v11032_v16, %v5252_v31  ;;  %v5520_v31 = vrot.slane %v5506_v4, %v9461_v60  ;;  %v5488_v4 = vrot.slane %v5474_v35, %v9447_v17  ;;  %vm13639_vm6 = vmmov %vm13628_vm5 }
 0x601   : > { %v5489_v18 = vcombine.low %v5393_v3, %v5425_v46 }
 0x603   : > { %v5497_v48 = vrot.slane %v5489_v18, %v9447_v17  ;;  %v11319_v2 = vpop.permute.xlu0 %5259  ;;  %v5490_v18 = vcombine.high %v5393_v3, %v5425_v46  ;;  %v11354_v46 = vsel %vm13638_vm9, %v10856_v33, %v11132_v36  ;;  %v11372_v36 = vsel %vm13641_vm8, %v10782_v20, %v11064_v50  ;;  %vm13643_vm9 = vmmov %vm13628_vm5 }
 0x604   : > { %v11394_v50 = vsel %vm13628_vm5, %v10842_v41, %v11118_v38  ;;  %v11399_v32 = vsel %vm13643_vm9, %v10876_v45, %v11152_v30  ;;  %vm13646_vm8 = vmmov %vm13628_vm5 }
 0x605   : > { %v5537_v19 = vcombine.low %v5481_v23, %v5497_v48  ;;  %v5538_v44 = vcombine.high %v5481_v23, %v5497_v48  ;;  %v5458_v23 = vcombine.high %v5329_v25, %v5361_v12  ;;  %v11345_v25 = vsel %vm13637_vm10, %v10962_v37, %v11230_v56  ;;  %vm13642_vm10 = vmmov %vm13628_vm5 }
 0x606   : > { %v11362_v37 = vsel %vm13639_vm6, %v10822_v28, %v11098_v62  ;;  %v5577_v28 = vcombine.low %v11372_v36, %v11354_v46  ;;  %v11385_v62 = vsel %vm13642_vm10, %v10910_v29, %v11186_v8  ;;  %vm13644_vm6 = vmmov %vm13628_vm5 }
 0x607   : > { %v11316_v10 = vrot.slane %v5537_v19, %v9461_v60  ;;  %v5552_v16 = vrot.slane %v5538_v44, %v9461_v60  ;;  %v5504_v19 = vrot.slane %v5490_v18, %v9447_v17  ;;  %v11327_v24 = vpop.permute.xlu0 %5267  ;;  %v11332_v44 = vsel %vm13634_vm7, %v11030_v58, %v5256_v57  ;;  %vm13640_vm7 = vmmov %vm13628_vm5 }
 0x608   : > { %v5472_v12 = vrot.slane %v5458_v23, %v9447_v17  ;;  %v11349_v58 = vsel %vm13628_vm5, %v10996_v51, %v5189_v43  ;;  %v5625_v49 = vcombine.low %v11345_v25, %v11332_v44  ;;  %v11367_v51 = vsel %vm13640_vm7, %v10924_v54, %v11200_v40  ;;  %vm13645_vm7 = vmmov %vm13628_vm5 }
 0x609   : > { %v5569_v55 = vcombine.low %v11313_v53, %v11316_v10  ;;  %v5571_v48 = vcombine.low %v5520_v31, %v5552_v16  ;;  %v5570_v13 = vcombine.high %v11313_v53, %v11316_v10  ;;  %v5553_v27 = vcombine.low %v5488_v4, %v5504_v19  ;;  %vm13649_vm10 = vmmov %vm13628_vm5 }
 0x60a   : > { %v5593_v43 = vcombine.low %v11362_v37, %v11340_v42  ;;  %v5521_v33 = vcombine.low %v5456_v47, %v5472_v12  ;;  %v5609_v7 = vcombine.low %v11367_v51, %v11349_v58  ;;  %v11388_v20 = vrot.slane %v5625_v49, %v9447_v17  ;;  %vm13653_vm9 = vmmov %vm13628_vm5 }
 0x60b   : > { %7622 = vrot.lane.b32.xlu1 %v5571_v48, %s13633_s11  ;;  %7618 = vrot.lane.b32.xlu0 %v5570_v13, %s13635_s26  ;;  %v11378_v56 = vpop.permute.xlu0 %5275  ;;  %v5554_v54 = vcombine.high %v5488_v4, %v5504_v19  ;;  %v5561_v40 = vrot.slane %v5553_v27, %v9461_v60  ;;  %v5522_v8 = vcombine.high %v5456_v47, %v5472_v12  ;;  %s13652_s11 = smov 16  }
 0x60c   : > { %v11402_v63 = vrot.slane %v5593_v43, %v9447_v17  ;;  %v5529_v29 = vrot.slane %v5521_v33, %v9461_v60  ;;  %v5617_v3 = vrot.slane %v5609_v7, %v9447_v17  ;;  %v11409_v18 = vsel %vm13644_vm6, %v10808_v52, %v11084_v6  ;;  %vm13655_vm6 = vmmov %vm13628_vm5 }
 0x60d   : > { %v5585_v41 = vrot.slane %v5577_v28, %v9447_v17  ;;  %v6545_v38 = vcombine.low %v11394_v50, %v11385_v62  ;;  %v11417_v30 = vsel %vm13645_vm7, %v11016_v39, %v11272_v14  ;;  %v5568_v23 = vrot.slane %v5554_v54, %v9461_v60  ;;  %vm13656_vm7 = vmmov %vm13628_vm5 }
 0x60e   : > { %v5673_v45 = vcombine.low %v5617_v3, %v11388_v20  ;;  %v5573_v35 = vcombine.low %v5529_v29, %v5561_v40  ;;  %v5572_v57 = vcombine.high %v5520_v31, %v5552_v16  ;;  %v6529_v6 = vcombine.low %v11409_v18, %v11399_v32 }
 0x60f   : > { %v5284_v48 = vpop.permute.xlu0 %5283  ;;  %v5641_v52 = vcombine.low %v5585_v41, %v11402_v63  ;;  %v5536_v13 = vrot.slane %v5522_v8, %v9461_v60  ;;  %v11428_v19 = vsel %vm13646_vm8, %v10948_v15, %v11216_v0  ;;  %v11433_v39 = vrot.slane %v6545_v38, %v9447_v17  ;;  %vm13657_vm8 = vmmov %vm13628_vm5 }
 0x610   : > { %7630 = vrot.lane.b32.xlu1 %v5573_v35, %s13647_s6  ;;  %7626 = vrot.lane.b32.xlu0 %v5572_v57, %s13648_s9  ;;  %v6561_v14 = vcombine.low %v11428_v19, %v11417_v30  ;;  %v11439_v16 = vsel %vm13649_vm10, %v11050_v21, %v5284_v48  ;;  %v11444_v31 = vsel %vm13628_vm5, %v10982_v61, %v11246_v59  ;;  %s13651_s6 = smov 10   ;;  %vm13660_vm10 = vmmov %vm13628_vm5  ;;  %v13661_v35 = vld [vmem:[#allocation166_spill] sm:$0xff]  ;;  %v13662_v57 = vld [vmem:[#allocation159_spill] sm:$0xff] }
 0x611   : > { %v5681_v0 = vrot.slane %v5673_v45, %v9461_v60  ;;  %v5575_v15 = vcombine.low %v5536_v13, %v5568_v23  ;;  %v5574_v12 = vcombine.high %v5529_v29, %v5561_v40  ;;  %v11448_v4 = vrot.slane %v6529_v6, %v9447_v17  ;;  %v13664_v48 = vld [vmem:[#allocation208_spill] sm:$0xff]  ;;  %v13667_v6 = vld [vmem:[#allocation163_spill] sm:$0xff] }
 0x612   : > { %v6577_v47 = vcombine.low %v11444_v31, %v11439_v16  ;;  %v5649_v49 = vrot.slane %v5641_v52, %v9461_v60  ;;  %v11458_v61 = vrot.slane %v6561_v14, %v9447_v17  ;;  %v5626_v33 = vcombine.high %v11345_v25, %v11332_v44 }
 0x613   : > { %v6593_v21 = vcombine.low %v11448_v4, %v11433_v39  ;;  %v5594_v54 = vcombine.high %v11362_v37, %v11340_v42  ;;  %v5610_v40 = vcombine.high %v11367_v51, %v11349_v58  ;;  %v5578_v8 = vcombine.high %v11372_v36, %v11354_v46 }
 0x614   : > { %7638 = vrot.lane.b32.xlu1 %v5575_v15, %s13650_s19  ;;  %7634 = vrot.lane.b32.xlu0 %v5574_v12, %s13651_s6  ;;  %v11461_v59 = vrot.slane %v6577_v47, %v9447_v17  ;;  %v5705_v27 = vcombine.low %v5649_v49, %v5681_v0  ;;  %v5640_v25 = vrot.slane %v5626_v33, %v9447_v17  ;;  %s13669_s19 = smov 20   ;;  %s13671_s6 = smov 24  }
 0x615   : > { %v11469_v7 = vrot.slane %v6593_v21, %v9461_v60  ;;  %v5674_v29 = vcombine.high %v5617_v3, %v11388_v20  ;;  %v5576_v38 = vcombine.high %v5536_v13, %v5568_v23  ;;  %v5427_v45 = vsel %vm13653_vm9, %v11036_v22, %v11319_v2  ;;  %v13658_v2 = vld [vmem:[#allocation152_spill] sm:$0xff]  ;;  %v13659_v20 = vld [vmem:[#allocation198_spill] sm:$0xff]  ;;  %vm13665_vm9 = vmmov %vm13628_vm5 }
 0x616   : > { %v6625_v43 = vcombine.low %v11458_v61, %v11461_v59  ;;  %v5608_v42 = vrot.slane %v5594_v54, %v9447_v17  ;;  %v5642_v37 = vcombine.high %v5585_v41, %v11402_v63  ;;  %v5624_v58 = vrot.slane %v5610_v40, %v9447_v17 }
 0x617   : > { %v5592_v46 = vrot.slane %v5578_v8, %v9447_v17  ;;  %v5363_v51 = vsel %vm13655_vm6, %v10896_v5, %v11172_v26  ;;  %v5395_v36 = vsel %vm13656_vm7, %v10968_v34, %v11234_v9  ;;  %v5411_v22 = vsel %vm13657_vm8, %v11002_v1, %v11262_v11  ;;  %v13663_v26 = vld [vmem:[#allocation165_spill] sm:$0xff]  ;;  %v13666_v34 = vld [vmem:[#allocation103_spill] sm:$0xff]  ;;  %vm13668_vm6 = vmmov %vm13628_vm5 }
 0x618   : > { %7646 = vrot.lane.b32.xlu1 %v5705_v27, %s13652_s11  ;;  %v11472_v28 = vrot.slane %v6625_v43, %v9461_v60  ;;  %s13654_s11 = smov 14   ;;  %v5347_v63 = vsel %vm13660_vm10, %v13659_v20, %v13658_v2  ;;  %v5688_v3 = vrot.slane %v5674_v29, %v9461_v60  ;;  %v5689_v41 = vcombine.low %v5624_v58, %v5640_v25  ;;  %v5264_v20 = vpop.permute.xlu1 %5263  ;;  %vm13675_vm7 = vmmov %vm13628_vm5 }
 0x619   : > { %7642 = vrot.lane.b32.xlu0 %v5576_v38, %s13654_s11  ;;  %v5761_v23 = vcombine.low %v5395_v36, %v5427_v45  ;;  %v5315_v5 = vsel %vm13628_vm5, %v13662_v57, %v13661_v35  ;;  %v5331_v9 = vsel %vm13665_vm9, %v13664_v48, %v13663_v26  ;;  %v5379_v11 = vsel %vm13668_vm6, %v13667_v6, %v13666_v34  ;;  %s13670_s11 = smov 18   ;;  %v13674_v26 = vld [vmem:[#allocation70_spill] sm:$0xff]  ;;  %v13676_v48 = vld [vmem:[#allocation73_spill] sm:$0xff]  ;;  %vm13677_vm8 = vmmov %vm13628_vm5 }
 0x61a   : > { %v6657_v44 = vcombine.low %v11469_v7, %v11472_v28  ;;  %v5656_v1 = vrot.slane %v5642_v37, %v9461_v60  ;;  %v5657_v52 = vcombine.low %v5592_v46, %v5608_v42  ;;  %v5729_v13 = vcombine.low %v5331_v9, %v5363_v51  ;;  %vm13681_vm10 = vmmov %vm13628_vm5 }
 0x61b   : > { %v5745_v14 = vcombine.low %v5379_v11, %v5411_v22  ;;  %v5713_v15 = vcombine.low %v5315_v5, %v5347_v63  ;;  %v5690_v12 = vcombine.high %v5624_v58, %v5640_v25  ;;  %v5697_v47 = vrot.slane %v5689_v41, %v9461_v60  ;;  %vm13686_vm9 = vmmov %vm13628_vm5 }
 0x61c   : > { %v5769_v21 = vrot.slane %v5761_v23, %v9447_v17  ;;  %v5707_v27 = vcombine.low %v5656_v1, %v5688_v3  ;;  %v5706_v43 = vcombine.high %v5649_v49, %v5681_v0  ;;  %v5658_v33 = vcombine.high %v5592_v46, %v5608_v42  ;;  %vm13690_vm6 = vmmov %vm13628_vm5 }
 0x61d   : > { %v5665_v54 = vrot.slane %v5657_v52, %v9461_v60  ;;  %v5737_v40 = vrot.slane %v5729_v13, %v9447_v17  ;;  %v5753_v8 = vrot.slane %v5745_v14, %v9447_v17  ;;  %v5721_v29 = vrot.slane %v5713_v15, %v9447_v17  ;;  %v13682_v13 = vld [vmem:[#allocation207_spill] sm:$0xff]  ;;  %v13683_v14 = vld [vmem:[#allocation45_spill] sm:$0xff] }
 0x61e   : > { %7654 = vrot.lane.b32.xlu1 %v5707_v27, %s13669_s19  ;;  %7650 = vrot.lane.b32.xlu0 %v5706_v43, %s13670_s11  ;;  %v5704_v25 = vrot.slane %v5690_v12, %v9461_v60  ;;  %v5762_v38 = vcombine.high %v5395_v36, %v5427_v45  ;;  %v5708_v2 = vcombine.high %v5656_v1, %v5688_v3  ;;  %s13672_s19 = smov 22   ;;  %v13673_v36 = vld [vmem:[#allocation35_spill] sm:$0xff]  ;;  %v13680_v1 = vld [vmem:[#allocation121_spill] sm:$0xff]  ;;  %v13684_v12 = vld [vmem:[#allocation130_spill] sm:$0xff] }
 0x61f   : > { %v5809_v37 = vcombine.low %v5753_v8, %v5769_v21  ;;  %v5709_v58 = vcombine.low %v5665_v54, %v5697_v47  ;;  %v5672_v0 = vrot.slane %v5658_v33, %v9461_v60  ;;  %v5730_v49 = vcombine.high %v5331_v9, %v5363_v51 }
 0x620   : > { %v5777_v42 = vcombine.low %v5721_v29, %v5737_v40  ;;  %v5746_v46 = vcombine.high %v5379_v11, %v5411_v22  ;;  %v5714_v41 = vcombine.high %v5315_v5, %v5347_v63  ;;  %v5776_v23 = vrot.slane %v5762_v38, %v9447_v17  ;;  %v13679_v11 = vld [vmem:[#allocation117_spill] sm:$0xff]  ;;  %v13691_v38 = vld [vmem:[#allocation90_spill] sm:$0xff] }
 0x621   : > { %v5810_v35 = vcombine.high %v5753_v8, %v5769_v21  ;;  %v5817_v57 = vrot.slane %v5809_v37, %v9461_v60  ;;  %v5711_v45 = vcombine.low %v5672_v0, %v5704_v25  ;;  %v5348_v3 = vsel %vm13675_vm7, %v13674_v26, %v13673_v36  ;;  %v13689_v8 = vld [vmem:[#allocation40_spill] sm:$0xff]  ;;  %v13692_v37 = vld [vmem:[#allocation95_spill] sm:$0xff]  ;;  %vm13693_vm7 = vmmov %vm13628_vm5 }
 0x622   : > { %7662 = vrot.lane.b32.xlu1 %v5709_v58, %s13671_s6  ;;  %7658 = vrot.lane.b32.xlu0 %v5708_v2, %s13672_s19  ;;  %v5428_v51 = vsel %vm13677_vm8, %v13676_v48, %v5264_v20  ;;  %v5710_v22 = vcombine.high %v5665_v54, %v5697_v47  ;;  %v5744_v9 = vrot.slane %v5730_v49, %v9447_v17  ;;  %s13678_s6 = smov 28   ;;  %v13685_v47 = vld [vmem:[#allocation136_spill] sm:$0xff]  ;;  %s13687_s19 = smov 26   ;;  %vm13696_vm8 = vmmov %vm13628_vm5 }
 0x623   : > { %v5778_v34 = vcombine.high %v5721_v29, %v5737_v40  ;;  %v5785_v63 = vrot.slane %v5777_v42, %v9461_v60  ;;  %v5760_v5 = vrot.slane %v5746_v46, %v9447_v17  ;;  %v5728_v6 = vrot.slane %v5714_v41, %v9447_v17  ;;  %v13688_v40 = vld [vmem:[#allocation34_spill] sm:$0xff]  ;;  %v13694_v2 = vld [vmem:[#allocation204_spill] sm:$0xff] }
 0x624   : > { %v5364_v52 = vsel %vm13681_vm10, %v13680_v1, %v13679_v11  ;;  %v5396_v15 = vsel %vm13628_vm5, %v13683_v14, %v13682_v13  ;;  %v5412_v21 = vsel %vm13686_vm9, %v13685_v47, %v13684_v12  ;;  %v5824_v43 = vrot.slane %v5810_v35, %v9461_v60  ;;  %v13695_v49 = vld [vmem:[#allocation84_spill] sm:$0xff]  ;;  %vm13699_vm10 = vmmov %vm13628_vm5 }
 0x625   : > { %v5897_v27 = vcombine.low %v5396_v15, %v5428_v51  ;;  %v5825_v33 = vcombine.low %v5760_v5, %v5776_v23  ;;  %v5841_v54 = vcombine.low %v5785_v63, %v5817_v57  ;;  %v5316_v29 = vsel %vm13690_vm6, %v13689_v8, %v13688_v40  ;;  %vm13704_vm9 = vmmov %vm13628_vm5 }
 0x626   : > { %7670 = vrot.lane.b32.xlu1 %v5711_v45, %s13678_s6  ;;  %7666 = vrot.lane.b32.xlu0 %v5710_v22, %s13687_s19  ;;  %v5332_v58 = vsel %vm13693_vm7, %v13692_v37, %v13691_v38  ;;  %v5380_v42 = vsel %vm13696_vm8, %v13695_v49, %v13694_v2  ;;  %v5712_v46 = vcombine.high %v5672_v0, %v5704_v25  ;;  %s13697_s6 = smov 30   ;;  %v13701_v2 = vld [vmem:[#allocation209_spill] sm:$0xff]  ;;  %vm13707_vm6 = vmmov %vm13628_vm5 }
 0x627   : > { %v5865_v20 = vcombine.low %v5332_v58, %v5364_v52  ;;  %v5792_v41 = vrot.slane %v5778_v34, %v9461_v60  ;;  %v5793_v45 = vcombine.low %v5728_v6, %v5744_v9  ;;  %v5881_v35 = vcombine.low %v5380_v42, %v5412_v21  ;;  %vm13710_vm7 = vmmov %vm13628_vm5 }
 0x628   : > { %v5849_v36 = vcombine.low %v5316_v29, %v5348_v3  ;;  %v5905_v26 = vrot.slane %v5897_v27, %v9447_v17  ;;  %v5826_v48 = vcombine.high %v5760_v5, %v5776_v23  ;;  %v5833_v22 = vrot.slane %v5825_v33, %v9461_v60  ;;  %vm13713_vm8 = vmmov %vm13628_vm5 }
 0x629   : > { %v5843_v11 = vcombine.low %v5792_v41, %v5824_v43  ;;  %v5842_v1 = vcombine.high %v5785_v63, %v5817_v57  ;;  %v5873_v13 = vrot.slane %v5865_v20, %v9447_v17  ;;  %v5794_v25 = vcombine.high %v5728_v6, %v5744_v9 }
 0x62a   : > { %7678 = vrot.lane.b32.xlu1 %v5841_v54, %s13271_s24  ;;  %7674 = vrot.lane.b32.xlu0 %v5712_v46, %s13697_s6  ;;  %v5801_v0 = vrot.slane %v5793_v45, %v9461_v60  ;;  %v5889_v34 = vrot.slane %v5881_v35, %v9447_v17  ;;  %v5857_v14 = vrot.slane %v5849_v36, %v9447_v17  ;;  %v13703_v46 = vld [vmem:[#allocation69_spill] sm:$0xff]  ;;  %v13708_v35 = vld [vmem:[#allocation194_spill] sm:$0xff] }
 0x62b   : > { %v5898_v12 = vcombine.high %v5396_v15, %v5428_v51  ;;  %v5840_v23 = vrot.slane %v5826_v48, %v9461_v60  ;;  %v5850_v27 = vcombine.high %v5316_v29, %v5348_v3  ;;  %v5844_v57 = vcombine.high %v5792_v41, %v5824_v43  ;;  %v13698_v3 = vld [vmem:[#allocation88_spill] sm:$0xff]  ;;  %v13705_v41 = vld [vmem:[#allocation217_spill] sm:$0xff] }
 0x62c   : > { %v5945_v47 = vcombine.low %v5889_v34, %v5905_v26  ;;  %v5845_v5 = vcombine.low %v5801_v0, %v5833_v22  ;;  %v5866_v63 = vcombine.high %v5332_v58, %v5364_v52  ;;  %v5913_v33 = vcombine.low %v5857_v14, %v5873_v13  ;;  %v13700_v58 = vld [vmem:[#allocation142_spill] sm:$0xff]  ;;  %v13709_v36 = vld [vmem:[#allocation149_spill] sm:$0xff] }
 0x62d   : > { %v5808_v9 = vrot.slane %v5794_v25, %v9461_v60  ;;  %v5882_v6 = vcombine.high %v5380_v42, %v5412_v21  ;;  %v5912_v54 = vrot.slane %v5898_v12, %v9447_v17  ;;  %v5946_v40 = vcombine.high %v5889_v34, %v5905_v26  ;;  %v13702_v42 = vld [vmem:[#allocation50_spill] sm:$0xff]  ;;  %v13712_v25 = vld [vmem:[#allocation184_spill] sm:$0xff]  ;;  %v13714_v34 = vld [vmem:[#allocation177_spill] sm:$0xff] }
 0x62e   : > { %7686 = vrot.lane.b32.xlu1 %v5843_v11, %s13273_s22  ;;  %7682 = vrot.lane.b32.xlu0 %v5842_v1, %s13268_s3  ;;  %v5953_v51 = vrot.slane %v5945_v47, %v9461_v60  ;;  %v5864_v8 = vrot.slane %v5850_v27, %v9447_v17  ;;  %v5429_v52 = vsel %vm13699_vm10, %v13698_v3, %v11327_v24  ;;  %v13706_v24 = vld [vmem:[#allocation87_spill] sm:$0xff]  ;;  %vm13716_vm10 = vmmov %vm13628_vm5  ;;  %v13717_v47 = vld [vmem:[#allocation116_spill] sm:$0xff] }
 0x62f   : > { %v5847_v15 = vcombine.low %v5808_v9, %v5840_v23  ;;  %v5846_v43 = vcombine.high %v5801_v0, %v5833_v22  ;;  %v5880_v29 = vrot.slane %v5866_v63, %v9447_v17  ;;  %v5914_v21 = vcombine.high %v5857_v14, %v5873_v13  ;;  %v13711_v13 = vld [vmem:[#allocation127_spill] sm:$0xff]  ;;  %v13715_v14 = vld [vmem:[#allocation132_spill] sm:$0xff] }
 0x630   : > { %v5921_v38 = vrot.slane %v5913_v33, %v9461_v60  ;;  %v5896_v37 = vrot.slane %v5882_v6, %v9447_v17  ;;  %v5349_v49 = vsel %vm13628_vm5, %v13701_v2, %v13700_v58  ;;  %v5365_v20 = vsel %vm13704_vm9, %v13703_v46, %v13702_v42  ;;  %vm13721_vm9 = vmmov %vm13628_vm5 }
 0x631   : > { %v5397_v45 = vsel %vm13707_vm6, %v13706_v24, %v13705_v41  ;;  %v5413_v26 = vsel %vm13710_vm7, %v13709_v36, %v13708_v35  ;;  %v5960_v48 = vrot.slane %v5946_v40, %v9461_v60  ;;  %v5317_v0 = vsel %vm13713_vm8, %v13712_v25, %v13711_v13  ;;  %vm13723_vm6 = vmmov %vm13628_vm5 }
 0x632   : > { %7694 = vrot.lane.b32.xlu1 %v5845_v5, %s13280_s16  ;;  %7690 = vrot.lane.b32.xlu0 %v5844_v57, %s13272_s23  ;;  %v5961_v22 = vcombine.low %v5896_v37, %v5912_v54  ;;  %v6033_v11 = vcombine.low %v5397_v45, %v5429_v52  ;;  %v5977_v1 = vcombine.low %v5921_v38, %v5953_v51  ;;  %v13718_v5 = vld [vmem:[#allocation124_spill] sm:$0xff]  ;;  %vm13726_vm7 = vmmov %vm13628_vm5 }
 0x633   : > { %v5333_v12 = vsel %vm13716_vm10, %v13715_v14, %v13714_v34  ;;  %v5381_v27 = vsel %vm13628_vm5, %v13718_v5, %v13717_v47  ;;  %v5848_v57 = vcombine.high %v5808_v9, %v5840_v23  ;;  %v5928_v63 = vrot.slane %v5914_v21, %v9461_v60  ;;  %v13720_v34 = vld [vmem:[#allocation97_spill] sm:$0xff]  ;;  %vm13729_vm8 = vmmov %vm13628_vm5 }
 0x634   : > { %v5929_v33 = vcombine.low %v5864_v8, %v5880_v29  ;;  %v6001_v6 = vcombine.low %v5333_v12, %v5365_v20  ;;  %v6017_v40 = vcombine.low %v5381_v27, %v5413_v26  ;;  %v5962_v3 = vcombine.high %v5896_v37, %v5912_v54  ;;  %vm13732_vm10 = vmmov %vm13628_vm5 }
 0x635   : > { %v6041_v58 = vrot.slane %v6033_v11, %v9447_v17  ;;  %v5979_v2 = vcombine.low %v5928_v63, %v5960_v48  ;;  %v5978_v42 = vcombine.high %v5921_v38, %v5953_v51  ;;  %v5930_v46 = vcombine.high %v5864_v8, %v5880_v29 }
 0x636   : > { %7702 = vrot.lane.b32.xlu1 %v5847_v15, %s13290_s13  ;;  %7698 = vrot.lane.b32.xlu0 %v5846_v43, %s13278_s17  ;;  %v5985_v15 = vcombine.low %v5317_v0, %v5349_v49  ;;  %v5969_v43 = vrot.slane %v5961_v22, %v9461_v60  ;;  %v5937_v23 = vrot.slane %v5929_v33, %v9461_v60  ;;  %v5272_v22 = vpop.permute.xlu1 %5271  ;;  %v13727_v33 = vld [vmem:[#allocation106_spill] sm:$0xff] }
 0x637   : > { %v6009_v9 = vrot.slane %v6001_v6, %v9447_v17  ;;  %v6025_v21 = vrot.slane %v6017_v40, %v9447_v17  ;;  %v5976_v54 = vrot.slane %v5962_v3, %v9461_v60  ;;  %v6034_v37 = vcombine.high %v5397_v45, %v5429_v52  ;;  %v13719_v45 = vld [vmem:[#allocation47_spill] sm:$0xff]  ;;  %v13728_v6 = vld [vmem:[#allocation188_spill] sm:$0xff]  ;;  %v13731_v3 = vld [vmem:[#allocation30_spill] sm:$0xff] }
 0x638   : > { %v5993_v41 = vrot.slane %v5985_v15, %v9447_v17  ;;  %v5981_v35 = vcombine.low %v5937_v23, %v5969_v43  ;;  %v5980_v36 = vcombine.high %v5928_v63, %v5960_v48  ;;  %v5944_v51 = vrot.slane %v5930_v46, %v9461_v60  ;;  %v13730_v15 = vld [vmem:[#allocation93_spill] sm:$0xff] }
 0x639   : > { %v6081_v24 = vcombine.low %v6025_v21, %v6041_v58  ;;  %v6002_v8 = vcombine.high %v5333_v12, %v5365_v20  ;;  %v6018_v38 = vcombine.high %v5381_v27, %v5413_v26  ;;  %v5986_v11 = vcombine.high %v5317_v0, %v5349_v49  ;;  %v13722_v20 = vld [vmem:[#allocation189_spill] sm:$0xff]  ;;  %v13724_v27 = vld [vmem:[#allocation155_spill] sm:$0xff] }
 0x63a   : > { %7710 = vrot.lane.b32.xlu1 %v5977_v1, %s13294_s5  ;;  %7706 = vrot.lane.b32.xlu0 %v5848_v57, %s13285_s15  ;;  %v6049_v29 = vcombine.low %v5993_v41, %v6009_v9  ;;  %v6048_v1 = vrot.slane %v6034_v37, %v9447_v17  ;;  %v6082_v13 = vcombine.high %v6025_v21, %v6041_v58  ;;  %v13725_v57 = vld [vmem:[#allocation172_spill] sm:$0xff]  ;;  %v13736_v37 = vld [vmem:[#allocation107_spill] sm:$0xff] }
 0x63b   : > { %v6089_v25 = vrot.slane %v6081_v24, %v9461_v60  ;;  %v5983_v52 = vcombine.low %v5944_v51, %v5976_v54  ;;  %v11627_v48 = vsel %vm13721_vm9, %v13720_v34, %v13719_v45  ;;  %v5430_v26 = vsel %vm13723_vm6, %v13722_v20, %v5272_v22  ;;  %vm13737_vm9 = vmmov %vm13628_vm5 }
 0x63c   : > { %v5982_v14 = vcombine.high %v5937_v23, %v5969_v43  ;;  %v6016_v12 = vrot.slane %v6002_v8, %v9447_v17  ;;  %v6050_v49 = vcombine.high %v5993_v41, %v6009_v9  ;;  %v6057_v0 = vrot.slane %v6049_v29, %v9461_v60  ;;  %v13733_v23 = vld [vmem:[#allocation62_spill] sm:$0xff]  ;;  %v13735_v41 = vld [vmem:[#allocation61_spill] sm:$0xff]  ;;  %vm13740_vm6 = vmmov %vm13628_vm5 }
 0x63d   : > { %v6032_v47 = vrot.slane %v6018_v38, %v9447_v17  ;;  %v6000_v5 = vrot.slane %v5986_v11, %v9447_v17  ;;  %v5366_v63 = vsel %vm13726_vm7, %v13725_v57, %v13724_v27  ;;  %v5398_v40 = vsel %vm13729_vm8, %v13728_v6, %v13727_v33  ;;  %v13734_v9 = vld [vmem:[#allocation54_spill] sm:$0xff]  ;;  %vm13745_vm7 = vmmov %vm13628_vm5 }
 0x63e   : > { %7718 = vrot.lane.b32.xlu1 %v5979_v2, %s13296_s30  ;;  %7714 = vrot.lane.b32.xlu0 %v5978_v42, %s13291_s12  ;;  %v5414_v43 = vsel %vm13732_vm10, %v13731_v3, %v13730_v15  ;;  %v6169_v58 = vcombine.low %v5398_v40, %v5430_v26  ;;  %v6096_v2 = vrot.slane %v6082_v13, %v9461_v60  ;;  %vm13748_vm8 = vmmov %vm13628_vm5 }
 0x63f   : > { %v6097_v42 = vcombine.low %v6032_v47, %v6048_v1  ;;  %v6113_v46 = vcombine.low %v6057_v0, %v6089_v25  ;;  %v5318_v21 = vsel %vm13628_vm5, %v13734_v9, %v13733_v23  ;;  %v5334_v24 = vsel %vm13737_vm9, %v13736_v37, %v13735_v41  ;;  %vm13752_vm10 = vmmov %vm13628_vm5 }
 0x640   : > { %v5984_v29 = vcombine.high %v5944_v51, %v5976_v54  ;;  %v6137_v38 = vcombine.low %v5334_v24, %v5366_v63  ;;  %v6064_v22 = vrot.slane %v6050_v49, %v9461_v60  ;;  %v6065_v11 = vcombine.low %v6000_v5, %v6016_v12  ;;  %vm13757_vm9 = vmmov %vm13628_vm5 }
 0x641   : > { %v6177_v45 = vrot.slane %v6169_v58, %v9447_v17  ;;  %v6098_v34 = vcombine.high %v6032_v47, %v6048_v1  ;;  %v6105_v20 = vrot.slane %v6097_v42, %v9461_v60  ;;  %v6114_v27 = vcombine.high %v6057_v0, %v6089_v25 }
 0x642   : > { %7726 = vrot.lane.b32.xlu1 %v5981_v35, %s13301_s18  ;;  %7722 = vrot.lane.b32.xlu0 %v5980_v36, %s13295_s2  ;;  %v13738_v35 = vld [vmem:[#allocation218_spill] sm:$0xff]  ;;  %v13739_v36 = vld [vmem:[#allocation59_spill] sm:$0xff]  ;;  %v6145_v54 = vrot.slane %v6137_v38, %v9447_v17  ;;  %v6066_v51 = vcombine.high %v6000_v5, %v6016_v12  ;;  %v6073_v49 = vrot.slane %v6065_v11, %v9461_v60  ;;  %v11686_v38 = vpop.permute.xlu1 %5279 }
 0x643   : > { %v5382_v8 = vsel %vm13740_vm6, %v13739_v36, %v13738_v35  ;;  %v6170_v6 = vcombine.high %v5398_v40, %v5430_v26  ;;  %v6112_v1 = vrot.slane %v6098_v34, %v9461_v60  ;;  %v6116_v3 = vcombine.high %v6064_v22, %v6096_v2  ;;  %vm13761_vm6 = vmmov %vm13628_vm5 }
 0x644   : > { %v6153_v13 = vcombine.low %v5382_v8, %v5414_v43  ;;  %v6117_v47 = vcombine.low %v6073_v49, %v6105_v20  ;;  %v6138_v25 = vcombine.high %v5334_v24, %v5366_v63  ;;  %v6080_v12 = vrot.slane %v6066_v51, %v9461_v60 }
 0x645   : > { %v6154_v5 = vcombine.high %v5382_v8, %v5414_v43  ;;  %v6122_v58 = vcombine.high %v5318_v21, %v11627_v48  ;;  %v6184_v42 = vrot.slane %v6170_v6, %v9447_v17  ;;  %v6118_v23 = vcombine.high %v6073_v49, %v6105_v20  ;;  %v13744_v6 = vld [vmem:[#allocation214_spill] sm:$0xff] }
 0x646   : > { %7734 = vrot.lane.b32.xlu1 %v5983_v52, %s13311_s28  ;;  %7730 = vrot.lane.b32.xlu0 %v5982_v14, %s13300_s29  ;;  %v6121_v52 = vcombine.low %v5318_v21, %v11627_v48  ;;  %v6115_v14 = vcombine.low %v6064_v22, %v6096_v2  ;;  %v6161_v57 = vrot.slane %v6153_v13, %v9447_v17  ;;  %v5288_v49 = vpop.permute.xlu1 %5287 }
 0x647   : > { %v6119_v40 = vcombine.low %v6080_v12, %v6112_v1  ;;  %v6152_v2 = vrot.slane %v6138_v25, %v9447_v17  ;;  %v6168_v43 = vrot.slane %v6154_v5, %v9447_v17  ;;  %v6136_v48 = vrot.slane %v6122_v58, %v9447_v17  ;;  %v13753_v25 = vld [vmem:[#allocation52_spill] sm:$0xff]  ;;  %v13755_v5 = vld [vmem:[#allocation118_spill] sm:$0xff] }
 0x648   : > { %v6129_v33 = vrot.slane %v6121_v52, %v9447_v17  ;;  %v6217_v15 = vcombine.low %v6161_v57, %v6177_v45  ;;  %v6120_v24 = vcombine.high %v6080_v12, %v6112_v1  ;;  %v6578_v34 = vcombine.high %v11444_v31, %v11439_v16  ;;  %v13756_v58 = vld [vmem:[#allocation86_spill] sm:$0xff] }
 0x649   : > { %v6233_v41 = vcombine.low %v6168_v43, %v6184_v42  ;;  %v6201_v36 = vcombine.low %v6136_v48, %v6152_v2  ;;  %v6234_v8 = vcombine.high %v6168_v43, %v6184_v42  ;;  %v6202_v13 = vcombine.high %v6136_v48, %v6152_v2  ;;  %v13760_v2 = vld [vmem:[#allocation25_spill] sm:$0xff]  ;;  %v13763_v43 = vld [vmem:[#allocation39_spill] sm:$0xff] }
 0x64a   : > { %7742 = vrot.lane.b32.xlu1 %v6113_v46, %s13313_s25  ;;  %7738 = vrot.lane.b32.xlu0 %v5984_v29, %s13308_s27  ;;  %v6185_v0 = vcombine.low %v6129_v33, %v6145_v54  ;;  %v6218_v46 = vcombine.high %v6161_v57, %v6177_v45  ;;  %v6225_v26 = vrot.slane %v6217_v15, %v9461_v60  ;;  %v13746_v15 = vld [vmem:[#allocation64_spill] sm:$0xff] }
 0x64b   : > { %v6186_v63 = vcombine.high %v6129_v33, %v6145_v54  ;;  %v6241_v29 = vrot.slane %v6233_v41, %v9461_v60  ;;  %v6209_v52 = vrot.slane %v6201_v36, %v9461_v60  ;;  %v6248_v45 = vrot.slane %v6234_v8, %v9461_v60  ;;  %v13766_v41 = vld [vmem:[#allocation200_spill] sm:$0xff] }
 0x64c   : > { %v6193_v9 = vrot.slane %v6185_v0, %v9461_v60  ;;  %v6232_v21 = vrot.slane %v6218_v46, %v9461_v60  ;;  %v6546_v54 = vcombine.high %v11394_v50, %v11385_v62  ;;  %v6562_v51 = vcombine.high %v11428_v19, %v11417_v30  ;;  %v13747_v30 = vld [vmem:[#allocation29_spill] sm:$0xff]  ;;  %v13754_v0 = vld [vmem:[#allocation123_spill] sm:$0xff] }
 0x64d   : > { %v6200_v35 = vrot.slane %v6186_v63, %v9461_v60  ;;  %v6253_v20 = vcombine.low %v6209_v52, %v6241_v29  ;;  %v6530_v57 = vcombine.high %v11409_v18, %v11399_v32  ;;  %v6592_v16 = vrot.slane %v6578_v34, %v9447_v17 }
 0x64e   : > { %7750 = vrot.lane.b32.xlu1 %v6115_v14, %s13317_s14  ;;  %7746 = vrot.lane.b32.xlu0 %v6114_v27, %s13312_s4  ;;  %v6249_v37 = vcombine.low %v6193_v9, %v6225_v26  ;;  %v6250_v11 = vcombine.high %v6193_v9, %v6225_v26  ;;  %v6216_v27 = vrot.slane %v6202_v13, %v9461_v60  ;;  %v11728_v26 = vpop.permute.xlu1 %5295  ;;  %v13762_v9 = vld [vmem:[#allocation190_spill] sm:$0xff] }
 0x64f   : > { %v6251_v22 = vcombine.low %v6200_v35, %v6232_v21  ;;  %v6252_v14 = vcombine.high %v6200_v35, %v6232_v21  ;;  %v6626_v31 = vcombine.high %v11458_v61, %v11461_v59  ;;  %v5434_v62 = vsel %vm13745_vm7, %v13744_v6, %v5288_v49  ;;  %v13750_v59 = vld [vmem:[#allocation167_spill] sm:$0xff]  ;;  %vm13764_vm7 = vmmov %vm13628_vm5  ;;  %v13765_v21 = vld [vmem:[#allocation144_spill] sm:$0xff] }
 0x650   : > { %v6255_v33 = vcombine.low %v6216_v27, %v6248_v45  ;;  %v6254_v50 = vcombine.high %v6209_v52, %v6241_v29  ;;  %v5354_v19 = vsel %vm13748_vm8, %v13747_v30, %v13746_v15  ;;  %v6560_v1 = vrot.slane %v6546_v54, %v9447_v17  ;;  %vm13767_vm8 = vmmov %vm13628_vm5 }
 0x651   : > { %v6594_v32 = vcombine.high %v11448_v4, %v11433_v39  ;;  %v6576_v18 = vrot.slane %v6562_v51, %v9447_v17  ;;  %v6544_v61 = vrot.slane %v6530_v57, %v9447_v17  ;;  %v5402_v12 = vsel %vm13628_vm5, %v13754_v0, %v13753_v25 }
 0x652   : > { %7758 = vrot.lane.b32.xlu1 %v6117_v47, %s13322_s20  ;;  %7754 = vrot.lane.b32.xlu0 %v6116_v3, %s13314_s0  ;;  %v13751_v47 = vld [vmem:[#allocation210_spill] sm:$0xff]  ;;  %v5418_v42 = vsel %vm13757_vm9, %v13756_v58, %v13755_v5  ;;  %v6713_v39 = vcombine.low %v5402_v12, %v5434_v62  ;;  %v6640_v4 = vrot.slane %v6626_v31, %v9461_v60  ;;  %v11749_v49 = vpop.permute.xlu1 %5303  ;;  %vm13779_vm9 = vmmov %vm13628_vm5 }
 0x653   : > { %v5370_v3 = vsel %vm13752_vm10, %v13751_v47, %v13750_v59  ;;  %v6641_v46 = vcombine.low %v6576_v18, %v6592_v16  ;;  %v5338_v48 = vsel %vm13764_vm7, %v13763_v43, %v13762_v9  ;;  %v6256_v35 = vcombine.high %v6216_v27, %v6248_v45  ;;  %vm13773_vm10 = vmmov %vm13628_vm5  ;;  %v13778_v9 = vld [vmem:[#allocation134_spill] sm:$0xff] }
 0x654   : > { %v6681_v36 = vcombine.low %v5338_v48, %v5370_v3  ;;  %v6608_v8 = vrot.slane %v6594_v32, %v9461_v60  ;;  %v6609_v29 = vcombine.low %v6544_v61, %v6560_v1  ;;  %v6721_v13 = vrot.slane %v6713_v39, %v9447_v17  ;;  %vm13785_vm7 = vmmov %vm13628_vm5 }
 0x655   : > { %v6642_v52 = vcombine.high %v6576_v18, %v6592_v16  ;;  %v6649_v34 = vrot.slane %v6641_v46, %v9461_v60  ;;  %v6610_v45 = vcombine.high %v6544_v61, %v6560_v1  ;;  %v6714_v16 = vcombine.high %v5402_v12, %v5434_v62  ;;  %v13772_v12 = vld [vmem:[#allocation151_spill] sm:$0xff] }
 0x656   : > { %7766 = vrot.lane.b32.xlu1 %v6119_v40, %s13334_s7  ;;  %7762 = vrot.lane.b32.xlu0 %v6118_v23, %s13320_s10  ;;  %s13741_s7 = smov 82   ;;  %v6658_v40 = vcombine.high %v11469_v7, %v11472_v28  ;;  %v13759_v23 = vld [vmem:[#allocation203_spill] sm:$0xff]  ;;  %v6689_v54 = vrot.slane %v6681_v36, %v9447_v17  ;;  %v6617_v27 = vrot.slane %v6609_v29, %v9461_v60  ;;  %v11762_v25 = vpop.permute.xlu1 %5311 }
 0x657   : > { %v5322_v63 = vsel %vm13761_vm6, %v13760_v2, %v13759_v23  ;;  %v6656_v6 = vrot.slane %v6642_v52, %v9461_v60  ;;  %v6682_v1 = vcombine.high %v5338_v48, %v5370_v3  ;;  %v6624_v18 = vrot.slane %v6610_v45, %v9461_v60  ;;  %v13776_v23 = vld [vmem:[#allocation43_spill] sm:$0xff]  ;;  %v13780_v48 = vld [vmem:[#allocation94_spill] sm:$0xff]  ;;  %vm13782_vm6 = vmmov %vm13628_vm5 }
 0x658   : > { %v6666_v15 = vcombine.high %v5322_v63, %v5354_v19  ;;  %v6661_v30 = vcombine.low %v6617_v27, %v6649_v34  ;;  %v6728_v59 = vrot.slane %v6714_v16, %v9447_v17  ;;  %v13788_v52 = vld [vmem:[#allocation53_spill] sm:$0xff]  ;;  %v13793_v45 = vld [vmem:[#allocation170_spill] sm:$0xff] }
 0x659   : > { %v6664_v0 = vcombine.high %v6624_v18, %v6656_v6  ;;  %v6663_v58 = vcombine.low %v6624_v18, %v6656_v6 }
 0x65a   : > { %7774 = vrot.lane.b32.xlu1 %v6249_v37, %s13338_s21  ;;  %7770 = vrot.lane.b32.xlu0 %v6120_v24, %s13329_s8  ;;  %s13742_s21 = smov 88   ;;  %v5386_v37 = vsel %vm13767_vm8, %v13766_v41, %v13765_v21  ;;  %v5292_v24 = vpop.permute.xlu0 %5291  ;;  %v13781_v21 = vld [vmem:[#allocation71_spill] sm:$0xff]  ;;  %vm13789_vm8 = vmmov %vm13628_vm5 }
 0x65b   : > { %v6698_v61 = vcombine.high %v5386_v37, %v5418_v42  ;;  %v5435_v3 = vsel %vm13773_vm10, %v13772_v12, %v5292_v24  ;;  %v5403_v41 = vsel %vm13782_vm6, %v13781_v21, %v13780_v48  ;;  %v13784_v24 = vld [vmem:[#allocation32_spill] sm:$0xff]  ;;  %vm13792_vm10 = vmmov %vm13628_vm5 }
 0x65c   : > { %v6849_v29 = vcombine.low %v5403_v41, %v5435_v3  ;;  %vm13803_vm6 = vmmov %vm13628_vm5 }
 0x65d   : > { %v6712_v46 = vrot.slane %v6698_v61, %v9447_v17 }
 0x65e   : > { %7782 = vrot.lane.b32.xlu1 %v6251_v22, %s13340_s1  ;;  %7778 = vrot.lane.b32.xlu0 %v6250_v11, %s13741_s7  ;;  %s13743_s1 = smov 86   ;;  %v6697_v22 = vcombine.low %v5386_v37, %v5418_v42  ;;  %v6665_v11 = vcombine.low %v5322_v63, %v5354_v19  ;;  %v11753_v31 = vpop.permute.xlu0 %5299  ;;  %v6680_v19 = vrot.slane %v6666_v15, %v9447_v17  ;;  %v13777_v63 = vld [vmem:[#allocation179_spill] sm:$0xff] }
 0x65f   : > { %v6696_v42 = vrot.slane %v6682_v1, %v9447_v17  ;;  %v5371_v43 = vsel %vm13779_vm9, %v13778_v9, %v13777_v63  ;;  %v13783_v37 = vld [vmem:[#allocation219_spill] sm:$0xff]  ;;  %v6778_v1 = vcombine.high %v6712_v46, %v6728_v59  ;;  %v6857_v18 = vrot.slane %v6849_v29, %v9447_v17  ;;  %vm13800_vm9 = vmmov %vm13628_vm5 }
 0x660   : > { %v6705_v51 = vrot.slane %v6697_v22, %v9447_v17  ;;  %v6673_v57 = vrot.slane %v6665_v11, %v9447_v17 }
 0x661   : > { %v6745_v6 = vcombine.low %v6680_v19, %v6696_v42 }
 0x662   : > { %7790 = vrot.lane.b32.xlu1 %v6253_v20, %s13742_s21  ;;  %7786 = vrot.lane.b32.xlu0 %v6252_v14, %s13743_s1  ;;  %s13749_s21 = smov 92   ;;  %s13758_s1 = smov 90   ;;  %v6660_v20 = vcombine.high %v6608_v8, %v6640_v4  ;;  %v6659_v14 = vcombine.low %v6608_v8, %v6640_v4  ;;  %v6729_v32 = vcombine.low %v6673_v57, %v6689_v54  ;;  %v11767_v5 = vpop.permute.xlu0 %5307 }
 0x663   : > { %v6762_v47 = vcombine.high %v6705_v51, %v6721_v13  ;;  %v6730_v39 = vcombine.high %v6673_v57, %v6689_v54  ;;  %v6777_v8 = vcombine.low %v6712_v46, %v6728_v59  ;;  %v6792_v46 = vrot.slane %v6778_v1, %v9461_v60  ;;  %v13814_v1 = vld [vmem:[#allocation174_spill] sm:$0xff] }
 0x664   : > { %v6737_v4 = vrot.slane %v6729_v32, %v9461_v60 }
 0x665   : > { %v6776_v36 = vrot.slane %v6762_v47, %v9461_v60  ;;  %v6785_v32 = vrot.slane %v6777_v8, %v9461_v60 }
 0x666   : > { %7798 = vrot.lane.b32.xlu1 %v6255_v33, %s13749_s21  ;;  %7794 = vrot.lane.b32.xlu0 %v6254_v50, %s13758_s1  ;;  %s13768_s21 = smov 94   ;;  %v6761_v33 = vcombine.low %v6705_v51, %v6721_v13  ;;  %v6662_v50 = vcombine.high %v6617_v27, %v6649_v34  ;;  %v13787_v13 = vld [vmem:[#allocation213_spill] sm:$0xff]  ;;  %v13794_v27 = vld [vmem:[#allocation211_spill] sm:$0xff] }
 0x667   : > { %v5323_v34 = vsel %vm13789_vm8, %v13788_v52, %v13787_v13  ;;  %v5387_v51 = vsel %vm13628_vm5, %v13794_v27, %v13793_v45  ;;  %vm13809_vm8 = vmmov %vm13628_vm5 }
 0x668   : > { %v6769_v62 = vrot.slane %v6761_v33, %v9461_v60  ;;  %v6744_v33 = vrot.slane %v6730_v39, %v9461_v60 }
 0x66a   : > { %7870 = vrot.lane.b32.xlu1 %v6658_v40, %s13635_s26  ;;  %7802 = vrot.lane.b32.xlu0 %v6256_v35, %s13768_s21  ;;  %s13769_s26 = smov 4   ;;  %s13770_s21 = smov 10   ;;  %v13775_v40 = vld [vmem:[#allocation77_spill] sm:$0xff]  ;;  %v5419_v35 = vsel %vm13785_vm7, %v13784_v24, %v13783_v37  ;;  %v6794_v22 = vcombine.high %v6737_v4, %v6769_v62  ;;  %v6793_v57 = vcombine.low %v6737_v4, %v6769_v62  ;;  %v13798_v24 = vld [vmem:[#allocation102_spill] sm:$0xff]  ;;  %vm13806_vm7 = vmmov %vm13628_vm5 }
 0x66b   : > { %v11776_v2 = vsel %vm13628_vm5, %v13776_v23, %v13775_v40  ;;  %v6833_v15 = vcombine.low %v5387_v51, %v5419_v35  ;;  %v6796_v61 = vcombine.high %v6744_v33, %v6776_v36  ;;  %v6795_v47 = vcombine.low %v6744_v33, %v6776_v36  ;;  %v13799_v36 = vld [vmem:[#allocation158_spill] sm:$0xff] }
 0x66c   : > { %v6746_v62 = vcombine.high %v6680_v19, %v6696_v42  ;;  %v6850_v40 = vcombine.high %v5403_v41, %v5435_v3  ;;  %v6834_v21 = vcombine.high %v5387_v51, %v5419_v35  ;;  %v11820_v8 = vsel %vm13800_vm9, %v13799_v36, %v13798_v24  ;;  %v13801_v3 = vld [vmem:[#allocation89_spill] sm:$0xff]  ;;  %v13802_v41 = vld [vmem:[#allocation183_spill] sm:$0xff]  ;;  %vm13817_vm9 = vmmov %vm13628_vm5 }
 0x66d   : > { %v6802_v29 = vcombine.high %v5323_v34, %v11776_v2  ;;  %v13804_v35 = vld [vmem:[#allocation63_spill] sm:$0xff] }
 0x66e   : > { %7878 = vrot.lane.b32.xlu1 %v6660_v20, %s13648_s9  ;;  %7874 = vrot.lane.b32.xlu0 %v6659_v14, %s13769_s26  ;;  %s13771_s9 = smov 8   ;;  %s13786_s26 = smov 12   ;;  %v13790_v20 = vld [vmem:[#allocation202_spill] sm:$0xff]  ;;  %v6760_v9 = vrot.slane %v6746_v62, %v9461_v60  ;;  %v6864_v10 = vrot.slane %v6850_v40, %v9447_v17 }
 0x66f   : > { %v13791_v14 = vld [vmem:[#allocation82_spill] sm:$0xff] }
 0x670   : > { %v5339_v54 = vsel %vm13792_vm10, %v13791_v14, %v13790_v20  ;;  %v6800_v52 = vcombine.high %v6760_v9, %v6792_v46  ;;  %v6799_v45 = vcombine.low %v6760_v9, %v6792_v46  ;;  %vm13812_vm10 = vmmov %vm13628_vm5 }
 0x671   : > { %v6818_v19 = vcombine.high %v5339_v54, %v5371_v43 }
 0x672   : > { %7886 = vrot.lane.b32.xlu1 %v6662_v50, %s13770_s21  ;;  %7882 = vrot.lane.b32.xlu0 %v6661_v30, %s13771_s9  ;;  %s13774_s21 = smov 14   ;;  %v6817_v50 = vcombine.low %v5339_v54, %v5371_v43  ;;  %v6801_v30 = vcombine.low %v5323_v34, %v11776_v2  ;;  %s13795_s9 = smov 16   ;;  %v11825_v43 = vsel %vm13803_vm6, %v13802_v41, %v13801_v3  ;;  %v13808_v54 = vld [vmem:[#allocation113_spill] sm:$0xff]  ;;  %vm13821_vm6 = vmmov %vm13628_vm5 }
 0x673   : > { %v6832_v14 = vrot.slane %v6818_v19, %v9447_v17  ;;  %v11840_v2 = vsel %vm13809_vm8, %v13808_v54, %v11728_v26  ;;  %v6816_v26 = vrot.slane %v6802_v29, %v9447_v17  ;;  %vm13823_vm8 = vcmask 97280  }
 0x674   : > { %v6825_v12 = vrot.slane %v6817_v50, %v9447_v17  ;;  %v6809_v4 = vrot.slane %v6801_v30, %v9447_v17  ;;  %v13811_v50 = vld [vmem:[#allocation148_spill] sm:$0xff]  ;;  %v13813_v30 = vld [vmem:[#allocation195_spill] sm:$0xff] }
 0x675   : > { %v6881_v19 = vcombine.low %v6816_v26, %v6832_v14 }
 0x676   : > { %7894 = vrot.lane.b32.xlu1 %v6664_v0, %s13774_s21  ;;  %7890 = vrot.lane.b32.xlu0 %v6663_v58, %s13786_s26  ;;  %v6753_v0 = vrot.slane %v6745_v6, %v9461_v60  ;;  %v6841_v58 = vrot.slane %v6833_v15, %v9447_v17  ;;  %s13796_s21 = smov 22   ;;  %v6865_v48 = vcombine.low %v6809_v4, %v6825_v12  ;;  %s13807_s26 = smov 24   ;;  %v13810_v6 = vld [vmem:[#allocation180_spill] sm:$0xff] }
 0x677   : > { %v6866_v51 = vcombine.high %v6809_v4, %v6825_v12  ;;  %v5356_v15 = vsel %vm13812_vm10, %v13811_v50, %v13810_v6  ;;  %v13819_v4 = vld [vmem:[#allocation38_spill] sm:$0xff]  ;;  %vm13824_vm10 = vcmask 113664  }
 0x678   : > { %v6897_v23 = vcombine.low %v6841_v58, %v6857_v18  ;;  %v6798_v63 = vcombine.high %v6753_v0, %v6785_v32  ;;  %v6797_v42 = vcombine.low %v6753_v0, %v6785_v32  ;;  %v13815_v32 = vld [vmem:[#allocation37_spill] sm:$0xff]  ;;  %v6938_v54 = vcombine.high %v11820_v8, %v5356_v15 }
 0x67a   : > { %7902 = vrot.lane.b32.xlu1 %v6794_v22, %s13670_s11  ;;  %7898 = vrot.lane.b32.xlu0 %v6793_v57, %s13795_s9  ;;  %s13797_s11 = smov 20   ;;  %v13805_v22 = vld [vmem:[#allocation109_spill] sm:$0xff]  ;;  %v6905_v13 = vrot.slane %v6897_v23, %v9461_v60  ;;  %v6873_v57 = vrot.slane %v6865_v48, %v9461_v60  ;;  %s14083_s9 = sld [smem:[#allocation11_spill]] }
 0x67b   : > { %v11831_v53 = vsel %vm13806_vm7, %v13805_v22, %v13804_v35  ;;  %vm13822_vm7 = vcmask 80896   ;;  %v6882_v22 = vcombine.high %v6816_v26, %v6832_v14  ;;  %v13828_v26 = vld [vmem:[#allocation171_spill] sm:$0xff] }
 0x67c   : > { %v6930_v12 = vcombine.high %v6873_v57, %v6905_v13  ;;  %v6929_v23 = vcombine.low %v6873_v57, %v6905_v13 }
 0x67d   : > { %v7623_v11 = vpop.permute.xlu1 %7622  ;;  %v7619_v16 = vpop.permute.xlu0 %7618 }
 0x67e   : > { %7910 = vrot.lane.b32.xlu1 %v6796_v61, %s13796_s21  ;;  %7906 = vrot.lane.b32.xlu0 %v6795_v47, %s13797_s11  ;;  %v8121_v37 = vsel %vm4052_vm1, %v5569_v55, %v7619_v16  ;;  %v6898_v55 = vcombine.high %v6841_v58, %v6857_v18  ;;  %v6848_v16 = vrot.slane %v6834_v21, %v9447_v17  ;;  %v13816_v18 = vld [vmem:[#allocation138_spill] sm:$0xff] }
 0x67f   : > { %v8122_v34 = vsel %vm4054_vm2, %v8121_v37, %v7623_v11  ;;  %v5404_v11 = vsel %vm13628_vm5, %v13814_v1, %v13813_v30  ;;  %v11857_v61 = vsel %vm13817_vm9, %v13816_v18, %v13815_v32  ;;  %v6953_v58 = vcombine.low %v11825_v43, %v11831_v53  ;;  %v13829_v1 = vld [vmem:[#allocation216_spill] sm:$0xff] }
 0x680   : > { %v6985_v47 = vcombine.low %v5404_v11, %v11840_v2  ;;  %v6912_v62 = vrot.slane %v6898_v55, %v9461_v60  ;;  %v6913_v0 = vcombine.low %v6848_v16, %v6864_v10  ;;  %v6937_v21 = vcombine.low %v11820_v8, %v5356_v15  ;;  %s8425_s21 = sshll.u32 %s14083_s9, 9 }
 0x681   : > { %v6914_v36 = vcombine.high %v6848_v16, %v6864_v10  ;;  %v6961_v41 = vrot.slane %v6953_v58, %v9447_v17  ;;  %v6889_v55 = vrot.slane %v6881_v19, %v9461_v60  ;;  %vm13825_vm5 = vcmask 130048  }
 0x682   : > { %v7631_v39 = vpop.permute.xlu1 %7630  ;;  %v7627_v59 = vpop.permute.xlu0 %7626  ;;  %7918 = vrot.lane.b32.xlu1 %v6798_v63, %s13687_s19  ;;  %7914 = vrot.lane.b32.xlu0 %v6797_v42, %s13807_s26  ;;  %s13818_s19 = smov 28   ;;  %v6880_v63 = vrot.slane %v6866_v51, %v9461_v60  ;;  %v6993_v24 = vrot.slane %v6985_v47, %v9447_v17  ;;  %v6945_v10 = vrot.slane %v6937_v21, %v9447_v17  ;;  %vm13826_vm9 = vcmask 146432   ;;  %v13840_v21 = vld [vmem:[#allocation147_spill] sm:$0xff] }
 0x683   : > { %v8123_v33 = vsel %vm4056_vm3, %v8122_v34, %v7627_v59  ;;  %v13820_v59 = vld [vmem:[#allocation99_spill] sm:$0xff]  ;;  %v6986_v34 = vcombine.high %v5404_v11, %v11840_v2  ;;  %v6954_v51 = vcombine.high %v11825_v43, %v11831_v53  ;;  %v6896_v8 = vrot.slane %v6882_v22, %v9461_v60  ;;  %v13827_v2 = vld [vmem:[#allocation153_spill] sm:$0xff] }
 0x684   : > { %v5388_v46 = vsel %vm13821_vm6, %v13820_v59, %v13819_v4  ;;  %v8124_v40 = vsel %vm4058_vm4, %v8123_v33, %v7631_v39  ;;  %v6921_v39 = vrot.slane %v6913_v0, %v9461_v60  ;;  %v6932_v3 = vcombine.high %v6880_v63, %v6912_v62  ;;  %v13830_v43 = vld [vmem:[#allocation57_spill] sm:$0xff] }
 0x685   : > { %v6969_v42 = vcombine.low %v5388_v46, %v11857_v61  ;;  %v6931_v35 = vcombine.low %v6880_v63, %v6912_v62  ;;  %v7001_v6 = vcombine.low %v6945_v10, %v6961_v41  ;;  %v6970_v50 = vcombine.high %v5388_v46, %v11857_v61 }
 0x686   : > { %v7639_v20 = vpop.permute.xlu1 %7638  ;;  %v7635_v27 = vpop.permute.xlu0 %7634  ;;  %7926 = vrot.lane.b32.xlu1 %v6800_v52, %s13697_s6  ;;  %7922 = vrot.lane.b32.xlu0 %v6799_v45, %s13818_s19  ;;  %v6933_v33 = vcombine.low %v6889_v55, %v6921_v39  ;;  %v11897_v30 = vsel %vm13821_vm6, %v13828_v26, %v13827_v2  ;;  %v11905_v11 = vrot.slane %v6938_v54, %v9447_v17  ;;  %s13932_s6 = smov 80  }
 0x687   : > { %v8125_v9 = vsel %vm13822_vm7, %v8124_v40, %v7635_v27  ;;  %v6977_v13 = vrot.slane %v6969_v42, %v9447_v17  ;;  %v6934_v27 = vcombine.high %v6889_v55, %v6921_v39  ;;  %vm13831_vm7 = vmmov %vm13821_vm6  ;;  %v7000_v32 = vrot.slane %v6986_v34, %v9447_v17  ;;  %v13836_v42 = vld [vmem:[#allocation205_spill] sm:$0xff] }
 0x688   : > { %v8126_v29 = vsel %vm13823_vm8, %v8125_v9, %v7639_v20  ;;  %v6928_v20 = vrot.slane %v6914_v36, %v9461_v60  ;;  %v11902_v53 = vsel %vm13831_vm7, %v13830_v43, %v13829_v1  ;;  %v6968_v0 = vrot.slane %v6954_v51, %v9447_v17  ;;  %vm13833_vm8 = vmmov %vm13821_vm6  ;;  %v13837_v9 = vld [vmem:[#allocation85_spill] sm:$0xff]  ;;  %v13842_v36 = vld [vmem:[#allocation98_spill] sm:$0xff] }
 0x689   : > { %v7033_v45 = vcombine.low %v6977_v13, %v6993_v24  ;;  %v7034_v18 = vcombine.high %v6977_v13, %v6993_v24  ;;  %v7002_v40 = vcombine.high %v6945_v10, %v6961_v41  ;;  %v6984_v63 = vrot.slane %v6970_v50, %v9447_v17  ;;  %v13841_v24 = vld [vmem:[#allocation65_spill] sm:$0xff]  ;;  %vm13843_vm7 = vmmov %vm13821_vm6  ;;  %v13845_v41 = vld [vmem:[#allocation60_spill] sm:$0xff] }
 0x68a   : > { %7934 = vrot.lane.b32.xlu1 %v6930_v12, %s13268_s3  ;;  %v7647_v48 = vpop.permute.xlu1 %7646  ;;  %7930 = vrot.lane.b32.xlu0 %v6929_v23, %s13271_s24  ;;  %v6936_v62 = vcombine.high %v6896_v8, %v6928_v20  ;;  %v13832_v12 = vld [vmem:[#allocation139_spill] sm:$0xff]  ;;  %v6935_v46 = vcombine.low %v6896_v8, %v6928_v20  ;;  %v7009_v23 = vrot.slane %v7001_v6, %v9461_v60  ;;  %v13848_v34 = vld [vmem:[#allocation137_spill] sm:$0xff]  ;;  %s14030_s3 = smov 126  }
 0x68b   : > { %v7643_v37 = vpop.permute.xlu0 %7642  ;;  %v7041_v61 = vrot.slane %v7033_v45, %v9461_v60  ;;  %v11914_v58 = vsel %vm13833_vm8, %v13832_v12, %v11753_v31  ;;  %v13839_v31 = vld [vmem:[#allocation128_spill] sm:$0xff]  ;;  %v5405_v39 = vsel %vm13843_vm7, %v13842_v36, %v13841_v24  ;;  %vm13846_vm8 = vmmov %vm13821_vm6  ;;  %v7049_v22 = vcombine.low %v6984_v63, %v7000_v32  ;;  %v13847_v10 = vld [vmem:[#allocation131_spill] sm:$0xff] }
 0x68c   : > { %v8127_v52 = vsel %vm13824_vm10, %v8126_v29, %v7643_v37  ;;  %vm13834_vm10 = vcmask 162816   ;;  %v11929_v37 = vsel %vm13821_vm6, %v13840_v21, %v13839_v31  ;;  %v7121_v55 = vcombine.low %v5405_v39, %v11914_v58 }
 0x68d   : > { %v8128_v57 = vsel %vm13825_vm5, %v8127_v52, %v7647_v48  ;;  %vm13835_vm5 = vcmask 179200   ;;  %v7066_v52 = vcombine.high %v7009_v23, %v7041_v61  ;;  %v7017_v54 = vcombine.low %v11905_v11, %v6968_v0 }
 0x68e   : > { %7942 = vrot.lane.b32.xlu1 %v6932_v3, %s13272_s23  ;;  %7938 = vrot.lane.b32.xlu0 %v6931_v35, %s13273_s22  ;;  %v13844_v3 = vld [vmem:[#allocation143_spill] sm:$0xff]  ;;  %v7048_v35 = vrot.slane %v7034_v18, %v9461_v60  ;;  %v7016_v51 = vrot.slane %v7002_v40, %v9461_v60  ;;  %v7050_v8 = vcombine.high %v6984_v63, %v7000_v32  ;;  %vm13853_vm7 = vcmask 244736   ;;  %v13855_v63 = vld [vmem:[#allocation133_spill] sm:$0xff]  ;;  %s14024_s22 = smov 122   ;;  %s14027_s23 = smov 124  }
 0x68f   : > { %v11937_v29 = vsel %vm13846_vm8, %v13845_v41, %v13844_v3  ;;  %v7057_v50 = vrot.slane %v7049_v22, %v9461_v60  ;;  %v7018_v1 = vcombine.high %v11905_v11, %v6968_v0  ;;  %v7122_v0 = vcombine.high %v5405_v39, %v11914_v58  ;;  %v13857_v3 = vld [vmem:[#allocation115_spill] sm:$0xff]  ;;  %v13858_v41 = vld [vmem:[#allocation120_spill] sm:$0xff]  ;;  %v13860_v22 = vld [vmem:[#allocation101_spill] sm:$0xff] }
 0x690   : > { %v7655_v14 = vpop.permute.xlu1 %7654  ;;  %v7651_v16 = vpop.permute.xlu0 %7650  ;;  %v7068_v26 = vcombine.high %v7016_v51, %v7048_v35  ;;  %v7064_v11 = vrot.slane %v7050_v8, %v9461_v60 }
 0x691   : > { %v8129_v15 = vsel %vm13826_vm9, %v8128_v57, %v7651_v16  ;;  %vm13838_vm9 = vmmov %vm13821_vm6  ;;  %v7089_v57 = vcombine.low %v11902_v53, %v11929_v37  ;;  %v7032_v24 = vrot.slane %v7018_v1, %v9461_v60  ;;  %v13873_v1 = vld [vmem:[#allocation199_spill] sm:$0xff] }
 0x692   : > { %7950 = vrot.lane.b32.xlu1 %v6934_v27, %s13278_s17  ;;  %7946 = vrot.lane.b32.xlu0 %v6933_v33, %s13280_s16  ;;  %v8130_v4 = vsel %vm13834_vm10, %v8129_v15, %v7655_v14  ;;  %v11924_v48 = vsel %vm13838_vm9, %v13837_v9, %v13836_v42  ;;  %vm13849_vm10 = vmmov %vm13821_vm6  ;;  %v7065_v27 = vcombine.low %v7009_v23, %v7041_v61  ;;  %vm13851_vm9 = vcmask 211968   ;;  %v13854_v23 = vld [vmem:[#allocation75_spill] sm:$0xff]  ;;  %s14019_s16 = smov 118   ;;  %s14022_s17 = smov 120  }
 0x693   : > { %v5389_v45 = vsel %vm13849_vm10, %v13848_v34, %v13847_v10  ;;  %v7073_v6 = vcombine.low %v11897_v30, %v11924_v48  ;;  %v7129_v15 = vrot.slane %v7121_v55, %v9447_v17  ;;  %vm13852_vm6 = vcmask 228352  }
 0x694   : > { %v7663_v47 = vpop.permute.xlu1 %7662  ;;  %v7659_v59 = vpop.permute.xlu0 %7658  ;;  %v7105_v16 = vcombine.low %v5389_v45, %v11937_v29  ;;  %v7067_v61 = vcombine.low %v7016_v51, %v7048_v35  ;;  %v7090_v42 = vcombine.high %v11902_v53, %v11929_v37  ;;  %v7106_v58 = vcombine.high %v5389_v45, %v11937_v29  ;;  %v13861_v53 = vld [vmem:[#allocation161_spill] sm:$0xff] }
 0x695   : > { %v8131_v19 = vsel %vm13835_vm5, %v8130_v4, %v7659_v59  ;;  %vm13850_vm5 = vcmask 195584   ;;  %v7081_v4 = vrot.slane %v7073_v6, %v9447_v17  ;;  %vm13856_vm10 = vcmask 277504  }
 0x696   : > { %7958 = vrot.lane.b32.xlu1 %v6936_v62, %s13285_s15  ;;  %7954 = vrot.lane.b32.xlu0 %v6935_v46, %s13290_s13  ;;  %v8132_v20 = vsel %vm13850_vm5, %v8131_v19, %v7663_v47  ;;  %v7025_v47 = vrot.slane %v7017_v54, %v9461_v60  ;;  %v7097_v62 = vrot.slane %v7089_v57, %v9447_v17  ;;  %vm13859_vm5 = vmmov %vm13846_vm8  ;;  %s14013_s13 = smov 114   ;;  %s14016_s15 = smov 116  }
 0x697   : > { %v7113_v12 = vrot.slane %v7105_v16, %v9447_v17  ;;  %v11972_v19 = vsel %vm13846_vm8, %v13855_v63, %v13854_v23  ;;  %v11984_v35 = vsel %vm13859_vm5, %v13858_v41, %v13857_v3  ;;  %v7074_v55 = vcombine.high %v11897_v30, %v11924_v48  ;;  %v13866_v30 = vld [vmem:[#allocation46_spill] sm:$0xff]  ;;  %v13886_v41 = vld [vmem:[#allocation145_spill] sm:$0xff] }
 0x698   : > { %v7671_v13 = vpop.permute.xlu1 %7670  ;;  %v7667_v14 = vpop.permute.xlu0 %7666  ;;  %v7070_v40 = vcombine.high %v7025_v47, %v7057_v50  ;;  %v7069_v21 = vcombine.low %v7025_v47, %v7057_v50  ;;  %v7137_v36 = vcombine.low %v7081_v4, %v7097_v62  ;;  %v12000_v54 = vrot.slane %v7122_v0, %v9447_v17  ;;  %v13870_v50 = vld [vmem:[#allocation129_spill] sm:$0xff]  ;;  %v13885_v3 = vld [vmem:[#allocation126_spill] sm:$0xff] }
 0x699   : > { %v8133_v33 = vsel %vm13851_vm9, %v8132_v20, %v7667_v14  ;;  %v7169_v59 = vcombine.low %v7113_v12, %v7129_v15  ;;  %vm13862_vm9 = vmmov %vm13859_vm5  ;;  %v7170_v10 = vcombine.high %v7113_v12, %v7129_v15  ;;  %v7072_v20 = vcombine.high %v7032_v24, %v7064_v11  ;;  %v13871_v15 = vld [vmem:[#allocation186_spill] sm:$0xff] }
 0x69a   : > { %7966 = vrot.lane.b32.xlu1 %v7066_v52, %s13291_s12  ;;  %7962 = vrot.lane.b32.xlu0 %v7065_v27, %s13294_s5  ;;  %v8134_v43 = vsel %vm13852_vm6, %v8133_v33, %v7671_v13  ;;  %v11989_v37 = vsel %vm13862_vm9, %v13861_v53, %v13860_v22  ;;  %v13863_v13 = vld [vmem:[#allocation76_spill] sm:$0xff]  ;;  %vm13865_vm6 = vmmov %vm13859_vm5  ;;  %v12004_v14 = vrot.slane %v7090_v42, %v9447_v17  ;;  %vm13868_vm8 = vcmask 293888   ;;  %s14007_s5 = smov 110   ;;  %s14010_s12 = smov 112  }
 0x69b   : > { %v13864_v52 = vld [vmem:[#allocation28_spill] sm:$0xff]  ;;  %v7177_v34 = vrot.slane %v7169_v59, %v9461_v60  ;;  %v7071_v57 = vcombine.low %v7032_v24, %v7064_v11  ;;  %v7138_v16 = vcombine.high %v7081_v4, %v7097_v62  ;;  %v7145_v33 = vrot.slane %v7137_v36, %v9461_v60  ;;  %vm13874_vm9 = vmmov %vm13859_vm5  ;;  %v13878_v59 = vld [vmem:[#allocation66_spill] sm:$0xff] }
 0x69c   : > { %v7679_v2 = vpop.permute.xlu1 %7678  ;;  %v7675_v18 = vpop.permute.xlu0 %7674  ;;  %v11996_v29 = vsel %vm13865_vm6, %v13864_v52, %v13863_v13  ;;  %v7120_v6 = vrot.slane %v7106_v58, %v9447_v17  ;;  %vm13877_vm6 = vmmov %vm13859_vm5  ;;  %v7184_v12 = vrot.slane %v7170_v10, %v9461_v60  ;;  %v13883_v36 = vld [vmem:[#allocation191_spill] sm:$0xff]  ;;  %v13884_v58 = vld [vmem:[#allocation196_spill] sm:$0xff] }
 0x69d   : > { %v8135_v32 = vsel %vm13853_vm7, %v8134_v43, %v7675_v18  ;;  %vm13867_vm7 = vmmov %vm13859_vm5  ;;  %v13875_v18 = vld [vmem:[#allocation51_spill] sm:$0xff]  ;;  %v7202_v11 = vcombine.high %v7145_v33, %v7177_v34  ;;  %v7225_v0 = vcombine.low %v11989_v37, %v11996_v29  ;;  %v7201_v42 = vcombine.low %v7145_v33, %v7177_v34 }
 0x69e   : > { %7974 = vrot.lane.b32.xlu1 %v7068_v26, %s13295_s2  ;;  %7970 = vrot.lane.b32.xlu0 %v7067_v61, %s13296_s30  ;;  %v8136_v9 = vsel %vm4082_vm13, %v8135_v32, %v7679_v2  ;;  %v12009_v48 = vsel %vm13867_vm7, %v13866_v30, %v11749_v49  ;;  %v5358_v2 = vsel %vm13859_vm5, %v13871_v15, %v13870_v50  ;;  %v13872_v26 = vld [vmem:[#allocation169_spill] sm:$0xff]  ;;  %v13876_v61 = vld [vmem:[#allocation164_spill] sm:$0xff]  ;;  %vm13880_vm7 = vmmov %vm13859_vm5  ;;  %s14005_s30 = smov 106   ;;  %s14006_s2 = smov 108  }
 0x69f   : > { %v7088_v49 = vrot.slane %v7074_v55, %v9447_v17  ;;  %v12023_v43 = vsel %vm13874_vm9, %v13873_v1, %v13872_v26  ;;  %v12028_v47 = vsel %vm13877_vm6, %v13876_v61, %v13875_v18  ;;  %v7185_v32 = vcombine.low %v7120_v6, %v12000_v54  ;;  %vm13887_vm9 = vmmov %vm13859_vm5  ;;  %v13894_v50 = vld [vmem:[#allocation135_spill] sm:$0xff] }
 0x6a0   : > { %v7687_v46 = vpop.permute.xlu1 %7686  ;;  %v7683_v31 = vpop.permute.xlu0 %7682  ;;  %v7257_v62 = vcombine.low %v12023_v43, %v12009_v48  ;;  %v12057_v22 = vsel %vm13887_vm9, %v13886_v41, %v13885_v3  ;;  %v7209_v53 = vcombine.low %v11984_v35, %v5358_v2  ;;  %v7210_v55 = vcombine.high %v11984_v35, %v5358_v2  ;;  %v13896_v2 = vld [vmem:[#allocation91_spill] sm:$0xff] }
 0x6a1   : > { %v8137_v39 = vsel %vm13856_vm10, %v8136_v9, %v7683_v31  ;;  %vm13869_vm10 = vcmask 310272   ;;  %v7152_v9 = vrot.slane %v7138_v16, %v9461_v60  ;;  %v7153_v31 = vcombine.low %v7088_v49, %v12004_v14 }
 0x6a2   : > { %7982 = vrot.lane.b32.xlu1 %v7070_v40, %s13300_s29  ;;  %7978 = vrot.lane.b32.xlu0 %v7069_v21, %s13301_s18  ;;  %v8138_v27 = vsel %vm13868_vm8, %v8137_v39, %v7687_v46  ;;  %v13879_v46 = vld [vmem:[#allocation112_spill] sm:$0xff]  ;;  %vm13881_vm8 = vcmask 326656   ;;  %v12052_v39 = vsel %vm13859_vm5, %v13884_v58, %v13883_v36  ;;  %v7265_v13 = vrot.slane %v7257_v62, %v9447_v17  ;;  %s13964_s18 = smov 100   ;;  %s14002_s29 = smov 104  }
 0x6a3   : > { %v12040_v40 = vsel %vm13880_vm7, %v13879_v46, %v13878_v59  ;;  %v7186_v52 = vcombine.high %v7120_v6, %v12000_v54  ;;  %v7193_v10 = vrot.slane %v7185_v32, %v9461_v60  ;;  %v12068_v30 = vrot.slane %v7225_v0, %v9447_v17  ;;  %v13890_v6 = vld [vmem:[#allocation141_spill] sm:$0xff] }
 0x6a4   : > { %v7695_v45 = vpop.permute.xlu1 %7694  ;;  %v7691_v51 = vpop.permute.xlu0 %7690  ;;  %v7241_v21 = vcombine.low %v12040_v40, %v12028_v47  ;;  %vm13888_vm6 = vcmask 359424   ;;  %v7203_v35 = vcombine.low %v7152_v9, %v7184_v12  ;;  %v7161_v16 = vrot.slane %v7153_v31, %v9461_v60  ;;  %v13903_v31 = vld [vmem:[#allocation92_spill] sm:$0xff] }
 0x6a5   : > { %v8139_v8 = vsel %vm13869_vm10, %v8138_v27, %v7691_v51  ;;  %vm13882_vm10 = vcmask 343040   ;;  %vm13889_vm7 = vcmask 375808   ;;  %v7258_v1 = vcombine.high %v12023_v43, %v12009_v48 }
 0x6a6   : > { %7990 = vrot.lane.b32.xlu1 %v7072_v20, %s13308_s27  ;;  %7986 = vrot.lane.b32.xlu0 %v7071_v57, %s13311_s28  ;;  %v8140_v23 = vsel %vm13881_vm8, %v8139_v8, %v7695_v45  ;;  %v7204_v45 = vcombine.high %v7152_v9, %v7184_v12  ;;  %v7226_v20 = vcombine.high %v11989_v37, %v11996_v29  ;;  %v13891_v8 = vld [vmem:[#allocation173_spill] sm:$0xff]  ;;  %vm13892_vm8 = vmmov %vm13859_vm5  ;;  %v13893_v29 = vld [vmem:[#allocation168_spill] sm:$0xff]  ;;  %vm13898_vm9 = vcmask 392192   ;;  %s13949_s28 = smov 98   ;;  %s13982_s27 = smov 102  }
 0x6a7   : > { %v7154_v57 = vcombine.high %v7088_v49, %v12004_v14  ;;  %v7249_v54 = vrot.slane %v7241_v21, %v9447_v17  ;;  %v12079_v37 = vsel %vm13892_vm8, %v13891_v8, %v13890_v6  ;;  %v7217_v14 = vrot.slane %v7209_v53, %v9447_v17  ;;  %v13897_v49 = vld [vmem:[#allocation185_spill] sm:$0xff]  ;;  %v13904_v21 = vld [vmem:[#allocation96_spill] sm:$0xff]  ;;  %vm13905_vm8 = vmmov %vm13859_vm5 }
 0x6a8   : > { %v7703_v4 = vpop.permute.xlu1 %7702  ;;  %v7699_v63 = vpop.permute.xlu0 %7698  ;;  %v12090_v26 = vsel %vm13859_vm5, %v13897_v49, %v13896_v2  ;;  %v7200_v61 = vrot.slane %v7186_v52, %v9461_v60  ;;  %v7206_v12 = vcombine.high %v7161_v16, %v7193_v10  ;;  %v12097_v32 = vrot.slane %v7210_v55, %v9447_v17  ;;  %v13906_v52 = vld [vmem:[#allocation140_spill] sm:$0xff]  ;;  %v13917_v8 = vld [vmem:[#allocation206_spill] sm:$0xff] }
 0x6a9   : > { %v8141_v24 = vsel %vm13882_vm10, %v8140_v23, %v7699_v63  ;;  %vm13895_vm10 = vmmov %vm13859_vm5  ;;  %v7305_v18 = vcombine.low %v7249_v54, %v7265_v13  ;;  %v7205_v59 = vcombine.low %v7161_v16, %v7193_v10  ;;  %v7273_v46 = vcombine.low %v7217_v14, %v12068_v30  ;;  %v13900_v63 = vld [vmem:[#allocation215_spill] sm:$0xff] }
 0x6aa   : > { %7998 = vrot.lane.b32.xlu1 %v7202_v11, %s13312_s4  ;;  %7994 = vrot.lane.b32.xlu0 %v7201_v42, %s13313_s25  ;;  %v8142_v27 = vsel %vm13888_vm6, %v8141_v24, %v7703_v4  ;;  %v12084_v15 = vsel %vm13895_vm10, %v13894_v50, %v13893_v29  ;;  %v12100_v4 = vrot.slane %v7226_v20, %v9447_v17  ;;  %vm13899_vm6 = vcmask 408576   ;;  %v13901_v42 = vld [vmem:[#allocation56_spill] sm:$0xff]  ;;  %vm13907_vm10 = vmmov %vm13859_vm5  ;;  %v13918_v29 = vld [vmem:[#allocation187_spill] sm:$0xff]  ;;  %s14079_s4 = sld [smem:[#allocation220_spill]] }
 0x6ab   : > { %v7168_v23 = vrot.slane %v7154_v57, %v9461_v60  ;;  %v7242_v48 = vcombine.high %v12040_v40, %v12028_v47  ;;  %v12117_v24 = vsel %vm13905_vm8, %v13904_v21, %v13903_v31  ;;  %v7274_v36 = vcombine.high %v7217_v14, %v12068_v30  ;;  %v13912_v57 = vld [vmem:[#allocation157_spill] sm:$0xff]  ;;  %v13921_v14 = vld [vmem:[#allocation176_spill] sm:$0xff] }
 0x6ac   : > { %v7711_v34 = vpop.permute.xlu1 %7710  ;;  %v7707_v51 = vpop.permute.xlu0 %7706  ;;  %v7361_v58 = vcombine.low %v12079_v37, %v12090_v26  ;;  %v7272_v47 = vrot.slane %v7258_v1, %v9447_v17  ;;  %v7306_v40 = vcombine.high %v7249_v54, %v7265_v13  ;;  %v7313_v3 = vrot.slane %v7305_v18, %v9461_v60  ;;  %v13914_v54 = vld [vmem:[#allocation78_spill] sm:$0xff] }
 0x6ad   : > { %v8143_v33 = vsel %vm13889_vm7, %v8142_v27, %v7707_v51  ;;  %vm13902_vm7 = vmmov %vm13859_vm5  ;;  %v7208_v53 = vcombine.high %v7168_v23, %v7200_v61  ;;  %v7289_v55 = vcombine.low %v12097_v32, %v12100_v4  ;;  %v12130_v10 = vsel %vm13907_vm10, %v13906_v52, %v11767_v5  ;;  %v13909_v27 = vld [vmem:[#allocation100_spill] sm:$0xff]  ;;  %v13913_v5 = vld [vmem:[#allocation58_spill] sm:$0xff] }
 0x6ae   : > { %8006 = vrot.lane.b32.xlu1 %v7204_v45, %s13314_s0  ;;  %8002 = vrot.lane.b32.xlu0 %v7203_v35, %s13317_s14  ;;  %v8144_v11 = vsel %vm13898_vm9, %v8143_v33, %v7711_v34  ;;  %v12112_v9 = vsel %vm13902_vm7, %v13901_v42, %v13900_v63  ;;  %vm13908_vm5 = vcmask 424960   ;;  %v7207_v20 = vcombine.low %v7168_v23, %v7200_v61  ;;  %vm13910_vm9 = vmmov %vm13902_vm7  ;;  %v13915_v33 = vld [vmem:[#allocation111_spill] sm:$0xff]  ;;  %s13923_s0 = smov 76   ;;  %v13928_v63 = vld [vmem:[#allocation49_spill] sm:$0xff]  ;;  %s13942_s14 = smov 94  }
 0x6af   : > { %v7281_v30 = vrot.slane %v7273_v46, %v9461_v60  ;;  %v7256_v13 = vrot.slane %v7242_v48, %v9447_v17  ;;  %v12138_v51 = vsel %vm13910_vm9, %v13909_v27, %v11378_v56  ;;  %v12145_v16 = vsel %vm13902_vm7, %v13913_v5, %v13912_v57  ;;  %vm13916_vm8 = vmmov %vm13902_vm7  ;;  %v13920_v56 = vld [vmem:[#allocation156_spill] sm:$0xff] }
 0x6b0   : > { %v7719_v62 = vpop.permute.xlu1 %7718  ;;  %v7715_v0 = vpop.permute.xlu0 %7714  ;;  %v12150_v6 = vsel %vm13916_vm8, %v13915_v33, %v13914_v54  ;;  %vm13919_vm10 = vmmov %vm13902_vm7  ;;  %v7320_v49 = vrot.slane %v7306_v40, %v9461_v60  ;;  %v13929_v42 = vld [vmem:[#allocation72_spill] sm:$0xff]  ;;  %vm13931_vm8 = vcmask 474112   ;;  %v12198_v27 = vrot.slane %v7361_v58, %v9447_v17  ;;  %s8323_s11 = sshll.u32 %s14079_s4, 4  ;;  %s12640_s11 = int_to_ptr.vmem [resolvable:$true] %s8323_s11 }
 0x6b1   : > { %v8145_v43 = vsel %vm13899_vm6, %v8144_v11, %v7715_v0  ;;  %vm13911_vm6 = vcmask 441344   ;;  %v12155_v50 = vsel %vm13919_vm10, %v13918_v29, %v13917_v8  ;;  %v7321_v1 = vcombine.low %v7256_v13, %v7272_v47  ;;  %v13925_v11 = vld [vmem:[#allocation150_spill] sm:$0xff] }
 0x6b2   : > { %8014 = vrot.lane.b32.xlu1 %v7206_v12, %s13320_s10  ;;  %8010 = vrot.lane.b32.xlu0 %v7205_v59, %s13322_s20  ;;  %v8146_v34 = vsel %vm13908_vm5, %v8145_v43, %v7719_v62  ;;  %vm13922_vm5 = vmmov %vm13902_vm7  ;;  %v7393_v18 = vcombine.low %v12150_v6, %v12130_v10  ;;  %v7338_v62 = vcombine.high %v7281_v30, %v7313_v3  ;;  %v13924_v12 = vld [vmem:[#allocation79_spill] sm:$0xff]  ;;  %vm13933_vm10 = vcmask 490496   ;;  %s13939_s10 = smov 88   ;;  %s13946_s20 = smov 96  }
 0x6b3   : > { %v12160_v2 = vsel %vm13922_vm5, %v13921_v14, %v13920_v56  ;;  %vm13926_vm9 = vmmov %vm13922_vm5  ;;  %v6305_v59 = vcombine.low %v12145_v16, %v12138_v51  ;;  %v7337_v48 = vcombine.low %v7281_v30, %v7313_v3  ;;  %v7288_v43 = vrot.slane %v7274_v36, %v9461_v60 }
 0x6b4   : > { %v7727_v41 = vpop.permute.xlu1 %7726  ;;  %v7723_v45 = vpop.permute.xlu0 %7722  ;;  %v12169_v0 = vsel %vm13926_vm9, %v13925_v11, %v13924_v12  ;;  %vm13930_vm7 = vmmov %vm13922_vm5  ;;  %v7345_v3 = vcombine.low %v12052_v39, %v12112_v9  ;;  %v6273_v36 = vcombine.low %v12057_v22, %v12117_v24  ;;  %v7322_v52 = vcombine.high %v7256_v13, %v7272_v47 }
 0x6b5   : > { %v8147_v35 = vsel %vm13911_vm6, %v8146_v34, %v7723_v45  ;;  %vm13927_vm6 = vcmask 457728   ;;  %v12178_v31 = vsel %vm13930_vm7, %v13929_v42, %v13928_v63  ;;  %v7377_v21 = vcombine.low %v12169_v0, %v12160_v2 }
 0x6b6   : > { %8022 = vrot.lane.b32.xlu1 %v7208_v53, %s13329_s8  ;;  %8018 = vrot.lane.b32.xlu0 %v7207_v20, %s13923_s0  ;;  %v8148_v46 = vsel %vm13927_vm6, %v8147_v35, %v7727_v41  ;;  %v6257_v53 = vcombine.low %v11972_v19, %v12084_v15  ;;  %v6289_v41 = vcombine.low %v12178_v31, %v12155_v50  ;;  %vm13934_vm5 = vcmask 506880   ;;  %s13936_s8 = smov 84   ;;  %s14086_s0 = sld [smem:[#allocation222_spill]] }
 0x6b7   : > { %v7329_v34 = vrot.slane %v7321_v1, %v9461_v60  ;;  %v12195_v45 = vrot.slane %v7393_v18, %v9447_v17  ;;  %v7340_v30 = vcombine.high %v7288_v43, %v7320_v49  ;;  %v12201_v35 = vrot.slane %v6305_v59, %v9447_v17 }
 0x6b8   : > { %v7735_v61 = vpop.permute.xlu1 %7734  ;;  %v7731_v23 = vpop.permute.xlu0 %7730  ;;  %v7339_v54 = vcombine.low %v7288_v43, %v7320_v49  ;;  %v7290_v47 = vcombine.high %v12097_v32, %v12100_v4  ;;  %v7297_v13 = vrot.slane %v7289_v55, %v9461_v60  ;;  %v7385_v33 = vrot.slane %v7377_v21, %v9447_v17 }
 0x6b9   : > { %v8149_v40 = vsel %vm13931_vm8, %v8148_v46, %v7731_v23  ;;  %v12211_v58 = vrot.slane %v6273_v36, %v9447_v17  ;;  %v6297_v29 = vrot.slane %v6289_v41, %v9447_v17  ;;  %v7353_v56 = vrot.slane %v7345_v3, %v9447_v17 }
 0x6ba   : > { %8030 = vrot.lane.b32.xlu1 %v7338_v62, %s13741_s7  ;;  %8026 = vrot.lane.b32.xlu0 %v7337_v48, %s13932_s6  ;;  %v8150_v57 = vsel %vm13933_vm10, %v8149_v40, %v7735_v61  ;;  %s13935_s7 = smov 86   ;;  %v7336_v14 = vrot.slane %v7322_v52, %v9461_v60  ;;  %v7441_v32 = vcombine.low %v7385_v33, %v12195_v45  ;;  %vm13937_vm9 = vcmask 523264  }
 0x6bb   : > { %v7342_v55 = vcombine.high %v7297_v13, %v7329_v34  ;;  %v6265_v49 = vrot.slane %v6257_v53, %v9447_v17  ;;  %v6353_v1 = vcombine.low %v6297_v29, %v12201_v35  ;;  %v7341_v62 = vcombine.low %v7297_v13, %v7329_v34 }
 0x6bc   : > { %v7743_v20 = vpop.permute.xlu1 %7742  ;;  %v7739_v5 = vpop.permute.xlu0 %7738  ;;  %v7304_v12 = vrot.slane %v7290_v47, %v9461_v60  ;;  %v7409_v11 = vcombine.low %v7353_v56, %v12198_v27  ;;  %vm13938_vm6 = vcmask 539648   ;;  %v7449_v23 = vrot.slane %v7441_v32, %v9461_v60  ;;  %s12638_s6 = scalar_lea.hbm %s14086_s0, %s8425_s21 }
 0x6bd   : > { %v8151_v8 = vsel %vm13934_vm5, %v8150_v57, %v7739_v5  ;;  %v6321_v46 = vcombine.low %v6265_v49, %v12211_v58  ;;  %v6361_v63 = vrot.slane %v6353_v1, %v9461_v60  ;;  %vm13940_vm7 = vcmask 556032   ;;  %v13954_v1 = vld [vmem:[#allocation110_spill] sm:$0xff] }
 0x6be   : > { %8038 = vrot.lane.b32.xlu1 %v7340_v30, %s13935_s7  ;;  %8034 = vrot.lane.b32.xlu0 %v7339_v54, %s13936_s8  ;;  %v8152_v18 = vsel %vm13937_vm9, %v8151_v8, %v7743_v20  ;;  %v7344_v43 = vcombine.high %v7304_v12, %v7336_v14  ;;  %v7343_v40 = vcombine.low %v7304_v12, %v7336_v14  ;;  %vm13941_vm8 = vcmask 572416   ;;  %s8585_s8 = scalar_lea.vmem %s12640_s11, 512 }
 0x6bf   : > { %v7417_v53 = vrot.slane %v7409_v11, %v9461_v60  ;;  %v6329_v36 = vrot.slane %v6321_v46, %v9461_v60  ;;  %v6274_v41 = vcombine.high %v12057_v22, %v12117_v24  ;;  %v7394_v52 = vcombine.high %v12150_v6, %v12130_v10  ;;  %p8586_p8 = scmp.ne.s32.totalorder %s12640_s11, %s8585_s8 }
 0x6c0   : > { %v7751_v4 = vpop.permute.xlu1 %7750  ;;  %v7747_v61 = vpop.permute.xlu0 %7746  ;;  %v7442_v34 = vcombine.high %v7385_v33, %v12195_v45  ;;  %v6306_v57 = vcombine.high %v12145_v16, %v12138_v51  ;;  %v6354_v5 = vcombine.high %v6297_v29, %v12201_v35  ;;  %vm13944_vm10 = vcmask 588800   ;;  %v13950_v29 = vld [vmem:[#allocation178_spill] sm:$0xff] }
 0x6c1   : > { %v8153_v59 = vsel %vm13938_vm6, %v8152_v18, %v7747_v61  ;;  %v7473_v30 = vcombine.low %v7417_v53, %v7449_v23  ;;  %v6385_v13 = vcombine.low %v6329_v36, %v6361_v63  ;;  %v7362_v8 = vcombine.high %v12079_v37, %v12090_v26 }
 0x6c2   : > { %8046 = vrot.lane.b32.xlu1 %v7342_v55, %s13758_s1  ;;  %8042 = vrot.lane.b32.xlu0 %v7341_v62, %s13939_s10  ;;  %v8154_v42 = vsel %vm13940_vm7, %v8153_v59, %v7751_v4  ;;  %s13943_s1 = smov 92   ;;  %v7410_v22 = vcombine.high %v7353_v56, %v12198_v27  ;;  %v7378_v24 = vcombine.high %v12169_v0, %v12160_v2  ;;  %vm13945_vm5 = vcmask 605184   ;;  %v13951_v56 = vld [vmem:[#allocation83_spill] sm:$0xff]  ;;  %s8737_s10 = smov [#allocation5]  }
 0x6c3   : > { %v6258_v51 = vcombine.high %v11972_v19, %v12084_v15  ;;  %v7346_v16 = vcombine.high %v12052_v39, %v12112_v9  ;;  %v6322_v6 = vcombine.high %v6265_v49, %v12211_v58  ;;  %v6290_v37 = vcombine.high %v12178_v31, %v12155_v50  ;;  %v13953_v49 = vld [vmem:[#allocation36_spill] sm:$0xff] }
 0x6c4   : > { %v7759_v48 = vpop.permute.xlu1 %7758  ;;  %v7755_v21 = vpop.permute.xlu0 %7754  ;;  %v12260_v26 = vrot.slane %v6274_v41, %v9447_v17  ;;  %v12263_v2 = vrot.slane %v7394_v52, %v9447_v17  ;;  %v7456_v0 = vrot.slane %v7442_v34, %v9461_v60  ;;  %v7474_v19 = vcombine.high %v7417_v53, %v7449_v23  ;;  %v13961_v53 = vld [vmem:[#allocation26_spill] sm:$0xff] }
 0x6c5   : > { %v8155_v3 = vsel %vm13941_vm8, %v8154_v42, %v7755_v21  ;;  %v12267_v15 = vrot.slane %v6306_v57, %v9447_v17  ;;  %v6368_v39 = vrot.slane %v6354_v5, %v9461_v60  ;;  %vm13947_vm9 = vcmask 621568   ;;  %v13958_v42 = vld [vmem:[#allocation67_spill] sm:$0xff]  ;;  %v13965_v52 = vld [vmem:[#allocation114_spill] sm:$0xff]  ;;  %v13968_v57 = vld [vmem:[#allocation192_spill] sm:$0xff] }
 0x6c6   : > { %8054 = vrot.lane.b32.xlu1 %v7344_v43, %s13942_s14  ;;  %8050 = vrot.lane.b32.xlu0 %v7343_v40, %s13943_s1  ;;  %v8156_v54 = vsel %vm13944_vm10, %v8155_v3, %v7759_v48  ;;  %v6386_v31 = vcombine.high %v6329_v36, %v6361_v63  ;;  %v12272_v27 = vrot.slane %v7362_v8, %v9447_v17  ;;  %vm13948_vm6 = vcmask 637952   ;;  %v13957_v63 = vld [vmem:[#allocation48_spill] sm:$0xff]  ;;  %v13960_v40 = vld [vmem:[#allocation74_spill] sm:$0xff]  ;;  %s8589_s14 = sshll.u32 %s8737_s10, 4  ;;  %s8590_s14 = int_to_ptr.vmem [resolvable:$false] %s8589_s14 }
 0x6c7   : > { %v7424_v35 = vrot.slane %v7410_v22, %v9461_v60  ;;  %v12276_v33 = vrot.slane %v7378_v24, %v9447_v17  ;;  %vm13952_vm7 = vcmask 7168   ;;  %v12286_v32 = vrot.slane %v6258_v51, %v9447_v17  ;;  %v13966_v34 = vld [vmem:[#allocation122_spill] sm:$0xff]  ;;  %v13973_v8 = vld [vmem:[#allocation160_spill] sm:$0xff]  ;;  %v13974_v24 = vld [vmem:[#allocation193_spill] sm:$0xff]  ;;  %s8591_s1 = scalar_lea.vmem %s8590_s14, 1024  ;;  %p8592_p6 = scmp.lt.s32.totalorder %s12640_s11, %s8590_s14 }
 0x6c8   : > { %v7767_v20 = vpop.permute.xlu1 %7766  ;;  %v7763_v47 = vpop.permute.xlu0 %7762  ;;  %v12283_v14 = vsel %vm13952_vm7, %v13951_v56, %v13950_v29  ;;  %v6336_v4 = vrot.slane %v6322_v6, %v9461_v60  ;;  %v12290_v55 = vrot.slane %v6290_v37, %v9447_v17  ;;  %vm13955_vm8 = vmmov %vm13952_vm7  ;;  %v12299_v61 = vrot.slane %v7346_v16, %v9447_v17  ;;  %v13969_v5 = vld [vmem:[#allocation42_spill] sm:$0xff]  ;;  %p8593_p13 = scmp.lt.s32.totalorder %s8591_s1, %s8585_s8 }
 0x6c9   : > { %v8157_v10 = vsel %vm13945_vm5, %v8156_v54, %v7763_v47  ;;  %v12296_v18 = vsel %vm13955_vm8, %v13954_v1, %v13953_v49  ;;  %v7457_v62 = vcombine.low %v12276_v33, %v12263_v2  ;;  %v7475_v11 = vcombine.low %v7424_v35, %v7456_v0  ;;  %vm13959_vm5 = vmmov %vm13952_vm7  ;;  %v13979_v49 = vld [vmem:[#allocation201_spill] sm:$0xff]  ;;  %v13983_v1 = vld [vmem:[#allocation119_spill] sm:$0xff] }
 0x6ca   : > { %8058 = vrot.lane.b32.xlu1 %v7473_v30, %s13946_s20  ;;  %7806 = vrot.lane.b32.xlu0 %v6385_v13, %s13946_s20  ;;  %v8158_v9 = vsel %vm13947_vm9, %v8157_v10, %v7767_v20  ;;  %v6337_v59 = vcombine.low %v12286_v32, %v12260_v26  ;;  %v6369_v46 = vcombine.low %v12290_v55, %v12267_v15  ;;  %vm13956_vm10 = vcmask 654336   ;;  %vm13962_vm9 = vmmov %vm13959_vm5  ;;  %v13972_v13 = vld [vmem:[#allocation104_spill] sm:$0xff]  ;;  %v13975_v10 = vld [vmem:[#allocation197_spill] sm:$0xff]  ;;  %p8594_p2 = por %p8593_p13, %p8592_p6 }
 0x6cb   : > { %v6387_v43 = vcombine.low %v6336_v4, %v6368_v39  ;;  %v12311_v21 = vsel %vm13959_vm5, %v13958_v42, %v13957_v63  ;;  %v12316_v3 = vsel %vm13962_vm9, %v13961_v53, %v13960_v40  ;;  %v7425_v36 = vcombine.low %v12299_v61, %v12272_v27  ;;  %vm13967_vm7 = vmmov %vm13959_vm5 }
 0x6cc   : > { %v7775_v45 = vpop.permute.xlu1 %7774  ;;  %v7771_v50 = vpop.permute.xlu0 %7770  ;;  %v12325_v20 = vsel %vm13967_vm7, %v13966_v34, %v13965_v52  ;;  %v6393_v30 = vcombine.low %v12283_v14, %v12296_v18  ;;  %vm13970_vm8 = vmmov %vm13959_vm5  ;;  %v12339_v22 = vsel %vm13959_vm5, %v13973_v8, %v13972_v13  ;;  %v7465_v16 = vrot.slane %v7457_v62, %v9461_v60  ;;  %v13984_v62 = vld [vmem:[#allocation162_spill] sm:$0xff] }
 0x6cd   : > { %v8159_v58 = vsel %vm13948_vm6, %v8158_v9, %v7771_v50  ;;  %vm13963_vm6 = vcmask 670720   ;;  %v12332_v54 = vsel %vm13970_vm8, %v13969_v5, %v13968_v57  ;;  %vm13976_vm9 = vmmov %vm13959_vm5  ;;  %v7476_v37 = vcombine.high %v7424_v35, %v7456_v0  ;;  %v13977_v9 = vld [vmem:[#allocation33_spill] sm:$0xff]  ;;  %v13998_v8 = vld [vmem:[#allocation154_spill] sm:$0xff] }
 0x6ce   : > { %8062 = vrot.lane.b32.xlu1 %v7474_v19, %s13949_s28  ;;  %7810 = vrot.lane.b32.xlu0 %v6386_v31, %s13949_s28  ;;  %v8160_v23 = vsel %vm13956_vm10, %v8159_v58, %v7775_v45  ;;  %vm13971_vm10 = vcmask 687104   ;;  %v12344_v51 = vsel %vm13976_vm9, %v13975_v10, %v13974_v24  ;;  %v6345_v45 = vrot.slane %v6337_v59, %v9461_v60  ;;  %vm13980_vm7 = vmmov %vm13959_vm5  ;;  %v13989_v59 = vld [vmem:[#allocation125_spill] sm:$0xff] }
 0x6cf   : > { %v6377_v19 = vrot.slane %v6369_v46, %v9461_v60  ;;  %v6388_v58 = vcombine.high %v6336_v4, %v6368_v39  ;;  %v7497_v29 = vcombine.low %v12325_v20, %v12332_v54  ;;  %v7433_v56 = vrot.slane %v7425_v36, %v9461_v60  ;;  %v13986_v39 = vld [vmem:[#allocation181_spill] sm:$0xff]  ;;  %v13987_v4 = vld [vmem:[#allocation212_spill] sm:$0xff]  ;;  %vm13990_vm9 = vmmov %vm13959_vm5 }
 0x6d0   : > { %v7783_v12 = vpop.permute.xlu1 %7782  ;;  %v7779_v48 = vpop.permute.xlu0 %7778  ;;  %v12360_v0 = vsel %vm13980_vm7, %v13979_v49, %v11686_v38  ;;  %vm13981_vm8 = vcmask 703488   ;;  %vm13994_vm7 = vmmov %vm13959_vm5  ;;  %v7458_v42 = vcombine.high %v12276_v33, %v12263_v2  ;;  %v13995_v36 = vld [vmem:[#allocation182_spill] sm:$0xff]  ;;  %v6370_v57 = vcombine.high %v12290_v55, %v12267_v15  ;;  %v13999_v2 = vld [vmem:[#allocation175_spill] sm:$0xff] }
 0x6d1   : > { %v8161_v41 = vsel %vm13963_vm6, %v8160_v23, %v7779_v48  ;;  %vm13978_vm6 = vmmov %vm13959_vm5  ;;  %v13992_v23 = vld [vmem:[#allocation105_spill] sm:$0xff]  ;;  %v13993_v48 = vld [vmem:[#allocation44_spill] sm:$0xff]  ;;  %v7477_v53 = vcombine.low %v7433_v56, %v7465_v16  ;;  %v7426_v13 = vcombine.high %v12299_v61, %v12272_v27  ;;  %v6409_v15 = vcombine.low %v12316_v3, %v12344_v51 }
 0x6d2   : > { %8066 = vrot.lane.b32.xlu1 %v7475_v11, %s13964_s18  ;;  %7814 = vrot.lane.b32.xlu0 %v6387_v43, %s13964_s18  ;;  %v8162_v47 = vsel %vm13971_vm10, %v8161_v41, %v7783_v12  ;;  %v12352_v50 = vsel %vm13978_vm6, %v13977_v9, %v11762_v25  ;;  %vm13985_vm10 = vmmov %vm13959_vm5  ;;  %v12372_v12 = vsel %vm13959_vm5, %v13987_v4, %v13986_v39  ;;  %v13988_v11 = vld [vmem:[#allocation19_spill] sm:$0xff]  ;;  %vm13991_vm6 = vcmask 719872  }
 0x6d3   : > { %v12367_v25 = vsel %vm13985_vm10, %v13984_v62, %v13983_v1  ;;  %v12377_v46 = vsel %vm13990_vm9, %v13989_v59, %v13988_v11  ;;  %v12384_v43 = vsel %vm13994_vm7, %v13993_v48, %v13992_v23  ;;  %v7529_v63 = vcombine.low %v12372_v12, %v12352_v50  ;;  %v13996_v41 = vld [vmem:[#allocation31_spill] sm:$0xff]  ;;  %vm14000_vm10 = vmmov %vm13959_vm5 }
 0x6d4   : > { %v7791_v6 = vpop.permute.xlu1 %7790  ;;  %v7787_v31 = vpop.permute.xlu0 %7786  ;;  %v6441_v34 = vcombine.low %v12367_v25, %v12360_v0  ;;  %v12404_v33 = vsel %vm14000_vm10, %v13999_v2, %v13998_v8  ;;  %v6338_v55 = vcombine.high %v12286_v32, %v12260_v26  ;;  %vm14003_vm9 = vcmask 752640  }
 0x6d5   : > { %v8163_v35 = vsel %vm13981_vm8, %v8162_v47, %v7787_v31  ;;  %vm13997_vm8 = vmmov %vm13959_vm5  ;;  %v6389_v47 = vcombine.low %v6345_v45, %v6377_v19  ;;  %vm14001_vm5 = vcmask 736256   ;;  %v6425_v27 = vcombine.low %v12404_v33, %v12384_v43 }
 0x6d6   : > { %8070 = vrot.lane.b32.xlu1 %v7476_v37, %s13982_s27  ;;  %7818 = vrot.lane.b32.xlu0 %v6388_v58, %s13982_s27  ;;  %v8164_v38 = vsel %vm13991_vm6, %v8163_v35, %v7791_v6  ;;  %v12393_v52 = vsel %vm13997_vm8, %v13996_v41, %v13995_v36  ;;  %v7481_v6 = vcombine.low %v12311_v21, %v12339_v22  ;;  %vm14004_vm6 = vcmask 769024  }
 0x6d7   : > { %v7513_v24 = vcombine.low %v12393_v52, %v12377_v46  ;;  %v12421_v37 = vrot.slane %v7529_v63, %v9447_v17  ;;  %v7472_v9 = vrot.slane %v7458_v42, %v9461_v60  ;;  %v7478_v58 = vcombine.high %v7433_v56, %v7465_v16 }
 0x6d8   : > { %v7799_v40 = vpop.permute.xlu1 %7798  ;;  %v7795_v5 = vpop.permute.xlu0 %7794  ;;  %v12425_v49 = vrot.slane %v6441_v34, %v9447_v17  ;;  %v6384_v26 = vrot.slane %v6370_v57, %v9461_v60  ;;  %v6390_v1 = vcombine.high %v6345_v45, %v6377_v19  ;;  %v12433_v62 = vrot.slane %v7497_v29, %v9447_v17 }
 0x6d9   : > { %v8165_v10 = vsel %vm14001_vm5, %v8164_v38, %v7795_v5  ;;  %v7440_v39 = vrot.slane %v7426_v13, %v9461_v60  ;;  %v7521_v4 = vrot.slane %v7513_v24, %v9447_v17  ;;  %v12442_v56 = vrot.slane %v6409_v15, %v9447_v17 }
 0x6da   : > { %8074 = vrot.lane.b32.xlu1 %v7477_v53, %s14002_s29  ;;  %7822 = vrot.lane.b32.xlu0 %v6389_v47, %s14002_s29  ;;  %v8166_v61 = vsel %vm14003_vm9, %v8165_v10, %v7799_v40  ;;  %v6352_v7 = vrot.slane %v6338_v55, %v9461_v60  ;;  %v6433_v28 = vrot.slane %v6425_v27, %v9447_v17  ;;  %vm14014_vm7 = vcmask 146432  }
 0x6db   : > { %v7577_v45 = vcombine.low %v7521_v4, %v12421_v37  ;;  %v7479_v29 = vcombine.low %v7440_v39, %v7472_v9  ;;  %v6401_v11 = vrot.slane %v6393_v30, %v9447_v17  ;;  %v7480_v30 = vcombine.high %v7440_v39, %v7472_v9 }
 0x6dc   : > { %v7871_v31 = vpop.permute.xlu1 %7870  ;;  %v7803_v35 = vpop.permute.xlu0 %7802  ;;  %v6489_v59 = vcombine.low %v6433_v28, %v12425_v49  ;;  %v6391_v23 = vcombine.low %v6352_v7, %v6384_v26  ;;  %v6392_v57 = vcombine.high %v6352_v7, %v6384_v26  ;;  %v7530_v2 = vcombine.high %v12372_v12, %v12352_v50 }
 0x6dd   : > { %v8184_v32 = vsel %vm4052_vm1, %v6657_v44, %v7871_v31  ;;  %v12438_v16 = vsel %vm14004_vm6, %v8166_v61, %v7803_v35  ;;  %v7489_v44 = vrot.slane %v7481_v6, %v9447_v17  ;;  %v6457_v42 = vcombine.low %v6401_v11, %v12442_v56 }
 0x6de   : > { %8078 = vrot.lane.b32.xlu1 %v7478_v58, %s14005_s30  ;;  %7826 = vrot.lane.b32.xlu0 %v6390_v1, %s14005_s30  ;;  %v7585_v53 = vrot.slane %v7577_v45, %v9461_v60  ;;  %v6497_v41 = vrot.slane %v6489_v59, %v9461_v60  ;;  %vm14008_vm1 = vcmask 80896   ;;  %v7578_v24 = vcombine.high %v7521_v4, %v12421_v37 }
 0x6df   : > { %v7545_v48 = vcombine.low %v7489_v44, %v12433_v62  ;;  %v6465_v13 = vrot.slane %v6457_v42, %v9461_v60  ;;  %v6442_v55 = vcombine.high %v12367_v25, %v12360_v0  ;;  %v6490_v27 = vcombine.high %v6433_v28, %v12425_v49 }
 0x6e0   : > { %v7879_v19 = vpop.permute.xlu1 %7878  ;;  %v7875_v38 = vpop.permute.xlu0 %7874  ;;  %v7498_v9 = vcombine.high %v12325_v20, %v12332_v54  ;;  %v7546_v31 = vcombine.high %v7489_v44, %v12433_v62  ;;  %v7514_v58 = vcombine.high %v12393_v52, %v12377_v46  ;;  %v6410_v12 = vcombine.high %v12316_v3, %v12344_v51 }
 0x6e1   : > { %v8185_v63 = vsel %vm4054_vm2, %v8184_v32, %v7875_v38  ;;  %v7553_v5 = vrot.slane %v7545_v48, %v9461_v60  ;;  %v6521_v6 = vcombine.low %v6465_v13, %v6497_v41  ;;  %vm14009_vm2 = vcmask 97280  }
 0x6e2   : > { %8082 = vrot.lane.b32.xlu1 %v7479_v29, %s14006_s2  ;;  %v8186_v40 = vsel %vm4056_vm3, %v8185_v63, %v7879_v19  ;;  %7830 = vrot.lane.b32.xlu0 %v6391_v23, %s14006_s2  ;;  %v6458_v0 = vcombine.high %v6401_v11, %v12442_v56  ;;  %v6426_v25 = vcombine.high %v12404_v33, %v12384_v43  ;;  %vm14011_vm3 = vcmask 113664  }
 0x6e3   : > { %v7609_v15 = vcombine.low %v7553_v5, %v7585_v53  ;;  %v7482_v20 = vcombine.high %v12311_v21, %v12339_v22  ;;  %v7544_v54 = vrot.slane %v7530_v2, %v9447_v17  ;;  %v7592_v46 = vrot.slane %v7578_v24, %v9461_v60 }
 0x6e4   : > { %v7887_v36 = vpop.permute.xlu1 %7886  ;;  %v7883_v34 = vpop.permute.xlu0 %7882  ;;  %v7610_v49 = vcombine.high %v7553_v5, %v7585_v53  ;;  %v6394_v3 = vcombine.high %v12283_v14, %v12296_v18  ;;  %v6456_v51 = vrot.slane %v6442_v55, %v9447_v17  ;;  %v6504_v43 = vrot.slane %v6490_v27, %v9461_v60 }
 0x6e5   : > { %v8187_v47 = vsel %vm4058_vm4, %v8186_v40, %v7883_v34  ;;  %v6522_v26 = vcombine.high %v6465_v13, %v6497_v41  ;;  %v7512_v32 = vrot.slane %v7498_v9, %v9447_v17  ;;  %v7560_v35 = vrot.slane %v7546_v31, %v9461_v60 }
 0x6e6   : > { %8086 = vrot.lane.b32.xlu1 %v7480_v30, %s14007_s5  ;;  %v8188_v8 = vsel %vm14008_vm1, %v8187_v47, %v7887_v36  ;;  %7834 = vrot.lane.b32.xlu0 %v6392_v57, %s14007_s5  ;;  %v7528_v21 = vrot.slane %v7514_v58, %v9447_v17  ;;  %vm14012_vm4 = vcmask 130048   ;;  %v6424_v1 = vrot.slane %v6410_v12, %v9447_v17 }
 0x6e7   : > { %v6472_v14 = vrot.slane %v6458_v0, %v9461_v60  ;;  %v6440_v18 = vrot.slane %v6426_v25, %v9447_v17  ;;  %v7496_v39 = vrot.slane %v7482_v20, %v9447_v17  ;;  %v7611_v7 = vcombine.low %v7560_v35, %v7592_v46 }
 0x6e8   : > { %v7895_v10 = vpop.permute.xlu1 %7894  ;;  %v7891_v61 = vpop.permute.xlu0 %7890  ;;  %v7593_v4 = vcombine.low %v7528_v21, %v7544_v54  ;;  %v6408_v28 = vrot.slane %v6394_v3, %v9447_v17  ;;  %vm14015_vm8 = vcmask 162816   ;;  %vm14017_vm10 = vcmask 179200  }
 0x6e9   : > { %v8189_v50 = vsel %vm14009_vm2, %v8188_v8, %v7891_v61  ;;  %v6505_v44 = vcombine.low %v6440_v18, %v6456_v51  ;;  %v6523_v19 = vcombine.low %v6472_v14, %v6504_v43  ;;  %v7561_v29 = vcombine.low %v7496_v39, %v7512_v32 }
 0x6ea   : > { %8090 = vrot.lane.b32.xlu1 %v7609_v15, %s14010_s12  ;;  %v8190_v37 = vsel %vm14011_vm3, %v8189_v50, %v7895_v10  ;;  %7838 = vrot.lane.b32.xlu0 %v6521_v6, %s14010_s12  ;;  %v6473_v59 = vcombine.low %v6408_v28, %v6424_v1  ;;  %v7601_v23 = vrot.slane %v7593_v4, %v9461_v60  ;;  %vm14018_vm5 = vcmask 195584  }
 0x6eb   : > { %v7612_v63 = vcombine.high %v7560_v35, %v7592_v46  ;;  %v6513_v42 = vrot.slane %v6505_v44, %v9461_v60  ;;  %v6524_v40 = vcombine.high %v6472_v14, %v6504_v43  ;;  %v7569_v53 = vrot.slane %v7561_v29, %v9461_v60 }
 0x6ec   : > { %v7903_v52 = vpop.permute.xlu1 %7902  ;;  %v7899_v33 = vpop.permute.xlu0 %7898  ;;  %v6481_v30 = vrot.slane %v6473_v59, %v9461_v60  ;;  %vm14020_vm9 = vcmask 211968   ;;  %v7594_v34 = vcombine.high %v7528_v21, %v7544_v54  ;;  %v6506_v47 = vcombine.high %v6440_v18, %v6456_v51  ;;  %v14033_v21 = vld [vmem:[#allocation146_spill] sm:$0xff] }
 0x6ed   : > { %v8191_v22 = vsel %vm14012_vm4, %v8190_v37, %v7899_v33  ;;  %v7613_v5 = vcombine.low %v7569_v53, %v7601_v23  ;;  %v7562_v2 = vcombine.high %v7496_v39, %v7512_v32  ;;  %vm14021_vm6 = vcmask 228352  }
 0x6ee   : > { %8094 = vrot.lane.b32.xlu1 %v7610_v49, %s14013_s13  ;;  %v8192_v62 = vsel %vm14014_vm7, %v8191_v22, %v7903_v52  ;;  %7842 = vrot.lane.b32.xlu0 %v6522_v26, %s14013_s13  ;;  %v6525_v8 = vcombine.low %v6481_v30, %v6513_v42  ;;  %v6474_v10 = vcombine.high %v6408_v28, %v6424_v1  ;;  %vm14023_vm1 = vcmask 244736   ;;  %v14034_v22 = vld [vmem:[#allocation108_spill] sm:$0xff] }
 0x6ef   : > { %v7608_v55 = vrot.slane %v7594_v34, %v9461_v60  ;;  %v7614_v61 = vcombine.high %v7569_v53, %v7601_v23  ;;  %v6520_v6 = vrot.slane %v6506_v47, %v9461_v60  ;;  %v6526_v31 = vcombine.high %v6481_v30, %v6513_v42 }
 0x6f0   : > { %v7911_v56 = vpop.permute.xlu1 %7910  ;;  %v7907_v45 = vpop.permute.xlu0 %7906  ;;  %v7576_v58 = vrot.slane %v7562_v2, %v9461_v60  ;;  %v6488_v12 = vrot.slane %v6474_v10, %v9461_v60  ;;  %vm14025_vm2 = vcmask 277504   ;;  %vm14026_vm3 = vcmask 293888  }
 0x6f1   : > { %v8193_v11 = vsel %vm14015_vm8, %v8192_v62, %v7907_v45  ;;  %vm14028_vm4 = vcmask 310272   ;;  %vm14029_vm7 = vcmask 326656   ;;  %vm14031_vm8 = vcmask 343040  }
 0x6f2   : > { %8098 = vrot.lane.b32.xlu1 %v7611_v7, %s14016_s15  ;;  %v8194_v38 = vsel %vm14017_vm10, %v8193_v11, %v7911_v56  ;;  %7846 = vrot.lane.b32.xlu0 %v6523_v19, %s14016_s15  ;;  %v7615_v37 = vcombine.low %v7576_v58, %v7608_v55  ;;  %v6527_v54 = vcombine.low %v6488_v12, %v6520_v6  ;;  %vm14032_vm10 = vcmask 359424  }
 0x6f3   : > { %v7616_v3 = vcombine.high %v7576_v58, %v7608_v55  ;;  %v6528_v60 = vcombine.high %v6488_v12, %v6520_v6 }
 0x6f4   : > { %v7919_v48 = vpop.permute.xlu1 %7918  ;;  %v7915_v17 = vpop.permute.xlu0 %7914 }
 0x6f5   : > { %v8195_v36 = vsel %vm14018_vm5, %v8194_v38, %v7915_v17  ;;  %vm14035_vm5 = vcmask 375808  }
 0x6f6   : > { %8102 = vrot.lane.b32.xlu1 %v7612_v63, %s14019_s16  ;;  %v8196_v41 = vsel %vm14020_vm9, %v8195_v36, %v7919_v48  ;;  %7850 = vrot.lane.b32.xlu0 %v6524_v40, %s14019_s16  ;;  %vm14036_vm9 = vcmask 392192  }
 0x6f8   : > { %v7927_v57 = vpop.permute.xlu1 %7926  ;;  %v7923_v13 = vpop.permute.xlu0 %7922 }
 0x6f9   : > { %v8197_v24 = vsel %vm14021_vm6, %v8196_v41, %v7923_v13  ;;  %vm14037_vm6 = vcmask 408576  }
 0x6fa   : > { %8106 = vrot.lane.b32.xlu1 %v7613_v5, %s14022_s17  ;;  %v8198_v15 = vsel %vm14023_vm1, %v8197_v24, %v7927_v57  ;;  %7854 = vrot.lane.b32.xlu0 %v6525_v8, %s14022_s17  ;;  %vm14038_vm1 = vcmask 424960  }
 0x6fc   : > { %v7935_v27 = vpop.permute.xlu1 %7934  ;;  %v7931_v9 = vpop.permute.xlu0 %7930 }
 0x6fd   : > { %v8199_v50 = vsel %vm4082_vm13, %v8198_v15, %v7931_v9 }
 0x6fe   : > { %8110 = vrot.lane.b32.xlu1 %v7614_v61, %s14024_s22  ;;  %v8200_v0 = vsel %vm14025_vm2, %v8199_v50, %v7935_v27  ;;  %7858 = vrot.lane.b32.xlu0 %v6526_v31, %s14024_s22  ;;  %vm14039_vm2 = vcmask 441344  }
 0x700   : > { %v7943_v25 = vpop.permute.xlu1 %7942  ;;  %v7939_v20 = vpop.permute.xlu0 %7938 }
 0x701   : > { %v8201_v46 = vsel %vm14026_vm3, %v8200_v0, %v7939_v20  ;;  %vm14040_vm3 = vcmask 457728  }
 0x702   : > { %8114 = vrot.lane.b32.xlu1 %v7615_v37, %s14027_s23  ;;  %v8202_v52 = vsel %vm14028_vm4, %v8201_v46, %v7943_v25  ;;  %7862 = vrot.lane.b32.xlu0 %v6527_v54, %s14027_s23  ;;  %vm14041_vm4 = vcmask 474112  }
 0x704   : > { %v7951_v49 = vpop.permute.xlu1 %7950  ;;  %v7947_v51 = vpop.permute.xlu0 %7946 }
 0x705   : > { %v8203_v43 = vsel %vm14029_vm7, %v8202_v52, %v7947_v51  ;;  %vm14042_vm7 = vcmask 490496  }
 0x706   : > { %8118 = vrot.lane.b32.xlu1 %v7616_v3, %s14030_s3  ;;  %7866 = vrot.lane.b32.xlu0 %v6528_v60, %s14030_s3  ;;  %v8204_v33 = vsel %vm14031_vm8, %v8203_v43, %v7951_v49  ;;  %vm14043_vm8 = vcmask 506880  }
 0x708   : > { %v7959_v26 = vpop.permute.xlu1 %7958  ;;  %v7955_v32 = vpop.permute.xlu0 %7954 }
 0x709   : > { %v8205_v35 = vsel %vm14032_vm10, %v8204_v33, %v7955_v32  ;;  %vm14044_vm10 = vcmask 523264  }
 0x70a   : > { %8293 = vrot.lane.b32.xlu1 %v14033_v21, %s13313_s25  ;;  %8265 = vrot.lane.b32.xlu0 %v14034_v22, %s13313_s25  ;;  %v8206_v1 = vsel %vm14035_vm5, %v8205_v35, %v7959_v26  ;;  %vm14045_vm5 = vcmask 539648  }
 0x70c   : > { %v7967_v14 = vpop.permute.xlu1 %7966  ;;  %v7963_v18 = vpop.permute.xlu0 %7962 }
 0x70d   : > { %v8207_v62 = vsel %vm14036_vm9, %v8206_v1, %v7963_v18  ;;  %vm14046_vm9 = vcmask 556032  }
 0x70e   : > { %v8208_v39 = vsel %vm14037_vm6, %v8207_v62, %v7967_v14  ;;  %vm14047_vm6 = vcmask 572416  }
 0x710   : > { %v7975_v4 = vpop.permute.xlu1 %7974  ;;  %v7971_v56 = vpop.permute.xlu0 %7970 }
 0x711   : > { %v8209_v7 = vsel %vm14038_vm1, %v8208_v39, %v7971_v56  ;;  %vm14048_vm1 = vcmask 588800  }
 0x712   : > { %v8210_v28 = vsel %vm14039_vm2, %v8209_v7, %v7975_v4  ;;  %vm14049_vm2 = vcmask 605184  }
 0x714   : > { %v7983_v44 = vpop.permute.xlu1 %7982  ;;  %v7979_v45 = vpop.permute.xlu0 %7978 }
 0x715   : > { %v8211_v19 = vsel %vm14040_vm3, %v8210_v28, %v7979_v45  ;;  %vm14050_vm3 = vcmask 621568  }
 0x716   : > { %v8212_v29 = vsel %vm14041_vm4, %v8211_v19, %v7983_v44  ;;  %vm14051_vm4 = vcmask 637952  }
 0x718   : > { %v7991_v11 = vpop.permute.xlu1 %7990  ;;  %v7987_v59 = vpop.permute.xlu0 %7986 }
 0x719   : > { %v8213_v38 = vsel %vm14042_vm7, %v8212_v29, %v7987_v59  ;;  %vm14052_vm7 = vcmask 654336  }
 0x71a   : > { %v8214_v23 = vsel %vm14043_vm8, %v8213_v38, %v7991_v11  ;;  %vm14053_vm8 = vcmask 670720  }
 0x71c   : > { %v7999_v48 = vpop.permute.xlu1 %7998  ;;  %v7995_v63 = vpop.permute.xlu0 %7994 }
 0x71d   : > { %v8215_v42 = vsel %vm14044_vm10, %v8214_v23, %v7995_v63  ;;  %vm14054_vm10 = vcmask 687104  }
 0x71e   : > { %v8216_v17 = vsel %vm14045_vm5, %v8215_v42, %v7999_v48  ;;  %vm14055_vm5 = vcmask 703488  }
 0x720   : > { %v8007_v40 = vpop.permute.xlu1 %8006  ;;  %v8003_v53 = vpop.permute.xlu0 %8002 }
 0x721   : > { %v8217_v36 = vsel %vm14046_vm9, %v8216_v17, %v8003_v53  ;;  %vm14056_vm9 = vcmask 719872  }
 0x722   : > { %v8218_v30 = vsel %vm14047_vm6, %v8217_v36, %v8007_v40  ;;  %vm14057_vm6 = vcmask 736256  }
 0x724   : > { %v8015_v41 = vpop.permute.xlu1 %8014  ;;  %v8011_v34 = vpop.permute.xlu0 %8010 }
 0x725   : > { %v8219_v52 = vsel %vm14048_vm1, %v8218_v30, %v8011_v34  ;;  %vm14058_vm1 = vcmask 752640  }
 0x726   : > { %v8220_v51 = vsel %vm14049_vm2, %v8219_v52, %v8015_v41  ;;  %vm14059_vm2 = vcmask 801792  }
 0x728   : > { %v8023_v57 = vpop.permute.xlu1 %8022  ;;  %v8019_v5 = vpop.permute.xlu0 %8018 }
 0x729   : > { %v8221_v60 = vsel %vm14050_vm3, %v8220_v51, %v8019_v5  ;;  %vm14060_vm3 = vcmask 818176  }
 0x72a   : > { %v8222_v26 = vsel %vm14051_vm4, %v8221_v60, %v8023_v57  ;;  %vm14061_vm4 = vcmask 769024  }
 0x72c   : > { %v8031_v47 = vpop.permute.xlu1 %8030  ;;  %v8027_v13 = vpop.permute.xlu0 %8026 }
 0x72d   : > { %v8223_v32 = vsel %vm14052_vm7, %v8222_v26, %v8027_v13  ;;  %vm14062_vm7 = vcmask 834560  }
 0x72e   : > { %v8224_v14 = vsel %vm14053_vm8, %v8223_v32, %v8031_v47  ;;  %vm14063_vm8 = vcmask 850944  }
 0x730   : > { %v8039_v8 = vpop.permute.xlu1 %8038  ;;  %v8035_v2 = vpop.permute.xlu0 %8034 }
 0x731   : > { %v8225_v18 = vsel %vm14054_vm10, %v8224_v14, %v8035_v2  ;;  %vm14064_vm10 = vmmov %vm14059_vm2 }
 0x732   : > { %v8226_v4 = vsel %vm14055_vm5, %v8225_v18, %v8039_v8  ;;  %vm14065_vm5 = vcmask 867328  }
 0x734   : > { %v8047_v24 = vpop.permute.xlu1 %8046  ;;  %v8043_v10 = vpop.permute.xlu0 %8042 }
 0x735   : > { %v8227_v56 = vsel %vm14056_vm9, %v8226_v4, %v8043_v10  ;;  %vm14066_vm9 = vmmov %vm14060_vm3 }
 0x736   : > { %v8228_v44 = vsel %vm14057_vm6, %v8227_v56, %v8047_v24  ;;  %vm14067_vm6 = vcmask 883712  }
 0x738   : > { %v8055_v15 = vpop.permute.xlu1 %8054  ;;  %v8051_v55 = vpop.permute.xlu0 %8050 }
 0x739   : > { %v8229_v45 = vsel %vm14058_vm1, %v8228_v44, %v8051_v55  ;;  %vm14068_vm1 = vmmov %vm14062_vm7 }
 0x73a   : > { %v8230_v23 = vsel %vm14061_vm4, %v8229_v45, %v8055_v15  ;;  %vm14071_vm4 = vcmask 916480  }
 0x73c   : > { %v8059_v27 = vpop.permute.xlu1 %8058  ;;  %v7807_v61 = vpop.permute.xlu0 %7806 }
 0x73d   : > { %v8168_v19 = vsel %vm4146_vm11, %v12438_v16, %v7807_v61  ;;  %v8231_v63 = vsel %vm4146_vm11, %v8230_v23, %v8059_v27  ;;  %vm14072_vm11 = vmmov %vm14065_vm5 }
 0x740   : > { %v8063_v6 = vpop.permute.xlu1 %8062  ;;  %v7811_v9 = vpop.permute.xlu0 %7810 }
 0x741   : > { %v8169_v29 = vsel %vm14059_vm2, %v8168_v19, %v7811_v9  ;;  %v8232_v17 = vsel %vm14064_vm10, %v8231_v63, %v8063_v6  ;;  %vm14069_vm2 = vcmask 900096   ;;  %vm14075_vm10 = vcmask 949248  }
 0x744   : > { %v8067_v31 = vpop.permute.xlu1 %8066  ;;  %v7815_v58 = vpop.permute.xlu0 %7814 }
 0x745   : > { %v8170_v59 = vsel %vm14060_vm3, %v8169_v29, %v7815_v58  ;;  %v8233_v16 = vsel %vm14066_vm9, %v8232_v17, %v8067_v31  ;;  %vm14070_vm3 = vmmov %vm14063_vm8  ;;  %vm14077_vm9 = vcmask 965632  }
 0x748   : > { %v8071_v50 = vpop.permute.xlu1 %8070  ;;  %v7819_v12 = vpop.permute.xlu0 %7818 }
 0x749   : > { %v8171_v48 = vsel %vm14062_vm7, %v8170_v59, %v7819_v12  ;;  %v8234_v41 = vsel %vm14068_vm1, %v8233_v16, %v8071_v50  ;;  %vm14073_vm7 = vcmask 932864  }
 0x74a   : > { %vm14080_vm1 = vmmov %vm14073_vm7 }
 0x74c   : > { %v8075_v0 = vpop.permute.xlu1 %8074  ;;  %v7823_v25 = vpop.permute.xlu0 %7822 }
 0x74d   : > { %v8172_v42 = vsel %vm14063_vm8, %v8171_v48, %v7823_v25  ;;  %v8235_v57 = vsel %vm14070_vm3, %v8234_v41, %v8075_v0  ;;  %vm14074_vm8 = vmmov %vm14067_vm6 }
 0x74e   : > { %vm14082_vm3 = vmmov %vm14077_vm9 }
 0x750   : > { %v8079_v37 = vpop.permute.xlu1 %8078  ;;  %v7827_v20 = vpop.permute.xlu0 %7826 }
 0x751   : > { %v8173_v40 = vsel %vm14065_vm5, %v8172_v42, %v7827_v20  ;;  %v8236_v47 = vsel %vm14072_vm11, %v8235_v57, %v8079_v37  ;;  %vm14076_vm5 = vmmov %vm14069_vm2 }
 0x754   : > { %v8083_v54 = vpop.permute.xlu1 %8082  ;;  %v7831_v46 = vpop.permute.xlu0 %7830 }
 0x755   : > { %v8174_v36 = vsel %vm14067_vm6, %v8173_v40, %v7831_v46  ;;  %v8237_v2 = vsel %vm14074_vm8, %v8236_v47, %v8083_v54  ;;  %vm14078_vm6 = vmmov %vm14071_vm4 }
 0x758   : > { %v8087_v49 = vpop.permute.xlu1 %8086  ;;  %v7835_v3 = vpop.permute.xlu0 %7834 }
 0x759   : > { %v8175_v34 = vsel %vm14069_vm2, %v8174_v36, %v7835_v3  ;;  %v8238_v15 = vsel %vm14076_vm5, %v8237_v2, %v8087_v49  ;;  %vm14081_vm2 = vmmov %vm14075_vm10 }
 0x75c   : > { %v8091_v43 = vpop.permute.xlu1 %8090  ;;  %v7839_v33 = vpop.permute.xlu0 %7838 }
 0x75d   : > { %v8176_v5 = vsel %vm14071_vm4, %v8175_v34, %v7839_v33  ;;  %v8239_v27 = vsel %vm14078_vm6, %v8238_v15, %v8091_v43 }
 0x760   : > { %v8095_v35 = vpop.permute.xlu1 %8094  ;;  %v7843_v1 = vpop.permute.xlu0 %7842 }
 0x761   : > { %v8177_v13 = vsel %vm14073_vm7, %v8176_v5, %v7843_v1  ;;  %v8240_v6 = vsel %vm14080_vm1, %v8239_v27, %v8095_v35 }
 0x764   : > { %v8099_v62 = vpop.permute.xlu1 %8098  ;;  %v7847_v39 = vpop.permute.xlu0 %7846 }
 0x765   : > { %v8178_v24 = vsel %vm14075_vm10, %v8177_v13, %v7847_v39  ;;  %v8241_v58 = vsel %vm14081_vm2, %v8240_v6, %v8099_v62 }
 0x768   : > { %v8103_v7 = vpop.permute.xlu1 %8102  ;;  %v7851_v28 = vpop.permute.xlu0 %7850 }
 0x769   : > { %v8179_v55 = vsel %vm14077_vm9, %v8178_v24, %v7851_v28  ;;  %v8242_v0 = vsel %vm14082_vm3, %v8241_v58, %v8103_v7 }
 0x76c   : > { %v8107_v11 = vpop.permute.xlu1 %8106  ;;  %v7855_v38 = vpop.permute.xlu0 %7854 }
 0x76d   : > { %v8180_v61 = vsel %vm4170_vm12, %v8179_v55, %v7855_v38  ;;  %v8243_v37 = vsel %vm4170_vm12, %v8242_v0, %v8107_v11  ;;  %vm8258_vm12 = vcmask 785920  }
 0x770   : > { %v8111_v53 = vpop.permute.xlu1 %8110  ;;  %v7859_v30 = vpop.permute.xlu0 %7858 }
 0x771   : > { %v8181_v9 = vsel %vm4172_vm15, %v8180_v61, %v7859_v30  ;;  %v8244_v20 = vsel %vm4172_vm15, %v8243_v37, %v8111_v53 }
 0x774   : > { %v8115_v8 = vpop.permute.xlu1 %8114  ;;  %v7863_v10 = vpop.permute.xlu0 %7862 }
 0x775   : > { %v8182_v50 = vsel %vm4174_vm0, %v8181_v9, %v7863_v10  ;;  %v8245_v46 = vsel %vm4174_vm0, %v8244_v20, %v8115_v8  ;;  %vm8252_vm0 = vcmask 523520  }
 0x778   : > { %v8119_v31 = vpop.permute.xlu1 %8118  ;;  %v7867_v12 = vpop.permute.xlu0 %7866 }
 0x779   : > { %v8183_v25 = vsel %vm4176_vm14, %v8182_v50, %v7867_v12  ;;  %v8246_v49 = vsel %vm4176_vm14, %v8245_v46, %v8119_v31 }
 0x77a   : > { %8269 = vrot.lane.b32.xlu1 %v8183_v25, %s13946_s20  ;;  %8249 = vrot.lane.b32.xlu0 %v8183_v25, %s13271_s24 }
 0x77c   : > { %v8294_v54 = vpop.permute.xlu1 %8293  ;;  %v8266_v52 = vpop.permute.xlu0 %8265 }
 0x77d   : > { %8296 = vst.msk [vmem:[%s14079_s4 + $0x18] sm:$0xff] %vm4082_vm13, %v8294_v54  ;;  %8268 = vst.msk [vmem:[%s14079_s4 + $0x8] sm:$0xff] %vm4082_vm13, %v8266_v52  ;;  %vm8263_vm13 = vcmask 1048320  }
 0x77e   : > { %8297 = vrot.lane.b32.xlu1 %v8246_v49, %s13946_s20  ;;  %8280 = vrot.lane.b32.xlu0 %v8246_v49, %s13271_s24 }
 0x782   : > { %8273 = vrot.lane.b32.xlu1 %v14034_v22, %s13946_s20  ;;  %8255 = vrot.lane.b32.xlu0 %v14034_v22, %s13271_s24 }
 0x786   : > { %8301 = vrot.lane.b32.xlu1 %v14033_v21, %s13946_s20  ;;  %8285 = vrot.lane.b32.xlu0 %v14033_v21, %s13271_s24  ;;  %s14084_s24 = sld [smem:[#allocation18_spill]] }
 0x78a   : > { %8289 = vrot.lane.b32.xlu1 %v8246_v49, %s13313_s25  ;;  %8260 = vrot.lane.b32.xlu0 %v8183_v25, %s13313_s25  ;;  %s14085_s25 = sld [smem:[#allocation15_spill]] }
 0x78c   : > { %s8307_s7 = scalar_lea.sflag [#allocation4], %s14084_s24 }
 0x790   : > { %p14087_p9 = scmp.ne.s32.totalorder %s14085_s25, 0 }
 0x792   : > { %p8587_p11 = pnand %p8586_p8, %p14087_p9 }
 0x794   : > { %p8588_p0 = pneg %p8587_p11 }
 0x796   : > { %p8595_p5 = pnand %p8594_p2, %p8588_p0 }
 0x7ec   : > { %v8270_v3 = vpop.permute.xlu1 %8269  ;;  %v8250_v51 = vpop.permute.xlu0 %8249 }
 0x7ed   : > { %8272 = vst.msk [vmem:[%s14079_s4 + $0x8] sm:$0xff] %vm8252_vm0, %v8270_v3  ;;  %8253 = vst.msk [vmem:[%s14079_s4] sm:$0xff] %vm8252_vm0, %v8250_v51 }
 0x7f0   : > { %v8298_v22 = vpop.permute.xlu1 %8297  ;;  %v8281_v60 = vpop.permute.xlu0 %8280 }
 0x7f1   : > { %8300 = vst.msk [vmem:[%s14079_s4 + $0x18] sm:$0xff] %vm8252_vm0, %v8298_v22  ;;  %8283 = vst.msk [vmem:[%s14079_s4 + $0x10] sm:$0xff] %vm8252_vm0, %v8281_v60 }
 0x7f4   : > { %v8274_v21 = vpop.permute.xlu1 %8273  ;;  %v8256_v43 = vpop.permute.xlu0 %8255 }
 0x7f5   : > { %8276 = vst.msk [vmem:[%s14079_s4 + $0x8] sm:$0xff] %vm8258_vm12, %v8274_v21  ;;  %8259 = vst.msk [vmem:[%s14079_s4] sm:$0xff] %vm8258_vm12, %v8256_v43 }
 0x7f6   : > { %8277 = vst.msk [vmem:[%s14079_s4 + $0x8] sm:$0xff] %vm8263_vm13, %v8183_v25 }
 0x7f8   : > { %v8302_v33 = vpop.permute.xlu1 %8301  ;;  %v8286_v26 = vpop.permute.xlu0 %8285 }
 0x7f9   : > { %8304 = vst.msk [vmem:[%s14079_s4 + $0x18] sm:$0xff] %vm8258_vm12, %v8302_v33  ;;  %8288 = vst.msk [vmem:[%s14079_s4 + $0x10] sm:$0xff] %vm8258_vm12, %v8286_v26 }
 0x7fa   : > { %8305 = vst.msk [vmem:[%s14079_s4 + $0x18] sm:$0xff] %vm8263_vm13, %v8246_v49 }
 0x7fc   : > { %v8290_v32 = vpop.permute.xlu1 %8289  ;;  %v8261_v35 = vpop.permute.xlu0 %8260 }
 0x7fd   : > { %8292 = vst.msk [vmem:[%s14079_s4 + $0x10] sm:$0xff] %vm8263_vm13, %v8290_v32  ;;  %8264 = vst.msk [vmem:[%s14079_s4] sm:$0xff] %vm8263_vm13, %v8261_v35 }
 0x7fe   : > { %8598 = shalt.err (!%p8595_p5)
}
 0x7ff   : > { %s8599_s20 = scalar_lea.hbm %s12638_s6, 512  ;;  %s8603_s27 = scalar_lea.hbm %s14086_s0, 1024 }
 0x800   : > { %p8600_p4 = scmp.ne.s32.totalorder %s12638_s6, %s8599_s20  ;;  %p8604_p12 = scmp.lt.u32.totalorder %s12638_s6, %s14086_s0 }
 0x801   : > { %p8605_p1 = scmp.lt.u32.totalorder %s8603_s27, %s8599_s20  ;;  %p8607_p8 = scmp.lt.u32.totalorder %s8599_s20, %s12638_s6 }
 0x802   : > { %p8601_p7 = pnand %p8600_p4, %p14087_p9 }
 0x803   : > { %p8606_p3 = por %p8605_p1, %p8604_p12 }
 0x804   : > { %p8602_p10 = pneg %p8601_p7 }
 0x805   : > { %p8608_p11 = por %p8607_p8, %p8606_p3 }
 0x807   : > { %p8609_p0 = pnand %p8608_p11, %p8602_p10 }
 0x809   : > { %8612 = shalt.err (!%p8609_p0)
}
 0x80a   : > { %8428 = dma.vmem_to_hbm [thread:$0]  (%p14087_p9), %s12640_s11, 512, %s12638_s6, %s8307_s7  }
 0x80b PF: > { %s14088_s2 = sld [smem:[#allocation8_spill]]  ;;  %s14089_s5 = sld [smem:[#allocation17_spill]] }
 0x80c   : > { %s14090_s12 = sld [smem:[#allocation13_spill]] }
 0x811   : > { %s8335_s13 = sand.u32 1, %s14088_s2   ;;  %p14091_p6 = scmp.ne.s32.totalorder %s14089_s5, 0 }
 0x812   : > { %p14092_p13 = scmp.ge.s32.totalorder %s14090_s12, 2  ;;  %s8336_s15 = scalar_lea.sflag [#allocation4], %s8335_s13 }
 0x814   : > { %p8435_p2 = pnand %p14092_p13, %p14091_p6 }
 0x816   : > { %8642 = dma.done.wait (!%p8435_p2), %s8336_s15, 512  }
 0x817   : > { %8644 = vsyncadd (!%p8435_p2), %s8336_s15, 4294966784  ;;  %s17_s11 = sadd.s32 1, %s14090_s12   ;;  %s14093_s6 = sld [smem:[#allocation9_spill]] }
 0x818   : > { %p14_p5 = scmp.ge.s32.totalorder %s17_s11, 4   ;;  %s14094_s7 = sld [smem:[#allocation10_spill]] }
 0x819   : > { %s14095_s8 = sld [smem:[#allocation16_spill]]  ;;  %s14096_s9 = sld [smem:[#allocation12_spill]] }
 0x81a   : > { %s14097_s10 = sld [smem:[#allocation14_spill]]  ;;  %16 = sbr.rel (!%p14_p5) target bundleno = 9 (0x9), region = 72 }
 0x821   :  { %8341 = vsyncpa [#allocation3], 1 }
 0x822   :  { %8343 = vsyncpa [#allocation3 + $0x1], 1 }
 0x823   :  { %8344 = vsyncpa [#allocation4], 1 }
 0x824   :  { %8346 = vsyncpa [#allocation4 + $0x1], 1 }

</bundles_post_ra>
